<compile_context>
chip_gen: v6e
topology: v6e:2x2x1
jax: 0.10.0
libtpu: 0.0.40
codegen_flags: <defaults>
</compile_context>

<pallas_src>
import math

import numpy as np
import jax
import jax.numpy as jnp
from jax.experimental import pallas as pl
from jax.experimental.pallas import tpu as pltpu  # noqa: F401  (TPU backend)

# ---------------- small synthetic config (consistent with the module) ----------------
NUM_TIME = [64, 32]          # time steps per modality (divisible by 2**DEPTH)
NUM_CHAN = [4, 1]            # spatial channels per modality
MLP_DIM = [16, 16]
NUM_KERNEL = [8, 4]          # conv kernels per modality (= transformer in_chans)
TEMPORAL_KERNEL = [5, 3]     # odd -> 'same' padding
EMB_DIM = [16, 16]
DEPTH = 2
HEADS = 4
DIM_HEAD = 8
OUT_DIM = 8
BATCH = 2
INNER_DIM = HEADS * DIM_HEAD
N_MOD = len(NUM_TIME)

BN_EPS = 1e-5
LN_EPS = 1e-5
NEG_INF = -1e30


# ================================ in-kernel helpers ================================

def _gelu(x):
    # TODO(synk): PyTorch nn.GELU() is exact (erf-based); erf is not lowered by
    # Mosaic, so the tanh approximation is used (<1e-3 absolute difference).
    return 0.5 * x * (1.0 + jnp.tanh(0.7978845608028654 * (x + 0.044715 * x * x * x)))


def _layernorm(x, g, b):
    mu = jnp.mean(x, axis=-1, keepdims=True)
    var = jnp.mean((x - mu) ** 2, axis=-1, keepdims=True)
    return (x - mu) * jax.lax.rsqrt(var + LN_EPS) * g + b


def _ffw(x, g, b, w1, b1, w2, b2):
    """FeedForward: LayerNorm -> Linear -> GELU -> Linear (2-D row-stacked operands)."""
    h = jnp.dot(_layernorm(x, g, b), w1, preferred_element_type=jnp.float32) + b1
    return jnp.dot(_gelu(h), w2, preferred_element_type=jnp.float32) + b2


def _mha(q, k, v, bias, wo, bo, scale=None):
    """Multi-head attention on row-stacked (batch*token) operands, fused with to_out.

    q: (N, inner), k/v: (M, inner), bias: (N, M) 0 / -1e30 block-diagonal batch mask,
    wo: (inner, Dout), bo: (1, Dout).  Per-head contexts are concatenated along lanes
    and hit wo with ONE matmul (no per-head to_out decomposition, no k transpose)."""
    ctxs = []
    for h in range(HEADS):
        sl = slice(h * DIM_HEAD, (h + 1) * DIM_HEAD)
        qh = q[:, sl] if scale is None else q[:, sl] * scale
        s = jax.lax.dot_general(qh, k[:, sl], (((1,), (1,)), ((), ())),
                                preferred_element_type=jnp.float32) + bias
        s = s - jnp.max(s, axis=-1, keepdims=True)
        e = jnp.exp(s)
        # TODO(synk): approx EUP reciprocal deviates ~1e-3 from exact softmax (accepted).
        pmat = e * pl.reciprocal(jnp.sum(e, axis=-1, keepdims=True), approx=True)
        ctxs.append(jnp.dot(pmat, v[:, sl], preferred_element_type=jnp.float32))
    ctx = jnp.concatenate(ctxs, axis=-1)                                # (N, inner)
    return jnp.dot(ctx, wo, preferred_element_type=jnp.float32) + bo


def _maxpool(x, sel):
    """2:1 max-pool along lanes (per-batch segments, segment length even): max with a
    left-shifted copy, then select even columns via a 0/1 matmul.  Avoids in-kernel
    reshapes across (8,128) tiles and strided value slices."""
    L = x.shape[-1]
    xs = jnp.concatenate([x[:, 1:], x[:, L - 1:L]], axis=-1)
    return jnp.dot(jnp.maximum(x, xs), sel, preferred_element_type=jnp.float32)


def _to_tokens(x_kbt, B, K, D):
    """(K, B*D) channel-major layout -> (B*K, D) row-stacked token layout (slices+concat)."""
    return jnp.concatenate([x_kbt[:, b * D:(b + 1) * D] for b in range(B)], axis=0)


def _to_kbt(x_tok, B, K, D):
    """(B*K, D) token layout -> (K, B*D) channel-major layout (slices+concat)."""
    return jnp.concatenate([x_tok[b * K:(b + 1) * K, :] for b in range(B)], axis=-1)


def _conv_bn_elu(x_kbt, w_mat, scale, shift, B, T, tk):
    """'same' 1-D conv as ONE matmul contracting Cin*taps + folded eval-BN + ELU.

    x_kbt: (Cin, B*T) with per-batch lane segments; w_mat: (Cout, tk*Cin) laid out as
    [o, j*Cin + c]; scale/shift: (Cout, 1).  Returns (Cout, B*T)."""
    Cin = x_kbt.shape[0]
    pad = (tk - 1) // 2
    xpb = []
    for b in range(B):
        xb = x_kbt[:, b * T:(b + 1) * T]
        z = jnp.zeros((Cin, pad), jnp.float32)
        xpb.append(jnp.concatenate([z, xb, z], axis=-1))                # (Cin, T + 2*pad)
    if Cin == 1:
        # Degenerate contraction: outer-product taps on the VPU (no 1-row sublane concats).
        y = None
        for j in range(tk):
            row = jnp.concatenate([xpb[b][:, j:j + T] for b in range(B)], axis=-1)  # (1, B*T)
            term = w_mat[:, j:j + 1] * row
            y = term if y is None else y + term
    else:
        rows = [jnp.concatenate([xpb[b][:, j:j + T] for b in range(B)], axis=-1)
                for j in range(tk)]
        xcol = jnp.concatenate(rows, axis=0)                            # (tk*Cin, B*T)
        y = jnp.dot(w_mat, xcol, preferred_element_type=jnp.float32)    # (Cout, B*T)
    y = y * scale + shift
    # TODO(synk): expm1 would be marginally more accurate near 0; exp-1 kept for Mosaic safety.
    return jnp.where(y > 0.0, y, jnp.exp(y) - 1.0)                      # ELU(alpha=1)


# ================================ the fused forward kernel ================================

def make_kernel(off):
    """Builds the single fused forward kernel (whole-array VMEM blocks, no grid)."""
    assert N_MOD == 2, "kernel signature is specialized to two modalities"
    B = BATCH

    def kernel(x0_ref, x1_ref, slab_ref, out_ref):
        x_refs = (x0_ref, x1_ref)

        def p(name):
            r, h, w = off[name]
            return slab_ref[pl.ds(r, h), pl.ds(0, w)]

        # ---------------- CNN encoders + positional embeddings ----------------
        chans = []          # per modality: (K, B*T) channel-major activations
        times = []
        for i in range(N_MOD):
            T, tk = NUM_TIME[i], TEMPORAL_KERNEL[i]
            x = x_refs[i][...]                                          # (C, B*T)
            y = _conv_bn_elu(x, p(f"enc{i}_w"), p(f"enc{i}_scale"),
                             p(f"enc{i}_shift"), B, T, tk)              # (K, B*T)
            chans.append(y + p(f"pos{i}"))
            times.append(T)

        # ---------------- transformer depths ----------------
        infos = [[None] * N_MOD for _ in range(DEPTH)]
        for d in range(DEPTH):
            fine_tok = [None] * N_MOD
            dims_d = [None] * N_MOD
            for i in range(N_MOD):
                K, tk = NUM_KERNEL[i], TEMPORAL_KERNEL[i]
                T = times[i]
                Dm = T // 2
                dims_d[i] = Dm
                pre = f"d{d}m{i}_"
                x_kbt = chans[i]                                        # (K, B*T)
                sel = p(f"pool_sel_{B * T}")
                # coarse-grained branch: maxpool -> tokens
                xcg = _to_tokens(_maxpool(x_kbt, sel), B, K, Dm)        # (B*K, Dm)
                # fine-grained branch: conv + BN + ELU -> maxpool
                yc = _conv_bn_elu(x_kbt, p(pre + "conv_w"),
                                  p(pre + "conv_scale"), p(pre + "conv_shift"),
                                  B, T, tk)                             # (K, B*T)
                xfg_kbt = _maxpool(yc, sel)                             # (K, B*Dm)
                xfg = _to_tokens(xfg_kbt, B, K, Dm)                     # (B*K, Dm)
                # get_info: log(mean_t(x_fg^2)) as a (B, K) block via a masked-mean matmul
                infos[d][i] = jnp.log(jax.lax.dot_general(
                    p(f"info_mean_{i}_{d}"), xfg_kbt * xfg_kbt,
                    (((1,), (1,)), ((), ())), preferred_element_type=jnp.float32))
                # attention (+ residual), feed-forward (+ x_fg), head Linear
                qkv = jnp.dot(xcg, p(pre + "wqkv"), preferred_element_type=jnp.float32)
                a = _mha(qkv[:, :INNER_DIM], qkv[:, INNER_DIM:2 * INNER_DIM],
                         qkv[:, 2 * INNER_DIM:], p(f"attn_bias_f{i}"),
                         p(pre + "wo"), p(pre + "bo")) + xcg
                yf = _ffw(a, p(pre + "ln_g"), p(pre + "ln_b"),
                          p(pre + "w1"), p(pre + "b1"),
                          p(pre + "w2"), p(pre + "b2")) + xfg
                fine_tok[i] = jnp.dot(yf, p(pre + "head"),
                                      preferred_element_type=jnp.float32)   # (B*K, 32)
                times[i] = Dm
            # cross-channel layers (use the fine outputs of *all* modalities of this depth)
            cross_tok = [None] * N_MOD
            for i in range(N_MOD):
                pre = f"d{d}m{i}_"
                x_tok = fine_tok[i]                                     # (B*K_i, 32)
                x_agg = jnp.concatenate(
                    [fine_tok[n] for n in range(N_MOD) if n != i], axis=0)
                a = _mha(x_tok, x_agg, x_agg, p(f"attn_bias_c{i}"),
                         p(pre + "c_wo"), p(pre + "c_bo"),
                         scale=DIM_HEAD ** -0.5) + x_tok
                cross_tok[i] = _ffw(a, p(pre + "c_ln_g"), p(pre + "c_ln_b"),
                                    p(pre + "c_w1"), p(pre + "c_b1"),
                                    p(pre + "c_w2"), p(pre + "c_b2"))   # (B*K_i, Dm_i)
            for i in range(N_MOD):
                chans[i] = _to_kbt(cross_tok[i], B, NUM_KERNEL[i], dims_d[i])

        # ---------------- modality compression + output feed-forward ----------------
        embs = []
        for i in range(N_MOD):
            K, Df = NUM_KERNEL[i], times[i]
            rows = []
            for b in range(B):
                xb = chans[i][:, b * Df:(b + 1) * Df]                   # (K, Df)
                rows.append(jnp.concatenate([xb[k:k + 1, :] for k in range(K)],
                                            axis=-1))                  # (1, K*Df) row-major
            chan_flat = jnp.concatenate(rows, axis=0)                   # (B, K*Df)
            levels = jnp.concatenate([infos[d][i] for d in range(DEPTH)], axis=-1)
            comp = jnp.concatenate([chan_flat, levels], axis=-1)        # (B, K*Df + K*DEPTH)
            embs.append(_ffw(comp, p(f"cmp{i}_ln_g"), p(f"cmp{i}_ln_b"),
                             p(f"cmp{i}_w1"), p(f"cmp{i}_b1"),
                             p(f"cmp{i}_w2"), p(f"cmp{i}_b2")))         # (B, EMB_DIM[i])
        emb = jnp.concatenate(embs, axis=-1)                            # (B, sum(EMB_DIM))
        out_ref[...] = _ffw(emb, p("out_ln_g"), p("out_ln_b"),
                            p("out_w1"), p("out_b1"), p("out_w2"), p("out_b2"))

    return kernel


# ================================ host-side parameter packing ================================

class _Packer:
    """Packs many tiny 1-D / 2-D f32 parameters into one contiguous (rows, W) slab.

    Each entry starts at an 8-aligned row (sublane-aligned static pl.ds loads)."""

    def __init__(self, align=8):
        self.align = align
        self.off = {}
        self.chunks = []
        self.row = 0
        self.width = 0

    def add(self, name, arr):
        a = np.asarray(arr, dtype=np.float32)
        if a.ndim == 1:
            a = a.reshape(1, -1)
        assert a.ndim == 2, (name, a.shape)
        h, w = a.shape
        self.off[name] = (self.row, h, w)
        self.chunks.append((self.row, a))
        self.row += -(-h // self.align) * self.align
        self.width = max(self.width, w)
        return self

    def finalize(self):
        W = max(self.width, 128)
        R = -(-self.row // 8) * 8
        slab = np.zeros((R, W), np.float32)
        for r, a in self.chunks:
            slab[r:r + a.shape[0], :a.shape[1]] = a
        return slab


def renorm_np(w, maxnorm=2.0):
    """torch.renorm(w, p=2, dim=0, maxnorm): per-output-filter L2 norm clamp."""
    flat = w.reshape(w.shape[0], -1)
    norms = np.sqrt((flat * flat).sum(axis=1, keepdims=True))
    factor = np.where(norms > maxnorm, maxnorm / (norms + 1e-7), 1.0)
    return (flat * factor).reshape(w.shape)


def fold_bn_np(bn, conv_bias):
    g = np.asarray(bn["g"], np.float32)
    b = np.asarray(bn["b"], np.float32)
    mean = np.asarray(bn["mean"], np.float32)
    var = np.asarray(bn["var"], np.float32)
    scale = g / np.sqrt(var + BN_EPS)
    shift = scale * (np.asarray(conv_bias, np.float32) - mean) + b
    return scale, shift


def pack_params(params):
    """One-time host-side weight transform + packing (renorm, conv composition,
    BN folds, qkv concat with the attention scale folded into Wq, constants)."""
    pk = _Packer()
    B = BATCH

    # ---- constants: pool-selection, attention batch-masks, info-mean matrices ----
    pool_lens = sorted({B * (NUM_TIME[i] >> d) for d in range(DEPTH) for i in range(N_MOD)})
    for L in pool_lens:
        sel = np.zeros((L, L // 2), np.float32)
        sel[np.arange(0, L, 2), np.arange(L // 2)] = 1.0
        pk.add(f"pool_sel_{L}", sel)
    for i in range(N_MOD):
        Ki = NUM_KERNEL[i]
        bias = np.full((B * Ki, B * Ki), NEG_INF, np.float32)
        for b in range(B):
            bias[b * Ki:(b + 1) * Ki, b * Ki:(b + 1) * Ki] = 0.0
        pk.add(f"attn_bias_f{i}", bias)
        others = [n for n in range(N_MOD) if n != i]
        M = sum(B * NUM_KERNEL[n] for n in others)
        cb = np.full((B * Ki, M), NEG_INF, np.float32)
        c0 = 0
        for n in others:
            Kn = NUM_KERNEL[n]
            for b in range(B):
                cb[b * Ki:(b + 1) * Ki, c0 + b * Kn:c0 + (b + 1) * Kn] = 0.0
            c0 += B * Kn
        pk.add(f"attn_bias_c{i}", cb)
    for d in range(DEPTH):
        for i in range(N_MOD):
            Dm = NUM_TIME[i] >> (d + 1)
            A = np.zeros((B, B * Dm), np.float32)
            for b in range(B):
                A[b, b * Dm:(b + 1) * Dm] = 1.0 / Dm
            pk.add(f"info_mean_{i}_{d}", A)

    # ---- cnn encoders (renorm -> conv1/conv2 composition -> BN fold) + pos embeddings ----
    for i in range(N_MOD):
        K, C, tk = NUM_KERNEL[i], NUM_CHAN[i], TEMPORAL_KERNEL[i]
        enc = params["cnn_encoders"][i]
        w1 = renorm_np(np.asarray(enc["conv1"]["w"], np.float32))       # (K, 1, 1, tk)
        b1 = np.asarray(enc["conv1"]["b"], np.float32)
        if C > 1:
            w2 = renorm_np(np.asarray(enc["conv2"]["w"], np.float32))   # (K, K, C, 1)
            weff = np.einsum('okc,kj->ocj', w2[:, :, :, 0], w1[:, 0, 0, :])   # (K, C, tk)
            beff = np.einsum('okc,k->o', w2[:, :, :, 0], b1) + np.asarray(enc["conv2"]["b"])
        else:
            weff = w1[:, 0, :, :]                                       # (K, 1, tk)
            beff = b1
        w_mat = np.transpose(weff, (0, 2, 1)).reshape(K, tk * C)        # [o, j*C + c]
        scale, shift = fold_bn_np(enc["bn"], beff)
        pk.add(f"enc{i}_w", w_mat)
        pk.add(f"enc{i}_scale", scale.reshape(K, 1))
        pk.add(f"enc{i}_shift", shift.reshape(K, 1))
        pos = np.asarray(params["pos_emb"][i], np.float32)[0]           # (K, T)
        pk.add(f"pos{i}", np.concatenate([pos] * B, axis=-1))           # pre-tiled (K, B*T)

    # ---- per-depth / per-modality transformer parameters ----
    q_scale = DIM_HEAD ** -0.5
    for d in range(DEPTH):
        for i in range(N_MOD):
            lp = params["transformer"]["layers"][d][i]
            pre = f"d{d}m{i}_"
            wq = np.asarray(lp["attn"]["to_q"]["W"], np.float32) * q_scale   # scale folded
            wk = np.asarray(lp["attn"]["to_k"]["W"], np.float32)
            wv = np.asarray(lp["attn"]["to_v"]["W"], np.float32)
            pk.add(pre + "wqkv", np.concatenate([wq, wk, wv], axis=1))       # (D, 96)
            pk.add(pre + "wo", lp["attn"]["to_out"]["W"])
            pk.add(pre + "bo", lp["attn"]["to_out"]["b"])
            ff = lp["ff"]
            pk.add(pre + "ln_g", ff["ln_g"]).add(pre + "ln_b", ff["ln_b"])
            pk.add(pre + "w1", ff["W1"]).add(pre + "b1", ff["b1"])
            pk.add(pre + "w2", ff["W2"]).add(pre + "b2", ff["b2"])
            K, tk = NUM_KERNEL[i], TEMPORAL_KERNEL[i]
            wc = np.asarray(lp["cnn"]["conv"]["w"], np.float32)              # (K, K, tk)
            pk.add(pre + "conv_w", np.transpose(wc, (0, 2, 1)).reshape(K, tk * K))
            cs, ct = fold_bn_np(lp["cnn"]["bn"], lp["cnn"]["conv"]["b"])
            pk.add(pre + "conv_scale", cs.reshape(K, 1))
            pk.add(pre + "conv_shift", ct.reshape(K, 1))
            pk.add(pre + "head", lp["head"]["W"])
            cr = lp["cross"]
            pk.add(pre + "c_wo", cr["sa"]["to_out"]["W"])
            pk.add(pre + "c_bo", cr["sa"]["to_out"]["b"])
            cf = cr["ffwd"]
            pk.add(pre + "c_ln_g", cf["ln_g"]).add(pre + "c_ln_b", cf["ln_b"])
            pk.add(pre + "c_w1", cf["W1"]).add(pre + "c_b1", cf["b1"])
            pk.add(pre + "c_w2", cf["W2"]).add(pre + "c_b2", cf["b2"])

    # ---- modality compression + output feed-forward ----
    for i in range(N_MOD):
        cf = params["transformer"]["compress"][i]
        pk.add(f"cmp{i}_ln_g", cf["ln_g"]).add(f"cmp{i}_ln_b", cf["ln_b"])
        pk.add(f"cmp{i}_w1", cf["W1"]).add(f"cmp{i}_b1", cf["b1"])
        pk.add(f"cmp{i}_w2", cf["W2"]).add(f"cmp{i}_b2", cf["b2"])
    of = params["transformer"]["out_ffwd"]
    pk.add("out_ln_g", of["ln_g"]).add("out_ln_b", of["ln_b"])
    pk.add("out_w1", of["W1"]).add("out_b1", of["b1"])
    pk.add("out_w2", of["W2"]).add("out_b2", of["b2"])

    return pk.finalize(), pk.off


# ================================ forward wrapper ================================

def build_forward(offsets):
    kernel = make_kernel(offsets)

    def fwd(slab, channels):
        xs = []
        for i, x in enumerate(channels):
            C, T = NUM_CHAN[i], NUM_TIME[i]
            # (B, C, T) -> (C, B*T) channel-major with batch folded along lanes.
            xs.append(jnp.transpose(x.astype(jnp.float32), (1, 0, 2)).reshape(C, BATCH * T))
        return pl.pallas_call(
            kernel,
            out_shape=jax.ShapeDtypeStruct((BATCH, OUT_DIM), jnp.float32),
        )(xs[0], xs[1], slab)

    return jax.jit(fwd)


# ================================ parameter init (mirrors the torch module) ================================

_base_key = jax.random.PRNGKey(0)
_key_counter = [0]


def next_key():
    _key_counter[0] += 1
    return jax.random.fold_in(_base_key, _key_counter[0])


def init_linear(in_dim, out_dim, bias=True):
    bound = 1.0 / math.sqrt(in_dim)
    p = {"W": jax.random.uniform(next_key(), (in_dim, out_dim), jnp.float32, -bound, bound)}
    p["b"] = (jax.random.uniform(next_key(), (out_dim,), jnp.float32, -bound, bound)
              if bias else None)
    return p


def init_ffwd(dim, hidden, out):
    l1 = init_linear(dim, hidden)
    l2 = init_linear(hidden, out)
    return {"ln_g": jnp.ones((dim,), jnp.float32), "ln_b": jnp.zeros((dim,), jnp.float32),
            "W1": l1["W"], "b1": l1["b"], "W2": l2["W"], "b2": l2["b"]}


def init_attention(q_dim, inner, out_dim, create_heads=True):
    p = {}
    if create_heads:
        p["to_q"] = init_linear(q_dim, inner, bias=False)
        p["to_k"] = init_linear(q_dim, inner, bias=False)
        p["to_v"] = init_linear(q_dim, inner, bias=False)
    p["to_out"] = init_linear(inner, out_dim)
    return p


def init_conv(out_c, in_c, ksize):
    fan_in = in_c * int(np.prod(ksize))
    bound = 1.0 / math.sqrt(fan_in)
    return {"w": jax.random.uniform(next_key(), (out_c, in_c) + tuple(ksize),
                                    jnp.float32, -bound, bound),
            "b": jax.random.uniform(next_key(), (out_c,), jnp.float32, -bound, bound)}


def init_bn(c):
    return {"g": jnp.ones((c,), jnp.float32), "b": jnp.zeros((c,), jnp.float32),
            "mean": jnp.zeros((c,), jnp.float32), "var": jnp.ones((c,), jnp.float32)}


def init_params():
    params = {"cnn_encoders": [], "pos_emb": []}
    for i in range(N_MOD):
        K, C, tk = NUM_KERNEL[i], NUM_CHAN[i], TEMPORAL_KERNEL[i]
        enc = {"conv1": init_conv(K, 1, (1, tk)), "bn": init_bn(K)}
        if C > 1:
            enc["conv2"] = init_conv(K, K, (C, 1))
        params["cnn_encoders"].append(enc)
    for i in range(N_MOD):
        params["pos_emb"].append(
            jax.random.normal(next_key(), (1, NUM_KERNEL[i], NUM_TIME[i]), jnp.float32))

    tr = {"layers": [], "compress": []}
    dims = list(NUM_TIME)
    for _ in range(DEPTH):
        dims = [dd // 2 for dd in dims]
        depth_layers = []
        for k in range(N_MOD):
            dim = dims[k]
            depth_layers.append({
                "attn": init_attention(dim, INNER_DIM, dim, create_heads=True),
                "ff": init_ffwd(dim, MLP_DIM[k], dim),
                "cnn": {"conv": init_conv(NUM_KERNEL[k], NUM_KERNEL[k], (TEMPORAL_KERNEL[k],)),
                        "bn": init_bn(NUM_KERNEL[k])},
                "head": init_linear(dim, INNER_DIM, bias=False),
                "cross": {"sa": init_attention(INNER_DIM, INNER_DIM, INNER_DIM,
                                               create_heads=False),
                          "ffwd": init_ffwd(INNER_DIM, sum(MLP_DIM), dim)},
            })
        tr["layers"].append(depth_layers)
    out_sizes = [int(NUM_TIME[i] * 0.5 ** DEPTH) * NUM_KERNEL[i] + NUM_KERNEL[i] * DEPTH
                 for i in range(N_MOD)]
    for i in range(N_MOD):
        tr["compress"].append(init_ffwd(out_sizes[i], EMB_DIM[i], EMB_DIM[i]))
    tr["out_ffwd"] = init_ffwd(sum(EMB_DIM), sum(EMB_DIM), OUT_DIM)
    params["transformer"] = tr
    return params


# ================================ main ================================

if __name__ == "__main__":
    params = init_params()
    slab_np, offsets = pack_params(params)          # one-time host-side weight transform
    fwd = build_forward(offsets)

    key = jax.random.PRNGKey(0)
    keys = jax.random.split(key, N_MOD)
    channels = [jax.random.normal(keys[i], (BATCH, NUM_CHAN[i], NUM_TIME[i]), jnp.float32)
                for i in range(N_MOD)]
    slab = jnp.asarray(slab_np)

    emb = jax.block_until_ready(fwd(slab, channels))
    assert emb.shape == (BATCH, OUT_DIM), emb.shape
    assert bool(jnp.all(jnp.isfinite(emb)))
    print("KERNEL_OK")
</pallas_src>

<mosaic_0001>
module attributes {stable_mosaic.version = 11 : i64} {
  func.func @kernel(%arg0: memref<4x128xf32, #tpu.memory_space<vmem>>, %arg1: memref<1x64xf32, #tpu.memory_space<vmem>>, %arg2: memref<1952x144xf32, #tpu.memory_space<vmem>>, %arg3: memref<2x8xf32, #tpu.memory_space<vmem>>) attributes {dimension_semantics = [], scalar_prefetch = 0 : i64, scratch_operands = 0 : i64, tpu.core_type = #tpu.core_type<tc>} {
    %c0 = arith.constant 0 : index
    %c0_0 = arith.constant 0 : index
    %0 = vector.load %arg0[%c0, %c0_0] : memref<4x128xf32, #tpu.memory_space<vmem>>, vector<4x128xf32>
    %c304 = arith.constant 304 : index
    %c0_1 = arith.constant 0 : index
    %1 = vector.load %arg2[%c304, %c0_1] : memref<1952x144xf32, #tpu.memory_space<vmem>>, vector<8x20xf32>
    %c312 = arith.constant 312 : index
    %c0_2 = arith.constant 0 : index
    %2 = vector.load %arg2[%c312, %c0_2] : memref<1952x144xf32, #tpu.memory_space<vmem>>, vector<8x1xf32>
    %c320 = arith.constant 320 : index
    %c0_3 = arith.constant 0 : index
    %3 = vector.load %arg2[%c320, %c0_3] : memref<1952x144xf32, #tpu.memory_space<vmem>>, vector<8x1xf32>
    %4 = vector.extract_strided_slice %0 {offsets = [0, 0], sizes = [4, 64], strides = [1, 1]} : vector<4x128xf32> to vector<4x64xf32>
    %cst = arith.constant 0.000000e+00 : f32
    %5 = vector.broadcast %cst : f32 to vector<4x2xf32>
    %6 = tpu.concatenate %5, %4, %5 in 1 : vector<4x2xf32>, vector<4x64xf32>, vector<4x2xf32> -> vector<4x68xf32>
    %7 = vector.extract_strided_slice %0 {offsets = [0, 64], sizes = [4, 64], strides = [1, 1]} : vector<4x128xf32> to vector<4x64xf32>
    %cst_4 = arith.constant 0.000000e+00 : f32
    %8 = vector.broadcast %cst_4 : f32 to vector<4x2xf32>
    %9 = tpu.concatenate %8, %7, %8 in 1 : vector<4x2xf32>, vector<4x64xf32>, vector<4x2xf32> -> vector<4x68xf32>
    %10 = vector.extract_strided_slice %6 {offsets = [0, 0], sizes = [4, 64], strides = [1, 1]} : vector<4x68xf32> to vector<4x64xf32>
    %11 = vector.extract_strided_slice %9 {offsets = [0, 0], sizes = [4, 64], strides = [1, 1]} : vector<4x68xf32> to vector<4x64xf32>
    %12 = tpu.concatenate %10, %11 in 1 : vector<4x64xf32>, vector<4x64xf32> -> vector<4x128xf32>
    %13 = vector.extract_strided_slice %6 {offsets = [0, 1], sizes = [4, 64], strides = [1, 1]} : vector<4x68xf32> to vector<4x64xf32>
    %14 = vector.extract_strided_slice %9 {offsets = [0, 1], sizes = [4, 64], strides = [1, 1]} : vector<4x68xf32> to vector<4x64xf32>
    %15 = tpu.concatenate %13, %14 in 1 : vector<4x64xf32>, vector<4x64xf32> -> vector<4x128xf32>
    %16 = vector.extract_strided_slice %6 {offsets = [0, 2], sizes = [4, 64], strides = [1, 1]} : vector<4x68xf32> to vector<4x64xf32>
    %17 = vector.extract_strided_slice %9 {offsets = [0, 2], sizes = [4, 64], strides = [1, 1]} : vector<4x68xf32> to vector<4x64xf32>
    %18 = tpu.concatenate %16, %17 in 1 : vector<4x64xf32>, vector<4x64xf32> -> vector<4x128xf32>
    %19 = vector.extract_strided_slice %6 {offsets = [0, 3], sizes = [4, 64], strides = [1, 1]} : vector<4x68xf32> to vector<4x64xf32>
    %20 = vector.extract_strided_slice %9 {offsets = [0, 3], sizes = [4, 64], strides = [1, 1]} : vector<4x68xf32> to vector<4x64xf32>
    %21 = tpu.concatenate %19, %20 in 1 : vector<4x64xf32>, vector<4x64xf32> -> vector<4x128xf32>
    %22 = vector.extract_strided_slice %6 {offsets = [0, 4], sizes = [4, 64], strides = [1, 1]} : vector<4x68xf32> to vector<4x64xf32>
    %23 = vector.extract_strided_slice %9 {offsets = [0, 4], sizes = [4, 64], strides = [1, 1]} : vector<4x68xf32> to vector<4x64xf32>
    %24 = tpu.concatenate %22, %23 in 1 : vector<4x64xf32>, vector<4x64xf32> -> vector<4x128xf32>
    %25 = tpu.concatenate %12, %15, %18, %21, %24 in 0 : vector<4x128xf32>, vector<4x128xf32>, vector<4x128xf32>, vector<4x128xf32>, vector<4x128xf32> -> vector<20x128xf32>
    %cst_5 = arith.constant dense<0.000000e+00> : vector<8x128xf32>
    %26 = tpu.matmul %1, %25, %cst_5 {dimension_numbers = #tpu.dot_dimension_numbers<[1], [0], [0], [1], [0, 0, 1, 1], [], []>} : vector<8x20xf32>, vector<20x128xf32>, vector<8x128xf32> -> vector<8x128xf32>
    %27 = vector.broadcast %2 : vector<8x1xf32> to vector<8x128xf32>
    %28 = arith.mulf %26, %27 : vector<8x128xf32>
    %29 = vector.broadcast %3 : vector<8x1xf32> to vector<8x128xf32>
    %30 = arith.addf %28, %29 : vector<8x128xf32>
    %cst_6 = arith.constant 0.000000e+00 : f32
    %31 = vector.broadcast %cst_6 : f32 to vector<8x128xf32>
    %32 = arith.cmpf ogt, %30, %31 : vector<8x128xf32>
    %33 = math.exp %30 : vector<8x128xf32>
    %cst_7 = arith.constant 1.000000e+00 : f32
    %34 = vector.broadcast %cst_7 : f32 to vector<8x128xf32>
    %35 = arith.subf %33, %34 : vector<8x128xf32>
    %36 = arith.select %32, %30, %35 : vector<8x128xi1>, vector<8x128xf32>
    %c328 = arith.constant 328 : index
    %c0_8 = arith.constant 0 : index
    %37 = vector.load %arg2[%c328, %c0_8] : memref<1952x144xf32, #tpu.memory_space<vmem>>, vector<8x128xf32>
    %38 = arith.addf %36, %37 : vector<8x128xf32>
    %c0_9 = arith.constant 0 : index
    %c0_10 = arith.constant 0 : index
    %39 = vector.load %arg1[%c0_9, %c0_10] : memref<1x64xf32, #tpu.memory_space<vmem>>, vector<1x64xf32>
    %c336 = arith.constant 336 : index
    %c0_11 = arith.constant 0 : index
    %40 = vector.load %arg2[%c336, %c0_11] : memref<1952x144xf32, #tpu.memory_space<vmem>>, vector<4x3xf32>
    %c344 = arith.constant 344 : index
    %c0_12 = arith.constant 0 : index
    %41 = vector.load %arg2[%c344, %c0_12] : memref<1952x144xf32, #tpu.memory_space<vmem>>, vector<4x1xf32>
    %c352 = arith.constant 352 : index
    %c0_13 = arith.constant 0 : index
    %42 = vector.load %arg2[%c352, %c0_13] : memref<1952x144xf32, #tpu.memory_space<vmem>>, vector<4x1xf32>
    %43 = vector.extract_strided_slice %39 {offsets = [0, 0], sizes = [1, 32], strides = [1, 1]} : vector<1x64xf32> to vector<1x32xf32>
    %cst_14 = arith.constant 0.000000e+00 : f32
    %44 = vector.broadcast %cst_14 : f32 to vector<1x1xf32>
    %45 = tpu.concatenate %44, %43, %44 in 1 : vector<1x1xf32>, vector<1x32xf32>, vector<1x1xf32> -> vector<1x34xf32>
    %46 = vector.extract_strided_slice %39 {offsets = [0, 32], sizes = [1, 32], strides = [1, 1]} : vector<1x64xf32> to vector<1x32xf32>
    %cst_15 = arith.constant 0.000000e+00 : f32
    %47 = vector.broadcast %cst_15 : f32 to vector<1x1xf32>
    %48 = tpu.concatenate %47, %46, %47 in 1 : vector<1x1xf32>, vector<1x32xf32>, vector<1x1xf32> -> vector<1x34xf32>
    %49 = vector.extract_strided_slice %45 {offsets = [0, 0], sizes = [1, 32], strides = [1, 1]} : vector<1x34xf32> to vector<1x32xf32>
    %50 = vector.extract_strided_slice %48 {offsets = [0, 0], sizes = [1, 32], strides = [1, 1]} : vector<1x34xf32> to vector<1x32xf32>
    %51 = tpu.concatenate %49, %50 in 1 : vector<1x32xf32>, vector<1x32xf32> -> vector<1x64xf32>
    %52 = vector.extract_strided_slice %40 {offsets = [0, 0], sizes = [4, 1], strides = [1, 1]} : vector<4x3xf32> to vector<4x1xf32>
    %53 = vector.broadcast %52 : vector<4x1xf32> to vector<4x64xf32>
    %54 = vector.broadcast %51 : vector<1x64xf32> to vector<4x64xf32>
    %55 = arith.mulf %53, %54 : vector<4x64xf32>
    %56 = vector.extract_strided_slice %45 {offsets = [0, 1], sizes = [1, 32], strides = [1, 1]} : vector<1x34xf32> to vector<1x32xf32>
    %57 = vector.extract_strided_slice %48 {offsets = [0, 1], sizes = [1, 32], strides = [1, 1]} : vector<1x34xf32> to vector<1x32xf32>
    %58 = tpu.concatenate %56, %57 in 1 : vector<1x32xf32>, vector<1x32xf32> -> vector<1x64xf32>
    %59 = vector.extract_strided_slice %40 {offsets = [0, 1], sizes = [4, 1], strides = [1, 1]} : vector<4x3xf32> to vector<4x1xf32>
    %60 = vector.broadcast %59 : vector<4x1xf32> to vector<4x64xf32>
    %61 = vector.broadcast %58 : vector<1x64xf32> to vector<4x64xf32>
    %62 = arith.mulf %60, %61 : vector<4x64xf32>
    %63 = arith.addf %55, %62 : vector<4x64xf32>
    %64 = vector.extract_strided_slice %45 {offsets = [0, 2], sizes = [1, 32], strides = [1, 1]} : vector<1x34xf32> to vector<1x32xf32>
    %65 = vector.extract_strided_slice %48 {offsets = [0, 2], sizes = [1, 32], strides = [1, 1]} : vector<1x34xf32> to vector<1x32xf32>
    %66 = tpu.concatenate %64, %65 in 1 : vector<1x32xf32>, vector<1x32xf32> -> vector<1x64xf32>
    %67 = vector.extract_strided_slice %40 {offsets = [0, 2], sizes = [4, 1], strides = [1, 1]} : vector<4x3xf32> to vector<4x1xf32>
    %68 = vector.broadcast %67 : vector<4x1xf32> to vector<4x64xf32>
    %69 = vector.broadcast %66 : vector<1x64xf32> to vector<4x64xf32>
    %70 = arith.mulf %68, %69 : vector<4x64xf32>
    %71 = arith.addf %63, %70 : vector<4x64xf32>
    %72 = vector.broadcast %41 : vector<4x1xf32> to vector<4x64xf32>
    %73 = arith.mulf %71, %72 : vector<4x64xf32>
    %74 = vector.broadcast %42 : vector<4x1xf32> to vector<4x64xf32>
    %75 = arith.addf %73, %74 : vector<4x64xf32>
    %cst_16 = arith.constant 0.000000e+00 : f32
    %76 = vector.broadcast %cst_16 : f32 to vector<4x64xf32>
    %77 = arith.cmpf ogt, %75, %76 : vector<4x64xf32>
    %78 = math.exp %75 : vector<4x64xf32>
    %cst_17 = arith.constant 1.000000e+00 : f32
    %79 = vector.broadcast %cst_17 : f32 to vector<4x64xf32>
    %80 = arith.subf %78, %79 : vector<4x64xf32>
    %81 = arith.select %77, %75, %80 : vector<4x64xi1>, vector<4x64xf32>
    %c360 = arith.constant 360 : index
    %c0_18 = arith.constant 0 : index
    %82 = vector.load %arg2[%c360, %c0_18] : memref<1952x144xf32, #tpu.memory_space<vmem>>, vector<4x64xf32>
    %83 = arith.addf %81, %82 : vector<4x64xf32>
    %c96 = arith.constant 96 : index
    %c0_19 = arith.constant 0 : index
    %84 = vector.load %arg2[%c96, %c0_19] : memref<1952x144xf32, #tpu.memory_space<vmem>>, vector<128x64xf32>
    %85 = vector.extract_strided_slice %38 {offsets = [0, 1], sizes = [8, 127], strides = [1, 1]} : vector<8x128xf32> to vector<8x127xf32>
    %86 = vector.extract_strided_slice %38 {offsets = [0, 127], sizes = [8, 1], strides = [1, 1]} : vector<8x128xf32> to vector<8x1xf32>
    %87 = tpu.concatenate %85, %86 in 1 : vector<8x127xf32>, vector<8x1xf32> -> vector<8x128xf32>
    %88 = arith.maximumf %38, %87 : vector<8x128xf32>
    %cst_20 = arith.constant dense<0.000000e+00> : vector<8x64xf32>
    %89 = tpu.matmul %88, %84, %cst_20 {dimension_numbers = #tpu.dot_dimension_numbers<[1], [0], [0], [1], [0, 0, 1, 1], [], []>} : vector<8x128xf32>, vector<128x64xf32>, vector<8x64xf32> -> vector<8x64xf32>
    %90 = vector.extract_strided_slice %89 {offsets = [0, 0], sizes = [8, 32], strides = [1, 1]} : vector<8x64xf32> to vector<8x32xf32>
    %91 = vector.extract_strided_slice %89 {offsets = [0, 32], sizes = [8, 32], strides = [1, 1]} : vector<8x64xf32> to vector<8x32xf32>
    %92 = tpu.concatenate %90, %91 in 0 : vector<8x32xf32>, vector<8x32xf32> -> vector<16x32xf32>
    %c520 = arith.constant 520 : index
    %c0_21 = arith.constant 0 : index
    %93 = vector.load %arg2[%c520, %c0_21] : memref<1952x144xf32, #tpu.memory_space<vmem>>, vector<8x40xf32>
    %c528 = arith.constant 528 : index
    %c0_22 = arith.constant 0 : index
    %94 = vector.load %arg2[%c528, %c0_22] : memref<1952x144xf32, #tpu.memory_space<vmem>>, vector<8x1xf32>
    %c536 = arith.constant 536 : index
    %c0_23 = arith.constant 0 : index
    %95 = vector.load %arg2[%c536, %c0_23] : memref<1952x144xf32, #tpu.memory_space<vmem>>, vector<8x1xf32>
    %96 = vector.extract_strided_slice %38 {offsets = [0, 0], sizes = [8, 64], strides = [1, 1]} : vector<8x128xf32> to vector<8x64xf32>
    %cst_24 = arith.constant 0.000000e+00 : f32
    %97 = vector.broadcast %cst_24 : f32 to vector<8x2xf32>
    %98 = tpu.concatenate %97, %96, %97 in 1 : vector<8x2xf32>, vector<8x64xf32>, vector<8x2xf32> -> vector<8x68xf32>
    %99 = vector.extract_strided_slice %38 {offsets = [0, 64], sizes = [8, 64], strides = [1, 1]} : vector<8x128xf32> to vector<8x64xf32>
    %cst_25 = arith.constant 0.000000e+00 : f32
    %100 = vector.broadcast %cst_25 : f32 to vector<8x2xf32>
    %101 = tpu.concatenate %100, %99, %100 in 1 : vector<8x2xf32>, vector<8x64xf32>, vector<8x2xf32> -> vector<8x68xf32>
    %102 = vector.extract_strided_slice %98 {offsets = [0, 0], sizes = [8, 64], strides = [1, 1]} : vector<8x68xf32> to vector<8x64xf32>
    %103 = vector.extract_strided_slice %101 {offsets = [0, 0], sizes = [8, 64], strides = [1, 1]} : vector<8x68xf32> to vector<8x64xf32>
    %104 = tpu.concatenate %102, %103 in 1 : vector<8x64xf32>, vector<8x64xf32> -> vector<8x128xf32>
    %105 = vector.extract_strided_slice %98 {offsets = [0, 1], sizes = [8, 64], strides = [1, 1]} : vector<8x68xf32> to vector<8x64xf32>
    %106 = vector.extract_strided_slice %101 {offsets = [0, 1], sizes = [8, 64], strides = [1, 1]} : vector<8x68xf32> to vector<8x64xf32>
    %107 = tpu.concatenate %105, %106 in 1 : vector<8x64xf32>, vector<8x64xf32> -> vector<8x128xf32>
    %108 = vector.extract_strided_slice %98 {offsets = [0, 2], sizes = [8, 64], strides = [1, 1]} : vector<8x68xf32> to vector<8x64xf32>
    %109 = vector.extract_strided_slice %101 {offsets = [0, 2], sizes = [8, 64], strides = [1, 1]} : vector<8x68xf32> to vector<8x64xf32>
    %110 = tpu.concatenate %108, %109 in 1 : vector<8x64xf32>, vector<8x64xf32> -> vector<8x128xf32>
    %111 = vector.extract_strided_slice %98 {offsets = [0, 3], sizes = [8, 64], strides = [1, 1]} : vector<8x68xf32> to vector<8x64xf32>
    %112 = vector.extract_strided_slice %101 {offsets = [0, 3], sizes = [8, 64], strides = [1, 1]} : vector<8x68xf32> to vector<8x64xf32>
    %113 = tpu.concatenate %111, %112 in 1 : vector<8x64xf32>, vector<8x64xf32> -> vector<8x128xf32>
    %114 = vector.extract_strided_slice %98 {offsets = [0, 4], sizes = [8, 64], strides = [1, 1]} : vector<8x68xf32> to vector<8x64xf32>
    %115 = vector.extract_strided_slice %101 {offsets = [0, 4], sizes = [8, 64], strides = [1, 1]} : vector<8x68xf32> to vector<8x64xf32>
    %116 = tpu.concatenate %114, %115 in 1 : vector<8x64xf32>, vector<8x64xf32> -> vector<8x128xf32>
    %117 = tpu.concatenate %104, %107, %110, %113, %116 in 0 : vector<8x128xf32>, vector<8x128xf32>, vector<8x128xf32>, vector<8x128xf32>, vector<8x128xf32> -> vector<40x128xf32>
    %cst_26 = arith.constant dense<0.000000e+00> : vector<8x128xf32>
    %118 = tpu.matmul %93, %117, %cst_26 {dimension_numbers = #tpu.dot_dimension_numbers<[1], [0], [0], [1], [0, 0, 1, 1], [], []>} : vector<8x40xf32>, vector<40x128xf32>, vector<8x128xf32> -> vector<8x128xf32>
    %119 = vector.broadcast %94 : vector<8x1xf32> to vector<8x128xf32>
    %120 = arith.mulf %118, %119 : vector<8x128xf32>
    %121 = vector.broadcast %95 : vector<8x1xf32> to vector<8x128xf32>
    %122 = arith.addf %120, %121 : vector<8x128xf32>
    %cst_27 = arith.constant 0.000000e+00 : f32
    %123 = vector.broadcast %cst_27 : f32 to vector<8x128xf32>
    %124 = arith.cmpf ogt, %122, %123 : vector<8x128xf32>
    %125 = math.exp %122 : vector<8x128xf32>
    %cst_28 = arith.constant 1.000000e+00 : f32
    %126 = vector.broadcast %cst_28 : f32 to vector<8x128xf32>
    %127 = arith.subf %125, %126 : vector<8x128xf32>
    %128 = arith.select %124, %122, %127 : vector<8x128xi1>, vector<8x128xf32>
    %129 = vector.extract_strided_slice %128 {offsets = [0, 1], sizes = [8, 127], strides = [1, 1]} : vector<8x128xf32> to vector<8x127xf32>
    %130 = vector.extract_strided_slice %128 {offsets = [0, 127], sizes = [8, 1], strides = [1, 1]} : vector<8x128xf32> to vector<8x1xf32>
    %131 = tpu.concatenate %129, %130 in 1 : vector<8x127xf32>, vector<8x1xf32> -> vector<8x128xf32>
    %132 = arith.maximumf %128, %131 : vector<8x128xf32>
    %cst_29 = arith.constant dense<0.000000e+00> : vector<8x64xf32>
    %133 = tpu.matmul %132, %84, %cst_29 {dimension_numbers = #tpu.dot_dimension_numbers<[1], [0], [0], [1], [0, 0, 1, 1], [], []>} : vector<8x128xf32>, vector<128x64xf32>, vector<8x64xf32> -> vector<8x64xf32>
    %134 = vector.extract_strided_slice %133 {offsets = [0, 0], sizes = [8, 32], strides = [1, 1]} : vector<8x64xf32> to vector<8x32xf32>
    %135 = vector.extract_strided_slice %133 {offsets = [0, 32], sizes = [8, 32], strides = [1, 1]} : vector<8x64xf32> to vector<8x32xf32>
    %136 = tpu.concatenate %134, %135 in 0 : vector<8x32xf32>, vector<8x32xf32> -> vector<16x32xf32>
    %c272 = arith.constant 272 : index
    %c0_30 = arith.constant 0 : index
    %137 = vector.load %arg2[%c272, %c0_30] : memref<1952x144xf32, #tpu.memory_space<vmem>>, vector<2x64xf32>
    %138 = arith.mulf %133, %133 : vector<8x64xf32>
    %cst_31 = arith.constant dense<0.000000e+00> : vector<2x8xf32>
    %139 = tpu.matmul %137, %138, %cst_31 {dimension_numbers = #tpu.dot_dimension_numbers<[1], [1], [0], [0], [0, 0, 1, 0], [], []>} : vector<2x64xf32>, vector<8x64xf32>, vector<2x8xf32> -> vector<2x8xf32>
    %140 = math.log %139 : vector<2x8xf32>
    %c368 = arith.constant 368 : index
    %c0_32 = arith.constant 0 : index
    %141 = vector.load %arg2[%c368, %c0_32] : memref<1952x144xf32, #tpu.memory_space<vmem>>, vector<32x96xf32>
    %cst_33 = arith.constant dense<0.000000e+00> : vector<16x96xf32>
    %142 = tpu.matmul %92, %141, %cst_33 {dimension_numbers = #tpu.dot_dimension_numbers<[1], [0], [0], [1], [0, 0, 1, 1], [], []>} : vector<16x32xf32>, vector<32x96xf32>, vector<16x96xf32> -> vector<16x96xf32>
    %143 = vector.extract_strided_slice %142 {offsets = [0, 0], sizes = [16, 32], strides = [1, 1]} : vector<16x96xf32> to vector<16x32xf32>
    %144 = vector.extract_strided_slice %142 {offsets = [0, 32], sizes = [16, 32], strides = [1, 1]} : vector<16x96xf32> to vector<16x32xf32>
    %145 = vector.extract_strided_slice %142 {offsets = [0, 64], sizes = [16, 32], strides = [1, 1]} : vector<16x96xf32> to vector<16x32xf32>
    %c224 = arith.constant 224 : index
    %c0_34 = arith.constant 0 : index
    %146 = vector.load %arg2[%c224, %c0_34] : memref<1952x144xf32, #tpu.memory_space<vmem>>, vector<16x16xf32>
    %c400 = arith.constant 400 : index
    %c0_35 = arith.constant 0 : index
    %147 = vector.load %arg2[%c400, %c0_35] : memref<1952x144xf32, #tpu.memory_space<vmem>>, vector<32x32xf32>
    %c432 = arith.constant 432 : index
    %c0_36 = arith.constant 0 : index
    %148 = vector.load %arg2[%c432, %c0_36] : memref<1952x144xf32, #tpu.memory_space<vmem>>, vector<1x32xf32>
    %149 = vector.extract_strided_slice %143 {offsets = [0, 0], sizes = [16, 8], strides = [1, 1]} : vector<16x32xf32> to vector<16x8xf32>
    %150 = vector.extract_strided_slice %144 {offsets = [0, 0], sizes = [16, 8], strides = [1, 1]} : vector<16x32xf32> to vector<16x8xf32>
    %cst_37 = arith.constant dense<0.000000e+00> : vector<16x16xf32>
    %151 = tpu.matmul %149, %150, %cst_37 {dimension_numbers = #tpu.dot_dimension_numbers<[1], [1], [0], [0], [0, 0, 1, 0], [], []>} : vector<16x8xf32>, vector<16x8xf32>, vector<16x16xf32> -> vector<16x16xf32>
    %152 = arith.addf %151, %146 : vector<16x16xf32>
    %cst_38 = arith.constant dense<0xFF800000> : vector<16xf32>
    %153 = vector.multi_reduction <maximumf>, %152, %cst_38 [1] : vector<16x16xf32> to vector<16xf32>
    %154 = vector.shape_cast %153 : vector<16xf32> to vector<16x1xf32>
    %155 = vector.broadcast %154 : vector<16x1xf32> to vector<16x16xf32>
    %156 = arith.subf %152, %155 : vector<16x16xf32>
    %157 = math.exp %156 : vector<16x16xf32>
    %cst_39 = arith.constant dense<0.000000e+00> : vector<16xf32>
    %158 = vector.multi_reduction <add>, %157, %cst_39 [1] : vector<16x16xf32> to vector<16xf32>
    %159 = vector.shape_cast %158 : vector<16xf32> to vector<16x1xf32>
    %160 = tpu.reciprocal %159 {approx = true} : vector<16x1xf32> -> vector<16x1xf32>
    %161 = vector.broadcast %160 : vector<16x1xf32> to vector<16x16xf32>
    %162 = arith.mulf %157, %161 : vector<16x16xf32>
    %163 = vector.extract_strided_slice %145 {offsets = [0, 0], sizes = [16, 8], strides = [1, 1]} : vector<16x32xf32> to vector<16x8xf32>
    %cst_40 = arith.constant dense<0.000000e+00> : vector<16x8xf32>
    %164 = tpu.matmul %162, %163, %cst_40 {dimension_numbers = #tpu.dot_dimension_numbers<[1], [0], [0], [1], [0, 0, 1, 1], [], []>} : vector<16x16xf32>, vector<16x8xf32>, vector<16x8xf32> -> vector<16x8xf32>
    %165 = vector.extract_strided_slice %143 {offsets = [0, 8], sizes = [16, 8], strides = [1, 1]} : vector<16x32xf32> to vector<16x8xf32>
    %166 = vector.extract_strided_slice %144 {offsets = [0, 8], sizes = [16, 8], strides = [1, 1]} : vector<16x32xf32> to vector<16x8xf32>
    %cst_41 = arith.constant dense<0.000000e+00> : vector<16x16xf32>
    %167 = tpu.matmul %165, %166, %cst_41 {dimension_numbers = #tpu.dot_dimension_numbers<[1], [1], [0], [0], [0, 0, 1, 0], [], []>} : vector<16x8xf32>, vector<16x8xf32>, vector<16x16xf32> -> vector<16x16xf32>
    %168 = arith.addf %167, %146 : vector<16x16xf32>
    %cst_42 = arith.constant dense<0xFF800000> : vector<16xf32>
    %169 = vector.multi_reduction <maximumf>, %168, %cst_42 [1] : vector<16x16xf32> to vector<16xf32>
    %170 = vector.shape_cast %169 : vector<16xf32> to vector<16x1xf32>
    %171 = vector.broadcast %170 : vector<16x1xf32> to vector<16x16xf32>
    %172 = arith.subf %168, %171 : vector<16x16xf32>
    %173 = math.exp %172 : vector<16x16xf32>
    %cst_43 = arith.constant dense<0.000000e+00> : vector<16xf32>
    %174 = vector.multi_reduction <add>, %173, %cst_43 [1] : vector<16x16xf32> to vector<16xf32>
    %175 = vector.shape_cast %174 : vector<16xf32> to vector<16x1xf32>
    %176 = tpu.reciprocal %175 {approx = true} : vector<16x1xf32> -> vector<16x1xf32>
    %177 = vector.broadcast %176 : vector<16x1xf32> to vector<16x16xf32>
    %178 = arith.mulf %173, %177 : vector<16x16xf32>
    %179 = vector.extract_strided_slice %145 {offsets = [0, 8], sizes = [16, 8], strides = [1, 1]} : vector<16x32xf32> to vector<16x8xf32>
    %cst_44 = arith.constant dense<0.000000e+00> : vector<16x8xf32>
    %180 = tpu.matmul %178, %179, %cst_44 {dimension_numbers = #tpu.dot_dimension_numbers<[1], [0], [0], [1], [0, 0, 1, 1], [], []>} : vector<16x16xf32>, vector<16x8xf32>, vector<16x8xf32> -> vector<16x8xf32>
    %181 = vector.extract_strided_slice %143 {offsets = [0, 16], sizes = [16, 8], strides = [1, 1]} : vector<16x32xf32> to vector<16x8xf32>
    %182 = vector.extract_strided_slice %144 {offsets = [0, 16], sizes = [16, 8], strides = [1, 1]} : vector<16x32xf32> to vector<16x8xf32>
    %cst_45 = arith.constant dense<0.000000e+00> : vector<16x16xf32>
    %183 = tpu.matmul %181, %182, %cst_45 {dimension_numbers = #tpu.dot_dimension_numbers<[1], [1], [0], [0], [0, 0, 1, 0], [], []>} : vector<16x8xf32>, vector<16x8xf32>, vector<16x16xf32> -> vector<16x16xf32>
    %184 = arith.addf %183, %146 : vector<16x16xf32>
    %cst_46 = arith.constant dense<0xFF800000> : vector<16xf32>
    %185 = vector.multi_reduction <maximumf>, %184, %cst_46 [1] : vector<16x16xf32> to vector<16xf32>
    %186 = vector.shape_cast %185 : vector<16xf32> to vector<16x1xf32>
    %187 = vector.broadcast %186 : vector<16x1xf32> to vector<16x16xf32>
    %188 = arith.subf %184, %187 : vector<16x16xf32>
    %189 = math.exp %188 : vector<16x16xf32>
    %cst_47 = arith.constant dense<0.000000e+00> : vector<16xf32>
    %190 = vector.multi_reduction <add>, %189, %cst_47 [1] : vector<16x16xf32> to vector<16xf32>
    %191 = vector.shape_cast %190 : vector<16xf32> to vector<16x1xf32>
    %192 = tpu.reciprocal %191 {approx = true} : vector<16x1xf32> -> vector<16x1xf32>
    %193 = vector.broadcast %192 : vector<16x1xf32> to vector<16x16xf32>
    %194 = arith.mulf %189, %193 : vector<16x16xf32>
    %195 = vector.extract_strided_slice %145 {offsets = [0, 16], sizes = [16, 8], strides = [1, 1]} : vector<16x32xf32> to vector<16x8xf32>
    %cst_48 = arith.constant dense<0.000000e+00> : vector<16x8xf32>
    %196 = tpu.matmul %194, %195, %cst_48 {dimension_numbers = #tpu.dot_dimension_numbers<[1], [0], [0], [1], [0, 0, 1, 1], [], []>} : vector<16x16xf32>, vector<16x8xf32>, vector<16x8xf32> -> vector<16x8xf32>
    %197 = vector.extract_strided_slice %143 {offsets = [0, 24], sizes = [16, 8], strides = [1, 1]} : vector<16x32xf32> to vector<16x8xf32>
    %198 = vector.extract_strided_slice %144 {offsets = [0, 24], sizes = [16, 8], strides = [1, 1]} : vector<16x32xf32> to vector<16x8xf32>
    %cst_49 = arith.constant dense<0.000000e+00> : vector<16x16xf32>
    %199 = tpu.matmul %197, %198, %cst_49 {dimension_numbers = #tpu.dot_dimension_numbers<[1], [1], [0], [0], [0, 0, 1, 0], [], []>} : vector<16x8xf32>, vector<16x8xf32>, vector<16x16xf32> -> vector<16x16xf32>
    %200 = arith.addf %199, %146 : vector<16x16xf32>
    %cst_50 = arith.constant dense<0xFF800000> : vector<16xf32>
    %201 = vector.multi_reduction <maximumf>, %200, %cst_50 [1] : vector<16x16xf32> to vector<16xf32>
    %202 = vector.shape_cast %201 : vector<16xf32> to vector<16x1xf32>
    %203 = vector.broadcast %202 : vector<16x1xf32> to vector<16x16xf32>
    %204 = arith.subf %200, %203 : vector<16x16xf32>
    %205 = math.exp %204 : vector<16x16xf32>
    %cst_51 = arith.constant dense<0.000000e+00> : vector<16xf32>
    %206 = vector.multi_reduction <add>, %205, %cst_51 [1] : vector<16x16xf32> to vector<16xf32>
    %207 = vector.shape_cast %206 : vector<16xf32> to vector<16x1xf32>
    %208 = tpu.reciprocal %207 {approx = true} : vector<16x1xf32> -> vector<16x1xf32>
    %209 = vector.broadcast %208 : vector<16x1xf32> to vector<16x16xf32>
    %210 = arith.mulf %205, %209 : vector<16x16xf32>
    %211 = vector.extract_strided_slice %145 {offsets = [0, 24], sizes = [16, 8], strides = [1, 1]} : vector<16x32xf32> to vector<16x8xf32>
    %cst_52 = arith.constant dense<0.000000e+00> : vector<16x8xf32>
    %212 = tpu.matmul %210, %211, %cst_52 {dimension_numbers = #tpu.dot_dimension_numbers<[1], [0], [0], [1], [0, 0, 1, 1], [], []>} : vector<16x16xf32>, vector<16x8xf32>, vector<16x8xf32> -> vector<16x8xf32>
    %213 = tpu.concatenate %164, %180, %196, %212 in 1 : vector<16x8xf32>, vector<16x8xf32>, vector<16x8xf32>, vector<16x8xf32> -> vector<16x32xf32>
    %cst_53 = arith.constant dense<0.000000e+00> : vector<16x32xf32>
    %214 = tpu.matmul %213, %147, %cst_53 {dimension_numbers = #tpu.dot_dimension_numbers<[1], [0], [0], [1], [0, 0, 1, 1], [], []>} : vector<16x32xf32>, vector<32x32xf32>, vector<16x32xf32> -> vector<16x32xf32>
    %215 = vector.broadcast %148 : vector<1x32xf32> to vector<16x32xf32>
    %216 = arith.addf %214, %215 : vector<16x32xf32>
    %217 = arith.addf %216, %92 : vector<16x32xf32>
    %c440 = arith.constant 440 : index
    %c0_54 = arith.constant 0 : index
    %218 = vector.load %arg2[%c440, %c0_54] : memref<1952x144xf32, #tpu.memory_space<vmem>>, vector<1x32xf32>
    %c448 = arith.constant 448 : index
    %c0_55 = arith.constant 0 : index
    %219 = vector.load %arg2[%c448, %c0_55] : memref<1952x144xf32, #tpu.memory_space<vmem>>, vector<1x32xf32>
    %c456 = arith.constant 456 : index
    %c0_56 = arith.constant 0 : index
    %220 = vector.load %arg2[%c456, %c0_56] : memref<1952x144xf32, #tpu.memory_space<vmem>>, vector<32x16xf32>
    %c488 = arith.constant 488 : index
    %c0_57 = arith.constant 0 : index
    %221 = vector.load %arg2[%c488, %c0_57] : memref<1952x144xf32, #tpu.memory_space<vmem>>, vector<1x16xf32>
    %c496 = arith.constant 496 : index
    %c0_58 = arith.constant 0 : index
    %222 = vector.load %arg2[%c496, %c0_58] : memref<1952x144xf32, #tpu.memory_space<vmem>>, vector<16x32xf32>
    %c512 = arith.constant 512 : index
    %c0_59 = arith.constant 0 : index
    %223 = vector.load %arg2[%c512, %c0_59] : memref<1952x144xf32, #tpu.memory_space<vmem>>, vector<1x32xf32>
    %cst_60 = arith.constant dense<0.000000e+00> : vector<16xf32>
    %224 = vector.multi_reduction <add>, %217, %cst_60 [1] : vector<16x32xf32> to vector<16xf32>
    %225 = vector.shape_cast %224 : vector<16xf32> to vector<16x1xf32>
    %cst_61 = arith.constant 3.200000e+01 : f32
    %226 = vector.broadcast %cst_61 : f32 to vector<16x1xf32>
    %227 = arith.divf %225, %226 : vector<16x1xf32>
    %228 = vector.broadcast %227 : vector<16x1xf32> to vector<16x32xf32>
    %229 = arith.subf %217, %228 : vector<16x32xf32>
    %230 = arith.mulf %229, %229 : vector<16x32xf32>
    %cst_62 = arith.constant dense<0.000000e+00> : vector<16xf32>
    %231 = vector.multi_reduction <add>, %230, %cst_62 [1] : vector<16x32xf32> to vector<16xf32>
    %232 = vector.shape_cast %231 : vector<16xf32> to vector<16x1xf32>
    %cst_63 = arith.constant 3.200000e+01 : f32
    %233 = vector.broadcast %cst_63 : f32 to vector<16x1xf32>
    %234 = arith.divf %232, %233 : vector<16x1xf32>
    %235 = vector.broadcast %227 : vector<16x1xf32> to vector<16x32xf32>
    %236 = arith.subf %217, %235 : vector<16x32xf32>
    %cst_64 = arith.constant 9.99999974E-6 : f32
    %237 = vector.broadcast %cst_64 : f32 to vector<16x1xf32>
    %238 = arith.addf %234, %237 : vector<16x1xf32>
    %239 = math.rsqrt %238 : vector<16x1xf32>
    %240 = vector.broadcast %239 : vector<16x1xf32> to vector<16x32xf32>
    %241 = arith.mulf %236, %240 : vector<16x32xf32>
    %242 = vector.broadcast %218 : vector<1x32xf32> to vector<16x32xf32>
    %243 = arith.mulf %241, %242 : vector<16x32xf32>
    %244 = vector.broadcast %219 : vector<1x32xf32> to vector<16x32xf32>
    %245 = arith.addf %243, %244 : vector<16x32xf32>
    %cst_65 = arith.constant dense<0.000000e+00> : vector<16x16xf32>
    %246 = tpu.matmul %245, %220, %cst_65 {dimension_numbers = #tpu.dot_dimension_numbers<[1], [0], [0], [1], [0, 0, 1, 1], [], []>} : vector<16x32xf32>, vector<32x16xf32>, vector<16x16xf32> -> vector<16x16xf32>
    %247 = vector.broadcast %221 : vector<1x16xf32> to vector<16x16xf32>
    %248 = arith.addf %246, %247 : vector<16x16xf32>
    %cst_66 = arith.constant 5.000000e-01 : f32
    %249 = vector.broadcast %cst_66 : f32 to vector<16x16xf32>
    %250 = arith.mulf %249, %248 : vector<16x16xf32>
    %cst_67 = arith.constant 4.471500e-02 : f32
    %251 = vector.broadcast %cst_67 : f32 to vector<16x16xf32>
    %252 = arith.mulf %251, %248 : vector<16x16xf32>
    %253 = arith.mulf %252, %248 : vector<16x16xf32>
    %254 = arith.mulf %253, %248 : vector<16x16xf32>
    %255 = arith.addf %248, %254 : vector<16x16xf32>
    %cst_68 = arith.constant 0.797884583 : f32
    %256 = vector.broadcast %cst_68 : f32 to vector<16x16xf32>
    %257 = arith.mulf %256, %255 : vector<16x16xf32>
    %258 = math.tanh %257 : vector<16x16xf32>
    %cst_69 = arith.constant 1.000000e+00 : f32
    %259 = vector.broadcast %cst_69 : f32 to vector<16x16xf32>
    %260 = arith.addf %259, %258 : vector<16x16xf32>
    %261 = arith.mulf %250, %260 : vector<16x16xf32>
    %cst_70 = arith.constant dense<0.000000e+00> : vector<16x32xf32>
    %262 = tpu.matmul %261, %222, %cst_70 {dimension_numbers = #tpu.dot_dimension_numbers<[1], [0], [0], [1], [0, 0, 1, 1], [], []>} : vector<16x16xf32>, vector<16x32xf32>, vector<16x32xf32> -> vector<16x32xf32>
    %263 = vector.broadcast %223 : vector<1x32xf32> to vector<16x32xf32>
    %264 = arith.addf %262, %263 : vector<16x32xf32>
    %265 = arith.addf %264, %136 : vector<16x32xf32>
    %c544 = arith.constant 544 : index
    %c0_71 = arith.constant 0 : index
    %266 = vector.load %arg2[%c544, %c0_71] : memref<1952x144xf32, #tpu.memory_space<vmem>>, vector<32x32xf32>
    %cst_72 = arith.constant dense<0.000000e+00> : vector<16x32xf32>
    %267 = tpu.matmul %265, %266, %cst_72 {dimension_numbers = #tpu.dot_dimension_numbers<[1], [0], [0], [1], [0, 0, 1, 1], [], []>} : vector<16x32xf32>, vector<32x32xf32>, vector<16x32xf32> -> vector<16x32xf32>
    %c32 = arith.constant 32 : index
    %c0_73 = arith.constant 0 : index
    %268 = vector.load %arg2[%c32, %c0_73] : memref<1952x144xf32, #tpu.memory_space<vmem>>, vector<64x32xf32>
    %269 = vector.extract_strided_slice %83 {offsets = [0, 1], sizes = [4, 63], strides = [1, 1]} : vector<4x64xf32> to vector<4x63xf32>
    %270 = vector.extract_strided_slice %83 {offsets = [0, 63], sizes = [4, 1], strides = [1, 1]} : vector<4x64xf32> to vector<4x1xf32>
    %271 = tpu.concatenate %269, %270 in 1 : vector<4x63xf32>, vector<4x1xf32> -> vector<4x64xf32>
    %272 = arith.maximumf %83, %271 : vector<4x64xf32>
    %cst_74 = arith.constant dense<0.000000e+00> : vector<4x32xf32>
    %273 = tpu.matmul %272, %268, %cst_74 {dimension_numbers = #tpu.dot_dimension_numbers<[1], [0], [0], [1], [0, 0, 1, 1], [], []>} : vector<4x64xf32>, vector<64x32xf32>, vector<4x32xf32> -> vector<4x32xf32>
    %274 = vector.extract_strided_slice %273 {offsets = [0, 0], sizes = [4, 16], strides = [1, 1]} : vector<4x32xf32> to vector<4x16xf32>
    %275 = vector.extract_strided_slice %273 {offsets = [0, 16], sizes = [4, 16], strides = [1, 1]} : vector<4x32xf32> to vector<4x16xf32>
    %276 = tpu.concatenate %274, %275 in 0 : vector<4x16xf32>, vector<4x16xf32> -> vector<8x16xf32>
    %c832 = arith.constant 832 : index
    %c0_75 = arith.constant 0 : index
    %277 = vector.load %arg2[%c832, %c0_75] : memref<1952x144xf32, #tpu.memory_space<vmem>>, vector<4x12xf32>
    %c840 = arith.constant 840 : index
    %c0_76 = arith.constant 0 : index
    %278 = vector.load %arg2[%c840, %c0_76] : memref<1952x144xf32, #tpu.memory_space<vmem>>, vector<4x1xf32>
    %c848 = arith.constant 848 : index
    %c0_77 = arith.constant 0 : index
    %279 = vector.load %arg2[%c848, %c0_77] : memref<1952x144xf32, #tpu.memory_space<vmem>>, vector<4x1xf32>
    %280 = vector.extract_strided_slice %83 {offsets = [0, 0], sizes = [4, 32], strides = [1, 1]} : vector<4x64xf32> to vector<4x32xf32>
    %cst_78 = arith.constant 0.000000e+00 : f32
    %281 = vector.broadcast %cst_78 : f32 to vector<4x1xf32>
    %282 = tpu.concatenate %281, %280, %281 in 1 : vector<4x1xf32>, vector<4x32xf32>, vector<4x1xf32> -> vector<4x34xf32>
    %283 = vector.extract_strided_slice %83 {offsets = [0, 32], sizes = [4, 32], strides = [1, 1]} : vector<4x64xf32> to vector<4x32xf32>
    %cst_79 = arith.constant 0.000000e+00 : f32
    %284 = vector.broadcast %cst_79 : f32 to vector<4x1xf32>
    %285 = tpu.concatenate %284, %283, %284 in 1 : vector<4x1xf32>, vector<4x32xf32>, vector<4x1xf32> -> vector<4x34xf32>
    %286 = vector.extract_strided_slice %282 {offsets = [0, 0], sizes = [4, 32], strides = [1, 1]} : vector<4x34xf32> to vector<4x32xf32>
    %287 = vector.extract_strided_slice %285 {offsets = [0, 0], sizes = [4, 32], strides = [1, 1]} : vector<4x34xf32> to vector<4x32xf32>
    %288 = tpu.concatenate %286, %287 in 1 : vector<4x32xf32>, vector<4x32xf32> -> vector<4x64xf32>
    %289 = vector.extract_strided_slice %282 {offsets = [0, 1], sizes = [4, 32], strides = [1, 1]} : vector<4x34xf32> to vector<4x32xf32>
    %290 = vector.extract_strided_slice %285 {offsets = [0, 1], sizes = [4, 32], strides = [1, 1]} : vector<4x34xf32> to vector<4x32xf32>
    %291 = tpu.concatenate %289, %290 in 1 : vector<4x32xf32>, vector<4x32xf32> -> vector<4x64xf32>
    %292 = vector.extract_strided_slice %282 {offsets = [0, 2], sizes = [4, 32], strides = [1, 1]} : vector<4x34xf32> to vector<4x32xf32>
    %293 = vector.extract_strided_slice %285 {offsets = [0, 2], sizes = [4, 32], strides = [1, 1]} : vector<4x34xf32> to vector<4x32xf32>
    %294 = tpu.concatenate %292, %293 in 1 : vector<4x32xf32>, vector<4x32xf32> -> vector<4x64xf32>
    %295 = tpu.concatenate %288, %291, %294 in 0 : vector<4x64xf32>, vector<4x64xf32>, vector<4x64xf32> -> vector<12x64xf32>
    %cst_80 = arith.constant dense<0.000000e+00> : vector<4x64xf32>
    %296 = tpu.matmul %277, %295, %cst_80 {dimension_numbers = #tpu.dot_dimension_numbers<[1], [0], [0], [1], [0, 0, 1, 1], [], []>} : vector<4x12xf32>, vector<12x64xf32>, vector<4x64xf32> -> vector<4x64xf32>
    %297 = vector.broadcast %278 : vector<4x1xf32> to vector<4x64xf32>
    %298 = arith.mulf %296, %297 : vector<4x64xf32>
    %299 = vector.broadcast %279 : vector<4x1xf32> to vector<4x64xf32>
    %300 = arith.addf %298, %299 : vector<4x64xf32>
    %cst_81 = arith.constant 0.000000e+00 : f32
    %301 = vector.broadcast %cst_81 : f32 to vector<4x64xf32>
    %302 = arith.cmpf ogt, %300, %301 : vector<4x64xf32>
    %303 = math.exp %300 : vector<4x64xf32>
    %cst_82 = arith.constant 1.000000e+00 : f32
    %304 = vector.broadcast %cst_82 : f32 to vector<4x64xf32>
    %305 = arith.subf %303, %304 : vector<4x64xf32>
    %306 = arith.select %302, %300, %305 : vector<4x64xi1>, vector<4x64xf32>
    %307 = vector.extract_strided_slice %306 {offsets = [0, 1], sizes = [4, 63], strides = [1, 1]} : vector<4x64xf32> to vector<4x63xf32>
    %308 = vector.extract_strided_slice %306 {offsets = [0, 63], sizes = [4, 1], strides = [1, 1]} : vector<4x64xf32> to vector<4x1xf32>
    %309 = tpu.concatenate %307, %308 in 1 : vector<4x63xf32>, vector<4x1xf32> -> vector<4x64xf32>
    %310 = arith.maximumf %306, %309 : vector<4x64xf32>
    %cst_83 = arith.constant dense<0.000000e+00> : vector<4x32xf32>
    %311 = tpu.matmul %310, %268, %cst_83 {dimension_numbers = #tpu.dot_dimension_numbers<[1], [0], [0], [1], [0, 0, 1, 1], [], []>} : vector<4x64xf32>, vector<64x32xf32>, vector<4x32xf32> -> vector<4x32xf32>
    %312 = vector.extract_strided_slice %311 {offsets = [0, 0], sizes = [4, 16], strides = [1, 1]} : vector<4x32xf32> to vector<4x16xf32>
    %313 = vector.extract_strided_slice %311 {offsets = [0, 16], sizes = [4, 16], strides = [1, 1]} : vector<4x32xf32> to vector<4x16xf32>
    %314 = tpu.concatenate %312, %313 in 0 : vector<4x16xf32>, vector<4x16xf32> -> vector<8x16xf32>
    %c280 = arith.constant 280 : index
    %c0_84 = arith.constant 0 : index
    %315 = vector.load %arg2[%c280, %c0_84] : memref<1952x144xf32, #tpu.memory_space<vmem>>, vector<2x32xf32>
    %316 = arith.mulf %311, %311 : vector<4x32xf32>
    %cst_85 = arith.constant dense<0.000000e+00> : vector<2x4xf32>
    %317 = tpu.matmul %315, %316, %cst_85 {dimension_numbers = #tpu.dot_dimension_numbers<[1], [1], [0], [0], [0, 0, 1, 0], [], []>} : vector<2x32xf32>, vector<4x32xf32>, vector<2x4xf32> -> vector<2x4xf32>
    %318 = math.log %317 : vector<2x4xf32>
    %c712 = arith.constant 712 : index
    %c0_86 = arith.constant 0 : index
    %319 = vector.load %arg2[%c712, %c0_86] : memref<1952x144xf32, #tpu.memory_space<vmem>>, vector<16x96xf32>
    %cst_87 = arith.constant dense<0.000000e+00> : vector<8x96xf32>
    %320 = tpu.matmul %276, %319, %cst_87 {dimension_numbers = #tpu.dot_dimension_numbers<[1], [0], [0], [1], [0, 0, 1, 1], [], []>} : vector<8x16xf32>, vector<16x96xf32>, vector<8x96xf32> -> vector<8x96xf32>
    %321 = vector.extract_strided_slice %320 {offsets = [0, 0], sizes = [8, 32], strides = [1, 1]} : vector<8x96xf32> to vector<8x32xf32>
    %322 = vector.extract_strided_slice %320 {offsets = [0, 32], sizes = [8, 32], strides = [1, 1]} : vector<8x96xf32> to vector<8x32xf32>
    %323 = vector.extract_strided_slice %320 {offsets = [0, 64], sizes = [8, 32], strides = [1, 1]} : vector<8x96xf32> to vector<8x32xf32>
    %c256 = arith.constant 256 : index
    %c0_88 = arith.constant 0 : index
    %324 = vector.load %arg2[%c256, %c0_88] : memref<1952x144xf32, #tpu.memory_space<vmem>>, vector<8x8xf32>
    %c728 = arith.constant 728 : index
    %c0_89 = arith.constant 0 : index
    %325 = vector.load %arg2[%c728, %c0_89] : memref<1952x144xf32, #tpu.memory_space<vmem>>, vector<32x16xf32>
    %c760 = arith.constant 760 : index
    %c0_90 = arith.constant 0 : index
    %326 = vector.load %arg2[%c760, %c0_90] : memref<1952x144xf32, #tpu.memory_space<vmem>>, vector<1x16xf32>
    %327 = vector.extract_strided_slice %321 {offsets = [0, 0], sizes = [8, 8], strides = [1, 1]} : vector<8x32xf32> to vector<8x8xf32>
    %328 = vector.extract_strided_slice %322 {offsets = [0, 0], sizes = [8, 8], strides = [1, 1]} : vector<8x32xf32> to vector<8x8xf32>
    %cst_91 = arith.constant dense<0.000000e+00> : vector<8x8xf32>
    %329 = tpu.matmul %327, %328, %cst_91 {dimension_numbers = #tpu.dot_dimension_numbers<[1], [1], [0], [0], [0, 0, 1, 0], [], []>} : vector<8x8xf32>, vector<8x8xf32>, vector<8x8xf32> -> vector<8x8xf32>
    %330 = arith.addf %329, %324 : vector<8x8xf32>
    %cst_92 = arith.constant dense<0xFF800000> : vector<8xf32>
    %331 = vector.multi_reduction <maximumf>, %330, %cst_92 [1] : vector<8x8xf32> to vector<8xf32>
    %332 = vector.shape_cast %331 : vector<8xf32> to vector<8x1xf32>
    %333 = vector.broadcast %332 : vector<8x1xf32> to vector<8x8xf32>
    %334 = arith.subf %330, %333 : vector<8x8xf32>
    %335 = math.exp %334 : vector<8x8xf32>
    %cst_93 = arith.constant dense<0.000000e+00> : vector<8xf32>
    %336 = vector.multi_reduction <add>, %335, %cst_93 [1] : vector<8x8xf32> to vector<8xf32>
    %337 = vector.shape_cast %336 : vector<8xf32> to vector<8x1xf32>
    %338 = tpu.reciprocal %337 {approx = true} : vector<8x1xf32> -> vector<8x1xf32>
    %339 = vector.broadcast %338 : vector<8x1xf32> to vector<8x8xf32>
    %340 = arith.mulf %335, %339 : vector<8x8xf32>
    %341 = vector.extract_strided_slice %323 {offsets = [0, 0], sizes = [8, 8], strides = [1, 1]} : vector<8x32xf32> to vector<8x8xf32>
    %cst_94 = arith.constant dense<0.000000e+00> : vector<8x8xf32>
    %342 = tpu.matmul %340, %341, %cst_94 {dimension_numbers = #tpu.dot_dimension_numbers<[1], [0], [0], [1], [0, 0, 1, 1], [], []>} : vector<8x8xf32>, vector<8x8xf32>, vector<8x8xf32> -> vector<8x8xf32>
    %343 = vector.extract_strided_slice %321 {offsets = [0, 8], sizes = [8, 8], strides = [1, 1]} : vector<8x32xf32> to vector<8x8xf32>
    %344 = vector.extract_strided_slice %322 {offsets = [0, 8], sizes = [8, 8], strides = [1, 1]} : vector<8x32xf32> to vector<8x8xf32>
    %cst_95 = arith.constant dense<0.000000e+00> : vector<8x8xf32>
    %345 = tpu.matmul %343, %344, %cst_95 {dimension_numbers = #tpu.dot_dimension_numbers<[1], [1], [0], [0], [0, 0, 1, 0], [], []>} : vector<8x8xf32>, vector<8x8xf32>, vector<8x8xf32> -> vector<8x8xf32>
    %346 = arith.addf %345, %324 : vector<8x8xf32>
    %cst_96 = arith.constant dense<0xFF800000> : vector<8xf32>
    %347 = vector.multi_reduction <maximumf>, %346, %cst_96 [1] : vector<8x8xf32> to vector<8xf32>
    %348 = vector.shape_cast %347 : vector<8xf32> to vector<8x1xf32>
    %349 = vector.broadcast %348 : vector<8x1xf32> to vector<8x8xf32>
    %350 = arith.subf %346, %349 : vector<8x8xf32>
    %351 = math.exp %350 : vector<8x8xf32>
    %cst_97 = arith.constant dense<0.000000e+00> : vector<8xf32>
    %352 = vector.multi_reduction <add>, %351, %cst_97 [1] : vector<8x8xf32> to vector<8xf32>
    %353 = vector.shape_cast %352 : vector<8xf32> to vector<8x1xf32>
    %354 = tpu.reciprocal %353 {approx = true} : vector<8x1xf32> -> vector<8x1xf32>
    %355 = vector.broadcast %354 : vector<8x1xf32> to vector<8x8xf32>
    %356 = arith.mulf %351, %355 : vector<8x8xf32>
    %357 = vector.extract_strided_slice %323 {offsets = [0, 8], sizes = [8, 8], strides = [1, 1]} : vector<8x32xf32> to vector<8x8xf32>
    %cst_98 = arith.constant dense<0.000000e+00> : vector<8x8xf32>
    %358 = tpu.matmul %356, %357, %cst_98 {dimension_numbers = #tpu.dot_dimension_numbers<[1], [0], [0], [1], [0, 0, 1, 1], [], []>} : vector<8x8xf32>, vector<8x8xf32>, vector<8x8xf32> -> vector<8x8xf32>
    %359 = vector.extract_strided_slice %321 {offsets = [0, 16], sizes = [8, 8], strides = [1, 1]} : vector<8x32xf32> to vector<8x8xf32>
    %360 = vector.extract_strided_slice %322 {offsets = [0, 16], sizes = [8, 8], strides = [1, 1]} : vector<8x32xf32> to vector<8x8xf32>
    %cst_99 = arith.constant dense<0.000000e+00> : vector<8x8xf32>
    %361 = tpu.matmul %359, %360, %cst_99 {dimension_numbers = #tpu.dot_dimension_numbers<[1], [1], [0], [0], [0, 0, 1, 0], [], []>} : vector<8x8xf32>, vector<8x8xf32>, vector<8x8xf32> -> vector<8x8xf32>
    %362 = arith.addf %361, %324 : vector<8x8xf32>
    %cst_100 = arith.constant dense<0xFF800000> : vector<8xf32>
    %363 = vector.multi_reduction <maximumf>, %362, %cst_100 [1] : vector<8x8xf32> to vector<8xf32>
    %364 = vector.shape_cast %363 : vector<8xf32> to vector<8x1xf32>
    %365 = vector.broadcast %364 : vector<8x1xf32> to vector<8x8xf32>
    %366 = arith.subf %362, %365 : vector<8x8xf32>
    %367 = math.exp %366 : vector<8x8xf32>
    %cst_101 = arith.constant dense<0.000000e+00> : vector<8xf32>
    %368 = vector.multi_reduction <add>, %367, %cst_101 [1] : vector<8x8xf32> to vector<8xf32>
    %369 = vector.shape_cast %368 : vector<8xf32> to vector<8x1xf32>
    %370 = tpu.reciprocal %369 {approx = true} : vector<8x1xf32> -> vector<8x1xf32>
    %371 = vector.broadcast %370 : vector<8x1xf32> to vector<8x8xf32>
    %372 = arith.mulf %367, %371 : vector<8x8xf32>
    %373 = vector.extract_strided_slice %323 {offsets = [0, 16], sizes = [8, 8], strides = [1, 1]} : vector<8x32xf32> to vector<8x8xf32>
    %cst_102 = arith.constant dense<0.000000e+00> : vector<8x8xf32>
    %374 = tpu.matmul %372, %373, %cst_102 {dimension_numbers = #tpu.dot_dimension_numbers<[1], [0], [0], [1], [0, 0, 1, 1], [], []>} : vector<8x8xf32>, vector<8x8xf32>, vector<8x8xf32> -> vector<8x8xf32>
    %375 = vector.extract_strided_slice %321 {offsets = [0, 24], sizes = [8, 8], strides = [1, 1]} : vector<8x32xf32> to vector<8x8xf32>
    %376 = vector.extract_strided_slice %322 {offsets = [0, 24], sizes = [8, 8], strides = [1, 1]} : vector<8x32xf32> to vector<8x8xf32>
    %cst_103 = arith.constant dense<0.000000e+00> : vector<8x8xf32>
    %377 = tpu.matmul %375, %376, %cst_103 {dimension_numbers = #tpu.dot_dimension_numbers<[1], [1], [0], [0], [0, 0, 1, 0], [], []>} : vector<8x8xf32>, vector<8x8xf32>, vector<8x8xf32> -> vector<8x8xf32>
    %378 = arith.addf %377, %324 : vector<8x8xf32>
    %cst_104 = arith.constant dense<0xFF800000> : vector<8xf32>
    %379 = vector.multi_reduction <maximumf>, %378, %cst_104 [1] : vector<8x8xf32> to vector<8xf32>
    %380 = vector.shape_cast %379 : vector<8xf32> to vector<8x1xf32>
    %381 = vector.broadcast %380 : vector<8x1xf32> to vector<8x8xf32>
    %382 = arith.subf %378, %381 : vector<8x8xf32>
    %383 = math.exp %382 : vector<8x8xf32>
    %cst_105 = arith.constant dense<0.000000e+00> : vector<8xf32>
    %384 = vector.multi_reduction <add>, %383, %cst_105 [1] : vector<8x8xf32> to vector<8xf32>
    %385 = vector.shape_cast %384 : vector<8xf32> to vector<8x1xf32>
    %386 = tpu.reciprocal %385 {approx = true} : vector<8x1xf32> -> vector<8x1xf32>
    %387 = vector.broadcast %386 : vector<8x1xf32> to vector<8x8xf32>
    %388 = arith.mulf %383, %387 : vector<8x8xf32>
    %389 = vector.extract_strided_slice %323 {offsets = [0, 24], sizes = [8, 8], strides = [1, 1]} : vector<8x32xf32> to vector<8x8xf32>
    %cst_106 = arith.constant dense<0.000000e+00> : vector<8x8xf32>
    %390 = tpu.matmul %388, %389, %cst_106 {dimension_numbers = #tpu.dot_dimension_numbers<[1], [0], [0], [1], [0, 0, 1, 1], [], []>} : vector<8x8xf32>, vector<8x8xf32>, vector<8x8xf32> -> vector<8x8xf32>
    %391 = tpu.concatenate %342, %358, %374, %390 in 1 : vector<8x8xf32>, vector<8x8xf32>, vector<8x8xf32>, vector<8x8xf32> -> vector<8x32xf32>
    %cst_107 = arith.constant dense<0.000000e+00> : vector<8x16xf32>
    %392 = tpu.matmul %391, %325, %cst_107 {dimension_numbers = #tpu.dot_dimension_numbers<[1], [0], [0], [1], [0, 0, 1, 1], [], []>} : vector<8x32xf32>, vector<32x16xf32>, vector<8x16xf32> -> vector<8x16xf32>
    %393 = vector.broadcast %326 : vector<1x16xf32> to vector<8x16xf32>
    %394 = arith.addf %392, %393 : vector<8x16xf32>
    %395 = arith.addf %394, %276 : vector<8x16xf32>
    %c768 = arith.constant 768 : index
    %c0_108 = arith.constant 0 : index
    %396 = vector.load %arg2[%c768, %c0_108] : memref<1952x144xf32, #tpu.memory_space<vmem>>, vector<1x16xf32>
    %c776 = arith.constant 776 : index
    %c0_109 = arith.constant 0 : index
    %397 = vector.load %arg2[%c776, %c0_109] : memref<1952x144xf32, #tpu.memory_space<vmem>>, vector<1x16xf32>
    %c784 = arith.constant 784 : index
    %c0_110 = arith.constant 0 : index
    %398 = vector.load %arg2[%c784, %c0_110] : memref<1952x144xf32, #tpu.memory_space<vmem>>, vector<16x16xf32>
    %c800 = arith.constant 800 : index
    %c0_111 = arith.constant 0 : index
    %399 = vector.load %arg2[%c800, %c0_111] : memref<1952x144xf32, #tpu.memory_space<vmem>>, vector<1x16xf32>
    %c808 = arith.constant 808 : index
    %c0_112 = arith.constant 0 : index
    %400 = vector.load %arg2[%c808, %c0_112] : memref<1952x144xf32, #tpu.memory_space<vmem>>, vector<16x16xf32>
    %c824 = arith.constant 824 : index
    %c0_113 = arith.constant 0 : index
    %401 = vector.load %arg2[%c824, %c0_113] : memref<1952x144xf32, #tpu.memory_space<vmem>>, vector<1x16xf32>
    %cst_114 = arith.constant dense<0.000000e+00> : vector<8xf32>
    %402 = vector.multi_reduction <add>, %395, %cst_114 [1] : vector<8x16xf32> to vector<8xf32>
    %403 = vector.shape_cast %402 : vector<8xf32> to vector<8x1xf32>
    %cst_115 = arith.constant 1.600000e+01 : f32
    %404 = vector.broadcast %cst_115 : f32 to vector<8x1xf32>
    %405 = arith.divf %403, %404 : vector<8x1xf32>
    %406 = vector.broadcast %405 : vector<8x1xf32> to vector<8x16xf32>
    %407 = arith.subf %395, %406 : vector<8x16xf32>
    %408 = arith.mulf %407, %407 : vector<8x16xf32>
    %cst_116 = arith.constant dense<0.000000e+00> : vector<8xf32>
    %409 = vector.multi_reduction <add>, %408, %cst_116 [1] : vector<8x16xf32> to vector<8xf32>
    %410 = vector.shape_cast %409 : vector<8xf32> to vector<8x1xf32>
    %cst_117 = arith.constant 1.600000e+01 : f32
    %411 = vector.broadcast %cst_117 : f32 to vector<8x1xf32>
    %412 = arith.divf %410, %411 : vector<8x1xf32>
    %413 = vector.broadcast %405 : vector<8x1xf32> to vector<8x16xf32>
    %414 = arith.subf %395, %413 : vector<8x16xf32>
    %cst_118 = arith.constant 9.99999974E-6 : f32
    %415 = vector.broadcast %cst_118 : f32 to vector<8x1xf32>
    %416 = arith.addf %412, %415 : vector<8x1xf32>
    %417 = math.rsqrt %416 : vector<8x1xf32>
    %418 = vector.broadcast %417 : vector<8x1xf32> to vector<8x16xf32>
    %419 = arith.mulf %414, %418 : vector<8x16xf32>
    %420 = vector.broadcast %396 : vector<1x16xf32> to vector<8x16xf32>
    %421 = arith.mulf %419, %420 : vector<8x16xf32>
    %422 = vector.broadcast %397 : vector<1x16xf32> to vector<8x16xf32>
    %423 = arith.addf %421, %422 : vector<8x16xf32>
    %cst_119 = arith.constant dense<0.000000e+00> : vector<8x16xf32>
    %424 = tpu.matmul %423, %398, %cst_119 {dimension_numbers = #tpu.dot_dimension_numbers<[1], [0], [0], [1], [0, 0, 1, 1], [], []>} : vector<8x16xf32>, vector<16x16xf32>, vector<8x16xf32> -> vector<8x16xf32>
    %425 = vector.broadcast %399 : vector<1x16xf32> to vector<8x16xf32>
    %426 = arith.addf %424, %425 : vector<8x16xf32>
    %cst_120 = arith.constant 5.000000e-01 : f32
    %427 = vector.broadcast %cst_120 : f32 to vector<8x16xf32>
    %428 = arith.mulf %427, %426 : vector<8x16xf32>
    %cst_121 = arith.constant 4.471500e-02 : f32
    %429 = vector.broadcast %cst_121 : f32 to vector<8x16xf32>
    %430 = arith.mulf %429, %426 : vector<8x16xf32>
    %431 = arith.mulf %430, %426 : vector<8x16xf32>
    %432 = arith.mulf %431, %426 : vector<8x16xf32>
    %433 = arith.addf %426, %432 : vector<8x16xf32>
    %cst_122 = arith.constant 0.797884583 : f32
    %434 = vector.broadcast %cst_122 : f32 to vector<8x16xf32>
    %435 = arith.mulf %434, %433 : vector<8x16xf32>
    %436 = math.tanh %435 : vector<8x16xf32>
    %cst_123 = arith.constant 1.000000e+00 : f32
    %437 = vector.broadcast %cst_123 : f32 to vector<8x16xf32>
    %438 = arith.addf %437, %436 : vector<8x16xf32>
    %439 = arith.mulf %428, %438 : vector<8x16xf32>
    %cst_124 = arith.constant dense<0.000000e+00> : vector<8x16xf32>
    %440 = tpu.matmul %439, %400, %cst_124 {dimension_numbers = #tpu.dot_dimension_numbers<[1], [0], [0], [1], [0, 0, 1, 1], [], []>} : vector<8x16xf32>, vector<16x16xf32>, vector<8x16xf32> -> vector<8x16xf32>
    %441 = vector.broadcast %401 : vector<1x16xf32> to vector<8x16xf32>
    %442 = arith.addf %440, %441 : vector<8x16xf32>
    %443 = arith.addf %442, %314 : vector<8x16xf32>
    %c856 = arith.constant 856 : index
    %c0_125 = arith.constant 0 : index
    %444 = vector.load %arg2[%c856, %c0_125] : memref<1952x144xf32, #tpu.memory_space<vmem>>, vector<16x32xf32>
    %cst_126 = arith.constant dense<0.000000e+00> : vector<8x32xf32>
    %445 = tpu.matmul %443, %444, %cst_126 {dimension_numbers = #tpu.dot_dimension_numbers<[1], [0], [0], [1], [0, 0, 1, 1], [], []>} : vector<8x16xf32>, vector<16x32xf32>, vector<8x32xf32> -> vector<8x32xf32>
    %c240 = arith.constant 240 : index
    %c0_127 = arith.constant 0 : index
    %446 = vector.load %arg2[%c240, %c0_127] : memref<1952x144xf32, #tpu.memory_space<vmem>>, vector<16x8xf32>
    %c576 = arith.constant 576 : index
    %c0_128 = arith.constant 0 : index
    %447 = vector.load %arg2[%c576, %c0_128] : memref<1952x144xf32, #tpu.memory_space<vmem>>, vector<32x32xf32>
    %c608 = arith.constant 608 : index
    %c0_129 = arith.constant 0 : index
    %448 = vector.load %arg2[%c608, %c0_129] : memref<1952x144xf32, #tpu.memory_space<vmem>>, vector<1x32xf32>
    %449 = vector.extract_strided_slice %267 {offsets = [0, 0], sizes = [16, 8], strides = [1, 1]} : vector<16x32xf32> to vector<16x8xf32>
    %cst_130 = arith.constant 0.353553385 : f32
    %450 = vector.broadcast %cst_130 : f32 to vector<16x8xf32>
    %451 = arith.mulf %449, %450 : vector<16x8xf32>
    %452 = vector.extract_strided_slice %445 {offsets = [0, 0], sizes = [8, 8], strides = [1, 1]} : vector<8x32xf32> to vector<8x8xf32>
    %cst_131 = arith.constant dense<0.000000e+00> : vector<16x8xf32>
    %453 = tpu.matmul %451, %452, %cst_131 {dimension_numbers = #tpu.dot_dimension_numbers<[1], [1], [0], [0], [0, 0, 1, 0], [], []>} : vector<16x8xf32>, vector<8x8xf32>, vector<16x8xf32> -> vector<16x8xf32>
    %454 = arith.addf %453, %446 : vector<16x8xf32>
    %cst_132 = arith.constant dense<0xFF800000> : vector<16xf32>
    %455 = vector.multi_reduction <maximumf>, %454, %cst_132 [1] : vector<16x8xf32> to vector<16xf32>
    %456 = vector.shape_cast %455 : vector<16xf32> to vector<16x1xf32>
    %457 = vector.broadcast %456 : vector<16x1xf32> to vector<16x8xf32>
    %458 = arith.subf %454, %457 : vector<16x8xf32>
    %459 = math.exp %458 : vector<16x8xf32>
    %cst_133 = arith.constant dense<0.000000e+00> : vector<16xf32>
    %460 = vector.multi_reduction <add>, %459, %cst_133 [1] : vector<16x8xf32> to vector<16xf32>
    %461 = vector.shape_cast %460 : vector<16xf32> to vector<16x1xf32>
    %462 = tpu.reciprocal %461 {approx = true} : vector<16x1xf32> -> vector<16x1xf32>
    %463 = vector.broadcast %462 : vector<16x1xf32> to vector<16x8xf32>
    %464 = arith.mulf %459, %463 : vector<16x8xf32>
    %465 = vector.extract_strided_slice %445 {offsets = [0, 0], sizes = [8, 8], strides = [1, 1]} : vector<8x32xf32> to vector<8x8xf32>
    %cst_134 = arith.constant dense<0.000000e+00> : vector<16x8xf32>
    %466 = tpu.matmul %464, %465, %cst_134 {dimension_numbers = #tpu.dot_dimension_numbers<[1], [0], [0], [1], [0, 0, 1, 1], [], []>} : vector<16x8xf32>, vector<8x8xf32>, vector<16x8xf32> -> vector<16x8xf32>
    %467 = vector.extract_strided_slice %267 {offsets = [0, 8], sizes = [16, 8], strides = [1, 1]} : vector<16x32xf32> to vector<16x8xf32>
    %cst_135 = arith.constant 0.353553385 : f32
    %468 = vector.broadcast %cst_135 : f32 to vector<16x8xf32>
    %469 = arith.mulf %467, %468 : vector<16x8xf32>
    %470 = vector.extract_strided_slice %445 {offsets = [0, 8], sizes = [8, 8], strides = [1, 1]} : vector<8x32xf32> to vector<8x8xf32>
    %cst_136 = arith.constant dense<0.000000e+00> : vector<16x8xf32>
    %471 = tpu.matmul %469, %470, %cst_136 {dimension_numbers = #tpu.dot_dimension_numbers<[1], [1], [0], [0], [0, 0, 1, 0], [], []>} : vector<16x8xf32>, vector<8x8xf32>, vector<16x8xf32> -> vector<16x8xf32>
    %472 = arith.addf %471, %446 : vector<16x8xf32>
    %cst_137 = arith.constant dense<0xFF800000> : vector<16xf32>
    %473 = vector.multi_reduction <maximumf>, %472, %cst_137 [1] : vector<16x8xf32> to vector<16xf32>
    %474 = vector.shape_cast %473 : vector<16xf32> to vector<16x1xf32>
    %475 = vector.broadcast %474 : vector<16x1xf32> to vector<16x8xf32>
    %476 = arith.subf %472, %475 : vector<16x8xf32>
    %477 = math.exp %476 : vector<16x8xf32>
    %cst_138 = arith.constant dense<0.000000e+00> : vector<16xf32>
    %478 = vector.multi_reduction <add>, %477, %cst_138 [1] : vector<16x8xf32> to vector<16xf32>
    %479 = vector.shape_cast %478 : vector<16xf32> to vector<16x1xf32>
    %480 = tpu.reciprocal %479 {approx = true} : vector<16x1xf32> -> vector<16x1xf32>
    %481 = vector.broadcast %480 : vector<16x1xf32> to vector<16x8xf32>
    %482 = arith.mulf %477, %481 : vector<16x8xf32>
    %483 = vector.extract_strided_slice %445 {offsets = [0, 8], sizes = [8, 8], strides = [1, 1]} : vector<8x32xf32> to vector<8x8xf32>
    %cst_139 = arith.constant dense<0.000000e+00> : vector<16x8xf32>
    %484 = tpu.matmul %482, %483, %cst_139 {dimension_numbers = #tpu.dot_dimension_numbers<[1], [0], [0], [1], [0, 0, 1, 1], [], []>} : vector<16x8xf32>, vector<8x8xf32>, vector<16x8xf32> -> vector<16x8xf32>
    %485 = vector.extract_strided_slice %267 {offsets = [0, 16], sizes = [16, 8], strides = [1, 1]} : vector<16x32xf32> to vector<16x8xf32>
    %cst_140 = arith.constant 0.353553385 : f32
    %486 = vector.broadcast %cst_140 : f32 to vector<16x8xf32>
    %487 = arith.mulf %485, %486 : vector<16x8xf32>
    %488 = vector.extract_strided_slice %445 {offsets = [0, 16], sizes = [8, 8], strides = [1, 1]} : vector<8x32xf32> to vector<8x8xf32>
    %cst_141 = arith.constant dense<0.000000e+00> : vector<16x8xf32>
    %489 = tpu.matmul %487, %488, %cst_141 {dimension_numbers = #tpu.dot_dimension_numbers<[1], [1], [0], [0], [0, 0, 1, 0], [], []>} : vector<16x8xf32>, vector<8x8xf32>, vector<16x8xf32> -> vector<16x8xf32>
    %490 = arith.addf %489, %446 : vector<16x8xf32>
    %cst_142 = arith.constant dense<0xFF800000> : vector<16xf32>
    %491 = vector.multi_reduction <maximumf>, %490, %cst_142 [1] : vector<16x8xf32> to vector<16xf32>
    %492 = vector.shape_cast %491 : vector<16xf32> to vector<16x1xf32>
    %493 = vector.broadcast %492 : vector<16x1xf32> to vector<16x8xf32>
    %494 = arith.subf %490, %493 : vector<16x8xf32>
    %495 = math.exp %494 : vector<16x8xf32>
    %cst_143 = arith.constant dense<0.000000e+00> : vector<16xf32>
    %496 = vector.multi_reduction <add>, %495, %cst_143 [1] : vector<16x8xf32> to vector<16xf32>
    %497 = vector.shape_cast %496 : vector<16xf32> to vector<16x1xf32>
    %498 = tpu.reciprocal %497 {approx = true} : vector<16x1xf32> -> vector<16x1xf32>
    %499 = vector.broadcast %498 : vector<16x1xf32> to vector<16x8xf32>
    %500 = arith.mulf %495, %499 : vector<16x8xf32>
    %501 = vector.extract_strided_slice %445 {offsets = [0, 16], sizes = [8, 8], strides = [1, 1]} : vector<8x32xf32> to vector<8x8xf32>
    %cst_144 = arith.constant dense<0.000000e+00> : vector<16x8xf32>
    %502 = tpu.matmul %500, %501, %cst_144 {dimension_numbers = #tpu.dot_dimension_numbers<[1], [0], [0], [1], [0, 0, 1, 1], [], []>} : vector<16x8xf32>, vector<8x8xf32>, vector<16x8xf32> -> vector<16x8xf32>
    %503 = vector.extract_strided_slice %267 {offsets = [0, 24], sizes = [16, 8], strides = [1, 1]} : vector<16x32xf32> to vector<16x8xf32>
    %cst_145 = arith.constant 0.353553385 : f32
    %504 = vector.broadcast %cst_145 : f32 to vector<16x8xf32>
    %505 = arith.mulf %503, %504 : vector<16x8xf32>
    %506 = vector.extract_strided_slice %445 {offsets = [0, 24], sizes = [8, 8], strides = [1, 1]} : vector<8x32xf32> to vector<8x8xf32>
    %cst_146 = arith.constant dense<0.000000e+00> : vector<16x8xf32>
    %507 = tpu.matmul %505, %506, %cst_146 {dimension_numbers = #tpu.dot_dimension_numbers<[1], [1], [0], [0], [0, 0, 1, 0], [], []>} : vector<16x8xf32>, vector<8x8xf32>, vector<16x8xf32> -> vector<16x8xf32>
    %508 = arith.addf %507, %446 : vector<16x8xf32>
    %cst_147 = arith.constant dense<0xFF800000> : vector<16xf32>
    %509 = vector.multi_reduction <maximumf>, %508, %cst_147 [1] : vector<16x8xf32> to vector<16xf32>
    %510 = vector.shape_cast %509 : vector<16xf32> to vector<16x1xf32>
    %511 = vector.broadcast %510 : vector<16x1xf32> to vector<16x8xf32>
    %512 = arith.subf %508, %511 : vector<16x8xf32>
    %513 = math.exp %512 : vector<16x8xf32>
    %cst_148 = arith.constant dense<0.000000e+00> : vector<16xf32>
    %514 = vector.multi_reduction <add>, %513, %cst_148 [1] : vector<16x8xf32> to vector<16xf32>
    %515 = vector.shape_cast %514 : vector<16xf32> to vector<16x1xf32>
    %516 = tpu.reciprocal %515 {approx = true} : vector<16x1xf32> -> vector<16x1xf32>
    %517 = vector.broadcast %516 : vector<16x1xf32> to vector<16x8xf32>
    %518 = arith.mulf %513, %517 : vector<16x8xf32>
    %519 = vector.extract_strided_slice %445 {offsets = [0, 24], sizes = [8, 8], strides = [1, 1]} : vector<8x32xf32> to vector<8x8xf32>
    %cst_149 = arith.constant dense<0.000000e+00> : vector<16x8xf32>
    %520 = tpu.matmul %518, %519, %cst_149 {dimension_numbers = #tpu.dot_dimension_numbers<[1], [0], [0], [1], [0, 0, 1, 1], [], []>} : vector<16x8xf32>, vector<8x8xf32>, vector<16x8xf32> -> vector<16x8xf32>
    %521 = tpu.concatenate %466, %484, %502, %520 in 1 : vector<16x8xf32>, vector<16x8xf32>, vector<16x8xf32>, vector<16x8xf32> -> vector<16x32xf32>
    %cst_150 = arith.constant dense<0.000000e+00> : vector<16x32xf32>
    %522 = tpu.matmul %521, %447, %cst_150 {dimension_numbers = #tpu.dot_dimension_numbers<[1], [0], [0], [1], [0, 0, 1, 1], [], []>} : vector<16x32xf32>, vector<32x32xf32>, vector<16x32xf32> -> vector<16x32xf32>
    %523 = vector.broadcast %448 : vector<1x32xf32> to vector<16x32xf32>
    %524 = arith.addf %522, %523 : vector<16x32xf32>
    %525 = arith.addf %524, %267 : vector<16x32xf32>
    %c616 = arith.constant 616 : index
    %c0_151 = arith.constant 0 : index
    %526 = vector.load %arg2[%c616, %c0_151] : memref<1952x144xf32, #tpu.memory_space<vmem>>, vector<1x32xf32>
    %c624 = arith.constant 624 : index
    %c0_152 = arith.constant 0 : index
    %527 = vector.load %arg2[%c624, %c0_152] : memref<1952x144xf32, #tpu.memory_space<vmem>>, vector<1x32xf32>
    %c632 = arith.constant 632 : index
    %c0_153 = arith.constant 0 : index
    %528 = vector.load %arg2[%c632, %c0_153] : memref<1952x144xf32, #tpu.memory_space<vmem>>, vector<32x32xf32>
    %c664 = arith.constant 664 : index
    %c0_154 = arith.constant 0 : index
    %529 = vector.load %arg2[%c664, %c0_154] : memref<1952x144xf32, #tpu.memory_space<vmem>>, vector<1x32xf32>
    %c672 = arith.constant 672 : index
    %c0_155 = arith.constant 0 : index
    %530 = vector.load %arg2[%c672, %c0_155] : memref<1952x144xf32, #tpu.memory_space<vmem>>, vector<32x32xf32>
    %c704 = arith.constant 704 : index
    %c0_156 = arith.constant 0 : index
    %531 = vector.load %arg2[%c704, %c0_156] : memref<1952x144xf32, #tpu.memory_space<vmem>>, vector<1x32xf32>
    %cst_157 = arith.constant dense<0.000000e+00> : vector<16xf32>
    %532 = vector.multi_reduction <add>, %525, %cst_157 [1] : vector<16x32xf32> to vector<16xf32>
    %533 = vector.shape_cast %532 : vector<16xf32> to vector<16x1xf32>
    %cst_158 = arith.constant 3.200000e+01 : f32
    %534 = vector.broadcast %cst_158 : f32 to vector<16x1xf32>
    %535 = arith.divf %533, %534 : vector<16x1xf32>
    %536 = vector.broadcast %535 : vector<16x1xf32> to vector<16x32xf32>
    %537 = arith.subf %525, %536 : vector<16x32xf32>
    %538 = arith.mulf %537, %537 : vector<16x32xf32>
    %cst_159 = arith.constant dense<0.000000e+00> : vector<16xf32>
    %539 = vector.multi_reduction <add>, %538, %cst_159 [1] : vector<16x32xf32> to vector<16xf32>
    %540 = vector.shape_cast %539 : vector<16xf32> to vector<16x1xf32>
    %cst_160 = arith.constant 3.200000e+01 : f32
    %541 = vector.broadcast %cst_160 : f32 to vector<16x1xf32>
    %542 = arith.divf %540, %541 : vector<16x1xf32>
    %543 = vector.broadcast %535 : vector<16x1xf32> to vector<16x32xf32>
    %544 = arith.subf %525, %543 : vector<16x32xf32>
    %cst_161 = arith.constant 9.99999974E-6 : f32
    %545 = vector.broadcast %cst_161 : f32 to vector<16x1xf32>
    %546 = arith.addf %542, %545 : vector<16x1xf32>
    %547 = math.rsqrt %546 : vector<16x1xf32>
    %548 = vector.broadcast %547 : vector<16x1xf32> to vector<16x32xf32>
    %549 = arith.mulf %544, %548 : vector<16x32xf32>
    %550 = vector.broadcast %526 : vector<1x32xf32> to vector<16x32xf32>
    %551 = arith.mulf %549, %550 : vector<16x32xf32>
    %552 = vector.broadcast %527 : vector<1x32xf32> to vector<16x32xf32>
    %553 = arith.addf %551, %552 : vector<16x32xf32>
    %cst_162 = arith.constant dense<0.000000e+00> : vector<16x32xf32>
    %554 = tpu.matmul %553, %528, %cst_162 {dimension_numbers = #tpu.dot_dimension_numbers<[1], [0], [0], [1], [0, 0, 1, 1], [], []>} : vector<16x32xf32>, vector<32x32xf32>, vector<16x32xf32> -> vector<16x32xf32>
    %555 = vector.broadcast %529 : vector<1x32xf32> to vector<16x32xf32>
    %556 = arith.addf %554, %555 : vector<16x32xf32>
    %cst_163 = arith.constant 5.000000e-01 : f32
    %557 = vector.broadcast %cst_163 : f32 to vector<16x32xf32>
    %558 = arith.mulf %557, %556 : vector<16x32xf32>
    %cst_164 = arith.constant 4.471500e-02 : f32
    %559 = vector.broadcast %cst_164 : f32 to vector<16x32xf32>
    %560 = arith.mulf %559, %556 : vector<16x32xf32>
    %561 = arith.mulf %560, %556 : vector<16x32xf32>
    %562 = arith.mulf %561, %556 : vector<16x32xf32>
    %563 = arith.addf %556, %562 : vector<16x32xf32>
    %cst_165 = arith.constant 0.797884583 : f32
    %564 = vector.broadcast %cst_165 : f32 to vector<16x32xf32>
    %565 = arith.mulf %564, %563 : vector<16x32xf32>
    %566 = math.tanh %565 : vector<16x32xf32>
    %cst_166 = arith.constant 1.000000e+00 : f32
    %567 = vector.broadcast %cst_166 : f32 to vector<16x32xf32>
    %568 = arith.addf %567, %566 : vector<16x32xf32>
    %569 = arith.mulf %558, %568 : vector<16x32xf32>
    %cst_167 = arith.constant dense<0.000000e+00> : vector<16x32xf32>
    %570 = tpu.matmul %569, %530, %cst_167 {dimension_numbers = #tpu.dot_dimension_numbers<[1], [0], [0], [1], [0, 0, 1, 1], [], []>} : vector<16x32xf32>, vector<32x32xf32>, vector<16x32xf32> -> vector<16x32xf32>
    %571 = vector.broadcast %531 : vector<1x32xf32> to vector<16x32xf32>
    %572 = arith.addf %570, %571 : vector<16x32xf32>
    %c264 = arith.constant 264 : index
    %c0_168 = arith.constant 0 : index
    %573 = vector.load %arg2[%c264, %c0_168] : memref<1952x144xf32, #tpu.memory_space<vmem>>, vector<8x16xf32>
    %c872 = arith.constant 872 : index
    %c0_169 = arith.constant 0 : index
    %574 = vector.load %arg2[%c872, %c0_169] : memref<1952x144xf32, #tpu.memory_space<vmem>>, vector<32x32xf32>
    %c904 = arith.constant 904 : index
    %c0_170 = arith.constant 0 : index
    %575 = vector.load %arg2[%c904, %c0_170] : memref<1952x144xf32, #tpu.memory_space<vmem>>, vector<1x32xf32>
    %576 = vector.extract_strided_slice %445 {offsets = [0, 0], sizes = [8, 8], strides = [1, 1]} : vector<8x32xf32> to vector<8x8xf32>
    %cst_171 = arith.constant 0.353553385 : f32
    %577 = vector.broadcast %cst_171 : f32 to vector<8x8xf32>
    %578 = arith.mulf %576, %577 : vector<8x8xf32>
    %579 = vector.extract_strided_slice %267 {offsets = [0, 0], sizes = [16, 8], strides = [1, 1]} : vector<16x32xf32> to vector<16x8xf32>
    %cst_172 = arith.constant dense<0.000000e+00> : vector<8x16xf32>
    %580 = tpu.matmul %578, %579, %cst_172 {dimension_numbers = #tpu.dot_dimension_numbers<[1], [1], [0], [0], [0, 0, 1, 0], [], []>} : vector<8x8xf32>, vector<16x8xf32>, vector<8x16xf32> -> vector<8x16xf32>
    %581 = arith.addf %580, %573 : vector<8x16xf32>
    %cst_173 = arith.constant dense<0xFF800000> : vector<8xf32>
    %582 = vector.multi_reduction <maximumf>, %581, %cst_173 [1] : vector<8x16xf32> to vector<8xf32>
    %583 = vector.shape_cast %582 : vector<8xf32> to vector<8x1xf32>
    %584 = vector.broadcast %583 : vector<8x1xf32> to vector<8x16xf32>
    %585 = arith.subf %581, %584 : vector<8x16xf32>
    %586 = math.exp %585 : vector<8x16xf32>
    %cst_174 = arith.constant dense<0.000000e+00> : vector<8xf32>
    %587 = vector.multi_reduction <add>, %586, %cst_174 [1] : vector<8x16xf32> to vector<8xf32>
    %588 = vector.shape_cast %587 : vector<8xf32> to vector<8x1xf32>
    %589 = tpu.reciprocal %588 {approx = true} : vector<8x1xf32> -> vector<8x1xf32>
    %590 = vector.broadcast %589 : vector<8x1xf32> to vector<8x16xf32>
    %591 = arith.mulf %586, %590 : vector<8x16xf32>
    %592 = vector.extract_strided_slice %267 {offsets = [0, 0], sizes = [16, 8], strides = [1, 1]} : vector<16x32xf32> to vector<16x8xf32>
    %cst_175 = arith.constant dense<0.000000e+00> : vector<8x8xf32>
    %593 = tpu.matmul %591, %592, %cst_175 {dimension_numbers = #tpu.dot_dimension_numbers<[1], [0], [0], [1], [0, 0, 1, 1], [], []>} : vector<8x16xf32>, vector<16x8xf32>, vector<8x8xf32> -> vector<8x8xf32>
    %594 = vector.extract_strided_slice %445 {offsets = [0, 8], sizes = [8, 8], strides = [1, 1]} : vector<8x32xf32> to vector<8x8xf32>
    %cst_176 = arith.constant 0.353553385 : f32
    %595 = vector.broadcast %cst_176 : f32 to vector<8x8xf32>
    %596 = arith.mulf %594, %595 : vector<8x8xf32>
    %597 = vector.extract_strided_slice %267 {offsets = [0, 8], sizes = [16, 8], strides = [1, 1]} : vector<16x32xf32> to vector<16x8xf32>
    %cst_177 = arith.constant dense<0.000000e+00> : vector<8x16xf32>
    %598 = tpu.matmul %596, %597, %cst_177 {dimension_numbers = #tpu.dot_dimension_numbers<[1], [1], [0], [0], [0, 0, 1, 0], [], []>} : vector<8x8xf32>, vector<16x8xf32>, vector<8x16xf32> -> vector<8x16xf32>
    %599 = arith.addf %598, %573 : vector<8x16xf32>
    %cst_178 = arith.constant dense<0xFF800000> : vector<8xf32>
    %600 = vector.multi_reduction <maximumf>, %599, %cst_178 [1] : vector<8x16xf32> to vector<8xf32>
    %601 = vector.shape_cast %600 : vector<8xf32> to vector<8x1xf32>
    %602 = vector.broadcast %601 : vector<8x1xf32> to vector<8x16xf32>
    %603 = arith.subf %599, %602 : vector<8x16xf32>
    %604 = math.exp %603 : vector<8x16xf32>
    %cst_179 = arith.constant dense<0.000000e+00> : vector<8xf32>
    %605 = vector.multi_reduction <add>, %604, %cst_179 [1] : vector<8x16xf32> to vector<8xf32>
    %606 = vector.shape_cast %605 : vector<8xf32> to vector<8x1xf32>
    %607 = tpu.reciprocal %606 {approx = true} : vector<8x1xf32> -> vector<8x1xf32>
    %608 = vector.broadcast %607 : vector<8x1xf32> to vector<8x16xf32>
    %609 = arith.mulf %604, %608 : vector<8x16xf32>
    %610 = vector.extract_strided_slice %267 {offsets = [0, 8], sizes = [16, 8], strides = [1, 1]} : vector<16x32xf32> to vector<16x8xf32>
    %cst_180 = arith.constant dense<0.000000e+00> : vector<8x8xf32>
    %611 = tpu.matmul %609, %610, %cst_180 {dimension_numbers = #tpu.dot_dimension_numbers<[1], [0], [0], [1], [0, 0, 1, 1], [], []>} : vector<8x16xf32>, vector<16x8xf32>, vector<8x8xf32> -> vector<8x8xf32>
    %612 = vector.extract_strided_slice %445 {offsets = [0, 16], sizes = [8, 8], strides = [1, 1]} : vector<8x32xf32> to vector<8x8xf32>
    %cst_181 = arith.constant 0.353553385 : f32
    %613 = vector.broadcast %cst_181 : f32 to vector<8x8xf32>
    %614 = arith.mulf %612, %613 : vector<8x8xf32>
    %615 = vector.extract_strided_slice %267 {offsets = [0, 16], sizes = [16, 8], strides = [1, 1]} : vector<16x32xf32> to vector<16x8xf32>
    %cst_182 = arith.constant dense<0.000000e+00> : vector<8x16xf32>
    %616 = tpu.matmul %614, %615, %cst_182 {dimension_numbers = #tpu.dot_dimension_numbers<[1], [1], [0], [0], [0, 0, 1, 0], [], []>} : vector<8x8xf32>, vector<16x8xf32>, vector<8x16xf32> -> vector<8x16xf32>
    %617 = arith.addf %616, %573 : vector<8x16xf32>
    %cst_183 = arith.constant dense<0xFF800000> : vector<8xf32>
    %618 = vector.multi_reduction <maximumf>, %617, %cst_183 [1] : vector<8x16xf32> to vector<8xf32>
    %619 = vector.shape_cast %618 : vector<8xf32> to vector<8x1xf32>
    %620 = vector.broadcast %619 : vector<8x1xf32> to vector<8x16xf32>
    %621 = arith.subf %617, %620 : vector<8x16xf32>
    %622 = math.exp %621 : vector<8x16xf32>
    %cst_184 = arith.constant dense<0.000000e+00> : vector<8xf32>
    %623 = vector.multi_reduction <add>, %622, %cst_184 [1] : vector<8x16xf32> to vector<8xf32>
    %624 = vector.shape_cast %623 : vector<8xf32> to vector<8x1xf32>
    %625 = tpu.reciprocal %624 {approx = true} : vector<8x1xf32> -> vector<8x1xf32>
    %626 = vector.broadcast %625 : vector<8x1xf32> to vector<8x16xf32>
    %627 = arith.mulf %622, %626 : vector<8x16xf32>
    %628 = vector.extract_strided_slice %267 {offsets = [0, 16], sizes = [16, 8], strides = [1, 1]} : vector<16x32xf32> to vector<16x8xf32>
    %cst_185 = arith.constant dense<0.000000e+00> : vector<8x8xf32>
    %629 = tpu.matmul %627, %628, %cst_185 {dimension_numbers = #tpu.dot_dimension_numbers<[1], [0], [0], [1], [0, 0, 1, 1], [], []>} : vector<8x16xf32>, vector<16x8xf32>, vector<8x8xf32> -> vector<8x8xf32>
    %630 = vector.extract_strided_slice %445 {offsets = [0, 24], sizes = [8, 8], strides = [1, 1]} : vector<8x32xf32> to vector<8x8xf32>
    %cst_186 = arith.constant 0.353553385 : f32
    %631 = vector.broadcast %cst_186 : f32 to vector<8x8xf32>
    %632 = arith.mulf %630, %631 : vector<8x8xf32>
    %633 = vector.extract_strided_slice %267 {offsets = [0, 24], sizes = [16, 8], strides = [1, 1]} : vector<16x32xf32> to vector<16x8xf32>
    %cst_187 = arith.constant dense<0.000000e+00> : vector<8x16xf32>
    %634 = tpu.matmul %632, %633, %cst_187 {dimension_numbers = #tpu.dot_dimension_numbers<[1], [1], [0], [0], [0, 0, 1, 0], [], []>} : vector<8x8xf32>, vector<16x8xf32>, vector<8x16xf32> -> vector<8x16xf32>
    %635 = arith.addf %634, %573 : vector<8x16xf32>
    %cst_188 = arith.constant dense<0xFF800000> : vector<8xf32>
    %636 = vector.multi_reduction <maximumf>, %635, %cst_188 [1] : vector<8x16xf32> to vector<8xf32>
    %637 = vector.shape_cast %636 : vector<8xf32> to vector<8x1xf32>
    %638 = vector.broadcast %637 : vector<8x1xf32> to vector<8x16xf32>
    %639 = arith.subf %635, %638 : vector<8x16xf32>
    %640 = math.exp %639 : vector<8x16xf32>
    %cst_189 = arith.constant dense<0.000000e+00> : vector<8xf32>
    %641 = vector.multi_reduction <add>, %640, %cst_189 [1] : vector<8x16xf32> to vector<8xf32>
    %642 = vector.shape_cast %641 : vector<8xf32> to vector<8x1xf32>
    %643 = tpu.reciprocal %642 {approx = true} : vector<8x1xf32> -> vector<8x1xf32>
    %644 = vector.broadcast %643 : vector<8x1xf32> to vector<8x16xf32>
    %645 = arith.mulf %640, %644 : vector<8x16xf32>
    %646 = vector.extract_strided_slice %267 {offsets = [0, 24], sizes = [16, 8], strides = [1, 1]} : vector<16x32xf32> to vector<16x8xf32>
    %cst_190 = arith.constant dense<0.000000e+00> : vector<8x8xf32>
    %647 = tpu.matmul %645, %646, %cst_190 {dimension_numbers = #tpu.dot_dimension_numbers<[1], [0], [0], [1], [0, 0, 1, 1], [], []>} : vector<8x16xf32>, vector<16x8xf32>, vector<8x8xf32> -> vector<8x8xf32>
    %648 = tpu.concatenate %593, %611, %629, %647 in 1 : vector<8x8xf32>, vector<8x8xf32>, vector<8x8xf32>, vector<8x8xf32> -> vector<8x32xf32>
    %cst_191 = arith.constant dense<0.000000e+00> : vector<8x32xf32>
    %649 = tpu.matmul %648, %574, %cst_191 {dimension_numbers = #tpu.dot_dimension_numbers<[1], [0], [0], [1], [0, 0, 1, 1], [], []>} : vector<8x32xf32>, vector<32x32xf32>, vector<8x32xf32> -> vector<8x32xf32>
    %650 = vector.broadcast %575 : vector<1x32xf32> to vector<8x32xf32>
    %651 = arith.addf %649, %650 : vector<8x32xf32>
    %652 = arith.addf %651, %445 : vector<8x32xf32>
    %c912 = arith.constant 912 : index
    %c0_192 = arith.constant 0 : index
    %653 = vector.load %arg2[%c912, %c0_192] : memref<1952x144xf32, #tpu.memory_space<vmem>>, vector<1x32xf32>
    %c920 = arith.constant 920 : index
    %c0_193 = arith.constant 0 : index
    %654 = vector.load %arg2[%c920, %c0_193] : memref<1952x144xf32, #tpu.memory_space<vmem>>, vector<1x32xf32>
    %c928 = arith.constant 928 : index
    %c0_194 = arith.constant 0 : index
    %655 = vector.load %arg2[%c928, %c0_194] : memref<1952x144xf32, #tpu.memory_space<vmem>>, vector<32x32xf32>
    %c960 = arith.constant 960 : index
    %c0_195 = arith.constant 0 : index
    %656 = vector.load %arg2[%c960, %c0_195] : memref<1952x144xf32, #tpu.memory_space<vmem>>, vector<1x32xf32>
    %c968 = arith.constant 968 : index
    %c0_196 = arith.constant 0 : index
    %657 = vector.load %arg2[%c968, %c0_196] : memref<1952x144xf32, #tpu.memory_space<vmem>>, vector<32x16xf32>
    %c1000 = arith.constant 1000 : index
    %c0_197 = arith.constant 0 : index
    %658 = vector.load %arg2[%c1000, %c0_197] : memref<1952x144xf32, #tpu.memory_space<vmem>>, vector<1x16xf32>
    %cst_198 = arith.constant dense<0.000000e+00> : vector<8xf32>
    %659 = vector.multi_reduction <add>, %652, %cst_198 [1] : vector<8x32xf32> to vector<8xf32>
    %660 = vector.shape_cast %659 : vector<8xf32> to vector<8x1xf32>
    %cst_199 = arith.constant 3.200000e+01 : f32
    %661 = vector.broadcast %cst_199 : f32 to vector<8x1xf32>
    %662 = arith.divf %660, %661 : vector<8x1xf32>
    %663 = vector.broadcast %662 : vector<8x1xf32> to vector<8x32xf32>
    %664 = arith.subf %652, %663 : vector<8x32xf32>
    %665 = arith.mulf %664, %664 : vector<8x32xf32>
    %cst_200 = arith.constant dense<0.000000e+00> : vector<8xf32>
    %666 = vector.multi_reduction <add>, %665, %cst_200 [1] : vector<8x32xf32> to vector<8xf32>
    %667 = vector.shape_cast %666 : vector<8xf32> to vector<8x1xf32>
    %cst_201 = arith.constant 3.200000e+01 : f32
    %668 = vector.broadcast %cst_201 : f32 to vector<8x1xf32>
    %669 = arith.divf %667, %668 : vector<8x1xf32>
    %670 = vector.broadcast %662 : vector<8x1xf32> to vector<8x32xf32>
    %671 = arith.subf %652, %670 : vector<8x32xf32>
    %cst_202 = arith.constant 9.99999974E-6 : f32
    %672 = vector.broadcast %cst_202 : f32 to vector<8x1xf32>
    %673 = arith.addf %669, %672 : vector<8x1xf32>
    %674 = math.rsqrt %673 : vector<8x1xf32>
    %675 = vector.broadcast %674 : vector<8x1xf32> to vector<8x32xf32>
    %676 = arith.mulf %671, %675 : vector<8x32xf32>
    %677 = vector.broadcast %653 : vector<1x32xf32> to vector<8x32xf32>
    %678 = arith.mulf %676, %677 : vector<8x32xf32>
    %679 = vector.broadcast %654 : vector<1x32xf32> to vector<8x32xf32>
    %680 = arith.addf %678, %679 : vector<8x32xf32>
    %cst_203 = arith.constant dense<0.000000e+00> : vector<8x32xf32>
    %681 = tpu.matmul %680, %655, %cst_203 {dimension_numbers = #tpu.dot_dimension_numbers<[1], [0], [0], [1], [0, 0, 1, 1], [], []>} : vector<8x32xf32>, vector<32x32xf32>, vector<8x32xf32> -> vector<8x32xf32>
    %682 = vector.broadcast %656 : vector<1x32xf32> to vector<8x32xf32>
    %683 = arith.addf %681, %682 : vector<8x32xf32>
    %cst_204 = arith.constant 5.000000e-01 : f32
    %684 = vector.broadcast %cst_204 : f32 to vector<8x32xf32>
    %685 = arith.mulf %684, %683 : vector<8x32xf32>
    %cst_205 = arith.constant 4.471500e-02 : f32
    %686 = vector.broadcast %cst_205 : f32 to vector<8x32xf32>
    %687 = arith.mulf %686, %683 : vector<8x32xf32>
    %688 = arith.mulf %687, %683 : vector<8x32xf32>
    %689 = arith.mulf %688, %683 : vector<8x32xf32>
    %690 = arith.addf %683, %689 : vector<8x32xf32>
    %cst_206 = arith.constant 0.797884583 : f32
    %691 = vector.broadcast %cst_206 : f32 to vector<8x32xf32>
    %692 = arith.mulf %691, %690 : vector<8x32xf32>
    %693 = math.tanh %692 : vector<8x32xf32>
    %cst_207 = arith.constant 1.000000e+00 : f32
    %694 = vector.broadcast %cst_207 : f32 to vector<8x32xf32>
    %695 = arith.addf %694, %693 : vector<8x32xf32>
    %696 = arith.mulf %685, %695 : vector<8x32xf32>
    %cst_208 = arith.constant dense<0.000000e+00> : vector<8x16xf32>
    %697 = tpu.matmul %696, %657, %cst_208 {dimension_numbers = #tpu.dot_dimension_numbers<[1], [0], [0], [1], [0, 0, 1, 1], [], []>} : vector<8x32xf32>, vector<32x16xf32>, vector<8x16xf32> -> vector<8x16xf32>
    %698 = vector.broadcast %658 : vector<1x16xf32> to vector<8x16xf32>
    %699 = arith.addf %697, %698 : vector<8x16xf32>
    %700 = vector.extract_strided_slice %572 {offsets = [0, 0], sizes = [8, 32], strides = [1, 1]} : vector<16x32xf32> to vector<8x32xf32>
    %701 = vector.extract_strided_slice %572 {offsets = [8, 0], sizes = [8, 32], strides = [1, 1]} : vector<16x32xf32> to vector<8x32xf32>
    %702 = tpu.concatenate %700, %701 in 1 : vector<8x32xf32>, vector<8x32xf32> -> vector<8x64xf32>
    %703 = vector.extract_strided_slice %699 {offsets = [0, 0], sizes = [4, 16], strides = [1, 1]} : vector<8x16xf32> to vector<4x16xf32>
    %704 = vector.extract_strided_slice %699 {offsets = [4, 0], sizes = [4, 16], strides = [1, 1]} : vector<8x16xf32> to vector<4x16xf32>
    %705 = tpu.concatenate %703, %704 in 1 : vector<4x16xf32>, vector<4x16xf32> -> vector<4x32xf32>
    %c32_209 = arith.constant 32 : index
    %c0_210 = arith.constant 0 : index
    %706 = vector.load %arg2[%c32_209, %c0_210] : memref<1952x144xf32, #tpu.memory_space<vmem>>, vector<64x32xf32>
    %707 = vector.extract_strided_slice %702 {offsets = [0, 1], sizes = [8, 63], strides = [1, 1]} : vector<8x64xf32> to vector<8x63xf32>
    %708 = vector.extract_strided_slice %702 {offsets = [0, 63], sizes = [8, 1], strides = [1, 1]} : vector<8x64xf32> to vector<8x1xf32>
    %709 = tpu.concatenate %707, %708 in 1 : vector<8x63xf32>, vector<8x1xf32> -> vector<8x64xf32>
    %710 = arith.maximumf %702, %709 : vector<8x64xf32>
    %cst_211 = arith.constant dense<0.000000e+00> : vector<8x32xf32>
    %711 = tpu.matmul %710, %706, %cst_211 {dimension_numbers = #tpu.dot_dimension_numbers<[1], [0], [0], [1], [0, 0, 1, 1], [], []>} : vector<8x64xf32>, vector<64x32xf32>, vector<8x32xf32> -> vector<8x32xf32>
    %712 = vector.extract_strided_slice %711 {offsets = [0, 0], sizes = [8, 16], strides = [1, 1]} : vector<8x32xf32> to vector<8x16xf32>
    %713 = vector.extract_strided_slice %711 {offsets = [0, 16], sizes = [8, 16], strides = [1, 1]} : vector<8x32xf32> to vector<8x16xf32>
    %714 = tpu.concatenate %712, %713 in 0 : vector<8x16xf32>, vector<8x16xf32> -> vector<16x16xf32>
    %c1128 = arith.constant 1128 : index
    %c0_212 = arith.constant 0 : index
    %715 = vector.load %arg2[%c1128, %c0_212] : memref<1952x144xf32, #tpu.memory_space<vmem>>, vector<8x40xf32>
    %c1136 = arith.constant 1136 : index
    %c0_213 = arith.constant 0 : index
    %716 = vector.load %arg2[%c1136, %c0_213] : memref<1952x144xf32, #tpu.memory_space<vmem>>, vector<8x1xf32>
    %c1144 = arith.constant 1144 : index
    %c0_214 = arith.constant 0 : index
    %717 = vector.load %arg2[%c1144, %c0_214] : memref<1952x144xf32, #tpu.memory_space<vmem>>, vector<8x1xf32>
    %718 = vector.extract_strided_slice %702 {offsets = [0, 0], sizes = [8, 32], strides = [1, 1]} : vector<8x64xf32> to vector<8x32xf32>
    %cst_215 = arith.constant 0.000000e+00 : f32
    %719 = vector.broadcast %cst_215 : f32 to vector<8x2xf32>
    %720 = tpu.concatenate %719, %718, %719 in 1 : vector<8x2xf32>, vector<8x32xf32>, vector<8x2xf32> -> vector<8x36xf32>
    %721 = vector.extract_strided_slice %702 {offsets = [0, 32], sizes = [8, 32], strides = [1, 1]} : vector<8x64xf32> to vector<8x32xf32>
    %cst_216 = arith.constant 0.000000e+00 : f32
    %722 = vector.broadcast %cst_216 : f32 to vector<8x2xf32>
    %723 = tpu.concatenate %722, %721, %722 in 1 : vector<8x2xf32>, vector<8x32xf32>, vector<8x2xf32> -> vector<8x36xf32>
    %724 = vector.extract_strided_slice %720 {offsets = [0, 0], sizes = [8, 32], strides = [1, 1]} : vector<8x36xf32> to vector<8x32xf32>
    %725 = vector.extract_strided_slice %723 {offsets = [0, 0], sizes = [8, 32], strides = [1, 1]} : vector<8x36xf32> to vector<8x32xf32>
    %726 = tpu.concatenate %724, %725 in 1 : vector<8x32xf32>, vector<8x32xf32> -> vector<8x64xf32>
    %727 = vector.extract_strided_slice %720 {offsets = [0, 1], sizes = [8, 32], strides = [1, 1]} : vector<8x36xf32> to vector<8x32xf32>
    %728 = vector.extract_strided_slice %723 {offsets = [0, 1], sizes = [8, 32], strides = [1, 1]} : vector<8x36xf32> to vector<8x32xf32>
    %729 = tpu.concatenate %727, %728 in 1 : vector<8x32xf32>, vector<8x32xf32> -> vector<8x64xf32>
    %730 = vector.extract_strided_slice %720 {offsets = [0, 2], sizes = [8, 32], strides = [1, 1]} : vector<8x36xf32> to vector<8x32xf32>
    %731 = vector.extract_strided_slice %723 {offsets = [0, 2], sizes = [8, 32], strides = [1, 1]} : vector<8x36xf32> to vector<8x32xf32>
    %732 = tpu.concatenate %730, %731 in 1 : vector<8x32xf32>, vector<8x32xf32> -> vector<8x64xf32>
    %733 = vector.extract_strided_slice %720 {offsets = [0, 3], sizes = [8, 32], strides = [1, 1]} : vector<8x36xf32> to vector<8x32xf32>
    %734 = vector.extract_strided_slice %723 {offsets = [0, 3], sizes = [8, 32], strides = [1, 1]} : vector<8x36xf32> to vector<8x32xf32>
    %735 = tpu.concatenate %733, %734 in 1 : vector<8x32xf32>, vector<8x32xf32> -> vector<8x64xf32>
    %736 = vector.extract_strided_slice %720 {offsets = [0, 4], sizes = [8, 32], strides = [1, 1]} : vector<8x36xf32> to vector<8x32xf32>
    %737 = vector.extract_strided_slice %723 {offsets = [0, 4], sizes = [8, 32], strides = [1, 1]} : vector<8x36xf32> to vector<8x32xf32>
    %738 = tpu.concatenate %736, %737 in 1 : vector<8x32xf32>, vector<8x32xf32> -> vector<8x64xf32>
    %739 = tpu.concatenate %726, %729, %732, %735, %738 in 0 : vector<8x64xf32>, vector<8x64xf32>, vector<8x64xf32>, vector<8x64xf32>, vector<8x64xf32> -> vector<40x64xf32>
    %cst_217 = arith.constant dense<0.000000e+00> : vector<8x64xf32>
    %740 = tpu.matmul %715, %739, %cst_217 {dimension_numbers = #tpu.dot_dimension_numbers<[1], [0], [0], [1], [0, 0, 1, 1], [], []>} : vector<8x40xf32>, vector<40x64xf32>, vector<8x64xf32> -> vector<8x64xf32>
    %741 = vector.broadcast %716 : vector<8x1xf32> to vector<8x64xf32>
    %742 = arith.mulf %740, %741 : vector<8x64xf32>
    %743 = vector.broadcast %717 : vector<8x1xf32> to vector<8x64xf32>
    %744 = arith.addf %742, %743 : vector<8x64xf32>
    %cst_218 = arith.constant 0.000000e+00 : f32
    %745 = vector.broadcast %cst_218 : f32 to vector<8x64xf32>
    %746 = arith.cmpf ogt, %744, %745 : vector<8x64xf32>
    %747 = math.exp %744 : vector<8x64xf32>
    %cst_219 = arith.constant 1.000000e+00 : f32
    %748 = vector.broadcast %cst_219 : f32 to vector<8x64xf32>
    %749 = arith.subf %747, %748 : vector<8x64xf32>
    %750 = arith.select %746, %744, %749 : vector<8x64xi1>, vector<8x64xf32>
    %751 = vector.extract_strided_slice %750 {offsets = [0, 1], sizes = [8, 63], strides = [1, 1]} : vector<8x64xf32> to vector<8x63xf32>
    %752 = vector.extract_strided_slice %750 {offsets = [0, 63], sizes = [8, 1], strides = [1, 1]} : vector<8x64xf32> to vector<8x1xf32>
    %753 = tpu.concatenate %751, %752 in 1 : vector<8x63xf32>, vector<8x1xf32> -> vector<8x64xf32>
    %754 = arith.maximumf %750, %753 : vector<8x64xf32>
    %cst_220 = arith.constant dense<0.000000e+00> : vector<8x32xf32>
    %755 = tpu.matmul %754, %706, %cst_220 {dimension_numbers = #tpu.dot_dimension_numbers<[1], [0], [0], [1], [0, 0, 1, 1], [], []>} : vector<8x64xf32>, vector<64x32xf32>, vector<8x32xf32> -> vector<8x32xf32>
    %756 = vector.extract_strided_slice %755 {offsets = [0, 0], sizes = [8, 16], strides = [1, 1]} : vector<8x32xf32> to vector<8x16xf32>
    %757 = vector.extract_strided_slice %755 {offsets = [0, 16], sizes = [8, 16], strides = [1, 1]} : vector<8x32xf32> to vector<8x16xf32>
    %758 = tpu.concatenate %756, %757 in 0 : vector<8x16xf32>, vector<8x16xf32> -> vector<16x16xf32>
    %c288 = arith.constant 288 : index
    %c0_221 = arith.constant 0 : index
    %759 = vector.load %arg2[%c288, %c0_221] : memref<1952x144xf32, #tpu.memory_space<vmem>>, vector<2x32xf32>
    %760 = arith.mulf %755, %755 : vector<8x32xf32>
    %cst_222 = arith.constant dense<0.000000e+00> : vector<2x8xf32>
    %761 = tpu.matmul %759, %760, %cst_222 {dimension_numbers = #tpu.dot_dimension_numbers<[1], [1], [0], [0], [0, 0, 1, 0], [], []>} : vector<2x32xf32>, vector<8x32xf32>, vector<2x8xf32> -> vector<2x8xf32>
    %762 = math.log %761 : vector<2x8xf32>
    %c1008 = arith.constant 1008 : index
    %c0_223 = arith.constant 0 : index
    %763 = vector.load %arg2[%c1008, %c0_223] : memref<1952x144xf32, #tpu.memory_space<vmem>>, vector<16x96xf32>
    %cst_224 = arith.constant dense<0.000000e+00> : vector<16x96xf32>
    %764 = tpu.matmul %714, %763, %cst_224 {dimension_numbers = #tpu.dot_dimension_numbers<[1], [0], [0], [1], [0, 0, 1, 1], [], []>} : vector<16x16xf32>, vector<16x96xf32>, vector<16x96xf32> -> vector<16x96xf32>
    %765 = vector.extract_strided_slice %764 {offsets = [0, 0], sizes = [16, 32], strides = [1, 1]} : vector<16x96xf32> to vector<16x32xf32>
    %766 = vector.extract_strided_slice %764 {offsets = [0, 32], sizes = [16, 32], strides = [1, 1]} : vector<16x96xf32> to vector<16x32xf32>
    %767 = vector.extract_strided_slice %764 {offsets = [0, 64], sizes = [16, 32], strides = [1, 1]} : vector<16x96xf32> to vector<16x32xf32>
    %c224_225 = arith.constant 224 : index
    %c0_226 = arith.constant 0 : index
    %768 = vector.load %arg2[%c224_225, %c0_226] : memref<1952x144xf32, #tpu.memory_space<vmem>>, vector<16x16xf32>
    %c1024 = arith.constant 1024 : index
    %c0_227 = arith.constant 0 : index
    %769 = vector.load %arg2[%c1024, %c0_227] : memref<1952x144xf32, #tpu.memory_space<vmem>>, vector<32x16xf32>
    %c1056 = arith.constant 1056 : index
    %c0_228 = arith.constant 0 : index
    %770 = vector.load %arg2[%c1056, %c0_228] : memref<1952x144xf32, #tpu.memory_space<vmem>>, vector<1x16xf32>
    %771 = vector.extract_strided_slice %765 {offsets = [0, 0], sizes = [16, 8], strides = [1, 1]} : vector<16x32xf32> to vector<16x8xf32>
    %772 = vector.extract_strided_slice %766 {offsets = [0, 0], sizes = [16, 8], strides = [1, 1]} : vector<16x32xf32> to vector<16x8xf32>
    %cst_229 = arith.constant dense<0.000000e+00> : vector<16x16xf32>
    %773 = tpu.matmul %771, %772, %cst_229 {dimension_numbers = #tpu.dot_dimension_numbers<[1], [1], [0], [0], [0, 0, 1, 0], [], []>} : vector<16x8xf32>, vector<16x8xf32>, vector<16x16xf32> -> vector<16x16xf32>
    %774 = arith.addf %773, %768 : vector<16x16xf32>
    %cst_230 = arith.constant dense<0xFF800000> : vector<16xf32>
    %775 = vector.multi_reduction <maximumf>, %774, %cst_230 [1] : vector<16x16xf32> to vector<16xf32>
    %776 = vector.shape_cast %775 : vector<16xf32> to vector<16x1xf32>
    %777 = vector.broadcast %776 : vector<16x1xf32> to vector<16x16xf32>
    %778 = arith.subf %774, %777 : vector<16x16xf32>
    %779 = math.exp %778 : vector<16x16xf32>
    %cst_231 = arith.constant dense<0.000000e+00> : vector<16xf32>
    %780 = vector.multi_reduction <add>, %779, %cst_231 [1] : vector<16x16xf32> to vector<16xf32>
    %781 = vector.shape_cast %780 : vector<16xf32> to vector<16x1xf32>
    %782 = tpu.reciprocal %781 {approx = true} : vector<16x1xf32> -> vector<16x1xf32>
    %783 = vector.broadcast %782 : vector<16x1xf32> to vector<16x16xf32>
    %784 = arith.mulf %779, %783 : vector<16x16xf32>
    %785 = vector.extract_strided_slice %767 {offsets = [0, 0], sizes = [16, 8], strides = [1, 1]} : vector<16x32xf32> to vector<16x8xf32>
    %cst_232 = arith.constant dense<0.000000e+00> : vector<16x8xf32>
    %786 = tpu.matmul %784, %785, %cst_232 {dimension_numbers = #tpu.dot_dimension_numbers<[1], [0], [0], [1], [0, 0, 1, 1], [], []>} : vector<16x16xf32>, vector<16x8xf32>, vector<16x8xf32> -> vector<16x8xf32>
    %787 = vector.extract_strided_slice %765 {offsets = [0, 8], sizes = [16, 8], strides = [1, 1]} : vector<16x32xf32> to vector<16x8xf32>
    %788 = vector.extract_strided_slice %766 {offsets = [0, 8], sizes = [16, 8], strides = [1, 1]} : vector<16x32xf32> to vector<16x8xf32>
    %cst_233 = arith.constant dense<0.000000e+00> : vector<16x16xf32>
    %789 = tpu.matmul %787, %788, %cst_233 {dimension_numbers = #tpu.dot_dimension_numbers<[1], [1], [0], [0], [0, 0, 1, 0], [], []>} : vector<16x8xf32>, vector<16x8xf32>, vector<16x16xf32> -> vector<16x16xf32>
    %790 = arith.addf %789, %768 : vector<16x16xf32>
    %cst_234 = arith.constant dense<0xFF800000> : vector<16xf32>
    %791 = vector.multi_reduction <maximumf>, %790, %cst_234 [1] : vector<16x16xf32> to vector<16xf32>
    %792 = vector.shape_cast %791 : vector<16xf32> to vector<16x1xf32>
    %793 = vector.broadcast %792 : vector<16x1xf32> to vector<16x16xf32>
    %794 = arith.subf %790, %793 : vector<16x16xf32>
    %795 = math.exp %794 : vector<16x16xf32>
    %cst_235 = arith.constant dense<0.000000e+00> : vector<16xf32>
    %796 = vector.multi_reduction <add>, %795, %cst_235 [1] : vector<16x16xf32> to vector<16xf32>
    %797 = vector.shape_cast %796 : vector<16xf32> to vector<16x1xf32>
    %798 = tpu.reciprocal %797 {approx = true} : vector<16x1xf32> -> vector<16x1xf32>
    %799 = vector.broadcast %798 : vector<16x1xf32> to vector<16x16xf32>
    %800 = arith.mulf %795, %799 : vector<16x16xf32>
    %801 = vector.extract_strided_slice %767 {offsets = [0, 8], sizes = [16, 8], strides = [1, 1]} : vector<16x32xf32> to vector<16x8xf32>
    %cst_236 = arith.constant dense<0.000000e+00> : vector<16x8xf32>
    %802 = tpu.matmul %800, %801, %cst_236 {dimension_numbers = #tpu.dot_dimension_numbers<[1], [0], [0], [1], [0, 0, 1, 1], [], []>} : vector<16x16xf32>, vector<16x8xf32>, vector<16x8xf32> -> vector<16x8xf32>
    %803 = vector.extract_strided_slice %765 {offsets = [0, 16], sizes = [16, 8], strides = [1, 1]} : vector<16x32xf32> to vector<16x8xf32>
    %804 = vector.extract_strided_slice %766 {offsets = [0, 16], sizes = [16, 8], strides = [1, 1]} : vector<16x32xf32> to vector<16x8xf32>
    %cst_237 = arith.constant dense<0.000000e+00> : vector<16x16xf32>
    %805 = tpu.matmul %803, %804, %cst_237 {dimension_numbers = #tpu.dot_dimension_numbers<[1], [1], [0], [0], [0, 0, 1, 0], [], []>} : vector<16x8xf32>, vector<16x8xf32>, vector<16x16xf32> -> vector<16x16xf32>
    %806 = arith.addf %805, %768 : vector<16x16xf32>
    %cst_238 = arith.constant dense<0xFF800000> : vector<16xf32>
    %807 = vector.multi_reduction <maximumf>, %806, %cst_238 [1] : vector<16x16xf32> to vector<16xf32>
    %808 = vector.shape_cast %807 : vector<16xf32> to vector<16x1xf32>
    %809 = vector.broadcast %808 : vector<16x1xf32> to vector<16x16xf32>
    %810 = arith.subf %806, %809 : vector<16x16xf32>
    %811 = math.exp %810 : vector<16x16xf32>
    %cst_239 = arith.constant dense<0.000000e+00> : vector<16xf32>
    %812 = vector.multi_reduction <add>, %811, %cst_239 [1] : vector<16x16xf32> to vector<16xf32>
    %813 = vector.shape_cast %812 : vector<16xf32> to vector<16x1xf32>
    %814 = tpu.reciprocal %813 {approx = true} : vector<16x1xf32> -> vector<16x1xf32>
    %815 = vector.broadcast %814 : vector<16x1xf32> to vector<16x16xf32>
    %816 = arith.mulf %811, %815 : vector<16x16xf32>
    %817 = vector.extract_strided_slice %767 {offsets = [0, 16], sizes = [16, 8], strides = [1, 1]} : vector<16x32xf32> to vector<16x8xf32>
    %cst_240 = arith.constant dense<0.000000e+00> : vector<16x8xf32>
    %818 = tpu.matmul %816, %817, %cst_240 {dimension_numbers = #tpu.dot_dimension_numbers<[1], [0], [0], [1], [0, 0, 1, 1], [], []>} : vector<16x16xf32>, vector<16x8xf32>, vector<16x8xf32> -> vector<16x8xf32>
    %819 = vector.extract_strided_slice %765 {offsets = [0, 24], sizes = [16, 8], strides = [1, 1]} : vector<16x32xf32> to vector<16x8xf32>
    %820 = vector.extract_strided_slice %766 {offsets = [0, 24], sizes = [16, 8], strides = [1, 1]} : vector<16x32xf32> to vector<16x8xf32>
    %cst_241 = arith.constant dense<0.000000e+00> : vector<16x16xf32>
    %821 = tpu.matmul %819, %820, %cst_241 {dimension_numbers = #tpu.dot_dimension_numbers<[1], [1], [0], [0], [0, 0, 1, 0], [], []>} : vector<16x8xf32>, vector<16x8xf32>, vector<16x16xf32> -> vector<16x16xf32>
    %822 = arith.addf %821, %768 : vector<16x16xf32>
    %cst_242 = arith.constant dense<0xFF800000> : vector<16xf32>
    %823 = vector.multi_reduction <maximumf>, %822, %cst_242 [1] : vector<16x16xf32> to vector<16xf32>
    %824 = vector.shape_cast %823 : vector<16xf32> to vector<16x1xf32>
    %825 = vector.broadcast %824 : vector<16x1xf32> to vector<16x16xf32>
    %826 = arith.subf %822, %825 : vector<16x16xf32>
    %827 = math.exp %826 : vector<16x16xf32>
    %cst_243 = arith.constant dense<0.000000e+00> : vector<16xf32>
    %828 = vector.multi_reduction <add>, %827, %cst_243 [1] : vector<16x16xf32> to vector<16xf32>
    %829 = vector.shape_cast %828 : vector<16xf32> to vector<16x1xf32>
    %830 = tpu.reciprocal %829 {approx = true} : vector<16x1xf32> -> vector<16x1xf32>
    %831 = vector.broadcast %830 : vector<16x1xf32> to vector<16x16xf32>
    %832 = arith.mulf %827, %831 : vector<16x16xf32>
    %833 = vector.extract_strided_slice %767 {offsets = [0, 24], sizes = [16, 8], strides = [1, 1]} : vector<16x32xf32> to vector<16x8xf32>
    %cst_244 = arith.constant dense<0.000000e+00> : vector<16x8xf32>
    %834 = tpu.matmul %832, %833, %cst_244 {dimension_numbers = #tpu.dot_dimension_numbers<[1], [0], [0], [1], [0, 0, 1, 1], [], []>} : vector<16x16xf32>, vector<16x8xf32>, vector<16x8xf32> -> vector<16x8xf32>
    %835 = tpu.concatenate %786, %802, %818, %834 in 1 : vector<16x8xf32>, vector<16x8xf32>, vector<16x8xf32>, vector<16x8xf32> -> vector<16x32xf32>
    %cst_245 = arith.constant dense<0.000000e+00> : vector<16x16xf32>
    %836 = tpu.matmul %835, %769, %cst_245 {dimension_numbers = #tpu.dot_dimension_numbers<[1], [0], [0], [1], [0, 0, 1, 1], [], []>} : vector<16x32xf32>, vector<32x16xf32>, vector<16x16xf32> -> vector<16x16xf32>
    %837 = vector.broadcast %770 : vector<1x16xf32> to vector<16x16xf32>
    %838 = arith.addf %836, %837 : vector<16x16xf32>
    %839 = arith.addf %838, %714 : vector<16x16xf32>
    %c1064 = arith.constant 1064 : index
    %c0_246 = arith.constant 0 : index
    %840 = vector.load %arg2[%c1064, %c0_246] : memref<1952x144xf32, #tpu.memory_space<vmem>>, vector<1x16xf32>
    %c1072 = arith.constant 1072 : index
    %c0_247 = arith.constant 0 : index
    %841 = vector.load %arg2[%c1072, %c0_247] : memref<1952x144xf32, #tpu.memory_space<vmem>>, vector<1x16xf32>
    %c1080 = arith.constant 1080 : index
    %c0_248 = arith.constant 0 : index
    %842 = vector.load %arg2[%c1080, %c0_248] : memref<1952x144xf32, #tpu.memory_space<vmem>>, vector<16x16xf32>
    %c1096 = arith.constant 1096 : index
    %c0_249 = arith.constant 0 : index
    %843 = vector.load %arg2[%c1096, %c0_249] : memref<1952x144xf32, #tpu.memory_space<vmem>>, vector<1x16xf32>
    %c1104 = arith.constant 1104 : index
    %c0_250 = arith.constant 0 : index
    %844 = vector.load %arg2[%c1104, %c0_250] : memref<1952x144xf32, #tpu.memory_space<vmem>>, vector<16x16xf32>
    %c1120 = arith.constant 1120 : index
    %c0_251 = arith.constant 0 : index
    %845 = vector.load %arg2[%c1120, %c0_251] : memref<1952x144xf32, #tpu.memory_space<vmem>>, vector<1x16xf32>
    %cst_252 = arith.constant dense<0.000000e+00> : vector<16xf32>
    %846 = vector.multi_reduction <add>, %839, %cst_252 [1] : vector<16x16xf32> to vector<16xf32>
    %847 = vector.shape_cast %846 : vector<16xf32> to vector<16x1xf32>
    %cst_253 = arith.constant 1.600000e+01 : f32
    %848 = vector.broadcast %cst_253 : f32 to vector<16x1xf32>
    %849 = arith.divf %847, %848 : vector<16x1xf32>
    %850 = vector.broadcast %849 : vector<16x1xf32> to vector<16x16xf32>
    %851 = arith.subf %839, %850 : vector<16x16xf32>
    %852 = arith.mulf %851, %851 : vector<16x16xf32>
    %cst_254 = arith.constant dense<0.000000e+00> : vector<16xf32>
    %853 = vector.multi_reduction <add>, %852, %cst_254 [1] : vector<16x16xf32> to vector<16xf32>
    %854 = vector.shape_cast %853 : vector<16xf32> to vector<16x1xf32>
    %cst_255 = arith.constant 1.600000e+01 : f32
    %855 = vector.broadcast %cst_255 : f32 to vector<16x1xf32>
    %856 = arith.divf %854, %855 : vector<16x1xf32>
    %857 = vector.broadcast %849 : vector<16x1xf32> to vector<16x16xf32>
    %858 = arith.subf %839, %857 : vector<16x16xf32>
    %cst_256 = arith.constant 9.99999974E-6 : f32
    %859 = vector.broadcast %cst_256 : f32 to vector<16x1xf32>
    %860 = arith.addf %856, %859 : vector<16x1xf32>
    %861 = math.rsqrt %860 : vector<16x1xf32>
    %862 = vector.broadcast %861 : vector<16x1xf32> to vector<16x16xf32>
    %863 = arith.mulf %858, %862 : vector<16x16xf32>
    %864 = vector.broadcast %840 : vector<1x16xf32> to vector<16x16xf32>
    %865 = arith.mulf %863, %864 : vector<16x16xf32>
    %866 = vector.broadcast %841 : vector<1x16xf32> to vector<16x16xf32>
    %867 = arith.addf %865, %866 : vector<16x16xf32>
    %cst_257 = arith.constant dense<0.000000e+00> : vector<16x16xf32>
    %868 = tpu.matmul %867, %842, %cst_257 {dimension_numbers = #tpu.dot_dimension_numbers<[1], [0], [0], [1], [0, 0, 1, 1], [], []>} : vector<16x16xf32>, vector<16x16xf32>, vector<16x16xf32> -> vector<16x16xf32>
    %869 = vector.broadcast %843 : vector<1x16xf32> to vector<16x16xf32>
    %870 = arith.addf %868, %869 : vector<16x16xf32>
    %cst_258 = arith.constant 5.000000e-01 : f32
    %871 = vector.broadcast %cst_258 : f32 to vector<16x16xf32>
    %872 = arith.mulf %871, %870 : vector<16x16xf32>
    %cst_259 = arith.constant 4.471500e-02 : f32
    %873 = vector.broadcast %cst_259 : f32 to vector<16x16xf32>
    %874 = arith.mulf %873, %870 : vector<16x16xf32>
    %875 = arith.mulf %874, %870 : vector<16x16xf32>
    %876 = arith.mulf %875, %870 : vector<16x16xf32>
    %877 = arith.addf %870, %876 : vector<16x16xf32>
    %cst_260 = arith.constant 0.797884583 : f32
    %878 = vector.broadcast %cst_260 : f32 to vector<16x16xf32>
    %879 = arith.mulf %878, %877 : vector<16x16xf32>
    %880 = math.tanh %879 : vector<16x16xf32>
    %cst_261 = arith.constant 1.000000e+00 : f32
    %881 = vector.broadcast %cst_261 : f32 to vector<16x16xf32>
    %882 = arith.addf %881, %880 : vector<16x16xf32>
    %883 = arith.mulf %872, %882 : vector<16x16xf32>
    %cst_262 = arith.constant dense<0.000000e+00> : vector<16x16xf32>
    %884 = tpu.matmul %883, %844, %cst_262 {dimension_numbers = #tpu.dot_dimension_numbers<[1], [0], [0], [1], [0, 0, 1, 1], [], []>} : vector<16x16xf32>, vector<16x16xf32>, vector<16x16xf32> -> vector<16x16xf32>
    %885 = vector.broadcast %845 : vector<1x16xf32> to vector<16x16xf32>
    %886 = arith.addf %884, %885 : vector<16x16xf32>
    %887 = arith.addf %886, %758 : vector<16x16xf32>
    %c1152 = arith.constant 1152 : index
    %c0_263 = arith.constant 0 : index
    %888 = vector.load %arg2[%c1152, %c0_263] : memref<1952x144xf32, #tpu.memory_space<vmem>>, vector<16x32xf32>
    %cst_264 = arith.constant dense<0.000000e+00> : vector<16x32xf32>
    %889 = tpu.matmul %887, %888, %cst_264 {dimension_numbers = #tpu.dot_dimension_numbers<[1], [0], [0], [1], [0, 0, 1, 1], [], []>} : vector<16x16xf32>, vector<16x32xf32>, vector<16x32xf32> -> vector<16x32xf32>
    %c0_265 = arith.constant 0 : index
    %c0_266 = arith.constant 0 : index
    %890 = vector.load %arg2[%c0_265, %c0_266] : memref<1952x144xf32, #tpu.memory_space<vmem>>, vector<32x16xf32>
    %891 = vector.extract_strided_slice %705 {offsets = [0, 1], sizes = [4, 31], strides = [1, 1]} : vector<4x32xf32> to vector<4x31xf32>
    %892 = vector.extract_strided_slice %705 {offsets = [0, 31], sizes = [4, 1], strides = [1, 1]} : vector<4x32xf32> to vector<4x1xf32>
    %893 = tpu.concatenate %891, %892 in 1 : vector<4x31xf32>, vector<4x1xf32> -> vector<4x32xf32>
    %894 = arith.maximumf %705, %893 : vector<4x32xf32>
    %cst_267 = arith.constant dense<0.000000e+00> : vector<4x16xf32>
    %895 = tpu.matmul %894, %890, %cst_267 {dimension_numbers = #tpu.dot_dimension_numbers<[1], [0], [0], [1], [0, 0, 1, 1], [], []>} : vector<4x32xf32>, vector<32x16xf32>, vector<4x16xf32> -> vector<4x16xf32>
    %896 = vector.extract_strided_slice %895 {offsets = [0, 0], sizes = [4, 8], strides = [1, 1]} : vector<4x16xf32> to vector<4x8xf32>
    %897 = vector.extract_strided_slice %895 {offsets = [0, 8], sizes = [4, 8], strides = [1, 1]} : vector<4x16xf32> to vector<4x8xf32>
    %898 = tpu.concatenate %896, %897 in 0 : vector<4x8xf32>, vector<4x8xf32> -> vector<8x8xf32>
    %c1408 = arith.constant 1408 : index
    %c0_268 = arith.constant 0 : index
    %899 = vector.load %arg2[%c1408, %c0_268] : memref<1952x144xf32, #tpu.memory_space<vmem>>, vector<4x12xf32>
    %c1416 = arith.constant 1416 : index
    %c0_269 = arith.constant 0 : index
    %900 = vector.load %arg2[%c1416, %c0_269] : memref<1952x144xf32, #tpu.memory_space<vmem>>, vector<4x1xf32>
    %c1424 = arith.constant 1424 : index
    %c0_270 = arith.constant 0 : index
    %901 = vector.load %arg2[%c1424, %c0_270] : memref<1952x144xf32, #tpu.memory_space<vmem>>, vector<4x1xf32>
    %902 = vector.extract_strided_slice %705 {offsets = [0, 0], sizes = [4, 16], strides = [1, 1]} : vector<4x32xf32> to vector<4x16xf32>
    %cst_271 = arith.constant 0.000000e+00 : f32
    %903 = vector.broadcast %cst_271 : f32 to vector<4x1xf32>
    %904 = tpu.concatenate %903, %902, %903 in 1 : vector<4x1xf32>, vector<4x16xf32>, vector<4x1xf32> -> vector<4x18xf32>
    %905 = vector.extract_strided_slice %705 {offsets = [0, 16], sizes = [4, 16], strides = [1, 1]} : vector<4x32xf32> to vector<4x16xf32>
    %cst_272 = arith.constant 0.000000e+00 : f32
    %906 = vector.broadcast %cst_272 : f32 to vector<4x1xf32>
    %907 = tpu.concatenate %906, %905, %906 in 1 : vector<4x1xf32>, vector<4x16xf32>, vector<4x1xf32> -> vector<4x18xf32>
    %908 = vector.extract_strided_slice %904 {offsets = [0, 0], sizes = [4, 16], strides = [1, 1]} : vector<4x18xf32> to vector<4x16xf32>
    %909 = vector.extract_strided_slice %907 {offsets = [0, 0], sizes = [4, 16], strides = [1, 1]} : vector<4x18xf32> to vector<4x16xf32>
    %910 = tpu.concatenate %908, %909 in 1 : vector<4x16xf32>, vector<4x16xf32> -> vector<4x32xf32>
    %911 = vector.extract_strided_slice %904 {offsets = [0, 1], sizes = [4, 16], strides = [1, 1]} : vector<4x18xf32> to vector<4x16xf32>
    %912 = vector.extract_strided_slice %907 {offsets = [0, 1], sizes = [4, 16], strides = [1, 1]} : vector<4x18xf32> to vector<4x16xf32>
    %913 = tpu.concatenate %911, %912 in 1 : vector<4x16xf32>, vector<4x16xf32> -> vector<4x32xf32>
    %914 = vector.extract_strided_slice %904 {offsets = [0, 2], sizes = [4, 16], strides = [1, 1]} : vector<4x18xf32> to vector<4x16xf32>
    %915 = vector.extract_strided_slice %907 {offsets = [0, 2], sizes = [4, 16], strides = [1, 1]} : vector<4x18xf32> to vector<4x16xf32>
    %916 = tpu.concatenate %914, %915 in 1 : vector<4x16xf32>, vector<4x16xf32> -> vector<4x32xf32>
    %917 = tpu.concatenate %910, %913, %916 in 0 : vector<4x32xf32>, vector<4x32xf32>, vector<4x32xf32> -> vector<12x32xf32>
    %cst_273 = arith.constant dense<0.000000e+00> : vector<4x32xf32>
    %918 = tpu.matmul %899, %917, %cst_273 {dimension_numbers = #tpu.dot_dimension_numbers<[1], [0], [0], [1], [0, 0, 1, 1], [], []>} : vector<4x12xf32>, vector<12x32xf32>, vector<4x32xf32> -> vector<4x32xf32>
    %919 = vector.broadcast %900 : vector<4x1xf32> to vector<4x32xf32>
    %920 = arith.mulf %918, %919 : vector<4x32xf32>
    %921 = vector.broadcast %901 : vector<4x1xf32> to vector<4x32xf32>
    %922 = arith.addf %920, %921 : vector<4x32xf32>
    %cst_274 = arith.constant 0.000000e+00 : f32
    %923 = vector.broadcast %cst_274 : f32 to vector<4x32xf32>
    %924 = arith.cmpf ogt, %922, %923 : vector<4x32xf32>
    %925 = math.exp %922 : vector<4x32xf32>
    %cst_275 = arith.constant 1.000000e+00 : f32
    %926 = vector.broadcast %cst_275 : f32 to vector<4x32xf32>
    %927 = arith.subf %925, %926 : vector<4x32xf32>
    %928 = arith.select %924, %922, %927 : vector<4x32xi1>, vector<4x32xf32>
    %929 = vector.extract_strided_slice %928 {offsets = [0, 1], sizes = [4, 31], strides = [1, 1]} : vector<4x32xf32> to vector<4x31xf32>
    %930 = vector.extract_strided_slice %928 {offsets = [0, 31], sizes = [4, 1], strides = [1, 1]} : vector<4x32xf32> to vector<4x1xf32>
    %931 = tpu.concatenate %929, %930 in 1 : vector<4x31xf32>, vector<4x1xf32> -> vector<4x32xf32>
    %932 = arith.maximumf %928, %931 : vector<4x32xf32>
    %cst_276 = arith.constant dense<0.000000e+00> : vector<4x16xf32>
    %933 = tpu.matmul %932, %890, %cst_276 {dimension_numbers = #tpu.dot_dimension_numbers<[1], [0], [0], [1], [0, 0, 1, 1], [], []>} : vector<4x32xf32>, vector<32x16xf32>, vector<4x16xf32> -> vector<4x16xf32>
    %934 = vector.extract_strided_slice %933 {offsets = [0, 0], sizes = [4, 8], strides = [1, 1]} : vector<4x16xf32> to vector<4x8xf32>
    %935 = vector.extract_strided_slice %933 {offsets = [0, 8], sizes = [4, 8], strides = [1, 1]} : vector<4x16xf32> to vector<4x8xf32>
    %936 = tpu.concatenate %934, %935 in 0 : vector<4x8xf32>, vector<4x8xf32> -> vector<8x8xf32>
    %c296 = arith.constant 296 : index
    %c0_277 = arith.constant 0 : index
    %937 = vector.load %arg2[%c296, %c0_277] : memref<1952x144xf32, #tpu.memory_space<vmem>>, vector<2x16xf32>
    %938 = arith.mulf %933, %933 : vector<4x16xf32>
    %cst_278 = arith.constant dense<0.000000e+00> : vector<2x4xf32>
    %939 = tpu.matmul %937, %938, %cst_278 {dimension_numbers = #tpu.dot_dimension_numbers<[1], [1], [0], [0], [0, 0, 1, 0], [], []>} : vector<2x16xf32>, vector<4x16xf32>, vector<2x4xf32> -> vector<2x4xf32>
    %940 = math.log %939 : vector<2x4xf32>
    %c1304 = arith.constant 1304 : index
    %c0_279 = arith.constant 0 : index
    %941 = vector.load %arg2[%c1304, %c0_279] : memref<1952x144xf32, #tpu.memory_space<vmem>>, vector<8x96xf32>
    %cst_280 = arith.constant dense<0.000000e+00> : vector<8x96xf32>
    %942 = tpu.matmul %898, %941, %cst_280 {dimension_numbers = #tpu.dot_dimension_numbers<[1], [0], [0], [1], [0, 0, 1, 1], [], []>} : vector<8x8xf32>, vector<8x96xf32>, vector<8x96xf32> -> vector<8x96xf32>
    %943 = vector.extract_strided_slice %942 {offsets = [0, 0], sizes = [8, 32], strides = [1, 1]} : vector<8x96xf32> to vector<8x32xf32>
    %944 = vector.extract_strided_slice %942 {offsets = [0, 32], sizes = [8, 32], strides = [1, 1]} : vector<8x96xf32> to vector<8x32xf32>
    %945 = vector.extract_strided_slice %942 {offsets = [0, 64], sizes = [8, 32], strides = [1, 1]} : vector<8x96xf32> to vector<8x32xf32>
    %c256_281 = arith.constant 256 : index
    %c0_282 = arith.constant 0 : index
    %946 = vector.load %arg2[%c256_281, %c0_282] : memref<1952x144xf32, #tpu.memory_space<vmem>>, vector<8x8xf32>
    %c1312 = arith.constant 1312 : index
    %c0_283 = arith.constant 0 : index
    %947 = vector.load %arg2[%c1312, %c0_283] : memref<1952x144xf32, #tpu.memory_space<vmem>>, vector<32x8xf32>
    %c1344 = arith.constant 1344 : index
    %c0_284 = arith.constant 0 : index
    %948 = vector.load %arg2[%c1344, %c0_284] : memref<1952x144xf32, #tpu.memory_space<vmem>>, vector<1x8xf32>
    %949 = vector.extract_strided_slice %943 {offsets = [0, 0], sizes = [8, 8], strides = [1, 1]} : vector<8x32xf32> to vector<8x8xf32>
    %950 = vector.extract_strided_slice %944 {offsets = [0, 0], sizes = [8, 8], strides = [1, 1]} : vector<8x32xf32> to vector<8x8xf32>
    %cst_285 = arith.constant dense<0.000000e+00> : vector<8x8xf32>
    %951 = tpu.matmul %949, %950, %cst_285 {dimension_numbers = #tpu.dot_dimension_numbers<[1], [1], [0], [0], [0, 0, 1, 0], [], []>} : vector<8x8xf32>, vector<8x8xf32>, vector<8x8xf32> -> vector<8x8xf32>
    %952 = arith.addf %951, %946 : vector<8x8xf32>
    %cst_286 = arith.constant dense<0xFF800000> : vector<8xf32>
    %953 = vector.multi_reduction <maximumf>, %952, %cst_286 [1] : vector<8x8xf32> to vector<8xf32>
    %954 = vector.shape_cast %953 : vector<8xf32> to vector<8x1xf32>
    %955 = vector.broadcast %954 : vector<8x1xf32> to vector<8x8xf32>
    %956 = arith.subf %952, %955 : vector<8x8xf32>
    %957 = math.exp %956 : vector<8x8xf32>
    %cst_287 = arith.constant dense<0.000000e+00> : vector<8xf32>
    %958 = vector.multi_reduction <add>, %957, %cst_287 [1] : vector<8x8xf32> to vector<8xf32>
    %959 = vector.shape_cast %958 : vector<8xf32> to vector<8x1xf32>
    %960 = tpu.reciprocal %959 {approx = true} : vector<8x1xf32> -> vector<8x1xf32>
    %961 = vector.broadcast %960 : vector<8x1xf32> to vector<8x8xf32>
    %962 = arith.mulf %957, %961 : vector<8x8xf32>
    %963 = vector.extract_strided_slice %945 {offsets = [0, 0], sizes = [8, 8], strides = [1, 1]} : vector<8x32xf32> to vector<8x8xf32>
    %cst_288 = arith.constant dense<0.000000e+00> : vector<8x8xf32>
    %964 = tpu.matmul %962, %963, %cst_288 {dimension_numbers = #tpu.dot_dimension_numbers<[1], [0], [0], [1], [0, 0, 1, 1], [], []>} : vector<8x8xf32>, vector<8x8xf32>, vector<8x8xf32> -> vector<8x8xf32>
    %965 = vector.extract_strided_slice %943 {offsets = [0, 8], sizes = [8, 8], strides = [1, 1]} : vector<8x32xf32> to vector<8x8xf32>
    %966 = vector.extract_strided_slice %944 {offsets = [0, 8], sizes = [8, 8], strides = [1, 1]} : vector<8x32xf32> to vector<8x8xf32>
    %cst_289 = arith.constant dense<0.000000e+00> : vector<8x8xf32>
    %967 = tpu.matmul %965, %966, %cst_289 {dimension_numbers = #tpu.dot_dimension_numbers<[1], [1], [0], [0], [0, 0, 1, 0], [], []>} : vector<8x8xf32>, vector<8x8xf32>, vector<8x8xf32> -> vector<8x8xf32>
    %968 = arith.addf %967, %946 : vector<8x8xf32>
    %cst_290 = arith.constant dense<0xFF800000> : vector<8xf32>
    %969 = vector.multi_reduction <maximumf>, %968, %cst_290 [1] : vector<8x8xf32> to vector<8xf32>
    %970 = vector.shape_cast %969 : vector<8xf32> to vector<8x1xf32>
    %971 = vector.broadcast %970 : vector<8x1xf32> to vector<8x8xf32>
    %972 = arith.subf %968, %971 : vector<8x8xf32>
    %973 = math.exp %972 : vector<8x8xf32>
    %cst_291 = arith.constant dense<0.000000e+00> : vector<8xf32>
    %974 = vector.multi_reduction <add>, %973, %cst_291 [1] : vector<8x8xf32> to vector<8xf32>
    %975 = vector.shape_cast %974 : vector<8xf32> to vector<8x1xf32>
    %976 = tpu.reciprocal %975 {approx = true} : vector<8x1xf32> -> vector<8x1xf32>
    %977 = vector.broadcast %976 : vector<8x1xf32> to vector<8x8xf32>
    %978 = arith.mulf %973, %977 : vector<8x8xf32>
    %979 = vector.extract_strided_slice %945 {offsets = [0, 8], sizes = [8, 8], strides = [1, 1]} : vector<8x32xf32> to vector<8x8xf32>
    %cst_292 = arith.constant dense<0.000000e+00> : vector<8x8xf32>
    %980 = tpu.matmul %978, %979, %cst_292 {dimension_numbers = #tpu.dot_dimension_numbers<[1], [0], [0], [1], [0, 0, 1, 1], [], []>} : vector<8x8xf32>, vector<8x8xf32>, vector<8x8xf32> -> vector<8x8xf32>
    %981 = vector.extract_strided_slice %943 {offsets = [0, 16], sizes = [8, 8], strides = [1, 1]} : vector<8x32xf32> to vector<8x8xf32>
    %982 = vector.extract_strided_slice %944 {offsets = [0, 16], sizes = [8, 8], strides = [1, 1]} : vector<8x32xf32> to vector<8x8xf32>
    %cst_293 = arith.constant dense<0.000000e+00> : vector<8x8xf32>
    %983 = tpu.matmul %981, %982, %cst_293 {dimension_numbers = #tpu.dot_dimension_numbers<[1], [1], [0], [0], [0, 0, 1, 0], [], []>} : vector<8x8xf32>, vector<8x8xf32>, vector<8x8xf32> -> vector<8x8xf32>
    %984 = arith.addf %983, %946 : vector<8x8xf32>
    %cst_294 = arith.constant dense<0xFF800000> : vector<8xf32>
    %985 = vector.multi_reduction <maximumf>, %984, %cst_294 [1] : vector<8x8xf32> to vector<8xf32>
    %986 = vector.shape_cast %985 : vector<8xf32> to vector<8x1xf32>
    %987 = vector.broadcast %986 : vector<8x1xf32> to vector<8x8xf32>
    %988 = arith.subf %984, %987 : vector<8x8xf32>
    %989 = math.exp %988 : vector<8x8xf32>
    %cst_295 = arith.constant dense<0.000000e+00> : vector<8xf32>
    %990 = vector.multi_reduction <add>, %989, %cst_295 [1] : vector<8x8xf32> to vector<8xf32>
    %991 = vector.shape_cast %990 : vector<8xf32> to vector<8x1xf32>
    %992 = tpu.reciprocal %991 {approx = true} : vector<8x1xf32> -> vector<8x1xf32>
    %993 = vector.broadcast %992 : vector<8x1xf32> to vector<8x8xf32>
    %994 = arith.mulf %989, %993 : vector<8x8xf32>
    %995 = vector.extract_strided_slice %945 {offsets = [0, 16], sizes = [8, 8], strides = [1, 1]} : vector<8x32xf32> to vector<8x8xf32>
    %cst_296 = arith.constant dense<0.000000e+00> : vector<8x8xf32>
    %996 = tpu.matmul %994, %995, %cst_296 {dimension_numbers = #tpu.dot_dimension_numbers<[1], [0], [0], [1], [0, 0, 1, 1], [], []>} : vector<8x8xf32>, vector<8x8xf32>, vector<8x8xf32> -> vector<8x8xf32>
    %997 = vector.extract_strided_slice %943 {offsets = [0, 24], sizes = [8, 8], strides = [1, 1]} : vector<8x32xf32> to vector<8x8xf32>
    %998 = vector.extract_strided_slice %944 {offsets = [0, 24], sizes = [8, 8], strides = [1, 1]} : vector<8x32xf32> to vector<8x8xf32>
    %cst_297 = arith.constant dense<0.000000e+00> : vector<8x8xf32>
    %999 = tpu.matmul %997, %998, %cst_297 {dimension_numbers = #tpu.dot_dimension_numbers<[1], [1], [0], [0], [0, 0, 1, 0], [], []>} : vector<8x8xf32>, vector<8x8xf32>, vector<8x8xf32> -> vector<8x8xf32>
    %1000 = arith.addf %999, %946 : vector<8x8xf32>
    %cst_298 = arith.constant dense<0xFF800000> : vector<8xf32>
    %1001 = vector.multi_reduction <maximumf>, %1000, %cst_298 [1] : vector<8x8xf32> to vector<8xf32>
    %1002 = vector.shape_cast %1001 : vector<8xf32> to vector<8x1xf32>
    %1003 = vector.broadcast %1002 : vector<8x1xf32> to vector<8x8xf32>
    %1004 = arith.subf %1000, %1003 : vector<8x8xf32>
    %1005 = math.exp %1004 : vector<8x8xf32>
    %cst_299 = arith.constant dense<0.000000e+00> : vector<8xf32>
    %1006 = vector.multi_reduction <add>, %1005, %cst_299 [1] : vector<8x8xf32> to vector<8xf32>
    %1007 = vector.shape_cast %1006 : vector<8xf32> to vector<8x1xf32>
    %1008 = tpu.reciprocal %1007 {approx = true} : vector<8x1xf32> -> vector<8x1xf32>
    %1009 = vector.broadcast %1008 : vector<8x1xf32> to vector<8x8xf32>
    %1010 = arith.mulf %1005, %1009 : vector<8x8xf32>
    %1011 = vector.extract_strided_slice %945 {offsets = [0, 24], sizes = [8, 8], strides = [1, 1]} : vector<8x32xf32> to vector<8x8xf32>
    %cst_300 = arith.constant dense<0.000000e+00> : vector<8x8xf32>
    %1012 = tpu.matmul %1010, %1011, %cst_300 {dimension_numbers = #tpu.dot_dimension_numbers<[1], [0], [0], [1], [0, 0, 1, 1], [], []>} : vector<8x8xf32>, vector<8x8xf32>, vector<8x8xf32> -> vector<8x8xf32>
    %1013 = tpu.concatenate %964, %980, %996, %1012 in 1 : vector<8x8xf32>, vector<8x8xf32>, vector<8x8xf32>, vector<8x8xf32> -> vector<8x32xf32>
    %cst_301 = arith.constant dense<0.000000e+00> : vector<8x8xf32>
    %1014 = tpu.matmul %1013, %947, %cst_301 {dimension_numbers = #tpu.dot_dimension_numbers<[1], [0], [0], [1], [0, 0, 1, 1], [], []>} : vector<8x32xf32>, vector<32x8xf32>, vector<8x8xf32> -> vector<8x8xf32>
    %1015 = vector.broadcast %948 : vector<1x8xf32> to vector<8x8xf32>
    %1016 = arith.addf %1014, %1015 : vector<8x8xf32>
    %1017 = arith.addf %1016, %898 : vector<8x8xf32>
    %c1352 = arith.constant 1352 : index
    %c0_302 = arith.constant 0 : index
    %1018 = vector.load %arg2[%c1352, %c0_302] : memref<1952x144xf32, #tpu.memory_space<vmem>>, vector<1x8xf32>
    %c1360 = arith.constant 1360 : index
    %c0_303 = arith.constant 0 : index
    %1019 = vector.load %arg2[%c1360, %c0_303] : memref<1952x144xf32, #tpu.memory_space<vmem>>, vector<1x8xf32>
    %c1368 = arith.constant 1368 : index
    %c0_304 = arith.constant 0 : index
    %1020 = vector.load %arg2[%c1368, %c0_304] : memref<1952x144xf32, #tpu.memory_space<vmem>>, vector<8x16xf32>
    %c1376 = arith.constant 1376 : index
    %c0_305 = arith.constant 0 : index
    %1021 = vector.load %arg2[%c1376, %c0_305] : memref<1952x144xf32, #tpu.memory_space<vmem>>, vector<1x16xf32>
    %c1384 = arith.constant 1384 : index
    %c0_306 = arith.constant 0 : index
    %1022 = vector.load %arg2[%c1384, %c0_306] : memref<1952x144xf32, #tpu.memory_space<vmem>>, vector<16x8xf32>
    %c1400 = arith.constant 1400 : index
    %c0_307 = arith.constant 0 : index
    %1023 = vector.load %arg2[%c1400, %c0_307] : memref<1952x144xf32, #tpu.memory_space<vmem>>, vector<1x8xf32>
    %cst_308 = arith.constant dense<0.000000e+00> : vector<8xf32>
    %1024 = vector.multi_reduction <add>, %1017, %cst_308 [1] : vector<8x8xf32> to vector<8xf32>
    %1025 = vector.shape_cast %1024 : vector<8xf32> to vector<8x1xf32>
    %cst_309 = arith.constant 8.000000e+00 : f32
    %1026 = vector.broadcast %cst_309 : f32 to vector<8x1xf32>
    %1027 = arith.divf %1025, %1026 : vector<8x1xf32>
    %1028 = vector.broadcast %1027 : vector<8x1xf32> to vector<8x8xf32>
    %1029 = arith.subf %1017, %1028 : vector<8x8xf32>
    %1030 = arith.mulf %1029, %1029 : vector<8x8xf32>
    %cst_310 = arith.constant dense<0.000000e+00> : vector<8xf32>
    %1031 = vector.multi_reduction <add>, %1030, %cst_310 [1] : vector<8x8xf32> to vector<8xf32>
    %1032 = vector.shape_cast %1031 : vector<8xf32> to vector<8x1xf32>
    %cst_311 = arith.constant 8.000000e+00 : f32
    %1033 = vector.broadcast %cst_311 : f32 to vector<8x1xf32>
    %1034 = arith.divf %1032, %1033 : vector<8x1xf32>
    %1035 = vector.broadcast %1027 : vector<8x1xf32> to vector<8x8xf32>
    %1036 = arith.subf %1017, %1035 : vector<8x8xf32>
    %cst_312 = arith.constant 9.99999974E-6 : f32
    %1037 = vector.broadcast %cst_312 : f32 to vector<8x1xf32>
    %1038 = arith.addf %1034, %1037 : vector<8x1xf32>
    %1039 = math.rsqrt %1038 : vector<8x1xf32>
    %1040 = vector.broadcast %1039 : vector<8x1xf32> to vector<8x8xf32>
    %1041 = arith.mulf %1036, %1040 : vector<8x8xf32>
    %1042 = vector.broadcast %1018 : vector<1x8xf32> to vector<8x8xf32>
    %1043 = arith.mulf %1041, %1042 : vector<8x8xf32>
    %1044 = vector.broadcast %1019 : vector<1x8xf32> to vector<8x8xf32>
    %1045 = arith.addf %1043, %1044 : vector<8x8xf32>
    %cst_313 = arith.constant dense<0.000000e+00> : vector<8x16xf32>
    %1046 = tpu.matmul %1045, %1020, %cst_313 {dimension_numbers = #tpu.dot_dimension_numbers<[1], [0], [0], [1], [0, 0, 1, 1], [], []>} : vector<8x8xf32>, vector<8x16xf32>, vector<8x16xf32> -> vector<8x16xf32>
    %1047 = vector.broadcast %1021 : vector<1x16xf32> to vector<8x16xf32>
    %1048 = arith.addf %1046, %1047 : vector<8x16xf32>
    %cst_314 = arith.constant 5.000000e-01 : f32
    %1049 = vector.broadcast %cst_314 : f32 to vector<8x16xf32>
    %1050 = arith.mulf %1049, %1048 : vector<8x16xf32>
    %cst_315 = arith.constant 4.471500e-02 : f32
    %1051 = vector.broadcast %cst_315 : f32 to vector<8x16xf32>
    %1052 = arith.mulf %1051, %1048 : vector<8x16xf32>
    %1053 = arith.mulf %1052, %1048 : vector<8x16xf32>
    %1054 = arith.mulf %1053, %1048 : vector<8x16xf32>
    %1055 = arith.addf %1048, %1054 : vector<8x16xf32>
    %cst_316 = arith.constant 0.797884583 : f32
    %1056 = vector.broadcast %cst_316 : f32 to vector<8x16xf32>
    %1057 = arith.mulf %1056, %1055 : vector<8x16xf32>
    %1058 = math.tanh %1057 : vector<8x16xf32>
    %cst_317 = arith.constant 1.000000e+00 : f32
    %1059 = vector.broadcast %cst_317 : f32 to vector<8x16xf32>
    %1060 = arith.addf %1059, %1058 : vector<8x16xf32>
    %1061 = arith.mulf %1050, %1060 : vector<8x16xf32>
    %cst_318 = arith.constant dense<0.000000e+00> : vector<8x8xf32>
    %1062 = tpu.matmul %1061, %1022, %cst_318 {dimension_numbers = #tpu.dot_dimension_numbers<[1], [0], [0], [1], [0, 0, 1, 1], [], []>} : vector<8x16xf32>, vector<16x8xf32>, vector<8x8xf32> -> vector<8x8xf32>
    %1063 = vector.broadcast %1023 : vector<1x8xf32> to vector<8x8xf32>
    %1064 = arith.addf %1062, %1063 : vector<8x8xf32>
    %1065 = arith.addf %1064, %936 : vector<8x8xf32>
    %c1432 = arith.constant 1432 : index
    %c0_319 = arith.constant 0 : index
    %1066 = vector.load %arg2[%c1432, %c0_319] : memref<1952x144xf32, #tpu.memory_space<vmem>>, vector<8x32xf32>
    %cst_320 = arith.constant dense<0.000000e+00> : vector<8x32xf32>
    %1067 = tpu.matmul %1065, %1066, %cst_320 {dimension_numbers = #tpu.dot_dimension_numbers<[1], [0], [0], [1], [0, 0, 1, 1], [], []>} : vector<8x8xf32>, vector<8x32xf32>, vector<8x32xf32> -> vector<8x32xf32>
    %c240_321 = arith.constant 240 : index
    %c0_322 = arith.constant 0 : index
    %1068 = vector.load %arg2[%c240_321, %c0_322] : memref<1952x144xf32, #tpu.memory_space<vmem>>, vector<16x8xf32>
    %c1168 = arith.constant 1168 : index
    %c0_323 = arith.constant 0 : index
    %1069 = vector.load %arg2[%c1168, %c0_323] : memref<1952x144xf32, #tpu.memory_space<vmem>>, vector<32x32xf32>
    %c1200 = arith.constant 1200 : index
    %c0_324 = arith.constant 0 : index
    %1070 = vector.load %arg2[%c1200, %c0_324] : memref<1952x144xf32, #tpu.memory_space<vmem>>, vector<1x32xf32>
    %1071 = vector.extract_strided_slice %889 {offsets = [0, 0], sizes = [16, 8], strides = [1, 1]} : vector<16x32xf32> to vector<16x8xf32>
    %cst_325 = arith.constant 0.353553385 : f32
    %1072 = vector.broadcast %cst_325 : f32 to vector<16x8xf32>
    %1073 = arith.mulf %1071, %1072 : vector<16x8xf32>
    %1074 = vector.extract_strided_slice %1067 {offsets = [0, 0], sizes = [8, 8], strides = [1, 1]} : vector<8x32xf32> to vector<8x8xf32>
    %cst_326 = arith.constant dense<0.000000e+00> : vector<16x8xf32>
    %1075 = tpu.matmul %1073, %1074, %cst_326 {dimension_numbers = #tpu.dot_dimension_numbers<[1], [1], [0], [0], [0, 0, 1, 0], [], []>} : vector<16x8xf32>, vector<8x8xf32>, vector<16x8xf32> -> vector<16x8xf32>
    %1076 = arith.addf %1075, %1068 : vector<16x8xf32>
    %cst_327 = arith.constant dense<0xFF800000> : vector<16xf32>
    %1077 = vector.multi_reduction <maximumf>, %1076, %cst_327 [1] : vector<16x8xf32> to vector<16xf32>
    %1078 = vector.shape_cast %1077 : vector<16xf32> to vector<16x1xf32>
    %1079 = vector.broadcast %1078 : vector<16x1xf32> to vector<16x8xf32>
    %1080 = arith.subf %1076, %1079 : vector<16x8xf32>
    %1081 = math.exp %1080 : vector<16x8xf32>
    %cst_328 = arith.constant dense<0.000000e+00> : vector<16xf32>
    %1082 = vector.multi_reduction <add>, %1081, %cst_328 [1] : vector<16x8xf32> to vector<16xf32>
    %1083 = vector.shape_cast %1082 : vector<16xf32> to vector<16x1xf32>
    %1084 = tpu.reciprocal %1083 {approx = true} : vector<16x1xf32> -> vector<16x1xf32>
    %1085 = vector.broadcast %1084 : vector<16x1xf32> to vector<16x8xf32>
    %1086 = arith.mulf %1081, %1085 : vector<16x8xf32>
    %1087 = vector.extract_strided_slice %1067 {offsets = [0, 0], sizes = [8, 8], strides = [1, 1]} : vector<8x32xf32> to vector<8x8xf32>
    %cst_329 = arith.constant dense<0.000000e+00> : vector<16x8xf32>
    %1088 = tpu.matmul %1086, %1087, %cst_329 {dimension_numbers = #tpu.dot_dimension_numbers<[1], [0], [0], [1], [0, 0, 1, 1], [], []>} : vector<16x8xf32>, vector<8x8xf32>, vector<16x8xf32> -> vector<16x8xf32>
    %1089 = vector.extract_strided_slice %889 {offsets = [0, 8], sizes = [16, 8], strides = [1, 1]} : vector<16x32xf32> to vector<16x8xf32>
    %cst_330 = arith.constant 0.353553385 : f32
    %1090 = vector.broadcast %cst_330 : f32 to vector<16x8xf32>
    %1091 = arith.mulf %1089, %1090 : vector<16x8xf32>
    %1092 = vector.extract_strided_slice %1067 {offsets = [0, 8], sizes = [8, 8], strides = [1, 1]} : vector<8x32xf32> to vector<8x8xf32>
    %cst_331 = arith.constant dense<0.000000e+00> : vector<16x8xf32>
    %1093 = tpu.matmul %1091, %1092, %cst_331 {dimension_numbers = #tpu.dot_dimension_numbers<[1], [1], [0], [0], [0, 0, 1, 0], [], []>} : vector<16x8xf32>, vector<8x8xf32>, vector<16x8xf32> -> vector<16x8xf32>
    %1094 = arith.addf %1093, %1068 : vector<16x8xf32>
    %cst_332 = arith.constant dense<0xFF800000> : vector<16xf32>
    %1095 = vector.multi_reduction <maximumf>, %1094, %cst_332 [1] : vector<16x8xf32> to vector<16xf32>
    %1096 = vector.shape_cast %1095 : vector<16xf32> to vector<16x1xf32>
    %1097 = vector.broadcast %1096 : vector<16x1xf32> to vector<16x8xf32>
    %1098 = arith.subf %1094, %1097 : vector<16x8xf32>
    %1099 = math.exp %1098 : vector<16x8xf32>
    %cst_333 = arith.constant dense<0.000000e+00> : vector<16xf32>
    %1100 = vector.multi_reduction <add>, %1099, %cst_333 [1] : vector<16x8xf32> to vector<16xf32>
    %1101 = vector.shape_cast %1100 : vector<16xf32> to vector<16x1xf32>
    %1102 = tpu.reciprocal %1101 {approx = true} : vector<16x1xf32> -> vector<16x1xf32>
    %1103 = vector.broadcast %1102 : vector<16x1xf32> to vector<16x8xf32>
    %1104 = arith.mulf %1099, %1103 : vector<16x8xf32>
    %1105 = vector.extract_strided_slice %1067 {offsets = [0, 8], sizes = [8, 8], strides = [1, 1]} : vector<8x32xf32> to vector<8x8xf32>
    %cst_334 = arith.constant dense<0.000000e+00> : vector<16x8xf32>
    %1106 = tpu.matmul %1104, %1105, %cst_334 {dimension_numbers = #tpu.dot_dimension_numbers<[1], [0], [0], [1], [0, 0, 1, 1], [], []>} : vector<16x8xf32>, vector<8x8xf32>, vector<16x8xf32> -> vector<16x8xf32>
    %1107 = vector.extract_strided_slice %889 {offsets = [0, 16], sizes = [16, 8], strides = [1, 1]} : vector<16x32xf32> to vector<16x8xf32>
    %cst_335 = arith.constant 0.353553385 : f32
    %1108 = vector.broadcast %cst_335 : f32 to vector<16x8xf32>
    %1109 = arith.mulf %1107, %1108 : vector<16x8xf32>
    %1110 = vector.extract_strided_slice %1067 {offsets = [0, 16], sizes = [8, 8], strides = [1, 1]} : vector<8x32xf32> to vector<8x8xf32>
    %cst_336 = arith.constant dense<0.000000e+00> : vector<16x8xf32>
    %1111 = tpu.matmul %1109, %1110, %cst_336 {dimension_numbers = #tpu.dot_dimension_numbers<[1], [1], [0], [0], [0, 0, 1, 0], [], []>} : vector<16x8xf32>, vector<8x8xf32>, vector<16x8xf32> -> vector<16x8xf32>
    %1112 = arith.addf %1111, %1068 : vector<16x8xf32>
    %cst_337 = arith.constant dense<0xFF800000> : vector<16xf32>
    %1113 = vector.multi_reduction <maximumf>, %1112, %cst_337 [1] : vector<16x8xf32> to vector<16xf32>
    %1114 = vector.shape_cast %1113 : vector<16xf32> to vector<16x1xf32>
    %1115 = vector.broadcast %1114 : vector<16x1xf32> to vector<16x8xf32>
    %1116 = arith.subf %1112, %1115 : vector<16x8xf32>
    %1117 = math.exp %1116 : vector<16x8xf32>
    %cst_338 = arith.constant dense<0.000000e+00> : vector<16xf32>
    %1118 = vector.multi_reduction <add>, %1117, %cst_338 [1] : vector<16x8xf32> to vector<16xf32>
    %1119 = vector.shape_cast %1118 : vector<16xf32> to vector<16x1xf32>
    %1120 = tpu.reciprocal %1119 {approx = true} : vector<16x1xf32> -> vector<16x1xf32>
    %1121 = vector.broadcast %1120 : vector<16x1xf32> to vector<16x8xf32>
    %1122 = arith.mulf %1117, %1121 : vector<16x8xf32>
    %1123 = vector.extract_strided_slice %1067 {offsets = [0, 16], sizes = [8, 8], strides = [1, 1]} : vector<8x32xf32> to vector<8x8xf32>
    %cst_339 = arith.constant dense<0.000000e+00> : vector<16x8xf32>
    %1124 = tpu.matmul %1122, %1123, %cst_339 {dimension_numbers = #tpu.dot_dimension_numbers<[1], [0], [0], [1], [0, 0, 1, 1], [], []>} : vector<16x8xf32>, vector<8x8xf32>, vector<16x8xf32> -> vector<16x8xf32>
    %1125 = vector.extract_strided_slice %889 {offsets = [0, 24], sizes = [16, 8], strides = [1, 1]} : vector<16x32xf32> to vector<16x8xf32>
    %cst_340 = arith.constant 0.353553385 : f32
    %1126 = vector.broadcast %cst_340 : f32 to vector<16x8xf32>
    %1127 = arith.mulf %1125, %1126 : vector<16x8xf32>
    %1128 = vector.extract_strided_slice %1067 {offsets = [0, 24], sizes = [8, 8], strides = [1, 1]} : vector<8x32xf32> to vector<8x8xf32>
    %cst_341 = arith.constant dense<0.000000e+00> : vector<16x8xf32>
    %1129 = tpu.matmul %1127, %1128, %cst_341 {dimension_numbers = #tpu.dot_dimension_numbers<[1], [1], [0], [0], [0, 0, 1, 0], [], []>} : vector<16x8xf32>, vector<8x8xf32>, vector<16x8xf32> -> vector<16x8xf32>
    %1130 = arith.addf %1129, %1068 : vector<16x8xf32>
    %cst_342 = arith.constant dense<0xFF800000> : vector<16xf32>
    %1131 = vector.multi_reduction <maximumf>, %1130, %cst_342 [1] : vector<16x8xf32> to vector<16xf32>
    %1132 = vector.shape_cast %1131 : vector<16xf32> to vector<16x1xf32>
    %1133 = vector.broadcast %1132 : vector<16x1xf32> to vector<16x8xf32>
    %1134 = arith.subf %1130, %1133 : vector<16x8xf32>
    %1135 = math.exp %1134 : vector<16x8xf32>
    %cst_343 = arith.constant dense<0.000000e+00> : vector<16xf32>
    %1136 = vector.multi_reduction <add>, %1135, %cst_343 [1] : vector<16x8xf32> to vector<16xf32>
    %1137 = vector.shape_cast %1136 : vector<16xf32> to vector<16x1xf32>
    %1138 = tpu.reciprocal %1137 {approx = true} : vector<16x1xf32> -> vector<16x1xf32>
    %1139 = vector.broadcast %1138 : vector<16x1xf32> to vector<16x8xf32>
    %1140 = arith.mulf %1135, %1139 : vector<16x8xf32>
    %1141 = vector.extract_strided_slice %1067 {offsets = [0, 24], sizes = [8, 8], strides = [1, 1]} : vector<8x32xf32> to vector<8x8xf32>
    %cst_344 = arith.constant dense<0.000000e+00> : vector<16x8xf32>
    %1142 = tpu.matmul %1140, %1141, %cst_344 {dimension_numbers = #tpu.dot_dimension_numbers<[1], [0], [0], [1], [0, 0, 1, 1], [], []>} : vector<16x8xf32>, vector<8x8xf32>, vector<16x8xf32> -> vector<16x8xf32>
    %1143 = tpu.concatenate %1088, %1106, %1124, %1142 in 1 : vector<16x8xf32>, vector<16x8xf32>, vector<16x8xf32>, vector<16x8xf32> -> vector<16x32xf32>
    %cst_345 = arith.constant dense<0.000000e+00> : vector<16x32xf32>
    %1144 = tpu.matmul %1143, %1069, %cst_345 {dimension_numbers = #tpu.dot_dimension_numbers<[1], [0], [0], [1], [0, 0, 1, 1], [], []>} : vector<16x32xf32>, vector<32x32xf32>, vector<16x32xf32> -> vector<16x32xf32>
    %1145 = vector.broadcast %1070 : vector<1x32xf32> to vector<16x32xf32>
    %1146 = arith.addf %1144, %1145 : vector<16x32xf32>
    %1147 = arith.addf %1146, %889 : vector<16x32xf32>
    %c1208 = arith.constant 1208 : index
    %c0_346 = arith.constant 0 : index
    %1148 = vector.load %arg2[%c1208, %c0_346] : memref<1952x144xf32, #tpu.memory_space<vmem>>, vector<1x32xf32>
    %c1216 = arith.constant 1216 : index
    %c0_347 = arith.constant 0 : index
    %1149 = vector.load %arg2[%c1216, %c0_347] : memref<1952x144xf32, #tpu.memory_space<vmem>>, vector<1x32xf32>
    %c1224 = arith.constant 1224 : index
    %c0_348 = arith.constant 0 : index
    %1150 = vector.load %arg2[%c1224, %c0_348] : memref<1952x144xf32, #tpu.memory_space<vmem>>, vector<32x32xf32>
    %c1256 = arith.constant 1256 : index
    %c0_349 = arith.constant 0 : index
    %1151 = vector.load %arg2[%c1256, %c0_349] : memref<1952x144xf32, #tpu.memory_space<vmem>>, vector<1x32xf32>
    %c1264 = arith.constant 1264 : index
    %c0_350 = arith.constant 0 : index
    %1152 = vector.load %arg2[%c1264, %c0_350] : memref<1952x144xf32, #tpu.memory_space<vmem>>, vector<32x16xf32>
    %c1296 = arith.constant 1296 : index
    %c0_351 = arith.constant 0 : index
    %1153 = vector.load %arg2[%c1296, %c0_351] : memref<1952x144xf32, #tpu.memory_space<vmem>>, vector<1x16xf32>
    %cst_352 = arith.constant dense<0.000000e+00> : vector<16xf32>
    %1154 = vector.multi_reduction <add>, %1147, %cst_352 [1] : vector<16x32xf32> to vector<16xf32>
    %1155 = vector.shape_cast %1154 : vector<16xf32> to vector<16x1xf32>
    %cst_353 = arith.constant 3.200000e+01 : f32
    %1156 = vector.broadcast %cst_353 : f32 to vector<16x1xf32>
    %1157 = arith.divf %1155, %1156 : vector<16x1xf32>
    %1158 = vector.broadcast %1157 : vector<16x1xf32> to vector<16x32xf32>
    %1159 = arith.subf %1147, %1158 : vector<16x32xf32>
    %1160 = arith.mulf %1159, %1159 : vector<16x32xf32>
    %cst_354 = arith.constant dense<0.000000e+00> : vector<16xf32>
    %1161 = vector.multi_reduction <add>, %1160, %cst_354 [1] : vector<16x32xf32> to vector<16xf32>
    %1162 = vector.shape_cast %1161 : vector<16xf32> to vector<16x1xf32>
    %cst_355 = arith.constant 3.200000e+01 : f32
    %1163 = vector.broadcast %cst_355 : f32 to vector<16x1xf32>
    %1164 = arith.divf %1162, %1163 : vector<16x1xf32>
    %1165 = vector.broadcast %1157 : vector<16x1xf32> to vector<16x32xf32>
    %1166 = arith.subf %1147, %1165 : vector<16x32xf32>
    %cst_356 = arith.constant 9.99999974E-6 : f32
    %1167 = vector.broadcast %cst_356 : f32 to vector<16x1xf32>
    %1168 = arith.addf %1164, %1167 : vector<16x1xf32>
    %1169 = math.rsqrt %1168 : vector<16x1xf32>
    %1170 = vector.broadcast %1169 : vector<16x1xf32> to vector<16x32xf32>
    %1171 = arith.mulf %1166, %1170 : vector<16x32xf32>
    %1172 = vector.broadcast %1148 : vector<1x32xf32> to vector<16x32xf32>
    %1173 = arith.mulf %1171, %1172 : vector<16x32xf32>
    %1174 = vector.broadcast %1149 : vector<1x32xf32> to vector<16x32xf32>
    %1175 = arith.addf %1173, %1174 : vector<16x32xf32>
    %cst_357 = arith.constant dense<0.000000e+00> : vector<16x32xf32>
    %1176 = tpu.matmul %1175, %1150, %cst_357 {dimension_numbers = #tpu.dot_dimension_numbers<[1], [0], [0], [1], [0, 0, 1, 1], [], []>} : vector<16x32xf32>, vector<32x32xf32>, vector<16x32xf32> -> vector<16x32xf32>
    %1177 = vector.broadcast %1151 : vector<1x32xf32> to vector<16x32xf32>
    %1178 = arith.addf %1176, %1177 : vector<16x32xf32>
    %cst_358 = arith.constant 5.000000e-01 : f32
    %1179 = vector.broadcast %cst_358 : f32 to vector<16x32xf32>
    %1180 = arith.mulf %1179, %1178 : vector<16x32xf32>
    %cst_359 = arith.constant 4.471500e-02 : f32
    %1181 = vector.broadcast %cst_359 : f32 to vector<16x32xf32>
    %1182 = arith.mulf %1181, %1178 : vector<16x32xf32>
    %1183 = arith.mulf %1182, %1178 : vector<16x32xf32>
    %1184 = arith.mulf %1183, %1178 : vector<16x32xf32>
    %1185 = arith.addf %1178, %1184 : vector<16x32xf32>
    %cst_360 = arith.constant 0.797884583 : f32
    %1186 = vector.broadcast %cst_360 : f32 to vector<16x32xf32>
    %1187 = arith.mulf %1186, %1185 : vector<16x32xf32>
    %1188 = math.tanh %1187 : vector<16x32xf32>
    %cst_361 = arith.constant 1.000000e+00 : f32
    %1189 = vector.broadcast %cst_361 : f32 to vector<16x32xf32>
    %1190 = arith.addf %1189, %1188 : vector<16x32xf32>
    %1191 = arith.mulf %1180, %1190 : vector<16x32xf32>
    %cst_362 = arith.constant dense<0.000000e+00> : vector<16x16xf32>
    %1192 = tpu.matmul %1191, %1152, %cst_362 {dimension_numbers = #tpu.dot_dimension_numbers<[1], [0], [0], [1], [0, 0, 1, 1], [], []>} : vector<16x32xf32>, vector<32x16xf32>, vector<16x16xf32> -> vector<16x16xf32>
    %1193 = vector.broadcast %1153 : vector<1x16xf32> to vector<16x16xf32>
    %1194 = arith.addf %1192, %1193 : vector<16x16xf32>
    %c264_363 = arith.constant 264 : index
    %c0_364 = arith.constant 0 : index
    %1195 = vector.load %arg2[%c264_363, %c0_364] : memref<1952x144xf32, #tpu.memory_space<vmem>>, vector<8x16xf32>
    %c1440 = arith.constant 1440 : index
    %c0_365 = arith.constant 0 : index
    %1196 = vector.load %arg2[%c1440, %c0_365] : memref<1952x144xf32, #tpu.memory_space<vmem>>, vector<32x32xf32>
    %c1472 = arith.constant 1472 : index
    %c0_366 = arith.constant 0 : index
    %1197 = vector.load %arg2[%c1472, %c0_366] : memref<1952x144xf32, #tpu.memory_space<vmem>>, vector<1x32xf32>
    %1198 = vector.extract_strided_slice %1067 {offsets = [0, 0], sizes = [8, 8], strides = [1, 1]} : vector<8x32xf32> to vector<8x8xf32>
    %cst_367 = arith.constant 0.353553385 : f32
    %1199 = vector.broadcast %cst_367 : f32 to vector<8x8xf32>
    %1200 = arith.mulf %1198, %1199 : vector<8x8xf32>
    %1201 = vector.extract_strided_slice %889 {offsets = [0, 0], sizes = [16, 8], strides = [1, 1]} : vector<16x32xf32> to vector<16x8xf32>
    %cst_368 = arith.constant dense<0.000000e+00> : vector<8x16xf32>
    %1202 = tpu.matmul %1200, %1201, %cst_368 {dimension_numbers = #tpu.dot_dimension_numbers<[1], [1], [0], [0], [0, 0, 1, 0], [], []>} : vector<8x8xf32>, vector<16x8xf32>, vector<8x16xf32> -> vector<8x16xf32>
    %1203 = arith.addf %1202, %1195 : vector<8x16xf32>
    %cst_369 = arith.constant dense<0xFF800000> : vector<8xf32>
    %1204 = vector.multi_reduction <maximumf>, %1203, %cst_369 [1] : vector<8x16xf32> to vector<8xf32>
    %1205 = vector.shape_cast %1204 : vector<8xf32> to vector<8x1xf32>
    %1206 = vector.broadcast %1205 : vector<8x1xf32> to vector<8x16xf32>
    %1207 = arith.subf %1203, %1206 : vector<8x16xf32>
    %1208 = math.exp %1207 : vector<8x16xf32>
    %cst_370 = arith.constant dense<0.000000e+00> : vector<8xf32>
    %1209 = vector.multi_reduction <add>, %1208, %cst_370 [1] : vector<8x16xf32> to vector<8xf32>
    %1210 = vector.shape_cast %1209 : vector<8xf32> to vector<8x1xf32>
    %1211 = tpu.reciprocal %1210 {approx = true} : vector<8x1xf32> -> vector<8x1xf32>
    %1212 = vector.broadcast %1211 : vector<8x1xf32> to vector<8x16xf32>
    %1213 = arith.mulf %1208, %1212 : vector<8x16xf32>
    %1214 = vector.extract_strided_slice %889 {offsets = [0, 0], sizes = [16, 8], strides = [1, 1]} : vector<16x32xf32> to vector<16x8xf32>
    %cst_371 = arith.constant dense<0.000000e+00> : vector<8x8xf32>
    %1215 = tpu.matmul %1213, %1214, %cst_371 {dimension_numbers = #tpu.dot_dimension_numbers<[1], [0], [0], [1], [0, 0, 1, 1], [], []>} : vector<8x16xf32>, vector<16x8xf32>, vector<8x8xf32> -> vector<8x8xf32>
    %1216 = vector.extract_strided_slice %1067 {offsets = [0, 8], sizes = [8, 8], strides = [1, 1]} : vector<8x32xf32> to vector<8x8xf32>
    %cst_372 = arith.constant 0.353553385 : f32
    %1217 = vector.broadcast %cst_372 : f32 to vector<8x8xf32>
    %1218 = arith.mulf %1216, %1217 : vector<8x8xf32>
    %1219 = vector.extract_strided_slice %889 {offsets = [0, 8], sizes = [16, 8], strides = [1, 1]} : vector<16x32xf32> to vector<16x8xf32>
    %cst_373 = arith.constant dense<0.000000e+00> : vector<8x16xf32>
    %1220 = tpu.matmul %1218, %1219, %cst_373 {dimension_numbers = #tpu.dot_dimension_numbers<[1], [1], [0], [0], [0, 0, 1, 0], [], []>} : vector<8x8xf32>, vector<16x8xf32>, vector<8x16xf32> -> vector<8x16xf32>
    %1221 = arith.addf %1220, %1195 : vector<8x16xf32>
    %cst_374 = arith.constant dense<0xFF800000> : vector<8xf32>
    %1222 = vector.multi_reduction <maximumf>, %1221, %cst_374 [1] : vector<8x16xf32> to vector<8xf32>
    %1223 = vector.shape_cast %1222 : vector<8xf32> to vector<8x1xf32>
    %1224 = vector.broadcast %1223 : vector<8x1xf32> to vector<8x16xf32>
    %1225 = arith.subf %1221, %1224 : vector<8x16xf32>
    %1226 = math.exp %1225 : vector<8x16xf32>
    %cst_375 = arith.constant dense<0.000000e+00> : vector<8xf32>
    %1227 = vector.multi_reduction <add>, %1226, %cst_375 [1] : vector<8x16xf32> to vector<8xf32>
    %1228 = vector.shape_cast %1227 : vector<8xf32> to vector<8x1xf32>
    %1229 = tpu.reciprocal %1228 {approx = true} : vector<8x1xf32> -> vector<8x1xf32>
    %1230 = vector.broadcast %1229 : vector<8x1xf32> to vector<8x16xf32>
    %1231 = arith.mulf %1226, %1230 : vector<8x16xf32>
    %1232 = vector.extract_strided_slice %889 {offsets = [0, 8], sizes = [16, 8], strides = [1, 1]} : vector<16x32xf32> to vector<16x8xf32>
    %cst_376 = arith.constant dense<0.000000e+00> : vector<8x8xf32>
    %1233 = tpu.matmul %1231, %1232, %cst_376 {dimension_numbers = #tpu.dot_dimension_numbers<[1], [0], [0], [1], [0, 0, 1, 1], [], []>} : vector<8x16xf32>, vector<16x8xf32>, vector<8x8xf32> -> vector<8x8xf32>
    %1234 = vector.extract_strided_slice %1067 {offsets = [0, 16], sizes = [8, 8], strides = [1, 1]} : vector<8x32xf32> to vector<8x8xf32>
    %cst_377 = arith.constant 0.353553385 : f32
    %1235 = vector.broadcast %cst_377 : f32 to vector<8x8xf32>
    %1236 = arith.mulf %1234, %1235 : vector<8x8xf32>
    %1237 = vector.extract_strided_slice %889 {offsets = [0, 16], sizes = [16, 8], strides = [1, 1]} : vector<16x32xf32> to vector<16x8xf32>
    %cst_378 = arith.constant dense<0.000000e+00> : vector<8x16xf32>
    %1238 = tpu.matmul %1236, %1237, %cst_378 {dimension_numbers = #tpu.dot_dimension_numbers<[1], [1], [0], [0], [0, 0, 1, 0], [], []>} : vector<8x8xf32>, vector<16x8xf32>, vector<8x16xf32> -> vector<8x16xf32>
    %1239 = arith.addf %1238, %1195 : vector<8x16xf32>
    %cst_379 = arith.constant dense<0xFF800000> : vector<8xf32>
    %1240 = vector.multi_reduction <maximumf>, %1239, %cst_379 [1] : vector<8x16xf32> to vector<8xf32>
    %1241 = vector.shape_cast %1240 : vector<8xf32> to vector<8x1xf32>
    %1242 = vector.broadcast %1241 : vector<8x1xf32> to vector<8x16xf32>
    %1243 = arith.subf %1239, %1242 : vector<8x16xf32>
    %1244 = math.exp %1243 : vector<8x16xf32>
    %cst_380 = arith.constant dense<0.000000e+00> : vector<8xf32>
    %1245 = vector.multi_reduction <add>, %1244, %cst_380 [1] : vector<8x16xf32> to vector<8xf32>
    %1246 = vector.shape_cast %1245 : vector<8xf32> to vector<8x1xf32>
    %1247 = tpu.reciprocal %1246 {approx = true} : vector<8x1xf32> -> vector<8x1xf32>
    %1248 = vector.broadcast %1247 : vector<8x1xf32> to vector<8x16xf32>
    %1249 = arith.mulf %1244, %1248 : vector<8x16xf32>
    %1250 = vector.extract_strided_slice %889 {offsets = [0, 16], sizes = [16, 8], strides = [1, 1]} : vector<16x32xf32> to vector<16x8xf32>
    %cst_381 = arith.constant dense<0.000000e+00> : vector<8x8xf32>
    %1251 = tpu.matmul %1249, %1250, %cst_381 {dimension_numbers = #tpu.dot_dimension_numbers<[1], [0], [0], [1], [0, 0, 1, 1], [], []>} : vector<8x16xf32>, vector<16x8xf32>, vector<8x8xf32> -> vector<8x8xf32>
    %1252 = vector.extract_strided_slice %1067 {offsets = [0, 24], sizes = [8, 8], strides = [1, 1]} : vector<8x32xf32> to vector<8x8xf32>
    %cst_382 = arith.constant 0.353553385 : f32
    %1253 = vector.broadcast %cst_382 : f32 to vector<8x8xf32>
    %1254 = arith.mulf %1252, %1253 : vector<8x8xf32>
    %1255 = vector.extract_strided_slice %889 {offsets = [0, 24], sizes = [16, 8], strides = [1, 1]} : vector<16x32xf32> to vector<16x8xf32>
    %cst_383 = arith.constant dense<0.000000e+00> : vector<8x16xf32>
    %1256 = tpu.matmul %1254, %1255, %cst_383 {dimension_numbers = #tpu.dot_dimension_numbers<[1], [1], [0], [0], [0, 0, 1, 0], [], []>} : vector<8x8xf32>, vector<16x8xf32>, vector<8x16xf32> -> vector<8x16xf32>
    %1257 = arith.addf %1256, %1195 : vector<8x16xf32>
    %cst_384 = arith.constant dense<0xFF800000> : vector<8xf32>
    %1258 = vector.multi_reduction <maximumf>, %1257, %cst_384 [1] : vector<8x16xf32> to vector<8xf32>
    %1259 = vector.shape_cast %1258 : vector<8xf32> to vector<8x1xf32>
    %1260 = vector.broadcast %1259 : vector<8x1xf32> to vector<8x16xf32>
    %1261 = arith.subf %1257, %1260 : vector<8x16xf32>
    %1262 = math.exp %1261 : vector<8x16xf32>
    %cst_385 = arith.constant dense<0.000000e+00> : vector<8xf32>
    %1263 = vector.multi_reduction <add>, %1262, %cst_385 [1] : vector<8x16xf32> to vector<8xf32>
    %1264 = vector.shape_cast %1263 : vector<8xf32> to vector<8x1xf32>
    %1265 = tpu.reciprocal %1264 {approx = true} : vector<8x1xf32> -> vector<8x1xf32>
    %1266 = vector.broadcast %1265 : vector<8x1xf32> to vector<8x16xf32>
    %1267 = arith.mulf %1262, %1266 : vector<8x16xf32>
    %1268 = vector.extract_strided_slice %889 {offsets = [0, 24], sizes = [16, 8], strides = [1, 1]} : vector<16x32xf32> to vector<16x8xf32>
    %cst_386 = arith.constant dense<0.000000e+00> : vector<8x8xf32>
    %1269 = tpu.matmul %1267, %1268, %cst_386 {dimension_numbers = #tpu.dot_dimension_numbers<[1], [0], [0], [1], [0, 0, 1, 1], [], []>} : vector<8x16xf32>, vector<16x8xf32>, vector<8x8xf32> -> vector<8x8xf32>
    %1270 = tpu.concatenate %1215, %1233, %1251, %1269 in 1 : vector<8x8xf32>, vector<8x8xf32>, vector<8x8xf32>, vector<8x8xf32> -> vector<8x32xf32>
    %cst_387 = arith.constant dense<0.000000e+00> : vector<8x32xf32>
    %1271 = tpu.matmul %1270, %1196, %cst_387 {dimension_numbers = #tpu.dot_dimension_numbers<[1], [0], [0], [1], [0, 0, 1, 1], [], []>} : vector<8x32xf32>, vector<32x32xf32>, vector<8x32xf32> -> vector<8x32xf32>
    %1272 = vector.broadcast %1197 : vector<1x32xf32> to vector<8x32xf32>
    %1273 = arith.addf %1271, %1272 : vector<8x32xf32>
    %1274 = arith.addf %1273, %1067 : vector<8x32xf32>
    %c1480 = arith.constant 1480 : index
    %c0_388 = arith.constant 0 : index
    %1275 = vector.load %arg2[%c1480, %c0_388] : memref<1952x144xf32, #tpu.memory_space<vmem>>, vector<1x32xf32>
    %c1488 = arith.constant 1488 : index
    %c0_389 = arith.constant 0 : index
    %1276 = vector.load %arg2[%c1488, %c0_389] : memref<1952x144xf32, #tpu.memory_space<vmem>>, vector<1x32xf32>
    %c1496 = arith.constant 1496 : index
    %c0_390 = arith.constant 0 : index
    %1277 = vector.load %arg2[%c1496, %c0_390] : memref<1952x144xf32, #tpu.memory_space<vmem>>, vector<32x32xf32>
    %c1528 = arith.constant 1528 : index
    %c0_391 = arith.constant 0 : index
    %1278 = vector.load %arg2[%c1528, %c0_391] : memref<1952x144xf32, #tpu.memory_space<vmem>>, vector<1x32xf32>
    %c1536 = arith.constant 1536 : index
    %c0_392 = arith.constant 0 : index
    %1279 = vector.load %arg2[%c1536, %c0_392] : memref<1952x144xf32, #tpu.memory_space<vmem>>, vector<32x8xf32>
    %c1568 = arith.constant 1568 : index
    %c0_393 = arith.constant 0 : index
    %1280 = vector.load %arg2[%c1568, %c0_393] : memref<1952x144xf32, #tpu.memory_space<vmem>>, vector<1x8xf32>
    %cst_394 = arith.constant dense<0.000000e+00> : vector<8xf32>
    %1281 = vector.multi_reduction <add>, %1274, %cst_394 [1] : vector<8x32xf32> to vector<8xf32>
    %1282 = vector.shape_cast %1281 : vector<8xf32> to vector<8x1xf32>
    %cst_395 = arith.constant 3.200000e+01 : f32
    %1283 = vector.broadcast %cst_395 : f32 to vector<8x1xf32>
    %1284 = arith.divf %1282, %1283 : vector<8x1xf32>
    %1285 = vector.broadcast %1284 : vector<8x1xf32> to vector<8x32xf32>
    %1286 = arith.subf %1274, %1285 : vector<8x32xf32>
    %1287 = arith.mulf %1286, %1286 : vector<8x32xf32>
    %cst_396 = arith.constant dense<0.000000e+00> : vector<8xf32>
    %1288 = vector.multi_reduction <add>, %1287, %cst_396 [1] : vector<8x32xf32> to vector<8xf32>
    %1289 = vector.shape_cast %1288 : vector<8xf32> to vector<8x1xf32>
    %cst_397 = arith.constant 3.200000e+01 : f32
    %1290 = vector.broadcast %cst_397 : f32 to vector<8x1xf32>
    %1291 = arith.divf %1289, %1290 : vector<8x1xf32>
    %1292 = vector.broadcast %1284 : vector<8x1xf32> to vector<8x32xf32>
    %1293 = arith.subf %1274, %1292 : vector<8x32xf32>
    %cst_398 = arith.constant 9.99999974E-6 : f32
    %1294 = vector.broadcast %cst_398 : f32 to vector<8x1xf32>
    %1295 = arith.addf %1291, %1294 : vector<8x1xf32>
    %1296 = math.rsqrt %1295 : vector<8x1xf32>
    %1297 = vector.broadcast %1296 : vector<8x1xf32> to vector<8x32xf32>
    %1298 = arith.mulf %1293, %1297 : vector<8x32xf32>
    %1299 = vector.broadcast %1275 : vector<1x32xf32> to vector<8x32xf32>
    %1300 = arith.mulf %1298, %1299 : vector<8x32xf32>
    %1301 = vector.broadcast %1276 : vector<1x32xf32> to vector<8x32xf32>
    %1302 = arith.addf %1300, %1301 : vector<8x32xf32>
    %cst_399 = arith.constant dense<0.000000e+00> : vector<8x32xf32>
    %1303 = tpu.matmul %1302, %1277, %cst_399 {dimension_numbers = #tpu.dot_dimension_numbers<[1], [0], [0], [1], [0, 0, 1, 1], [], []>} : vector<8x32xf32>, vector<32x32xf32>, vector<8x32xf32> -> vector<8x32xf32>
    %1304 = vector.broadcast %1278 : vector<1x32xf32> to vector<8x32xf32>
    %1305 = arith.addf %1303, %1304 : vector<8x32xf32>
    %cst_400 = arith.constant 5.000000e-01 : f32
    %1306 = vector.broadcast %cst_400 : f32 to vector<8x32xf32>
    %1307 = arith.mulf %1306, %1305 : vector<8x32xf32>
    %cst_401 = arith.constant 4.471500e-02 : f32
    %1308 = vector.broadcast %cst_401 : f32 to vector<8x32xf32>
    %1309 = arith.mulf %1308, %1305 : vector<8x32xf32>
    %1310 = arith.mulf %1309, %1305 : vector<8x32xf32>
    %1311 = arith.mulf %1310, %1305 : vector<8x32xf32>
    %1312 = arith.addf %1305, %1311 : vector<8x32xf32>
    %cst_402 = arith.constant 0.797884583 : f32
    %1313 = vector.broadcast %cst_402 : f32 to vector<8x32xf32>
    %1314 = arith.mulf %1313, %1312 : vector<8x32xf32>
    %1315 = math.tanh %1314 : vector<8x32xf32>
    %cst_403 = arith.constant 1.000000e+00 : f32
    %1316 = vector.broadcast %cst_403 : f32 to vector<8x32xf32>
    %1317 = arith.addf %1316, %1315 : vector<8x32xf32>
    %1318 = arith.mulf %1307, %1317 : vector<8x32xf32>
    %cst_404 = arith.constant dense<0.000000e+00> : vector<8x8xf32>
    %1319 = tpu.matmul %1318, %1279, %cst_404 {dimension_numbers = #tpu.dot_dimension_numbers<[1], [0], [0], [1], [0, 0, 1, 1], [], []>} : vector<8x32xf32>, vector<32x8xf32>, vector<8x8xf32> -> vector<8x8xf32>
    %1320 = vector.broadcast %1280 : vector<1x8xf32> to vector<8x8xf32>
    %1321 = arith.addf %1319, %1320 : vector<8x8xf32>
    %1322 = vector.extract_strided_slice %1194 {offsets = [0, 0], sizes = [8, 16], strides = [1, 1]} : vector<16x16xf32> to vector<8x16xf32>
    %1323 = vector.extract_strided_slice %1194 {offsets = [8, 0], sizes = [8, 16], strides = [1, 1]} : vector<16x16xf32> to vector<8x16xf32>
    %1324 = tpu.concatenate %1322, %1323 in 1 : vector<8x16xf32>, vector<8x16xf32> -> vector<8x32xf32>
    %1325 = vector.extract_strided_slice %1321 {offsets = [0, 0], sizes = [4, 8], strides = [1, 1]} : vector<8x8xf32> to vector<4x8xf32>
    %1326 = vector.extract_strided_slice %1321 {offsets = [4, 0], sizes = [4, 8], strides = [1, 1]} : vector<8x8xf32> to vector<4x8xf32>
    %1327 = tpu.concatenate %1325, %1326 in 1 : vector<4x8xf32>, vector<4x8xf32> -> vector<4x16xf32>
    %1328 = vector.extract_strided_slice %1324 {offsets = [0, 0], sizes = [8, 16], strides = [1, 1]} : vector<8x32xf32> to vector<8x16xf32>
    %1329 = vector.extract_strided_slice %1328 {offsets = [0, 0], sizes = [1, 16], strides = [1, 1]} : vector<8x16xf32> to vector<1x16xf32>
    %1330 = vector.extract_strided_slice %1328 {offsets = [1, 0], sizes = [1, 16], strides = [1, 1]} : vector<8x16xf32> to vector<1x16xf32>
    %1331 = vector.extract_strided_slice %1328 {offsets = [2, 0], sizes = [1, 16], strides = [1, 1]} : vector<8x16xf32> to vector<1x16xf32>
    %1332 = vector.extract_strided_slice %1328 {offsets = [3, 0], sizes = [1, 16], strides = [1, 1]} : vector<8x16xf32> to vector<1x16xf32>
    %1333 = vector.extract_strided_slice %1328 {offsets = [4, 0], sizes = [1, 16], strides = [1, 1]} : vector<8x16xf32> to vector<1x16xf32>
    %1334 = vector.extract_strided_slice %1328 {offsets = [5, 0], sizes = [1, 16], strides = [1, 1]} : vector<8x16xf32> to vector<1x16xf32>
    %1335 = vector.extract_strided_slice %1328 {offsets = [6, 0], sizes = [1, 16], strides = [1, 1]} : vector<8x16xf32> to vector<1x16xf32>
    %1336 = vector.extract_strided_slice %1328 {offsets = [7, 0], sizes = [1, 16], strides = [1, 1]} : vector<8x16xf32> to vector<1x16xf32>
    %1337 = tpu.concatenate %1329, %1330, %1331, %1332, %1333, %1334, %1335, %1336 in 1 : vector<1x16xf32>, vector<1x16xf32>, vector<1x16xf32>, vector<1x16xf32>, vector<1x16xf32>, vector<1x16xf32>, vector<1x16xf32>, vector<1x16xf32> -> vector<1x128xf32>
    %1338 = vector.extract_strided_slice %1324 {offsets = [0, 16], sizes = [8, 16], strides = [1, 1]} : vector<8x32xf32> to vector<8x16xf32>
    %1339 = vector.extract_strided_slice %1338 {offsets = [0, 0], sizes = [1, 16], strides = [1, 1]} : vector<8x16xf32> to vector<1x16xf32>
    %1340 = vector.extract_strided_slice %1338 {offsets = [1, 0], sizes = [1, 16], strides = [1, 1]} : vector<8x16xf32> to vector<1x16xf32>
    %1341 = vector.extract_strided_slice %1338 {offsets = [2, 0], sizes = [1, 16], strides = [1, 1]} : vector<8x16xf32> to vector<1x16xf32>
    %1342 = vector.extract_strided_slice %1338 {offsets = [3, 0], sizes = [1, 16], strides = [1, 1]} : vector<8x16xf32> to vector<1x16xf32>
    %1343 = vector.extract_strided_slice %1338 {offsets = [4, 0], sizes = [1, 16], strides = [1, 1]} : vector<8x16xf32> to vector<1x16xf32>
    %1344 = vector.extract_strided_slice %1338 {offsets = [5, 0], sizes = [1, 16], strides = [1, 1]} : vector<8x16xf32> to vector<1x16xf32>
    %1345 = vector.extract_strided_slice %1338 {offsets = [6, 0], sizes = [1, 16], strides = [1, 1]} : vector<8x16xf32> to vector<1x16xf32>
    %1346 = vector.extract_strided_slice %1338 {offsets = [7, 0], sizes = [1, 16], strides = [1, 1]} : vector<8x16xf32> to vector<1x16xf32>
    %1347 = tpu.concatenate %1339, %1340, %1341, %1342, %1343, %1344, %1345, %1346 in 1 : vector<1x16xf32>, vector<1x16xf32>, vector<1x16xf32>, vector<1x16xf32>, vector<1x16xf32>, vector<1x16xf32>, vector<1x16xf32>, vector<1x16xf32> -> vector<1x128xf32>
    %1348 = tpu.concatenate %1337, %1347 in 0 : vector<1x128xf32>, vector<1x128xf32> -> vector<2x128xf32>
    %1349 = tpu.concatenate %140, %762 in 1 : vector<2x8xf32>, vector<2x8xf32> -> vector<2x16xf32>
    %1350 = tpu.concatenate %1348, %1349 in 1 : vector<2x128xf32>, vector<2x16xf32> -> vector<2x144xf32>
    %c1576 = arith.constant 1576 : index
    %c0_405 = arith.constant 0 : index
    %1351 = vector.load %arg2[%c1576, %c0_405] : memref<1952x144xf32, #tpu.memory_space<vmem>>, vector<1x144xf32>
    %c1584 = arith.constant 1584 : index
    %c0_406 = arith.constant 0 : index
    %1352 = vector.load %arg2[%c1584, %c0_406] : memref<1952x144xf32, #tpu.memory_space<vmem>>, vector<1x144xf32>
    %c1592 = arith.constant 1592 : index
    %c0_407 = arith.constant 0 : index
    %1353 = vector.load %arg2[%c1592, %c0_407] : memref<1952x144xf32, #tpu.memory_space<vmem>>, vector<144x16xf32>
    %c1736 = arith.constant 1736 : index
    %c0_408 = arith.constant 0 : index
    %1354 = vector.load %arg2[%c1736, %c0_408] : memref<1952x144xf32, #tpu.memory_space<vmem>>, vector<1x16xf32>
    %c1744 = arith.constant 1744 : index
    %c0_409 = arith.constant 0 : index
    %1355 = vector.load %arg2[%c1744, %c0_409] : memref<1952x144xf32, #tpu.memory_space<vmem>>, vector<16x16xf32>
    %c1760 = arith.constant 1760 : index
    %c0_410 = arith.constant 0 : index
    %1356 = vector.load %arg2[%c1760, %c0_410] : memref<1952x144xf32, #tpu.memory_space<vmem>>, vector<1x16xf32>
    %cst_411 = arith.constant dense<0.000000e+00> : vector<2xf32>
    %1357 = vector.multi_reduction <add>, %1350, %cst_411 [1] : vector<2x144xf32> to vector<2xf32>
    %1358 = vector.shape_cast %1357 : vector<2xf32> to vector<2x1xf32>
    %cst_412 = arith.constant 1.440000e+02 : f32
    %1359 = vector.broadcast %cst_412 : f32 to vector<2x1xf32>
    %1360 = arith.divf %1358, %1359 : vector<2x1xf32>
    %1361 = vector.broadcast %1360 : vector<2x1xf32> to vector<2x144xf32>
    %1362 = arith.subf %1350, %1361 : vector<2x144xf32>
    %1363 = arith.mulf %1362, %1362 : vector<2x144xf32>
    %cst_413 = arith.constant dense<0.000000e+00> : vector<2xf32>
    %1364 = vector.multi_reduction <add>, %1363, %cst_413 [1] : vector<2x144xf32> to vector<2xf32>
    %1365 = vector.shape_cast %1364 : vector<2xf32> to vector<2x1xf32>
    %cst_414 = arith.constant 1.440000e+02 : f32
    %1366 = vector.broadcast %cst_414 : f32 to vector<2x1xf32>
    %1367 = arith.divf %1365, %1366 : vector<2x1xf32>
    %1368 = vector.broadcast %1360 : vector<2x1xf32> to vector<2x144xf32>
    %1369 = arith.subf %1350, %1368 : vector<2x144xf32>
    %cst_415 = arith.constant 9.99999974E-6 : f32
    %1370 = vector.broadcast %cst_415 : f32 to vector<2x1xf32>
    %1371 = arith.addf %1367, %1370 : vector<2x1xf32>
    %1372 = math.rsqrt %1371 : vector<2x1xf32>
    %1373 = vector.broadcast %1372 : vector<2x1xf32> to vector<2x144xf32>
    %1374 = arith.mulf %1369, %1373 : vector<2x144xf32>
    %1375 = vector.broadcast %1351 : vector<1x144xf32> to vector<2x144xf32>
    %1376 = arith.mulf %1374, %1375 : vector<2x144xf32>
    %1377 = vector.broadcast %1352 : vector<1x144xf32> to vector<2x144xf32>
    %1378 = arith.addf %1376, %1377 : vector<2x144xf32>
    %cst_416 = arith.constant dense<0.000000e+00> : vector<2x16xf32>
    %1379 = tpu.matmul %1378, %1353, %cst_416 {dimension_numbers = #tpu.dot_dimension_numbers<[1], [0], [0], [1], [0, 0, 1, 1], [], []>} : vector<2x144xf32>, vector<144x16xf32>, vector<2x16xf32> -> vector<2x16xf32>
    %1380 = vector.broadcast %1354 : vector<1x16xf32> to vector<2x16xf32>
    %1381 = arith.addf %1379, %1380 : vector<2x16xf32>
    %cst_417 = arith.constant 5.000000e-01 : f32
    %1382 = vector.broadcast %cst_417 : f32 to vector<2x16xf32>
    %1383 = arith.mulf %1382, %1381 : vector<2x16xf32>
    %cst_418 = arith.constant 4.471500e-02 : f32
    %1384 = vector.broadcast %cst_418 : f32 to vector<2x16xf32>
    %1385 = arith.mulf %1384, %1381 : vector<2x16xf32>
    %1386 = arith.mulf %1385, %1381 : vector<2x16xf32>
    %1387 = arith.mulf %1386, %1381 : vector<2x16xf32>
    %1388 = arith.addf %1381, %1387 : vector<2x16xf32>
    %cst_419 = arith.constant 0.797884583 : f32
    %1389 = vector.broadcast %cst_419 : f32 to vector<2x16xf32>
    %1390 = arith.mulf %1389, %1388 : vector<2x16xf32>
    %1391 = math.tanh %1390 : vector<2x16xf32>
    %cst_420 = arith.constant 1.000000e+00 : f32
    %1392 = vector.broadcast %cst_420 : f32 to vector<2x16xf32>
    %1393 = arith.addf %1392, %1391 : vector<2x16xf32>
    %1394 = arith.mulf %1383, %1393 : vector<2x16xf32>
    %cst_421 = arith.constant dense<0.000000e+00> : vector<2x16xf32>
    %1395 = tpu.matmul %1394, %1355, %cst_421 {dimension_numbers = #tpu.dot_dimension_numbers<[1], [0], [0], [1], [0, 0, 1, 1], [], []>} : vector<2x16xf32>, vector<16x16xf32>, vector<2x16xf32> -> vector<2x16xf32>
    %1396 = vector.broadcast %1356 : vector<1x16xf32> to vector<2x16xf32>
    %1397 = arith.addf %1395, %1396 : vector<2x16xf32>
    %1398 = vector.extract_strided_slice %1327 {offsets = [0, 0], sizes = [4, 8], strides = [1, 1]} : vector<4x16xf32> to vector<4x8xf32>
    %1399 = vector.extract_strided_slice %1398 {offsets = [0, 0], sizes = [1, 8], strides = [1, 1]} : vector<4x8xf32> to vector<1x8xf32>
    %1400 = vector.extract_strided_slice %1398 {offsets = [1, 0], sizes = [1, 8], strides = [1, 1]} : vector<4x8xf32> to vector<1x8xf32>
    %1401 = vector.extract_strided_slice %1398 {offsets = [2, 0], sizes = [1, 8], strides = [1, 1]} : vector<4x8xf32> to vector<1x8xf32>
    %1402 = vector.extract_strided_slice %1398 {offsets = [3, 0], sizes = [1, 8], strides = [1, 1]} : vector<4x8xf32> to vector<1x8xf32>
    %1403 = tpu.concatenate %1399, %1400, %1401, %1402 in 1 : vector<1x8xf32>, vector<1x8xf32>, vector<1x8xf32>, vector<1x8xf32> -> vector<1x32xf32>
    %1404 = vector.extract_strided_slice %1327 {offsets = [0, 8], sizes = [4, 8], strides = [1, 1]} : vector<4x16xf32> to vector<4x8xf32>
    %1405 = vector.extract_strided_slice %1404 {offsets = [0, 0], sizes = [1, 8], strides = [1, 1]} : vector<4x8xf32> to vector<1x8xf32>
    %1406 = vector.extract_strided_slice %1404 {offsets = [1, 0], sizes = [1, 8], strides = [1, 1]} : vector<4x8xf32> to vector<1x8xf32>
    %1407 = vector.extract_strided_slice %1404 {offsets = [2, 0], sizes = [1, 8], strides = [1, 1]} : vector<4x8xf32> to vector<1x8xf32>
    %1408 = vector.extract_strided_slice %1404 {offsets = [3, 0], sizes = [1, 8], strides = [1, 1]} : vector<4x8xf32> to vector<1x8xf32>
    %1409 = tpu.concatenate %1405, %1406, %1407, %1408 in 1 : vector<1x8xf32>, vector<1x8xf32>, vector<1x8xf32>, vector<1x8xf32> -> vector<1x32xf32>
    %1410 = tpu.concatenate %1403, %1409 in 0 : vector<1x32xf32>, vector<1x32xf32> -> vector<2x32xf32>
    %1411 = tpu.concatenate %318, %940 in 1 : vector<2x4xf32>, vector<2x4xf32> -> vector<2x8xf32>
    %1412 = tpu.concatenate %1410, %1411 in 1 : vector<2x32xf32>, vector<2x8xf32> -> vector<2x40xf32>
    %c1768 = arith.constant 1768 : index
    %c0_422 = arith.constant 0 : index
    %1413 = vector.load %arg2[%c1768, %c0_422] : memref<1952x144xf32, #tpu.memory_space<vmem>>, vector<1x40xf32>
    %c1776 = arith.constant 1776 : index
    %c0_423 = arith.constant 0 : index
    %1414 = vector.load %arg2[%c1776, %c0_423] : memref<1952x144xf32, #tpu.memory_space<vmem>>, vector<1x40xf32>
    %c1784 = arith.constant 1784 : index
    %c0_424 = arith.constant 0 : index
    %1415 = vector.load %arg2[%c1784, %c0_424] : memref<1952x144xf32, #tpu.memory_space<vmem>>, vector<40x16xf32>
    %c1824 = arith.constant 1824 : index
    %c0_425 = arith.constant 0 : index
    %1416 = vector.load %arg2[%c1824, %c0_425] : memref<1952x144xf32, #tpu.memory_space<vmem>>, vector<1x16xf32>
    %c1832 = arith.constant 1832 : index
    %c0_426 = arith.constant 0 : index
    %1417 = vector.load %arg2[%c1832, %c0_426] : memref<1952x144xf32, #tpu.memory_space<vmem>>, vector<16x16xf32>
    %c1848 = arith.constant 1848 : index
    %c0_427 = arith.constant 0 : index
    %1418 = vector.load %arg2[%c1848, %c0_427] : memref<1952x144xf32, #tpu.memory_space<vmem>>, vector<1x16xf32>
    %cst_428 = arith.constant dense<0.000000e+00> : vector<2xf32>
    %1419 = vector.multi_reduction <add>, %1412, %cst_428 [1] : vector<2x40xf32> to vector<2xf32>
    %1420 = vector.shape_cast %1419 : vector<2xf32> to vector<2x1xf32>
    %cst_429 = arith.constant 4.000000e+01 : f32
    %1421 = vector.broadcast %cst_429 : f32 to vector<2x1xf32>
    %1422 = arith.divf %1420, %1421 : vector<2x1xf32>
    %1423 = vector.broadcast %1422 : vector<2x1xf32> to vector<2x40xf32>
    %1424 = arith.subf %1412, %1423 : vector<2x40xf32>
    %1425 = arith.mulf %1424, %1424 : vector<2x40xf32>
    %cst_430 = arith.constant dense<0.000000e+00> : vector<2xf32>
    %1426 = vector.multi_reduction <add>, %1425, %cst_430 [1] : vector<2x40xf32> to vector<2xf32>
    %1427 = vector.shape_cast %1426 : vector<2xf32> to vector<2x1xf32>
    %cst_431 = arith.constant 4.000000e+01 : f32
    %1428 = vector.broadcast %cst_431 : f32 to vector<2x1xf32>
    %1429 = arith.divf %1427, %1428 : vector<2x1xf32>
    %1430 = vector.broadcast %1422 : vector<2x1xf32> to vector<2x40xf32>
    %1431 = arith.subf %1412, %1430 : vector<2x40xf32>
    %cst_432 = arith.constant 9.99999974E-6 : f32
    %1432 = vector.broadcast %cst_432 : f32 to vector<2x1xf32>
    %1433 = arith.addf %1429, %1432 : vector<2x1xf32>
    %1434 = math.rsqrt %1433 : vector<2x1xf32>
    %1435 = vector.broadcast %1434 : vector<2x1xf32> to vector<2x40xf32>
    %1436 = arith.mulf %1431, %1435 : vector<2x40xf32>
    %1437 = vector.broadcast %1413 : vector<1x40xf32> to vector<2x40xf32>
    %1438 = arith.mulf %1436, %1437 : vector<2x40xf32>
    %1439 = vector.broadcast %1414 : vector<1x40xf32> to vector<2x40xf32>
    %1440 = arith.addf %1438, %1439 : vector<2x40xf32>
    %cst_433 = arith.constant dense<0.000000e+00> : vector<2x16xf32>
    %1441 = tpu.matmul %1440, %1415, %cst_433 {dimension_numbers = #tpu.dot_dimension_numbers<[1], [0], [0], [1], [0, 0, 1, 1], [], []>} : vector<2x40xf32>, vector<40x16xf32>, vector<2x16xf32> -> vector<2x16xf32>
    %1442 = vector.broadcast %1416 : vector<1x16xf32> to vector<2x16xf32>
    %1443 = arith.addf %1441, %1442 : vector<2x16xf32>
    %cst_434 = arith.constant 5.000000e-01 : f32
    %1444 = vector.broadcast %cst_434 : f32 to vector<2x16xf32>
    %1445 = arith.mulf %1444, %1443 : vector<2x16xf32>
    %cst_435 = arith.constant 4.471500e-02 : f32
    %1446 = vector.broadcast %cst_435 : f32 to vector<2x16xf32>
    %1447 = arith.mulf %1446, %1443 : vector<2x16xf32>
    %1448 = arith.mulf %1447, %1443 : vector<2x16xf32>
    %1449 = arith.mulf %1448, %1443 : vector<2x16xf32>
    %1450 = arith.addf %1443, %1449 : vector<2x16xf32>
    %cst_436 = arith.constant 0.797884583 : f32
    %1451 = vector.broadcast %cst_436 : f32 to vector<2x16xf32>
    %1452 = arith.mulf %1451, %1450 : vector<2x16xf32>
    %1453 = math.tanh %1452 : vector<2x16xf32>
    %cst_437 = arith.constant 1.000000e+00 : f32
    %1454 = vector.broadcast %cst_437 : f32 to vector<2x16xf32>
    %1455 = arith.addf %1454, %1453 : vector<2x16xf32>
    %1456 = arith.mulf %1445, %1455 : vector<2x16xf32>
    %cst_438 = arith.constant dense<0.000000e+00> : vector<2x16xf32>
    %1457 = tpu.matmul %1456, %1417, %cst_438 {dimension_numbers = #tpu.dot_dimension_numbers<[1], [0], [0], [1], [0, 0, 1, 1], [], []>} : vector<2x16xf32>, vector<16x16xf32>, vector<2x16xf32> -> vector<2x16xf32>
    %1458 = vector.broadcast %1418 : vector<1x16xf32> to vector<2x16xf32>
    %1459 = arith.addf %1457, %1458 : vector<2x16xf32>
    %1460 = tpu.concatenate %1397, %1459 in 1 : vector<2x16xf32>, vector<2x16xf32> -> vector<2x32xf32>
    %c1856 = arith.constant 1856 : index
    %c0_439 = arith.constant 0 : index
    %1461 = vector.load %arg2[%c1856, %c0_439] : memref<1952x144xf32, #tpu.memory_space<vmem>>, vector<1x32xf32>
    %c1864 = arith.constant 1864 : index
    %c0_440 = arith.constant 0 : index
    %1462 = vector.load %arg2[%c1864, %c0_440] : memref<1952x144xf32, #tpu.memory_space<vmem>>, vector<1x32xf32>
    %c1872 = arith.constant 1872 : index
    %c0_441 = arith.constant 0 : index
    %1463 = vector.load %arg2[%c1872, %c0_441] : memref<1952x144xf32, #tpu.memory_space<vmem>>, vector<32x32xf32>
    %c1904 = arith.constant 1904 : index
    %c0_442 = arith.constant 0 : index
    %1464 = vector.load %arg2[%c1904, %c0_442] : memref<1952x144xf32, #tpu.memory_space<vmem>>, vector<1x32xf32>
    %c1912 = arith.constant 1912 : index
    %c0_443 = arith.constant 0 : index
    %1465 = vector.load %arg2[%c1912, %c0_443] : memref<1952x144xf32, #tpu.memory_space<vmem>>, vector<32x8xf32>
    %c1944 = arith.constant 1944 : index
    %c0_444 = arith.constant 0 : index
    %1466 = vector.load %arg2[%c1944, %c0_444] : memref<1952x144xf32, #tpu.memory_space<vmem>>, vector<1x8xf32>
    %cst_445 = arith.constant dense<0.000000e+00> : vector<2xf32>
    %1467 = vector.multi_reduction <add>, %1460, %cst_445 [1] : vector<2x32xf32> to vector<2xf32>
    %1468 = vector.shape_cast %1467 : vector<2xf32> to vector<2x1xf32>
    %cst_446 = arith.constant 3.200000e+01 : f32
    %1469 = vector.broadcast %cst_446 : f32 to vector<2x1xf32>
    %1470 = arith.divf %1468, %1469 : vector<2x1xf32>
    %1471 = vector.broadcast %1470 : vector<2x1xf32> to vector<2x32xf32>
    %1472 = arith.subf %1460, %1471 : vector<2x32xf32>
    %1473 = arith.mulf %1472, %1472 : vector<2x32xf32>
    %cst_447 = arith.constant dense<0.000000e+00> : vector<2xf32>
    %1474 = vector.multi_reduction <add>, %1473, %cst_447 [1] : vector<2x32xf32> to vector<2xf32>
    %1475 = vector.shape_cast %1474 : vector<2xf32> to vector<2x1xf32>
    %cst_448 = arith.constant 3.200000e+01 : f32
    %1476 = vector.broadcast %cst_448 : f32 to vector<2x1xf32>
    %1477 = arith.divf %1475, %1476 : vector<2x1xf32>
    %1478 = vector.broadcast %1470 : vector<2x1xf32> to vector<2x32xf32>
    %1479 = arith.subf %1460, %1478 : vector<2x32xf32>
    %cst_449 = arith.constant 9.99999974E-6 : f32
    %1480 = vector.broadcast %cst_449 : f32 to vector<2x1xf32>
    %1481 = arith.addf %1477, %1480 : vector<2x1xf32>
    %1482 = math.rsqrt %1481 : vector<2x1xf32>
    %1483 = vector.broadcast %1482 : vector<2x1xf32> to vector<2x32xf32>
    %1484 = arith.mulf %1479, %1483 : vector<2x32xf32>
    %1485 = vector.broadcast %1461 : vector<1x32xf32> to vector<2x32xf32>
    %1486 = arith.mulf %1484, %1485 : vector<2x32xf32>
    %1487 = vector.broadcast %1462 : vector<1x32xf32> to vector<2x32xf32>
    %1488 = arith.addf %1486, %1487 : vector<2x32xf32>
    %cst_450 = arith.constant dense<0.000000e+00> : vector<2x32xf32>
    %1489 = tpu.matmul %1488, %1463, %cst_450 {dimension_numbers = #tpu.dot_dimension_numbers<[1], [0], [0], [1], [0, 0, 1, 1], [], []>} : vector<2x32xf32>, vector<32x32xf32>, vector<2x32xf32> -> vector<2x32xf32>
    %1490 = vector.broadcast %1464 : vector<1x32xf32> to vector<2x32xf32>
    %1491 = arith.addf %1489, %1490 : vector<2x32xf32>
    %cst_451 = arith.constant 5.000000e-01 : f32
    %1492 = vector.broadcast %cst_451 : f32 to vector<2x32xf32>
    %1493 = arith.mulf %1492, %1491 : vector<2x32xf32>
    %cst_452 = arith.constant 4.471500e-02 : f32
    %1494 = vector.broadcast %cst_452 : f32 to vector<2x32xf32>
    %1495 = arith.mulf %1494, %1491 : vector<2x32xf32>
    %1496 = arith.mulf %1495, %1491 : vector<2x32xf32>
    %1497 = arith.mulf %1496, %1491 : vector<2x32xf32>
    %1498 = arith.addf %1491, %1497 : vector<2x32xf32>
    %cst_453 = arith.constant 0.797884583 : f32
    %1499 = vector.broadcast %cst_453 : f32 to vector<2x32xf32>
    %1500 = arith.mulf %1499, %1498 : vector<2x32xf32>
    %1501 = math.tanh %1500 : vector<2x32xf32>
    %cst_454 = arith.constant 1.000000e+00 : f32
    %1502 = vector.broadcast %cst_454 : f32 to vector<2x32xf32>
    %1503 = arith.addf %1502, %1501 : vector<2x32xf32>
    %1504 = arith.mulf %1493, %1503 : vector<2x32xf32>
    %cst_455 = arith.constant dense<0.000000e+00> : vector<2x8xf32>
    %1505 = tpu.matmul %1504, %1465, %cst_455 {dimension_numbers = #tpu.dot_dimension_numbers<[1], [0], [0], [1], [0, 0, 1, 1], [], []>} : vector<2x32xf32>, vector<32x8xf32>, vector<2x8xf32> -> vector<2x8xf32>
    %1506 = vector.broadcast %1466 : vector<1x8xf32> to vector<2x8xf32>
    %1507 = arith.addf %1505, %1506 : vector<2x8xf32>
    %c0_456 = arith.constant 0 : index
    %c0_457 = arith.constant 0 : index
    %1508 = vector.load %arg3[%c0_456, %c0_457] : memref<2x8xf32, #tpu.memory_space<vmem>>, vector<2x8xf32>
    tpu.vector_store %arg3[%c0_456, %c0_457], %1507 {strides = array<i32>} : memref<2x8xf32, #tpu.memory_space<vmem>>, vector<2x8xf32>,
    return
  }
}

</mosaic_0001>

<bundles_post_ra>
// kernel: fwd.1
= control target key start
LH: loop header
LB: loop body
LE: loop exit
PB: predicated region body
PF: predicated region fallthrough
CT: control target
= control target key end

     0   :  { %s13470_s14 = smov 2   ;;  %s15990_s0 = inlined_call_operand.vmem [shape: f32[4,128], index: 0, kind: input, shape index: {}]   ;;  %s15991_s1 = inlined_call_operand.vmem [shape: f32[1,64], index: 1, kind: input, shape index: {}]   ;;  %s15992_s2 = inlined_call_operand.vmem [shape: f32[1952,144], index: 2, kind: input, shape index: {}]   ;;  %s15993_s3 = inlined_call_operand.hbm [shape: f32[2,8], index: 3, kind: output, shape index: {}]  }
   0x1   :  { %v15_v0 = vld [vmem:[%s15990_s0] sm:$0xf] }
   0x2   :  { %20 = vrot.lane.b32.xlu0 %v15_v0, %s13470_s14 }
   0x3   :  { %8 = vsyncpa [#allocation3], 0  ;;  %s13471_s15 = smov 66   ;;  %vm23_vm0 = vcmask 15360   ;;  %v13472_v1 = vmov 0.0   ;;  %vm25_vm1 = vcmask 539648  }
   0x4   :  { %12151 = vmatprep.subr.mxu0 %v13472_v1  ;;  %12160 = vmatprep.subr.mxu1 %v13472_v1  ;;  %s15995_s0 = smov 124   ;;  %s15994_s16 = smov 125   ;;  %vm13477_vm2 = vmmov 0   ;;  %v13480_v8 = vmov 0   ;;  %v18_v9 = vld [vmem:[%s15992_s2 + $0x280] sm:$0xff]  ;;  %v17_v10 = vld [vmem:[%s15992_s2 + $0x270] sm:$0xff] }
   0x5   :  { %s13475_s17 = smov 127   ;;  %s13476_s18 = smov 61   ;;  %12157 = vmatprep.mubr.msk.f32.mxu0 %vm13477_vm2, %v13472_v1  ;;  %12192 = vmatprep.mubr.msk.f32.mxu1 %vm13477_vm2, %v13472_v1  ;;  %vm73_vm3 = vcmask 1043456   ;;  %vm36_vm4 = vcmask 523264   ;;  %v16_v28 = vld [vmem:[%s15992_s2 + $0x260] sm:$0xff]  ;;  %vm76_vm5 = vcmask 162816  }
   0x6   :  { %27 = vrot.lane.b32.xlu0 %v15_v0, %s13471_s15  ;;  %s13478_s19 = smov 126   ;;  %s13479_s20 = smov 60   ;;  %13157 = vset.pattern.permute.xlu1 %v13480_v8  ;;  %v170_v38 = vld [vmem:[%s15992_s2 + $0x290] sm:$0xff]  ;;  %v13598_v43 = vld [vmem:[%s15992_s2 + $0x1a0] sm:$0xff]  ;;  %vm407_vm7 = vcmask 326656   ;;  %vm283_vm8 = vcmask 1039360  }
   0x7   :  { %13158 = vset.pattern.permute.xlu0 %v13480_v8  ;;  %s13481_s21 = smov 64   ;;  %s13482_s22 = smov 63   ;;  %v13592_v42 = vld [vmem:[%s15992_s2 + $0x1b0] sm:$0xff]  ;;  %v13612_v45 = vld [vmem:[%s15992_s2 + $0x180] sm:$0xff]  ;;  %vm197_vm10 = vcmask 261120   ;;  %vm754_vm11 = vcmask 64512  }
   0x8   :  { %s13483_s25 = smov 62   ;;  %12161 = vmatpush3.msra.mxu1 %v13592_v42  ;;  %v13606_v44 = vld [vmem:[%s15992_s2 + $0x190] sm:$0xff]  ;;  %v13632_v50 = vld [vmem:[%s15992_s2 + $0x160] sm:$0xff]  ;;  %s13484_s30 = smov 96   ;;  %vm838_vm12 = vcmask 130048   ;;  %vm1576_vm13 = vcmask 195584  }
   0x9   :  { %12162 = vmatprep.subr.mxu1 %v13472_v1  ;;  %v13624_v49 = vld [vmem:[%s15992_s2 + $0x170] sm:$0xff]  ;;  %v13651_v55 = vld [vmem:[%s15992_s2 + $0x140] sm:$0xff]  ;;  %s13486_s23 = smov 120   ;;  %s13487_s24 = smov 56   ;;  %vm184_vm14 = vcmask 7168   ;;  %vm186_vm15 = vcmask 269312  }
   0xa   :  { %12163 = vmatpush3.msra.mxu1 %v13598_v43  ;;  %v13642_v54 = vld [vmem:[%s15992_s2 + $0x150] sm:$0xff]  ;;  %v13668_v57 = vld [vmem:[%s15992_s2 + $0x120] sm:$0xff]  ;;  %s13488_s26 = smov 80   ;;  %s13489_s27 = smov 112  }
   0xb   :  { %12164 = vmatprep.subr.mxu1 %v13472_v1  ;;  %v13658_v56 = vld [vmem:[%s15992_s2 + $0x130] sm:$0xff]  ;;  %v13685_v59 = vld [vmem:[%s15992_s2 + $0x100] sm:$0xff]  ;;  %s13490_s28 = smov 48   ;;  %s13491_s29 = smov 72  }
   0xc   :  { %12165 = vmatpush3.msra.mxu1 %v13606_v44  ;;  %v13677_v58 = vld [vmem:[%s15992_s2 + $0x110] sm:$0xff]  ;;  %v361_v61 = vld [vmem:[%s15992_s2 + $0x420] sm:$0xff]  ;;  %s13492_s4 = smov 104   ;;  %s13494_s5 = smov 8  }
   0xd   :  { %12166 = vmatprep.subr.mxu1 %v13472_v1  ;;  %v362_v60 = vld [vmem:[%s15992_s2 + $0x430] sm:$0xff]  ;;  %v13706_v63 = vld [vmem:[%s15992_s2 + $0xe0] sm:$0xff]  ;;  %s13495_s6 = smov 16   ;;  %s13496_s13 = smov 24  }
   0xe   :  { %12167 = vmatpush3.msra.mxu1 %v13612_v45  ;;  %v13700_v62 = vld [vmem:[%s15992_s2 + $0xf0] sm:$0xff]  ;;  %s13501_s11 = smov 32   ;;  %s13502_s12 = smov 30  }
   0xf   :  { %12168 = vmatprep.subr.mxu1 %v13472_v1  ;;  %v13713_v0 = vld [vmem:[%s15992_s2 + $0xd0] sm:$0xff]  ;;  %s15997_s9 = smov 125   ;;  %s13506_s10 = smov 29  }
  0x10   :  { %12169 = vmatpush3.msra.mxu1 %v13624_v49  ;;  %s13508_s7 = smov 15  }
  0x11   :  { %12170 = vmatprep.subr.mxu1 %v13472_v1 }
  0x12   :  { %12171 = vmatpush3.msra.mxu1 %v13632_v50 }
  0x13   :  { %12172 = vmatprep.subr.mxu1 %v13472_v1 }
  0x14   :  { %12173 = vmatpush3.msra.mxu1 %v13642_v54 }
  0x15   :  { %12174 = vmatprep.subr.mxu1 %v13472_v1 }
  0x16   :  { %12175 = vmatpush3.msra.mxu1 %v13651_v55 }
  0x17   :  { %12176 = vmatprep.subr.mxu1 %v13472_v1 }
  0x18   :  { %12177 = vmatpush3.msra.mxu1 %v13658_v56 }
  0x19   :  { %12178 = vmatprep.subr.mxu1 %v13472_v1 }
  0x1a   :  { %12179 = vmatpush3.msra.mxu1 %v13668_v57 }
  0x1b   :  { %12180 = vmatprep.subr.mxu1 %v13472_v1 }
  0x1c   :  { %12181 = vmatpush3.msra.mxu1 %v13677_v58 }
  0x1d   :  { %12182 = vmatprep.subr.mxu1 %v13472_v1 }
  0x1e   :  { %12183 = vmatpush3.msra.mxu1 %v13685_v59 }
  0x1f   :  { %12184 = vmatprep.subr.mxu1 %v13472_v1 }
  0x20   :  { %12185 = vmatpush3.msra.mxu1 %v13700_v62 }
  0x21   :  { %12186 = vmatprep.subr.mxu1 %v13472_v1 }
  0x22   :  { %12187 = vmatpush3.msra.mxu1 %v13706_v63 }
  0x23   :  { %12188 = vmatprep.subr.mxu1 %v13472_v1 }
  0x24   :  { %12189 = vmatpush3.msra.mxu1 %v13713_v0 }
  0x25   :  { %12190 = vmatprep.subr.mxu1 %v13472_v1 }
  0x74   :  { %v21_v2 = vpop.permute.xlu0 %20 }
  0x75   :  { %v24_v3 = vsel %vm23_vm0, 0.0, %v21_v2  ;;  %v13722_v2 = vld [vmem:[%s15992_s2 + $0xc0] sm:$0xff] }
  0x76   :  { %v26_v4 = vsel %vm25_vm1, %v24_v3, 0.0  ;;  %12191 = vmatpush3.msra.mxu1 %v13722_v2 }
  0x77   :  { %60 = vrot.lane.b32.xlu0 %v26_v4, %s15995_s0  ;;  %53 = vrot.lane.b32.xlu1 %v26_v4, %s15994_s16 }
  0x78   :  { %v28_v5 = vpop.permute.xlu0 %27  ;;  %12243 = vmatprep.subr.mxu1 %v13472_v1 }
  0x79   :  { %v30_v6 = vsel %vm23_vm0, 0.0, %v28_v5 }
  0x7a   :  { %v31_v7 = vsel %vm25_vm1, %v30_v6, 0.0 }
  0x7b   :  { %39 = vrot.lane.b32.xlu0 %v26_v4, %s13475_s17  ;;  %56 = vrot.lane.b32.xlu1 %v31_v7, %s13476_s18 }
  0x7f   :  { %46 = vrot.lane.b32.xlu0 %v26_v4, %s13478_s19  ;;  %63 = vrot.lane.b32.xlu1 %v31_v7, %s13479_s20 }
  0x83   :  { %33 = vrot.lane.b32.xlu0 %v31_v7, %s13481_s21  ;;  %42 = vrot.lane.b32.xlu1 %v31_v7, %s13482_s22 }
  0x87   :  { %49 = vrot.lane.b32.xlu1 %v31_v7, %s13483_s25  ;;  %161 = vperm.xlu0 %13158, %v18_v9  }
  0x8b   :  { %155 = vperm.xlu1 %13157, %v17_v10  }
  0xe9   :  { %v54_v11 = vpop.permute.xlu1 %53  ;;  %v61_v12 = vpop.permute.xlu0 %60 }
  0xed   :  { %v57_v13 = vpop.permute.xlu1 %56  ;;  %v40_v14 = vpop.permute.xlu0 %39 }
  0xee   :  { %v59_v19 = vsel %vm36_vm4, %v54_v11, %v57_v13 }
  0xef   :  { %v71_v21 = vrot.slane %v59_v19, 4 }
  0xf1   :  { %v64_v15 = vpop.permute.xlu1 %63  ;;  %v47_v17 = vpop.permute.xlu0 %46 }
  0xf2   :  { %v66_v16 = vsel %vm36_vm4, %v61_v12, %v64_v15 }
  0xf3   :  { %12152 = vmatpush3.msk.msra.mxu0 %vm73_vm3, %v66_v16 }
  0xf4   :  { %12153 = vmatprep.subr.mxu0 %v13472_v1 }
  0xf5   :  { %v43_v18 = vpop.permute.xlu1 %42  ;;  %v34_v23 = vpop.permute.xlu0 %33 }
  0xf6   :  { %v45_v20 = vsel %vm36_vm4, %v40_v14, %v43_v18  ;;  %v37_v27 = vsel %vm36_vm4, %v26_v4, %v34_v23 }
  0xf7   :  { %v68_v22 = vrot.slane %v45_v20, 4 }
  0xf9   :  { %v50_v24 = vpop.permute.xlu1 %49  ;;  %v74_v29 = vsel %vm73_vm3, %v37_v27, %v68_v22 }
  0xfa   :  { %v52_v25 = vsel %vm36_vm4, %v47_v17, %v50_v24  ;;  %v360_v17 = vld [vmem:[%s15992_s2 + $0x410] sm:$0xff] }
  0xfb   :  { %v75_v26 = vsel %vm73_vm3, %v52_v25, %v71_v21 }
  0xfc   :  { %12154 = vmatpush3.msra.mxu0 %v75_v26 }
  0xfd   :  { %12155 = vmatprep.subr.mxu0 %v13472_v1 }
  0xfe   :  { %12156 = vmatpush3.msra.mxu0 %v74_v29 }
  0xff   :  { %12158 = vmatmul.mubr.msk.f32.vlgmr.msra.gmra.mxu0 %vm76_vm5, %v16_v28  ;;  %12195 = vmatprep.subr.mxu0 %v13472_v1  ;;  %vm1982_vm5 = vcmask 515072  }
 0x100   :  { %12205 = vmatprep.mubr.msk.f32.mxu0 %vm13477_vm2, %v13472_v1 }
 0x102   :  { %v162_v32 = vpop.permute.xlu0 %161 }
 0x106   :  { %v156_v30 = vpop.permute.xlu1 %155 }
 0x1bf   :  { %v149_v31 = vpop.f32.mrf.mxu0 }
 0x1c0   :  { %v158_v33 = vmul.f32 %v156_v30, %v149_v31 }
 0x1c1   :  { %v12159_v34 = vpop.f32.mrf.mxu0 }
 0x1c2   :  { %v164_v35 = vadd.f32 %v162_v32, %v158_v33 }
 0x1c4   :  { %v166_v36 = vmul.f32 1.442695, %v164_v35  ;;  %vm165_vm6 = vcmp.gt.f32.partialorder %v164_v35, 0.0 }
 0x1c6   :  { %13162 = vpow2.f32 %v166_v36 }
 0x1d3   :  { %v13163_v37 = vpop.eup %13162 }
 0x1d4   :  { %v11453_v39 = vadd.f32 -1.0, %v13163_v37 }
 0x1d6   :  { %v169_v40 = vsel %vm165_vm6, %v164_v35, %v11453_v39  ;;  %v661_v39 = vld [vmem:[%s15992_s2 + $0x310] sm:$0xff]  ;;  %vm2101_vm6 = vcmask 97280  }
 0x1d7   :  { %v13583_v41 = vadd.f32 %v170_v38, %v169_v40 }
 0x1d9   :  { %363 = vrot.lane.b32.xlu1 %v13583_v41, %s13470_s14 }
 0x1dd   :  { %368 = vrot.lane.b32.xlu1 %v13583_v41, %s13471_s15  ;;  %s13485_s15 = smov 88  }
 0x24b   :  { %v364_v46 = vpop.permute.xlu1 %363 }
 0x24c   :  { %v366_v47 = vsel %vm23_vm0, 0.0, %v364_v46 }
 0x24d   :  { %v13618_v48 = vsel %vm25_vm1, %v366_v47, 0.0 }
 0x24e   :  { %400 = vrot.lane.b32.xlu0 %v13618_v48, %s15995_s0  ;;  %s13505_s0 = smov 28  }
 0x24f   :  { %v369_v51 = vpop.permute.xlu1 %368 }
 0x250   :  { %v371_v52 = vsel %vm23_vm0, 0.0, %v369_v51 }
 0x251   :  { %v372_v53 = vsel %vm25_vm1, %v371_v52, 0.0  ;;  %v13835_v52 = vld [vmem:[%s15992_s2 + $0x1d0] sm:$0xff] }
 0x252   :  { %393 = vrot.lane.b32.xlu0 %v13618_v48, %s15994_s16  ;;  %403 = vrot.lane.b32.xlu1 %v372_v53, %s13479_s20  ;;  %s13493_s20 = smov 40   ;;  %s15996_s16 = smov 124  }
 0x256   :  { %386 = vrot.lane.b32.xlu0 %v13618_v48, %s13478_s19  ;;  %396 = vrot.lane.b32.xlu1 %v372_v53, %s13476_s18  ;;  %s13503_s18 = smov 31  }
 0x25a   :  { %379 = vrot.lane.b32.xlu0 %v13618_v48, %s13475_s17  ;;  %389 = vrot.lane.b32.xlu1 %v372_v53, %s13483_s25  ;;  %s13497_s25 = smov 1  }
 0x25e   :  { %374 = vrot.lane.b32.xlu0 %v372_v53, %s13481_s21  ;;  %382 = vrot.lane.b32.xlu1 %v372_v53, %s13482_s22 }
 0x262   :  { %489 = vperm.xlu0 %13158, %v362_v60   ;;  %483 = vperm.xlu1 %13157, %v361_v61  }
 0x266   :  { %280 = vrot.lane.b32.xlu1 %v13583_v41, %s13475_s17 }
 0x2c0   :  { %v401_v3 = vpop.permute.xlu0 %400 }
 0x2c4   :  { %v394_v4 = vpop.permute.xlu0 %393  ;;  %v404_v5 = vpop.permute.xlu1 %403 }
 0x2c5   :  { %v406_v6 = vsel %vm36_vm4, %v401_v3, %v404_v5 }
 0x2c6   :  { %12196 = vmatpush3.msra.mxu0 %v406_v6 }
 0x2c7   :  { %12197 = vmatprep.subr.mxu0 %v13472_v1 }
 0x2c8   :  { %v387_v7 = vpop.permute.xlu0 %386  ;;  %v397_v9 = vpop.permute.xlu1 %396 }
 0x2c9   :  { %v399_v10 = vsel %vm36_vm4, %v394_v4, %v397_v9 }
 0x2ca   :  { %12198 = vmatpush3.msra.mxu0 %v399_v10 }
 0x2cb   :  { %12199 = vmatprep.subr.mxu0 %v13472_v1 }
 0x2cc   :  { %v380_v11 = vpop.permute.xlu0 %379  ;;  %v390_v12 = vpop.permute.xlu1 %389 }
 0x2cd   :  { %v392_v13 = vsel %vm36_vm4, %v387_v7, %v390_v12 }
 0x2ce   :  { %12200 = vmatpush3.msra.mxu0 %v392_v13 }
 0x2cf   :  { %12201 = vmatprep.subr.mxu0 %v13472_v1 }
 0x2d0   :  { %v375_v14 = vpop.permute.xlu0 %374  ;;  %v383_v15 = vpop.permute.xlu1 %382 }
 0x2d1   :  { %v385_v16 = vsel %vm36_vm4, %v380_v11, %v383_v15  ;;  %v377_v18 = vsel %vm36_vm4, %v13618_v48, %v375_v14 }
 0x2d2   :  { %12202 = vmatpush3.msra.mxu0 %v385_v16 }
 0x2d3   :  { %12203 = vmatprep.subr.mxu0 %v13472_v1 }
 0x2d4   :  { %12204 = vmatpush3.msra.mxu0 %v377_v18 }
 0x2d5   :  { %12206 = vmatmul.mubr.msk.f32.vlgmr.msra.gmra.mxu0 %vm407_vm7, %v360_v17  ;;  %12208 = vmatprep.subr.mxu0 %v13472_v1 }
 0x2d6   :  { %12209 = vmatpush3.msra.mxu0 %v13592_v42  ;;  %12240 = vmatprep.mubr.msk.f32.mxu0 %vm13477_vm2, %v13472_v1  ;;  %v660_v42 = vld [vmem:[%s15992_s2 + $0x300] sm:$0xff] }
 0x2d7   :  { %12210 = vmatprep.subr.mxu0 %v13472_v1 }
 0x2d8   :  { %12211 = vmatpush3.msra.mxu0 %v13598_v43  ;;  %v659_v43 = vld [vmem:[%s15992_s2 + $0x2f0] sm:$0xff] }
 0x2d9   :  { %12212 = vmatprep.subr.mxu0 %v13472_v1 }
 0x2da   :  { %12213 = vmatpush3.msra.mxu0 %v13606_v44  ;;  %v658_v44 = vld [vmem:[%s15992_s2 + $0x2e0] sm:$0xff] }
 0x2db   :  { %12214 = vmatprep.subr.mxu0 %v13472_v1 }
 0x2dc   :  { %12215 = vmatpush3.msra.mxu0 %v13612_v45 }
 0x2dd   :  { %v484_v19 = vpop.permute.xlu1 %483  ;;  %12216 = vmatprep.subr.mxu0 %v13472_v1  ;;  %v490_v25 = vpop.permute.xlu0 %489 }
 0x2de   :  { %12217 = vmatpush3.msra.mxu0 %v13624_v49 }
 0x2df   :  { %12218 = vmatprep.subr.mxu0 %v13472_v1 }
 0x2e0   :  { %12219 = vmatpush3.msra.mxu0 %v13632_v50 }
 0x2e1   :  { %v281_v20 = vpop.permute.xlu1 %280  ;;  %12220 = vmatprep.subr.mxu0 %v13472_v1 }
 0x2e2   :  { %v284_v21 = vsel %vm283_vm8, %v281_v20, %v13583_v41  ;;  %12221 = vmatpush3.msra.mxu0 %v13642_v54  ;;  %v13840_v54 = vld [vmem:[%s15992_s2 + $0x1c0] sm:$0xff] }
 0x2e3   :  { %v285_v22 = vmax.f32 %v13583_v41, %v284_v21  ;;  %12222 = vmatprep.subr.mxu0 %v13472_v1  ;;  %v578_v41 = vld [vmem:[%s15992_s2 + $0x220] sm:$0x3] }
 0x2e4   :  { %12223 = vmatpush3.msra.mxu0 %v13651_v55 }
 0x2e5   :  { %12193 = vmatmul.mubr.f32.vlgmr.msra.gmra.mxu1 %v285_v22  ;;  %12224 = vmatprep.subr.mxu0 %v13472_v1 }
 0x2e6   :  { %12225 = vmatpush3.msra.mxu0 %v13658_v56  ;;  %12245 = vmatprep.mubr.msk.f32.mxu1 %vm13477_vm2, %v13472_v1 }
 0x2e7   :  { %12226 = vmatprep.subr.mxu0 %v13472_v1 }
 0x2e8   :  { %12227 = vmatpush3.msra.mxu0 %v13668_v57 }
 0x2e9   :  { %12228 = vmatprep.subr.mxu0 %v13472_v1 }
 0x2ea   :  { %12229 = vmatpush3.msra.mxu0 %v13677_v58 }
 0x2eb   :  { %12230 = vmatprep.subr.mxu0 %v13472_v1 }
 0x2ec   :  { %12231 = vmatpush3.msra.mxu0 %v13685_v59 }
 0x2ed   :  { %12232 = vmatprep.subr.mxu0 %v13472_v1 }
 0x2ee   :  { %12233 = vmatpush3.msra.mxu0 %v13700_v62 }
 0x2ef   :  { %12234 = vmatprep.subr.mxu0 %v13472_v1 }
 0x2f0   :  { %12235 = vmatpush3.msra.mxu0 %v13706_v63 }
 0x2f1   :  { %12236 = vmatprep.subr.mxu0 %v13472_v1 }
 0x2f2   :  { %12237 = vmatpush3.msra.mxu0 %v13713_v0 }
 0x2f3   :  { %12238 = vmatprep.subr.mxu0 %v13472_v1 }
 0x2f4   :  { %12239 = vmatpush3.msra.mxu0 %v13722_v2 }
 0x395   :  { %v477_v23 = vpop.f32.mrf.mxu0 }
 0x396   :  { %v486_v24 = vmul.f32 %v484_v19, %v477_v23 }
 0x397   :  { %v12207_v26 = vpop.f32.mrf.mxu0 }
 0x398   :  { %v492_v27 = vadd.f32 %v490_v25, %v486_v24 }
 0x39a   :  { %v494_v28 = vmul.f32 1.442695, %v492_v27  ;;  %vm493_vm9 = vcmp.gt.f32.partialorder %v492_v27, 0.0 }
 0x39c   :  { %13164 = vpow2.f32 %v494_v28 }
 0x3a5   :  { %v13781_v29 = vpop.f32.mrf.mxu1 }
 0x3a6   :  { %357 = vrot.lane.b32.xlu1 %v13781_v29, %s13484_s30 }
 0x3a7   :  { %v12194_v30 = vpop.f32.mrf.mxu1 }
 0x3a9   :  { %v13165_v31 = vpop.eup %13164 }
 0x3aa   :  { %v11457_v32 = vadd.f32 -1.0, %v13165_v31 }
 0x3ac   :  { %v497_v33 = vsel %vm493_vm9, %v492_v27, %v11457_v32  ;;  %vm5594_vm9 = vcmask 277504  }
 0x3ad   :  { %499 = vrot.lane.b32.xlu0 %v497_v33, %s13475_s17 }
 0x418   :  { %v13810_v45 = vpop.permute.xlu1 %357 }
 0x41f   :  { %v500_v34 = vpop.permute.xlu0 %499 }
 0x420   :  { %v502_v35 = vsel %vm283_vm8, %v500_v34, %v497_v33 }
 0x421   :  { %v503_v36 = vmax.f32 %v497_v33, %v502_v35 }
 0x423   :  { %12241 = vmatmul.mubr.f32.vlgmr.msra.gmra.mxu0 %v503_v36 }
 0x4e3   :  { %v13787_v37 = vpop.f32.mrf.mxu0 }
 0x4e4   :  { %v579_v38 = vmul.f32 %v13787_v37, %v13787_v37 }
 0x4e5   :  { %v12242_v40 = vpop.f32.mrf.mxu0 }
 0x4e6   :  { %12244 = vmatpush3.xpose.msk.msra.mxu1 %vm36_vm4, %v579_v38 }
 0x4e7   :  { %12248 = vmatprep.subr.mxu1 %v661_v39 }
 0x4e9   :  { %12246 = vmatmul.mubr.msk.f32.vlgmr.msra.gmra.mxu1 %vm36_vm4, %v578_v41 }
 0x4ea   :  { %12249 = vmatpush3.msra.mxu1 %v661_v39  ;;  %12256 = vmatprep.mubr.msk.f32.mxu1 %vm197_vm10, %v13781_v29 }
 0x4eb   :  { %12250 = vmatprep.subr.mxu1 %v660_v42 }
 0x4ec   :  { %12251 = vmatpush3.msra.mxu1 %v660_v42 }
 0x4ed   :  { %12252 = vmatprep.subr.mxu1 %v659_v43 }
 0x4ee   :  { %12253 = vmatpush3.msra.mxu1 %v659_v43 }
 0x4ef   :  { %12254 = vmatprep.subr.mxu1 %v658_v44 }
 0x4f0   :  { %12255 = vmatpush3.msra.mxu1 %v658_v44 }
 0x4f1   :  { %12257 = vmatmul.mubr.msk.f32.vlgmr.msra.gmra.mxu1 %vm197_vm10, %v13810_v45 }
 0x5a9   :  { %v13814_v46 = vpop.f32.mrf.mxu1 }
 0x5ab   :  { %v12247_v47 = vpop.f32.mrf.mxu1 }
 0x5b1   :  { %v13816_v48 = vpop.f32.mrf.mxu1 }
 0x5b2   :  { %752 = vrot.lane.b32.xlu0 %v13816_v48, %s13484_s30 }
 0x5b3   :  { %v13820_v49 = vpop.f32.mrf.mxu1 }
 0x5b4   :  { %750 = vrot.lane.b32.xlu1 %v13820_v49, %s13484_s30  ;;  %12263 = vmatprep.mubr.msk.f32.mxu1 %vm754_vm11, %v13820_v49 }
 0x624   :  { %v753_v50 = vpop.permute.xlu0 %752 }
 0x625   :  { %12259 = vmatprep.subr.msk.mxu1 %vm754_vm11, %v753_v50 }
 0x626   :  { %12260 = vmatpush3.xpose.msk.msra.mxu1 %vm754_vm11, %v753_v50  ;;  %v751_v51 = vpop.permute.xlu1 %750 }
 0x627   :  { %12261 = vmatprep.subr.msk.mxu1 %vm754_vm11, %v751_v51 }
 0x62a   :  { %12262 = vmatpush3.xpose.msk.msra.mxu1 %vm754_vm11, %v751_v51 }
 0x62d   :  { %12264 = vmatmul.mubr.msk.f32.vlgmr.msra.gmra.mxu1 %vm754_vm11, %v13816_v48 }
 0x6ed   :  { %v12265_v53 = vpop.f32.mrf.mxu1 }
 0x6ee   :  { %v835_v55 = vadd.f32 %v12265_v53, %v13835_v52 }
 0x6ef   :  { %v829_v56 = vpop.f32.mrf.mxu1 }
 0x6f0   :  { %v830_v57 = vadd.f32 %v829_v56, %v13840_v54  ;;  %v842_v58 = vsel %vm838_vm12, %v835_v55, -inf }
 0x6f1   :  { %843 = vmax.xlane.f32.xlu1 %v842_v58 }
 0x6f2   :  { %v839_v59 = vsel %vm838_vm12, %v830_v57, -inf }
 0x6f3   :  { %840 = vmax.xlane.f32.xlu0 %v839_v59 }
 0x702   :  { %863 = vrot.lane.b32.xlu1 %v13816_v48, %s13481_s21 }
 0x706   :  { %954 = vrot.lane.b32.xlu1 %v13816_v48, %s13485_s15 }
 0x70a   :  { %952 = vrot.lane.b32.xlu1 %v13820_v49, %s13485_s15 }
 0x70e   :  { %950 = vrot.lane.b32.xlu1 %v13816_v48, %s13486_s23 }
 0x77a   :  { %v844_v60 = vpop.xlane.xlu1 %843 }
 0x77b   :  { %v846_v61 = vsub.f32 %v835_v55, %v844_v60 }
 0x77c   :  { %v841_v62 = vpop.xlane.xlu0 %840 }
 0x77d   :  { %v849_v63 = vmul.f32 1.442695, %v846_v61  ;;  %v845_v0 = vsub.f32 %v830_v57, %v841_v62 }
 0x77e   :  { %v864_v2 = vpop.permute.xlu1 %863 }
 0x77f   :  { %13166 = vpow2.f32 %v849_v63  ;;  %v847_v3 = vmul.f32 1.442695, %v845_v0  ;;  %12266 = vmatprep.subr.mxu0 %v864_v2 }
 0x780   :  { %12267 = vmatpush3.msra.mxu0 %v864_v2 }
 0x781   :  { %13168 = vpow2.f32 %v847_v3 }
 0x782   :  { %v955_v12 = vpop.permute.xlu1 %954 }
 0x786   :  { %v953_v18 = vpop.permute.xlu1 %952 }
 0x78a   :  { %v951_v19 = vpop.permute.xlu1 %950 }
 0x78c   :  { %v13167_v4 = vpop.eup %13166 }
 0x78d   :  { %v854_v5 = vsel %vm838_vm12, %v13167_v4, 0.0 }
 0x78e   :  { %v13169_v6 = vpop.eup %13168  ;;  %855 = vadd.xlane.f32.xlu0 %v854_v5 }
 0x78f   :  { %v851_v7 = vsel %vm838_vm12, %v13169_v6, 0.0 }
 0x792   :  { %852 = vadd.xlane.f32.xlu0 %v851_v7 }
 0x7a8   :  { %861 = vrot.lane.b32.xlu0 %v13820_v49, %s13481_s21 }
 0x7ac   :  { %948 = vrot.lane.b32.xlu0 %v13820_v49, %s13486_s23 }
 0x817   :  { %v856_v9 = vpop.xlane.xlu0 %855 }
 0x818   :  { %13170 = vrcp.f32 %v856_v9 }
 0x81b   :  { %v853_v10 = vpop.xlane.xlu0 %852 }
 0x81c   :  { %13172 = vrcp.f32 %v853_v10 }
 0x81f   :  { %v862_v11 = vpop.permute.xlu0 %861 }
 0x820   :  { %12268 = vmatprep.subr.mxu0 %v862_v11 }
 0x821   :  { %12269 = vmatpush3.msra.mxu0 %v862_v11 }
 0x822   :  { %12273 = vmatprep.subr.msk.mxu0 %vm754_vm11, %v955_v12 }
 0x823   :  { %v949_v17 = vpop.permute.xlu0 %948 }
 0x825   :  { %v13171_v13 = vpop.eup %13170 }
 0x826   :  { %v860_v16 = vmul.f32 %v13171_v13, %v13167_v4 }
 0x829   :  { %v13173_v14 = vpop.eup %13172 }
 0x82a   :  { %v859_v15 = vmul.f32 %v13173_v14, %v13169_v6 }
 0x82c   :  { %12270 = vmatprep.mubr.msk.f32.mxu0 %vm838_vm12, %v859_v15 }
 0x82d   :  { %12271 = vmatmul.mubr.msk.f32.vlgmr.msra.gmra.mxu0 %vm838_vm12, %v860_v16 }
 0x82e   :  { %12274 = vmatpush3.xpose.msk.msra.mxu0 %vm754_vm11, %v955_v12  ;;  %12277 = vmatprep.mubr.msk.f32.mxu0 %vm754_vm11, %v949_v17 }
 0x82f   :  { %12275 = vmatprep.subr.msk.mxu0 %vm754_vm11, %v953_v18 }
 0x832   :  { %12276 = vmatpush3.xpose.msk.msra.mxu0 %vm754_vm11, %v953_v18 }
 0x835   :  { %12278 = vmatmul.mubr.msk.f32.vlgmr.msra.gmra.mxu0 %vm754_vm11, %v951_v19 }
 0x8ed   :  { %v13868_v20 = vpop.f32.mrf.mxu0 }
 0x8ef   :  { %v13870_v21 = vpop.f32.mrf.mxu0 }
 0x8f5   :  { %v12279_v22 = vpop.f32.mrf.mxu0 }
 0x8f6   :  { %v1036_v23 = vadd.f32 %v12279_v22, %v13835_v52 }
 0x8f7   :  { %v1030_v24 = vpop.f32.mrf.mxu0 }
 0x8f8   :  { %v1031_v25 = vadd.f32 %v1030_v24, %v13840_v54  ;;  %v1042_v26 = vsel %vm838_vm12, %v1036_v23, -inf }
 0x8f9   :  { %1043 = vmax.xlane.f32.xlu1 %v1042_v26 }
 0x8fa   :  { %v1039_v27 = vsel %vm838_vm12, %v1031_v25, -inf }
 0x8fb   :  { %1040 = vmax.xlane.f32.xlu0 %v1039_v27 }
 0x90a   :  { %1063 = vrot.lane.b32.xlu1 %v13816_v48, %s13487_s24 }
 0x90e   :  { %1154 = vrot.lane.b32.xlu1 %v13816_v48, %s13488_s26 }
 0x912   :  { %1152 = vrot.lane.b32.xlu1 %v13820_v49, %s13488_s26 }
 0x916   :  { %1150 = vrot.lane.b32.xlu1 %v13816_v48, %s13489_s27 }
 0x982   :  { %v1044_v28 = vpop.xlane.xlu1 %1043 }
 0x983   :  { %v1046_v30 = vsub.f32 %v1036_v23, %v1044_v28 }
 0x984   :  { %v1041_v31 = vpop.xlane.xlu0 %1040 }
 0x985   :  { %v1049_v32 = vmul.f32 1.442695, %v1046_v30  ;;  %v1045_v33 = vsub.f32 %v1031_v25, %v1041_v31 }
 0x986   :  { %v1064_v34 = vpop.permute.xlu1 %1063 }
 0x987   :  { %13174 = vpow2.f32 %v1049_v32  ;;  %v1047_v35 = vmul.f32 1.442695, %v1045_v33  ;;  %12280 = vmatprep.subr.mxu1 %v1064_v34 }
 0x988   :  { %12281 = vmatpush3.msra.mxu1 %v1064_v34 }
 0x989   :  { %13176 = vpow2.f32 %v1047_v35 }
 0x98a   :  { %v1155_v44 = vpop.permute.xlu1 %1154 }
 0x98e   :  { %v1153_v56 = vpop.permute.xlu1 %1152 }
 0x992   :  { %v1151_v57 = vpop.permute.xlu1 %1150 }
 0x994   :  { %v13175_v36 = vpop.eup %13174 }
 0x995   :  { %v1054_v38 = vsel %vm838_vm12, %v13175_v36, 0.0 }
 0x996   :  { %v13177_v39 = vpop.eup %13176  ;;  %1055 = vadd.xlane.f32.xlu0 %v1054_v38 }
 0x997   :  { %v1051_v40 = vsel %vm838_vm12, %v13177_v39, 0.0 }
 0x99a   :  { %1052 = vadd.xlane.f32.xlu0 %v1051_v40 }
 0x9b0   :  { %1061 = vrot.lane.b32.xlu0 %v13820_v49, %s13487_s24 }
 0x9b4   :  { %1148 = vrot.lane.b32.xlu0 %v13820_v49, %s13489_s27 }
 0xa1f   :  { %v1056_v41 = vpop.xlane.xlu0 %1055 }
 0xa20   :  { %13178 = vrcp.f32 %v1056_v41 }
 0xa23   :  { %v1053_v42 = vpop.xlane.xlu0 %1052 }
 0xa24   :  { %13180 = vrcp.f32 %v1053_v42 }
 0xa27   :  { %v1062_v43 = vpop.permute.xlu0 %1061 }
 0xa28   :  { %12282 = vmatprep.subr.mxu1 %v1062_v43 }
 0xa29   :  { %12283 = vmatpush3.msra.mxu1 %v1062_v43 }
 0xa2a   :  { %12287 = vmatprep.subr.msk.mxu1 %vm754_vm11, %v1155_v44 }
 0xa2b   :  { %v1149_v55 = vpop.permute.xlu0 %1148 }
 0xa2d   :  { %v13179_v47 = vpop.eup %13178 }
 0xa2e   :  { %v1060_v53 = vmul.f32 %v13179_v47, %v13175_v36 }
 0xa31   :  { %v13181_v50 = vpop.eup %13180 }
 0xa32   :  { %v1059_v51 = vmul.f32 %v13181_v50, %v13177_v39 }
 0xa34   :  { %12284 = vmatprep.mubr.msk.f32.mxu1 %vm838_vm12, %v1059_v51 }
 0xa35   :  { %12285 = vmatmul.mubr.msk.f32.vlgmr.msra.gmra.mxu1 %vm838_vm12, %v1060_v53 }
 0xa36   :  { %12288 = vmatpush3.xpose.msk.msra.mxu1 %vm754_vm11, %v1155_v44  ;;  %12291 = vmatprep.mubr.msk.f32.mxu1 %vm754_vm11, %v1149_v55 }
 0xa37   :  { %12289 = vmatprep.subr.msk.mxu1 %vm754_vm11, %v1153_v56 }
 0xa3a   :  { %12290 = vmatpush3.xpose.msk.msra.mxu1 %vm754_vm11, %v1153_v56 }
 0xa3d   :  { %12292 = vmatmul.mubr.msk.f32.vlgmr.msra.gmra.mxu1 %vm754_vm11, %v1151_v57 }
 0xaf5   :  { %v13898_v58 = vpop.f32.mrf.mxu1 }
 0xaf7   :  { %v13900_v59 = vpop.f32.mrf.mxu1 }
 0xafd   :  { %v12293_v60 = vpop.f32.mrf.mxu1 }
 0xafe   :  { %v1236_v61 = vadd.f32 %v12293_v60, %v13835_v52  ;;  %v744_v60 = vld [vmem:[%s15992_s2 + $0x330] sm:$0xff] }
 0xaff   :  { %v1230_v62 = vpop.f32.mrf.mxu1 }
 0xb00   :  { %v1231_v63 = vadd.f32 %v1230_v62, %v13840_v54  ;;  %v1242_v0 = vsel %vm838_vm12, %v1236_v61, -inf }
 0xb01   :  { %1243 = vmax.xlane.f32.xlu1 %v1242_v0 }
 0xb02   :  { %v1239_v2 = vsel %vm838_vm12, %v1231_v63, -inf }
 0xb03   :  { %1240 = vmax.xlane.f32.xlu0 %v1239_v2 }
 0xb12   :  { %1263 = vrot.lane.b32.xlu1 %v13816_v48, %s13490_s28 }
 0xb16   :  { %1354 = vrot.lane.b32.xlu1 %v13816_v48, %s13491_s29 }
 0xb1a   :  { %1352 = vrot.lane.b32.xlu1 %v13820_v49, %s13491_s29 }
 0xb1e   :  { %1350 = vrot.lane.b32.xlu1 %v13816_v48, %s13492_s4 }
 0xb8a   :  { %v1244_v3 = vpop.xlane.xlu1 %1243 }
 0xb8b   :  { %v1246_v4 = vsub.f32 %v1236_v61, %v1244_v3  ;;  %v743_v61 = vld [vmem:[%s15992_s2 + $0x320] sm:$0xff] }
 0xb8c   :  { %v1241_v5 = vpop.xlane.xlu0 %1240 }
 0xb8d   :  { %v1249_v6 = vmul.f32 1.442695, %v1246_v4  ;;  %v1245_v7 = vsub.f32 %v1231_v63, %v1241_v5 }
 0xb8e   :  { %v1264_v9 = vpop.permute.xlu1 %1263 }
 0xb8f   :  { %13182 = vpow2.f32 %v1249_v6  ;;  %v1247_v10 = vmul.f32 1.442695, %v1245_v7  ;;  %12294 = vmatprep.subr.mxu0 %v1264_v9 }
 0xb90   :  { %12295 = vmatpush3.msra.mxu0 %v1264_v9 }
 0xb91   :  { %13184 = vpow2.f32 %v1247_v10 }
 0xb92   :  { %v1355_v18 = vpop.permute.xlu1 %1354 }
 0xb96   :  { %v1353_v26 = vpop.permute.xlu1 %1352 }
 0xb9a   :  { %v1351_v27 = vpop.permute.xlu1 %1350 }
 0xb9c   :  { %v13183_v11 = vpop.eup %13182 }
 0xb9d   :  { %v1254_v12 = vsel %vm838_vm12, %v13183_v11, 0.0 }
 0xb9e   :  { %v13185_v13 = vpop.eup %13184  ;;  %1255 = vadd.xlane.f32.xlu0 %v1254_v12 }
 0xb9f   :  { %v1251_v14 = vsel %vm838_vm12, %v13185_v13, 0.0 }
 0xba2   :  { %1252 = vadd.xlane.f32.xlu0 %v1251_v14 }
 0xbb8   :  { %1261 = vrot.lane.b32.xlu0 %v13820_v49, %s13490_s28 }
 0xbbc   :  { %1348 = vrot.lane.b32.xlu0 %v13820_v49, %s13492_s4 }
 0xc27   :  { %v1256_v15 = vpop.xlane.xlu0 %1255 }
 0xc28   :  { %13186 = vrcp.f32 %v1256_v15 }
 0xc2b   :  { %v1253_v16 = vpop.xlane.xlu0 %1252 }
 0xc2c   :  { %13188 = vrcp.f32 %v1253_v16 }
 0xc2f   :  { %v1262_v17 = vpop.permute.xlu0 %1261 }
 0xc30   :  { %12296 = vmatprep.subr.mxu0 %v1262_v17 }
 0xc31   :  { %12297 = vmatpush3.msra.mxu0 %v1262_v17 }
 0xc32   :  { %12301 = vmatprep.subr.msk.mxu0 %vm754_vm11, %v1355_v18 }
 0xc33   :  { %v1349_v25 = vpop.permute.xlu0 %1348 }
 0xc35   :  { %v13187_v19 = vpop.eup %13186 }
 0xc36   :  { %v1260_v24 = vmul.f32 %v13187_v19, %v13183_v11 }
 0xc39   :  { %v13189_v22 = vpop.eup %13188 }
 0xc3a   :  { %v1259_v23 = vmul.f32 %v13189_v22, %v13185_v13 }
 0xc3c   :  { %12298 = vmatprep.mubr.msk.f32.mxu0 %vm838_vm12, %v1259_v23  ;;  %v11454_v23 = vld [vmem:[%s15991_s1] ss:$0 sm:$0xff]  ;;  %s13500_s1 = smov 97  }
 0xc3d   :  { %12299 = vmatmul.mubr.msk.f32.vlgmr.msra.gmra.mxu0 %vm838_vm12, %v1260_v24  ;;  %v173_v24 = vld [vmem:[%s15992_s2 + $0x2a0] sm:$0xf] }
 0xc3e   :  { %12302 = vmatpush3.xpose.msk.msra.mxu0 %vm754_vm11, %v1355_v18  ;;  %12305 = vmatprep.mubr.msk.f32.mxu0 %vm754_vm11, %v1349_v25 }
 0xc3f   :  { %12303 = vmatprep.subr.msk.mxu0 %vm754_vm11, %v1353_v26 }
 0xc42   :  { %12304 = vmatpush3.xpose.msk.msra.mxu0 %vm754_vm11, %v1353_v26 }
 0xc45   :  { %12306 = vmatmul.mubr.msk.f32.vlgmr.msra.gmra.mxu0 %vm754_vm11, %v1351_v27 }
 0xcfd   :  { %v12300_v28 = vpop.f32.mrf.mxu0 }
 0xcff   :  { %v1339_v30 = vpop.f32.mrf.mxu0 }
 0xd05   :  { %v12307_v31 = vpop.f32.mrf.mxu0 }
 0xd06   :  { %v1436_v32 = vadd.f32 %v12307_v31, %v13835_v52 }
 0xd07   :  { %v1430_v33 = vpop.f32.mrf.mxu0 }
 0xd08   :  { %v1431_v34 = vadd.f32 %v1430_v33, %v13840_v54  ;;  %v1442_v35 = vsel %vm838_vm12, %v1436_v32, -inf }
 0xd09   :  { %1443 = vmax.xlane.f32.xlu1 %v1442_v35 }
 0xd0a   :  { %v1439_v36 = vsel %vm838_vm12, %v1431_v34, -inf }
 0xd0b   :  { %1440 = vmax.xlane.f32.xlu0 %v1439_v36 }
 0xd1a   :  { %1463 = vrot.lane.b32.xlu1 %v13816_v48, %s13493_s20 }
 0xd1e   :  { %1550 = vrot.lane.b32.xlu1 %v13900_v59, %s13494_s5  ;;  %v745_v59 = vld [vmem:[%s15992_s2 + $0x340] sm:$0xff] }
 0xd22   :  { %1552 = vrot.lane.b32.xlu1 %v13898_v58, %s13494_s5 }
 0xd26   :  { %1560 = vrot.lane.b32.xlu1 %v12300_v28, %s13495_s6 }
 0xd92   :  { %v1444_v52 = vpop.xlane.xlu1 %1443 }
 0xd93   :  { %v1446_v54 = vsub.f32 %v1436_v32, %v1444_v52 }
 0xd94   :  { %v1441_v38 = vpop.xlane.xlu0 %1440 }
 0xd95   :  { %v1449_v39 = vmul.f32 1.442695, %v1446_v54  ;;  %v1445_v40 = vsub.f32 %v1431_v34, %v1441_v38  ;;  %v13499_v54 = vmov 2   ;;  %v1667_v38 = vld [vmem:[%s15992_s2 + $0x3c0] sm:$0xff] }
 0xd96   :  { %v1464_v41 = vpop.permute.xlu1 %1463  ;;  %12326 = vmatprep.subr.mxu0 %v1667_v38 }
 0xd97   :  { %13190 = vpow2.f32 %v1449_v39  ;;  %v1447_v42 = vmul.f32 1.442695, %v1445_v40  ;;  %12308 = vmatprep.subr.mxu1 %v1464_v41  ;;  %v1666_v39 = vld [vmem:[%s15992_s2 + $0x3b0] sm:$0xff]  ;;  %12327 = vmatpush3.msra.mxu0 %v1667_v38  ;;  %v1665_v40 = vld [vmem:[%s15992_s2 + $0x3a0] sm:$0xff] }
 0xd98   :  { %12309 = vmatpush3.msra.mxu1 %v1464_v41  ;;  %12328 = vmatprep.subr.mxu0 %v1666_v39 }
 0xd99   :  { %13192 = vpow2.f32 %v1447_v42  ;;  %12329 = vmatpush3.msra.mxu0 %v1666_v39 }
 0xd9a   :  { %v1551_v0 = vpop.permute.xlu1 %1550  ;;  %12330 = vmatprep.subr.mxu0 %v1665_v40 }
 0xd9b   :  { %v1572_v5 = vsel %vm754_vm11, %v13870_v21, %v1551_v0  ;;  %v747_v21 = vld [vmem:[%s15992_s2 + $0x360] ss:$0 sm:$0xff]  ;;  %12331 = vmatpush3.msra.mxu0 %v1665_v40 }
 0xd9e   :  { %v1553_v2 = vpop.permute.xlu1 %1552 }
 0xd9f   :  { %v1573_v7 = vsel %vm754_vm11, %v13868_v20, %v1553_v2 }
 0xda2   :  { %v1561_v3 = vpop.permute.xlu1 %1560 }
 0xda3   :  { %v1575_v11 = vsel %vm838_vm12, %v1573_v7, %v1561_v3  ;;  %v1670_v3 = vld [vmem:[%s15992_s2 + $0x3f0] sm:$0xff] }
 0xda4   :  { %v13191_v48 = vpop.eup %13190 }
 0xda5   :  { %v1454_v43 = vsel %vm838_vm12, %v13191_v48, 0.0 }
 0xda6   :  { %v13193_v44 = vpop.eup %13192  ;;  %1455 = vadd.xlane.f32.xlu0 %v1454_v43 }
 0xda7   :  { %v1451_v47 = vsel %vm838_vm12, %v13193_v44, 0.0 }
 0xdaa   :  { %1452 = vadd.xlane.f32.xlu0 %v1451_v47 }
 0xdc0   :  { %1461 = vrot.lane.b32.xlu0 %v13820_v49, %s13493_s20  ;;  %v746_v49 = vld [vmem:[%s15992_s2 + $0x350] sm:$0xff] }
 0xdc4   :  { %1558 = vrot.lane.b32.xlu0 %v1339_v30, %s13495_s6 }
 0xe2f   :  { %v1456_v50 = vpop.xlane.xlu0 %1455 }
 0xe30   :  { %13194 = vrcp.f32 %v1456_v50 }
 0xe33   :  { %v1453_v51 = vpop.xlane.xlu0 %1452 }
 0xe34   :  { %13196 = vrcp.f32 %v1453_v51 }
 0xe37   :  { %v1462_v53 = vpop.permute.xlu0 %1461 }
 0xe38   :  { %12310 = vmatprep.subr.mxu1 %v1462_v53 }
 0xe39   :  { %12311 = vmatpush3.msra.mxu1 %v1462_v53 }
 0xe3a   :  { %12315 = vmatprep.subr.mxu1 %v746_v49 }
 0xe3b   :  { %v1559_v4 = vpop.permute.xlu0 %1558 }
 0xe3c   :  { %v1574_v9 = vsel %vm838_vm12, %v1572_v5, %v1559_v4  ;;  %v1669_v4 = vld [vmem:[%s15992_s2 + $0x3e0] sm:$0xff] }
 0xe3d   :  { %v13195_v55 = vpop.eup %13194 }
 0xe3e   :  { %v1460_v58 = vmul.f32 %v13195_v55, %v13191_v48  ;;  %v175_v55 = vld [vmem:[%s15992_s2 + $0x2c0] sm:$0xf] }
 0xe41   :  { %v13197_v56 = vpop.eup %13196 }
 0xe42   :  { %v1459_v57 = vmul.f32 %v13197_v56, %v13193_v44 }
 0xe44   :  { %12312 = vmatprep.mubr.msk.f32.mxu1 %vm838_vm12, %v1459_v57  ;;  %v1662_v57 = vld [vmem:[%s15992_s2 + $0x370] ss:$0 sm:$0xff] }
 0xe45   :  { %12313 = vmatmul.mubr.msk.f32.vlgmr.msra.gmra.mxu1 %vm838_vm12, %v1460_v58 }
 0xe46   :  { %12316 = vmatpush3.msra.mxu1 %v746_v49  ;;  %v174_v49 = vld [vmem:[%s15992_s2 + $0x2b0] sm:$0xf] }
 0xe47   :  { %12317 = vmatprep.subr.mxu1 %v745_v59 }
 0xe48   :  { %12318 = vmatpush3.msra.mxu1 %v745_v59  ;;  %v1663_v59 = vld [vmem:[%s15992_s2 + $0x380] ss:$0 sm:$0xff] }
 0xe49   :  { %12319 = vmatprep.subr.mxu1 %v744_v60 }
 0xe4a   :  { %12320 = vmatpush3.msra.mxu1 %v744_v60 }
 0xe4b   :  { %12321 = vmatprep.subr.mxu1 %v743_v61 }
 0xe4c   :  { %12322 = vmatpush3.msra.mxu1 %v743_v61 }
 0xe4d   :  { %12337 = vmatprep.subr.mxu1 %v1670_v3 }
 0xf05   :  { %v12314_v62 = vpop.f32.mrf.mxu1 }
 0xf06   :  { %1568 = vrot.lane.b32.xlu1 %v12314_v62, %s13496_s13 }
 0xf07   :  { %v1539_v63 = vpop.f32.mrf.mxu1 }
 0xf08   :  { %1566 = vrot.lane.b32.xlu0 %v1539_v63, %s13496_s13 }
 0xf78   :  { %v1569_v6 = vpop.permute.xlu1 %1568 }
 0xf79   :  { %v1578_v13 = vsel %vm1576_vm13, %v1575_v11, %v1569_v6 }
 0xf7a   :  { %v1567_v10 = vpop.permute.xlu0 %1566 }
 0xf7b   :  { %v1577_v12 = vsel %vm1576_vm13, %v1574_v9, %v1567_v10  ;;  %v204_v9 = vlaneseq }
 0xf7c   :  { %12323 = vmatprep.mubr.msk.f32.mxu1 %vm197_vm10, %v1577_v12 }
 0xf7d   :  { %12324 = vmatmul.mubr.msk.f32.vlgmr.msra.gmra.mxu1 %vm197_vm10, %v1578_v13  ;;  %v14034_v12 = vshrl.u32 %v204_v9, 7  ;;  %v14095_v9 = vld [vmem:[%s15992_s2 + $0x80] sm:$0xff] }
 0xf7e   :  { %12338 = vmatpush3.msra.mxu1 %v1670_v3 }
 0xf7f   :  { %12339 = vmatprep.subr.mxu1 %v1669_v4 }
 0xf80   :  { %12340 = vmatpush3.msra.mxu1 %v1669_v4 }
 0xf81   :  { %12355 = vmatprep.subr.mxu1 %v13472_v1 }
0x103d   :  { %v12325_v14 = vpop.f32.mrf.mxu1 }
0x103e   :  { %v1657_v15 = vadd.f32 %v12325_v14, %v747_v21 }
0x103f   :  { %v1651_v20 = vpop.f32.mrf.mxu1 }
0x1040   :  { %v1652_v16 = vadd.f32 %v1651_v20, %v747_v21  ;;  %v1661_v17 = vadd.f32 %v1657_v15, %v13810_v45  ;;  %v13498_v45 = vmov 1   ;;  %v14038_v15 = vsub.s32 0, %v14034_v12 }
0x1042   :  { %v1675_v18 = vsel %vm197_vm10, %v1661_v17, 0.0  ;;  %v1660_v19 = vadd.f32 %v1652_v16, %v13781_v29 }
0x1043   :  { %1676 = vadd.xlane.f32.xlu1 %v1675_v18 }
0x1044   :  { %v1672_v22 = vsel %vm197_vm10, %v1660_v19, 0.0 }
0x1045   :  { %1673 = vadd.xlane.f32.xlu0 %v1672_v22 }
0x1054   :  { %181 = vrot.lane.b32.xlu1 %v11454_v23, %s13497_s25 }
0x1058   :  { %201 = vperm.xlu1 %13157, %v173_v24  }
0x105c   :  { %13159 = vset.pattern.permute.xlu1 %v13498_v45 }
0x105d   :  { %218 = vperm.xlu1 %13159, %v173_v24  }
0x1061   :  { %13160 = vset.pattern.permute.xlu1 %v13499_v54 }
0x10cc   :  { %v1677_v29 = vpop.xlane.xlu1 %1676 }
0x10cd   :  { %v1680_v25 = vmul.f32 0.03125, %v1677_v29 }
0x10ce   :  { %v1674_v26 = vpop.xlane.xlu0 %1673 }
0x10cf   :  { %v1679_v27 = vmul.f32 0.03125, %v1674_v26  ;;  %v1682_v28 = vsub.f32 %v1661_v17, %v1680_v25 }
0x10d0   :  { %v182_v35 = vpop.permute.xlu1 %181 }
0x10d1   :  { %v1681_v30 = vsub.f32 %v1660_v19, %v1679_v27  ;;  %v1684_v33 = vmul.f32 %v1682_v28, %v1682_v28  ;;  %v185_v36 = vsel %vm184_vm14, 0.0, %v182_v35 }
0x10d2   :  { %v13988_v52 = vsel %vm186_vm15, %v185_v36, 0.0 }
0x10d3   :  { %v1683_v31 = vmul.f32 %v1681_v30, %v1681_v30  ;;  %v1688_v34 = vsel %vm197_vm10, %v1684_v33, 0.0  ;;  %210 = vrot.lane.b32.xlu1 %v13988_v52, %s13475_s17  ;;  %v261_v33 = vld [vmem:[%s15992_s2 + $0x2d0] sm:$0xf] }
0x10d4   :  { %v202_v5 = vpop.permute.xlu1 %201 }
0x10d5   :  { %v1685_v32 = vsel %vm197_vm10, %v1683_v31, 0.0 }
0x10d6   :  { %1686 = vadd.xlane.f32.xlu0 %v1685_v32 }
0x10d7   :  { %235 = vperm.xlu1 %13160, %v173_v24  }
0x10d8   :  { %v219_v6 = vpop.permute.xlu1 %218 }
0x10da   :  { %1689 = vadd.xlane.f32.xlu0 %v1688_v34 }
0x10db   :  { %13161 = vset.pattern.permute.xlu1 %v13480_v8  ;;  %v1664_v8 = vld [vmem:[%s15992_s2 + $0x390] sm:$0xff] }
0x10dc   :  { %12332 = vmatprep.subr.mxu0 %v1664_v8 }
0x10dd   :  { %12333 = vmatpush3.msra.mxu0 %v1664_v8 }
0x10f0   :  { %188 = vrot.lane.b32.xlu0 %v11454_v23, %s13500_s1 }
0x1145   :  { %v211_v7 = vpop.permute.xlu1 %210 }
0x1152   :  { %v236_v11 = vpop.permute.xlu1 %235 }
0x115f   :  { %v1687_v41 = vpop.xlane.xlu0 %1686 }
0x1160   :  { %v1691_v42 = vmul.f32 0.03125, %v1687_v41 }
0x1162   :  { %v1693_v48 = vadd.f32 1e-05, %v1691_v42 }
0x1163   :  { %v1690_v43 = vpop.xlane.xlu0 %1689 }
0x1164   :  { %13198 = vrsqrt.f32 %v1693_v48  ;;  %v1692_v44 = vmul.f32 0.03125, %v1690_v43 }
0x1166   :  { %v1694_v47 = vadd.f32 1e-05, %v1692_v44 }
0x1167   :  { %v189_v50 = vpop.permute.xlu0 %188 }
0x1168   :  { %13200 = vrsqrt.f32 %v1694_v47  ;;  %v191_v51 = vsel %vm184_vm14, 0.0, %v189_v50 }
0x1169   :  { %v192_v53 = vsel %vm186_vm15, %v191_v51, 0.0 }
0x116a   :  { %194 = vrot.lane.b32.xlu0 %v192_v53, %s13501_s11  ;;  %230 = vrot.lane.b32.xlu1 %v192_v53, %s13502_s12 }
0x116e   :  { %213 = vrot.lane.b32.xlu0 %v192_v53, %s13503_s18  ;;  %252 = vperm.xlu1 %13161, %v175_v55  }
0x1171   :  { %v13199_v56 = vpop.eup %13198 }
0x1172   :  { %227 = vrot.lane.b32.xlu0 %v13988_v52, %s13478_s19  ;;  %v1697_v58 = vmul.f32 %v13199_v56, %v1681_v30 }
0x1174   :  { %v1699_v60 = vmul.f32 %v1697_v58, %v1662_v57 }
0x1175   :  { %v13201_v61 = vpop.eup %13200 }
0x1176   :  { %246 = vperm.xlu0 %13158, %v174_v49   ;;  %v1698_v62 = vmul.f32 %v13201_v61, %v1682_v28  ;;  %v1701_v63 = vadd.f32 %v1699_v60, %v1663_v59 }
0x1178   :  { %v1700_v0 = vmul.f32 %v1698_v62, %v1662_v57  ;;  %12334 = vmatprep.mubr.msk.f32.mxu0 %vm197_vm10, %v1701_v63  ;;  %v14067_v62 = vld [vmem:[%s15992_s2 + $0xb0] sm:$0xff]  ;;  %v14072_v63 = vld [vmem:[%s15992_s2 + $0xa0] sm:$0xff] }
0x117a   :  { %v1702_v2 = vadd.f32 %v1700_v0, %v1663_v59 }
0x117c   :  { %12335 = vmatmul.mubr.msk.f32.vlgmr.msra.gmra.mxu0 %vm197_vm10, %v1702_v2 }
0x11dc   :  { %v195_v10 = vpop.permute.xlu0 %194  ;;  %v231_v21 = vpop.permute.xlu1 %230 }
0x11dd   :  { %v198_v16 = vsel %vm197_vm10, %v13988_v52, %v195_v10  ;;  %v1668_v52 = vld [vmem:[%s15992_s2 + $0x3d0] ss:$0 sm:$0xff] }
0x11de   :  { %v207_v19 = vrot.slane %v198_v16, %v14038_v15  ;;  %v14103_v10 = vld [vmem:[%s15992_s2 + $0x70] sm:$0xff] }
0x11df   :  { %v1888_v16 = vld [vmem:[%s15992_s2 + $0x470] sm:$0xff] }
0x11e0   :  { %v214_v13 = vpop.permute.xlu0 %213  ;;  %v208_v24 = vmul.f32 %v207_v19, %v202_v5  ;;  %v14082_v5 = vld [vmem:[%s15992_s2 + $0x90] sm:$0xff]  ;;  %12344 = vmatprep.subr.mxu0 %v1888_v16  ;;  %v1885_v19 = vld [vmem:[%s15992_s2 + $0x440] sm:$0xff] }
0x11e1   :  { %v216_v14 = vsel %vm197_vm10, %v211_v7, %v214_v13  ;;  %v14116_v13 = vld [vmem:[%s15992_s2 + $0x60] sm:$0xff]  ;;  %12345 = vmatpush3.msra.mxu0 %v1888_v16 }
0x11e2   :  { %v224_v18 = vrot.slane %v216_v14, %v14038_v15  ;;  %v2066_v14 = vld [vmem:[%s15992_s2 + $0x6a0] sm:$0xf] }
0x11e4   :  { %v228_v20 = vpop.permute.xlu0 %227  ;;  %v225_v23 = vmul.f32 %v224_v18, %v219_v6  ;;  %v1886_v18 = vld [vmem:[%s15992_s2 + $0x450] sm:$0xff] }
0x11e5   :  { %v233_v17 = vsel %vm197_vm10, %v228_v20, %v231_v21  ;;  %v14123_v21 = vld [vmem:[%s15992_s2 + $0x50] sm:$0xff]  ;;  %v14134_v20 = vld [vmem:[%s15992_s2 + $0x40] sm:$0xff] }
0x11e6   :  { %v241_v22 = vrot.slane %v233_v17, %v14038_v15  ;;  %v226_v29 = vadd.f32 %v225_v23, %v208_v24  ;;  %v1887_v17 = vld [vmem:[%s15992_s2 + $0x460] sm:$0xff] }
0x11e7   :  { %12346 = vmatprep.subr.mxu0 %v1887_v17 }
0x11e8   :  { %v242_v45 = vmul.f32 %v241_v22, %v236_v11  ;;  %v2065_v11 = vld [vmem:[%s15992_s2 + $0x690] sm:$0xf]  ;;  %12347 = vmatpush3.msra.mxu0 %v1887_v17 }
0x11e9   :  { %v253_v27 = vpop.permute.xlu1 %252  ;;  %12348 = vmatprep.subr.mxu0 %v1886_v18 }
0x11ea   :  { %v243_v25 = vadd.f32 %v242_v45, %v226_v29  ;;  %12349 = vmatpush3.msra.mxu0 %v1886_v18 }
0x11eb   :  { %12350 = vmatprep.subr.mxu0 %v1885_v19 }
0x11ec   :  { %12351 = vmatpush3.msra.mxu0 %v1885_v19  ;;  %v2435_v19 = vld [vmem:[%s15992_s2 + $0x200] sm:$0xff] }
0x11ed   :  { %12374 = vmatprep.subr.mxu0 %v13472_v1 }
0x11f1   :  { %v247_v26 = vpop.permute.xlu0 %246 }
0x11f2   :  { %v249_v28 = vmul.f32 %v247_v26, %v243_v25 }
0x11f4   :  { %v255_v30 = vadd.f32 %v253_v27, %v249_v28 }
0x11f6   :  { %v257_v31 = vmul.f32 1.442695, %v255_v30  ;;  %vm256_vm1 = vcmp.gt.f32.partialorder %v255_v30, 0.0 }
0x11f8   :  { %13202 = vpow2.f32 %v257_v31 }
0x1205   :  { %v13203_v32 = vpop.eup %13202 }
0x1206   :  { %v11455_v34 = vadd.f32 -1.0, %v13203_v32 }
0x1208   :  { %v260_v35 = vsel %vm256_vm1, %v255_v30, %v11455_v34  ;;  %v1671_v30 = vld [vmem:[%s15992_s2 + $0x400] ss:$0 sm:$0xff] }
0x1209   :  { %v14049_v36 = vadd.f32 %v261_v33, %v260_v35 }
0x120b   :  { %2072 = vrot.lane.b32.xlu1 %v14049_v36, %s13500_s1  ;;  %2067 = vrot.lane.b32.xlu0 %v14049_v36, %s13497_s25  ;;  %s13504_s1 = smov 98  }
0x120f   :  { %575 = vrot.lane.b32.xlu0 %v13787_v37, %s13484_s30 }
0x123c   :  { %v12336_v54 = vpop.f32.mrf.mxu0 }
0x123d   :  { %v1781_v38 = vadd.f32 %v12336_v54, %v1668_v52 }
0x123e   :  { %v1775_v39 = vpop.f32.mrf.mxu0 }
0x123f   :  { %v1787_v40 = vmul.f32 0.044715, %v1781_v38  ;;  %v1776_v8 = vadd.f32 %v1775_v39, %v1668_v52  ;;  %v1785_v59 = vmul.f32 0.5, %v1781_v38 }
0x1241   :  { %v1789_v41 = vmul.f32 %v1787_v40, %v1781_v38  ;;  %v1786_v42 = vmul.f32 0.044715, %v1776_v8  ;;  %v1784_v58 = vmul.f32 0.5, %v1776_v8 }
0x1243   :  { %v1791_v48 = vmul.f32 %v1789_v41, %v1781_v38  ;;  %v1788_v43 = vmul.f32 %v1786_v42, %v1776_v8 }
0x1245   :  { %v1793_v44 = vadd.f32 %v1791_v48, %v1781_v38  ;;  %v1790_v47 = vmul.f32 %v1788_v43, %v1776_v8 }
0x1247   :  { %v1795_v50 = vmul.f32 0.7978846, %v1793_v44  ;;  %v1792_v51 = vadd.f32 %v1790_v47, %v1776_v8 }
0x1249   :  { %13204 = vtanh.f32 %v1795_v50  ;;  %v1794_v53 = vmul.f32 0.7978846, %v1792_v51 }
0x124b   :  { %13206 = vtanh.f32 %v1794_v53 }
0x1256   :  { %v13205_v55 = vpop.eup %13204 }
0x1257   :  { %v1799_v57 = vadd.f32 1.0, %v13205_v55 }
0x1258   :  { %v13207_v56 = vpop.eup %13206 }
0x1259   :  { %v1798_v49 = vadd.f32 1.0, %v13207_v56  ;;  %v1801_v61 = vmul.f32 %v1799_v57, %v1785_v59 }
0x125b   :  { %v1800_v60 = vmul.f32 %v1798_v49, %v1784_v58 }
0x125d   :  { %12341 = vmatprep.mubr.msk.f32.mxu1 %vm838_vm12, %v1800_v60 }
0x125e   :  { %12342 = vmatmul.mubr.msk.f32.vlgmr.msra.gmra.mxu1 %vm838_vm12, %v1801_v61 }
0x125f   :  { %12371 = vmatprep.mubr.msk.f32.mxu1 %vm13477_vm2, %v13472_v1  ;;  %12356 = vmatpush3.msra.mxu1 %v14067_v62 }
0x1260   :  { %12357 = vmatprep.subr.mxu1 %v13472_v1 }
0x1261   :  { %12358 = vmatpush3.msra.mxu1 %v14072_v63 }
0x1262   :  { %12359 = vmatprep.subr.mxu1 %v13472_v1 }
0x1263   :  { %12360 = vmatpush3.msra.mxu1 %v14082_v5 }
0x1264   :  { %12361 = vmatprep.subr.mxu1 %v13472_v1 }
0x1265   :  { %12362 = vmatpush3.msra.mxu1 %v14095_v9 }
0x1266   :  { %12363 = vmatprep.subr.mxu1 %v13472_v1 }
0x1267   :  { %12364 = vmatpush3.msra.mxu1 %v14103_v10 }
0x1268   :  { %12365 = vmatprep.subr.mxu1 %v13472_v1 }
0x1269   :  { %12366 = vmatpush3.msra.mxu1 %v14116_v13 }
0x126a   :  { %12367 = vmatprep.subr.mxu1 %v13472_v1 }
0x126b   :  { %12368 = vmatpush3.msra.mxu1 %v14123_v21 }
0x126c   :  { %12369 = vmatprep.subr.mxu1 %v13472_v1 }
0x126d   :  { %12370 = vmatpush3.msra.mxu1 %v14134_v20 }
0x126e   :  { %12400 = vmatprep.subr.mxu1 %v13472_v1 }
0x127d   :  { %v2073_v0 = vpop.permute.xlu1 %2072  ;;  %v2068_v2 = vpop.permute.xlu0 %2067 }
0x127e   :  { %v2075_v3 = vsel %vm184_vm14, 0.0, %v2073_v0  ;;  %v2070_v4 = vsel %vm184_vm14, 0.0, %v2068_v2  ;;  %v2280_v2 = vld [vmem:[%s15992_s2 + $0x230] sm:$0x3] }
0x127f   :  { %v2076_v6 = vsel %vm186_vm15, %v2075_v3, 0.0  ;;  %v14086_v7 = vsel %vm186_vm15, %v2070_v4, 0.0  ;;  %v2361_v3 = vld [vmem:[%s15992_s2 + $0x5a0] sm:$0xff]  ;;  %vm7285_vm15 = vcmask 138240  }
0x1280   :  { %2086 = vrot.lane.b32.xlu0 %v2076_v6, %s13503_s18  ;;  %2083 = vrot.lane.b32.xlu1 %v14086_v7, %s13475_s17 }
0x1281   :  { %v576_v22 = vpop.permute.xlu0 %575 }
0x1284   :  { %2093 = vrot.lane.b32.xlu0 %v2076_v6, %s13502_s12  ;;  %2090 = vrot.lane.b32.xlu1 %v14086_v7, %s13478_s19 }
0x1288   :  { %2180 = vperm.xlu0 %13158, %v2065_v11   ;;  %2078 = vrot.lane.b32.xlu1 %v2076_v6, %s13501_s11 }
0x128c   :  { %1979 = vrot.lane.b32.xlu0 %v14049_v36, %s13475_s17  ;;  %2186 = vperm.xlu1 %13161, %v2066_v14  }
0x12f2   :  { %v2087_v23 = vpop.permute.xlu0 %2086  ;;  %v2084_v27 = vpop.permute.xlu1 %2083 }
0x12f3   :  { %v2089_v52 = vsel %vm197_vm10, %v2084_v27, %v2087_v23 }
0x12f4   :  { %v2098_v39 = vrot.slane %v2089_v52, 4 }
0x12f6   :  { %v2094_v24 = vpop.permute.xlu0 %2093  ;;  %v2091_v28 = vpop.permute.xlu1 %2090 }
0x12f7   :  { %v2096_v40 = vsel %vm197_vm10, %v2091_v28, %v2094_v24 }
0x12fa   :  { %v2079_v35 = vpop.permute.xlu1 %2078 }
0x12fb   :  { %v2081_v38 = vsel %vm197_vm10, %v14086_v7, %v2079_v35 }
0x12fc   :  { %v2100_v8 = vsel %vm73_vm3, %v2081_v38, %v2098_v39 }
0x1303   :  { %v2181_v45 = vpop.permute.xlu0 %2180 }
0x1307   :  { %v1980_v29 = vpop.permute.xlu0 %1979  ;;  %v2187_v51 = vpop.permute.xlu1 %2186 }
0x1308   :  { %v1983_v25 = vsel %vm1982_vm5, %v1980_v29, %v14049_v36 }
0x1309   :  { %v1984_v26 = vmax.f32 %v14049_v36, %v1983_v25 }
0x130b   :  { %12372 = vmatmul.mubr.msk.f32.vlgmr.msra.gmra.mxu1 %vm36_vm4, %v1984_v26 }
0x130c   :  { %12402 = vmatprep.mubr.msk.f32.mxu1 %vm13477_vm2, %v13472_v1 }
0x131e   :  { %v12343_v31 = vpop.f32.mrf.mxu1 }
0x131f   :  { %v1880_v32 = vadd.f32 %v12343_v31, %v1671_v30 }
0x1320   :  { %v1874_v33 = vpop.f32.mrf.mxu1 }
0x1321   :  { %v1875_v34 = vadd.f32 %v1874_v33, %v1671_v30  ;;  %v1884_v54 = vadd.f32 %v1880_v32, %v576_v22 }
0x1323   :  { %v1883_v36 = vadd.f32 %v1875_v34, %v13787_v37  ;;  %v2064_v37 = vld [vmem:[%s15992_s2 + $0x680] sm:$0xf] }
0x1325   :  { %12352 = vmatprep.mubr.msk.f32.mxu0 %vm197_vm10, %v1883_v36 }
0x1326   :  { %12353 = vmatmul.mubr.msk.f32.vlgmr.msra.gmra.mxu0 %vm197_vm10, %v1884_v54 }
0x1327   :  { %12375 = vmatpush3.msk.msra.mxu0 %vm73_vm3, %v2096_v40  ;;  %12378 = vmatprep.mubr.msk.f32.mxu0 %vm13477_vm2, %v13472_v1 }
0x1328   :  { %12376 = vmatprep.subr.mxu0 %v13472_v1 }
0x1329   :  { %12377 = vmatpush3.msra.mxu0 %v2100_v8 }
0x132a   :  { %12379 = vmatmul.mubr.msk.f32.vlgmr.msra.gmra.mxu0 %vm2101_vm6, %v2064_v37  ;;  %12381 = vmatprep.subr.mxu0 %v13472_v1 }
0x132b   :  { %12382 = vmatpush3.msra.mxu0 %v14067_v62  ;;  %12397 = vmatprep.mubr.msk.f32.mxu0 %vm13477_vm2, %v13472_v1 }
0x132c   :  { %12383 = vmatprep.subr.mxu0 %v13472_v1 }
0x132d   :  { %12384 = vmatpush3.msra.mxu0 %v14072_v63 }
0x132e   :  { %12385 = vmatprep.subr.mxu0 %v13472_v1 }
0x132f   :  { %12386 = vmatpush3.msra.mxu0 %v14082_v5  ;;  %v2360_v5 = vld [vmem:[%s15992_s2 + $0x590] sm:$0xff] }
0x1330   :  { %12387 = vmatprep.subr.mxu0 %v13472_v1 }
0x1331   :  { %12388 = vmatpush3.msra.mxu0 %v14095_v9 }
0x1332   :  { %12389 = vmatprep.subr.mxu0 %v13472_v1 }
0x1333   :  { %12390 = vmatpush3.msra.mxu0 %v14103_v10 }
0x1334   :  { %12391 = vmatprep.subr.mxu0 %v13472_v1 }
0x1335   :  { %12392 = vmatpush3.msra.mxu0 %v14116_v13 }
0x1336   :  { %12393 = vmatprep.subr.mxu0 %v13472_v1 }
0x1337   :  { %12394 = vmatpush3.msra.mxu0 %v14123_v21 }
0x1338   :  { %12395 = vmatprep.subr.mxu0 %v13472_v1 }
0x1339   :  { %12396 = vmatpush3.msra.mxu0 %v14134_v20 }
0x133a   :  { %12417 = vmatprep.subr.mxu0 %v13472_v1 }
0x13cb   :  { %v2054_v41 = vpop.f32.mrf.mxu1 }
0x13cc   :  { %v2059_v42 = vrot.slane %v2054_v41, 4 }
0x13cd   :  { %v12373_v48 = vpop.f32.mrf.mxu1 }
0x13ce   :  { %2060 = vrot.lane.b32.xlu0 %v2059_v42, %s13489_s27 }
0x13e6   :  { %v14199_v43 = vpop.f32.mrf.mxu0 }
0x13e8   :  { %v14201_v44 = vpop.f32.mrf.mxu0 }
0x13ea   :  { %v2174_v47 = vpop.f32.mrf.mxu0 }
0x13eb   :  { %v2183_v50 = vmul.f32 %v2181_v45, %v2174_v47 }
0x13ec   :  { %v12380_v53 = vpop.f32.mrf.mxu0 }
0x13ed   :  { %v2189_v55 = vadd.f32 %v2187_v51, %v2183_v50 }
0x13ef   :  { %v2191_v56 = vmul.f32 1.442695, %v2189_v55  ;;  %vm2190_vm8 = vcmp.gt.f32.partialorder %v2189_v55, 0.0 }
0x13f1   :  { %13208 = vpow2.f32 %v2191_v56 }
0x13fe   :  { %v13209_v57 = vpop.eup %13208 }
0x13ff   :  { %v11497_v58 = vadd.f32 -1.0, %v13209_v57 }
0x1401   :  { %v2194_v49 = vsel %vm2190_vm8, %v2189_v55, %v11497_v58  ;;  %vm10749_vm8 = vcmask 916480  }
0x1402   :  { %2196 = vrot.lane.b32.xlu1 %v2194_v49, %s13475_s17 }
0x1440   :  { %v2061_v4 = vpop.permute.xlu0 %2060 }
0x1441   :  { %v14228_v6 = vsel %vm73_vm3, %v2054_v41, %v2061_v4 }
0x1474   :  { %v2197_v59 = vpop.permute.xlu1 %2196 }
0x1475   :  { %v2199_v60 = vsel %vm1982_vm5, %v2197_v59, %v2194_v49 }
0x1476   :  { %v2200_v61 = vmax.f32 %v2194_v49, %v2199_v60 }
0x1478   :  { %12398 = vmatmul.mubr.msk.f32.vlgmr.msra.gmra.mxu0 %vm36_vm4, %v2200_v61 }
0x1479   :  { %12419 = vmatprep.mubr.msk.f32.mxu0 %vm13477_vm2, %v13472_v1 }
0x1538   :  { %v14208_v62 = vpop.f32.mrf.mxu0 }
0x1539   :  { %v2281_v63 = vmul.f32 %v14208_v62, %v14208_v62 }
0x153a   :  { %v12399_v0 = vpop.f32.mrf.mxu0 }
0x153b   :  { %12401 = vmatpush3.xpose.msk.msra.mxu1 %vm197_vm10, %v2281_v63 }
0x153c   :  { %12405 = vmatprep.subr.mxu1 %v13472_v1 }
0x153e   :  { %12403 = vmatmul.mubr.msk.f32.vlgmr.msra.gmra.mxu1 %vm197_vm10, %v2280_v2 }
0x153f   :  { %12406 = vmatpush3.msra.mxu1 %v2361_v3  ;;  %12409 = vmatprep.mubr.msk.f32.mxu1 %vm13477_vm2, %v13472_v1 }
0x1540   :  { %12407 = vmatprep.subr.mxu1 %v13472_v1 }
0x1541   :  { %12408 = vmatpush3.msra.mxu1 %v2360_v5 }
0x1542   :  { %12410 = vmatmul.mubr.msk.f32.vlgmr.msra.gmra.mxu1 %vm838_vm12, %v14228_v6  ;;  %12412 = vmatprep.subr.mxu1 %v13472_v1 }
0x1543   :  { %12414 = vmatprep.mubr.msk.f32.mxu1 %vm13477_vm2, %v13472_v1 }
0x15fe   :  { %v14235_v7 = vpop.f32.mrf.mxu1 }
0x1600   :  { %v12404_v9 = vpop.f32.mrf.mxu1 }
0x1602   :  { %v14237_v10 = vpop.f32.mrf.mxu1 }
0x1603   :  { %2607 = vrot.lane.b32.xlu0 %v14237_v10, %s13485_s15  ;;  %2442 = vrot.lane.b32.xlu1 %v14237_v10, %s13484_s30 }
0x1604   :  { %v12411_v11 = vpop.f32.mrf.mxu1 }
0x1607   :  { %2772 = vrot.lane.b32.xlu0 %v14237_v10, %s13488_s26  ;;  %2605 = vrot.lane.b32.xlu1 %v14237_v10, %s13486_s23 }
0x160b   :  { %2937 = vrot.lane.b32.xlu0 %v14237_v10, %s13491_s29  ;;  %2770 = vrot.lane.b32.xlu1 %v14237_v10, %s13489_s27 }
0x160f   :  { %2935 = vrot.lane.b32.xlu1 %v14237_v10, %s13492_s4 }
0x1675   :  { %v2608_v13 = vpop.permute.xlu0 %2607  ;;  %v2443_v21 = vpop.permute.xlu1 %2442 }
0x1676   :  { %12413 = vmatpush3.xpose.msk.msra.mxu1 %vm754_vm11, %v2443_v21 }
0x1677   :  { %12422 = vmatprep.subr.mxu1 %v13472_v1 }
0x1679   :  { %12415 = vmatmul.mubr.msk.f32.vlgmr.msra.gmra.mxu1 %vm754_vm11, %v14237_v10  ;;  %v2606_v14 = vpop.permute.xlu1 %2605  ;;  %v2773_v20 = vpop.permute.xlu0 %2772 }
0x167a   :  { %12423 = vmatpush3.xpose.msk.msra.mxu1 %vm754_vm11, %v2608_v13  ;;  %12424 = vmatprep.mubr.msk.f32.mxu1 %vm13477_vm2, %v13472_v1 }
0x167b   :  { %12432 = vmatprep.subr.mxu1 %v13472_v1 }
0x167d   :  { %12425 = vmatmul.mubr.msk.f32.vlgmr.msra.gmra.mxu1 %vm754_vm11, %v2606_v14  ;;  %v2771_v16 = vpop.permute.xlu1 %2770  ;;  %v2938_v17 = vpop.permute.xlu0 %2937 }
0x167e   :  { %12433 = vmatpush3.xpose.msk.msra.mxu1 %vm754_vm11, %v2773_v20  ;;  %12434 = vmatprep.mubr.msk.f32.mxu1 %vm13477_vm2, %v13472_v1 }
0x167f   :  { %12442 = vmatprep.subr.mxu1 %v13472_v1 }
0x1681   :  { %12435 = vmatmul.mubr.msk.f32.vlgmr.msra.gmra.mxu1 %vm754_vm11, %v2771_v16  ;;  %v2936_v18 = vpop.permute.xlu1 %2935 }
0x1682   :  { %12443 = vmatpush3.xpose.msk.msra.mxu1 %vm754_vm11, %v2938_v17  ;;  %12444 = vmatprep.mubr.msk.f32.mxu1 %vm13477_vm2, %v13472_v1  ;;  %v2439_v17 = vld [vmem:[%s15992_s2 + $0x5e0] sm:$0xff] }
0x1683   :  { %12452 = vmatprep.subr.mxu1 %v13472_v1 }
0x1685   :  { %12445 = vmatmul.mubr.msk.f32.vlgmr.msra.gmra.mxu1 %vm754_vm11, %v2936_v18  ;;  %v2438_v18 = vld [vmem:[%s15992_s2 + $0x5d0] sm:$0xff] }
0x1686   :  { %12460 = vmatprep.mubr.msk.f32.mxu1 %vm13477_vm2, %v13472_v1  ;;  %12453 = vmatpush3.msra.mxu1 %v2439_v17 }
0x1687   :  { %12454 = vmatprep.subr.mxu1 %v13472_v1 }
0x1688   :  { %12455 = vmatpush3.msra.mxu1 %v2438_v18 }
0x1689   :  { %12456 = vmatprep.subr.mxu1 %v13472_v1 }
0x1739   :  { %v2514_v22 = vpop.f32.mrf.mxu1 }
0x173a   :  { %v2515_v23 = vadd.f32 %v2514_v22, %v2435_v19 }
0x173b   :  { %v12416_v24 = vpop.f32.mrf.mxu1 }
0x173c   :  { %v2518_v45 = vsel %vm754_vm11, %v2515_v23, -inf }
0x173d   :  { %2519 = vmax.xlane.f32.xlu0 %v2518_v45  ;;  %v2679_v29 = vpop.f32.mrf.mxu1 }
0x173e   :  { %v2680_v25 = vadd.f32 %v2679_v29, %v2435_v19 }
0x173f   :  { %v12426_v26 = vpop.f32.mrf.mxu1 }
0x1740   :  { %v2683_v27 = vsel %vm754_vm11, %v2680_v25, -inf }
0x1741   :  { %2684 = vmax.xlane.f32.xlu1 %v2683_v27  ;;  %v2844_v28 = vpop.f32.mrf.mxu1 }
0x1742   :  { %v2845_v30 = vadd.f32 %v2844_v28, %v2435_v19 }
0x1743   :  { %v12436_v31 = vpop.f32.mrf.mxu1 }
0x1744   :  { %v2848_v32 = vsel %vm754_vm11, %v2845_v30, -inf }
0x1745   :  { %2849 = vmax.xlane.f32.xlu0 %v2848_v32  ;;  %v3009_v33 = vpop.f32.mrf.mxu1 }
0x1746   :  { %v3010_v34 = vadd.f32 %v3009_v33, %v2435_v19  ;;  %v2437_v19 = vld [vmem:[%s15992_s2 + $0x5c0] sm:$0xff] }
0x1747   :  { %v12446_v35 = vpop.f32.mrf.mxu1  ;;  %12457 = vmatpush3.msra.mxu1 %v2437_v19  ;;  %v3370_v19 = vld [vmem:[%s15992_s2 + $0x6c0] sm:$0xff] }
0x1748   :  { %v3013_v52 = vsel %vm754_vm11, %v3010_v34, -inf  ;;  %12458 = vmatprep.subr.mxu1 %v13472_v1 }
0x1749   :  { %3014 = vmax.xlane.f32.xlu0 %v3013_v52  ;;  %v2440_v52 = vld [vmem:[%s15992_s2 + $0x5f0] ss:$0 sm:$0xff] }
0x1752   :  { %2529 = vrot.lane.b32.xlu1 %v14237_v10, %s13481_s21 }
0x17c6   :  { %v2520_v36 = vpop.xlane.xlu0 %2519 }
0x17c7   :  { %v2521_v54 = vsub.f32 %v2515_v23, %v2520_v36  ;;  %v2436_v23 = vld [vmem:[%s15992_s2 + $0x5b0] sm:$0xff] }
0x17c8   :  { %12459 = vmatpush3.msra.mxu1 %v2436_v23  ;;  %v3196_v23 = vld [vmem:[%s15992_s2 + $0x670] ss:$0 sm:$0xff] }
0x17c9   :  { %v2522_v38 = vmul.f32 1.442695, %v2521_v54  ;;  %12477 = vmatprep.subr.mxu1 %v13472_v1 }
0x17ca   :  { %v2685_v39 = vpop.xlane.xlu1 %2684 }
0x17cb   :  { %13210 = vpow2.f32 %v2522_v38  ;;  %v2686_v40 = vsub.f32 %v2680_v25, %v2685_v39 }
0x17cd   :  { %v2687_v37 = vmul.f32 1.442695, %v2686_v40 }
0x17ce   :  { %v2530_v8 = vpop.permute.xlu1 %2529  ;;  %v2850_v41 = vpop.xlane.xlu0 %2849 }
0x17cf   :  { %13212 = vpow2.f32 %v2687_v37  ;;  %v2851_v42 = vsub.f32 %v2845_v30, %v2850_v41  ;;  %12418 = vmatpush3.msra.mxu0 %v2530_v8  ;;  %v14340_v37 = vmul.f32 0.35355338, %v14201_v44 }
0x17d0   :  { %12427 = vmatprep.subr.mxu0 %v13472_v1 }
0x17d1   :  { %v2852_v48 = vmul.f32 1.442695, %v2851_v42 }
0x17d2   :  { %v3015_v47 = vpop.xlane.xlu0 %3014 }
0x17d3   :  { %13214 = vpow2.f32 %v2852_v48  ;;  %v3016_v50 = vsub.f32 %v3010_v34, %v3015_v47 }
0x17d5   :  { %v3017_v51 = vmul.f32 1.442695, %v3016_v50  ;;  %v2275_v50 = vrot.slane %v14208_v62, 4 }
0x17d7   :  { %13216 = vpow2.f32 %v3017_v51  ;;  %v3191_v51 = vld [vmem:[%s15992_s2 + $0x620] sm:$0xff] }
0x17d8   :  { %v13211_v53 = vpop.eup %13210 }
0x17d9   :  { %v2524_v55 = vsel %vm754_vm11, %v13211_v53, 0.0 }
0x17da   :  { %2525 = vadd.xlane.f32.xlu1 %v2524_v55 }
0x17dc   :  { %v13213_v56 = vpop.eup %13212 }
0x17dd   :  { %v2689_v57 = vsel %vm754_vm11, %v13213_v56, 0.0 }
0x17de   :  { %2690 = vadd.xlane.f32.xlu0 %v2689_v57 }
0x17e0   :  { %v13215_v58 = vpop.eup %13214 }
0x17e1   :  { %v2854_v49 = vsel %vm754_vm11, %v13215_v58, 0.0 }
0x17e2   :  { %2855 = vadd.xlane.f32.xlu1 %v2854_v49  ;;  %v3189_v49 = vld [vmem:[%s15992_s2 + $0x600] ss:$0 sm:$0xff] }
0x17e4   :  { %v13217_v59 = vpop.eup %13216 }
0x17e5   :  { %v3019_v60 = vsel %vm754_vm11, %v13217_v59, 0.0 }
0x17e6   :  { %3020 = vadd.xlane.f32.xlu0 %v3019_v60  ;;  %v3190_v60 = vld [vmem:[%s15992_s2 + $0x610] ss:$0 sm:$0xff] }
0x17f3   :  { %2859 = vrot.lane.b32.xlu1 %v14237_v10, %s13490_s28 }
0x17f7   :  { %3024 = vrot.lane.b32.xlu1 %v14237_v10, %s13493_s20 }
0x17fc   :  { %2694 = vrot.lane.b32.xlu0 %v14237_v10, %s13487_s24 }
0x1863   :  { %v2526_v61 = vpop.xlane.xlu1 %2525 }
0x1864   :  { %13218 = vrcp.f32 %v2526_v61 }
0x1867   :  { %v2691_v63 = vpop.xlane.xlu0 %2690 }
0x1868   :  { %13220 = vrcp.f32 %v2691_v63 }
0x186b   :  { %v2856_v0 = vpop.xlane.xlu1 %2855 }
0x186c   :  { %13222 = vrcp.f32 %v2856_v0  ;;  %v3195_v0 = vld [vmem:[%s15992_s2 + $0x660] sm:$0xff] }
0x186f   :  { %v3021_v2 = vpop.xlane.xlu0 %3020  ;;  %v2860_v11 = vpop.permute.xlu1 %2859 }
0x1870   :  { %13224 = vrcp.f32 %v3021_v2  ;;  %v3194_v2 = vld [vmem:[%s15992_s2 + $0x650] sm:$0xff] }
0x1871   :  { %v13219_v3 = vpop.eup %13218 }
0x1872   :  { %v2528_v4 = vmul.f32 %v13219_v3, %v13211_v53  ;;  %v14355_v53 = vmul.f32 0.35355338, %v14199_v43  ;;  %v3193_v3 = vld [vmem:[%s15992_s2 + $0x640] ss:$0 sm:$0xff] }
0x1873   :  { %v2695_v5 = vpop.permute.xlu0 %2694  ;;  %v3025_v14 = vpop.permute.xlu1 %3024 }
0x1874   :  { %12420 = vmatmul.mubr.msk.f32.vlgmr.msra.gmra.mxu0 %vm754_vm11, %v2528_v4 }
0x1875   :  { %v13221_v9 = vpop.eup %13220  ;;  %12428 = vmatpush3.msra.mxu0 %v2695_v5  ;;  %12429 = vmatprep.mubr.msk.f32.mxu0 %vm13477_vm2, %v13472_v1 }
0x1876   :  { %12437 = vmatprep.subr.mxu0 %v13472_v1  ;;  %v2693_v10 = vmul.f32 %v13221_v9, %v13213_v56 }
0x1878   :  { %12430 = vmatmul.mubr.msk.f32.vlgmr.msra.gmra.mxu0 %vm754_vm11, %v2693_v10 }
0x1879   :  { %v13223_v13 = vpop.eup %13222  ;;  %12438 = vmatpush3.msra.mxu0 %v2860_v11  ;;  %12439 = vmatprep.mubr.msk.f32.mxu0 %vm13477_vm2, %v13472_v1 }
0x187a   :  { %12447 = vmatprep.subr.mxu0 %v13472_v1  ;;  %v2858_v21 = vmul.f32 %v13223_v13, %v13215_v58 }
0x187c   :  { %12440 = vmatmul.mubr.msk.f32.vlgmr.msra.gmra.mxu0 %vm754_vm11, %v2858_v21 }
0x187d   :  { %v13225_v20 = vpop.eup %13224  ;;  %12448 = vmatpush3.msra.mxu0 %v3025_v14  ;;  %12449 = vmatprep.mubr.msk.f32.mxu0 %vm13477_vm2, %v13472_v1 }
0x187e   :  { %v3023_v16 = vmul.f32 %v13225_v20, %v13217_v59  ;;  %12463 = vmatprep.subr.mxu0 %v13472_v1 }
0x1880   :  { %12450 = vmatmul.mubr.msk.f32.vlgmr.msra.gmra.mxu0 %vm754_vm11, %v3023_v16 }
0x1881   :  { %12467 = vmatprep.mubr.msk.f32.mxu0 %vm13477_vm2, %v13472_v1 }
0x1934   :  { %v2601_v22 = vpop.f32.mrf.mxu0 }
0x1936   :  { %v12421_v24 = vpop.f32.mrf.mxu0 }
0x1938   :  { %v2766_v45 = vpop.f32.mrf.mxu0 }
0x1939   :  { %3101 = vrot.lane.b32.xlu0 %v2766_v45, %s13494_s5 }
0x193a   :  { %v12431_v29 = vpop.f32.mrf.mxu0 }
0x193c   :  { %v2931_v25 = vpop.f32.mrf.mxu0 }
0x193d   :  { %3105 = vrot.lane.b32.xlu1 %v2931_v25, %s13495_s6 }
0x193e   :  { %v12441_v26 = vpop.f32.mrf.mxu0 }
0x1940   :  { %v3096_v27 = vpop.f32.mrf.mxu0 }
0x1941   :  { %3109 = vrot.lane.b32.xlu0 %v3096_v27, %s13496_s13 }
0x1942   :  { %v12451_v28 = vpop.f32.mrf.mxu0 }
0x19ab   :  { %v3102_v30 = vpop.permute.xlu0 %3101 }
0x19ac   :  { %v3112_v32 = vsel %vm754_vm11, %v2601_v22, %v3102_v30  ;;  %v3369_v22 = vld [vmem:[%s15992_s2 + $0x6b0] sm:$0xff] }
0x19af   :  { %v3106_v31 = vpop.permute.xlu1 %3105 }
0x19b0   :  { %v3113_v33 = vsel %vm838_vm12, %v3112_v32, %v3106_v31 }
0x19b3   :  { %v3110_v34 = vpop.permute.xlu0 %3109 }
0x19b4   :  { %v3114_v35 = vsel %vm1576_vm13, %v3113_v33, %v3110_v34 }
0x19b5   :  { %12461 = vmatmul.mubr.msk.f32.vlgmr.msra.gmra.mxu1 %vm197_vm10, %v3114_v35 }
0x19b6   :  { %12481 = vmatprep.mubr.msk.f32.mxu1 %vm13477_vm2, %v13472_v1  ;;  %12478 = vmatpush3.msra.mxu1 %v3370_v19 }
0x19b7   :  { %12479 = vmatprep.subr.mxu1 %v13472_v1 }
0x19b8   :  { %12480 = vmatpush3.msra.mxu1 %v3369_v22 }
0x1a75   :  { %v3184_v36 = vpop.f32.mrf.mxu1 }
0x1a76   :  { %v3185_v54 = vadd.f32 %v3184_v36, %v2440_v52 }
0x1a77   :  { %v12462_v38 = vpop.f32.mrf.mxu1 }
0x1a78   :  { %v3188_v39 = vadd.f32 %v3185_v54, %v14228_v6  ;;  %v3192_v6 = vld [vmem:[%s15992_s2 + $0x630] sm:$0xff] }
0x1a79   :  { %12464 = vmatpush3.msra.mxu0 %v3192_v6  ;;  %v3445_v38 = vld [vmem:[%s15992_s2 + $0x1f0] sm:$0xff] }
0x1a7a   :  { %v3197_v40 = vsel %vm838_vm12, %v3188_v39, 0.0  ;;  %12465 = vmatprep.subr.mxu0 %v13472_v1 }
0x1a7b   :  { %3198 = vadd.xlane.f32.xlu1 %v3197_v40  ;;  %12466 = vmatpush3.msra.mxu0 %v3191_v51  ;;  %v3444_v40 = vld [vmem:[%s15992_s2 + $0x1e0] sm:$0xff] }
0x1a7c   :  { %12470 = vmatprep.subr.mxu0 %v13472_v1 }
0x1a8c   :  { %3640 = vrot.lane.b32.xlu1 %v14340_v37, %s13486_s23 }
0x1b04   :  { %v3199_v8 = vpop.xlane.xlu1 %3198 }
0x1b05   :  { %v3201_v41 = vmul.f32 0.0625, %v3199_v8 }
0x1b07   :  { %v3202_v42 = vsub.f32 %v3188_v39, %v3201_v41 }
0x1b09   :  { %v3203_v48 = vmul.f32 %v3202_v42, %v3202_v42 }
0x1b0b   :  { %v3204_v47 = vsel %vm838_vm12, %v3203_v48, 0.0 }
0x1b0c   :  { %3205 = vadd.xlane.f32.xlu0 %v3204_v47 }
0x1b22   :  { %2276 = vrot.lane.b32.xlu0 %v2275_v50, %s13489_s27 }
0x1b26   :  { %3642 = vrot.lane.b32.xlu0 %v14355_v53, %s13486_s23 }
0x1b2a   :  { %3831 = vrot.lane.b32.xlu0 %v14340_v37, %s13489_s27 }
0x1b95   :  { %v3206_v55 = vpop.xlane.xlu0 %3205 }
0x1b96   :  { %v3207_v56 = vmul.f32 0.0625, %v3206_v55 }
0x1b98   :  { %v3208_v57 = vadd.f32 1e-05, %v3207_v56 }
0x1b99   :  { %v2277_v24 = vpop.permute.xlu0 %2276 }
0x1b9a   :  { %13226 = vrsqrt.f32 %v3208_v57  ;;  %v2279_v25 = vsel %vm73_vm3, %v14208_v62, %v2277_v24  ;;  %v3641_v62 = vpop.permute.xlu1 %3640 }
0x1b9d   :  { %v3643_v31 = vpop.permute.xlu0 %3642 }
0x1ba1   :  { %v3832_v33 = vpop.permute.xlu0 %3831 }
0x1ba7   :  { %v13227_v58 = vpop.eup %13226 }
0x1ba8   :  { %v3210_v59 = vmul.f32 %v13227_v58, %v3202_v42 }
0x1baa   :  { %v3211_v61 = vmul.f32 %v3210_v59, %v3189_v49 }
0x1bac   :  { %v3212_v63 = vadd.f32 %v3211_v61, %v3190_v60 }
0x1bae   :  { %12468 = vmatmul.mubr.msk.f32.vlgmr.msra.gmra.mxu0 %vm838_vm12, %v3212_v63 }
0x1baf   :  { %12474 = vmatprep.mubr.msk.f32.mxu0 %vm13477_vm2, %v13472_v1  ;;  %12471 = vmatpush3.msra.mxu0 %v3195_v0 }
0x1bb0   :  { %12472 = vmatprep.subr.mxu0 %v13472_v1 }
0x1bb1   :  { %12473 = vmatpush3.msra.mxu0 %v3194_v2 }
0x1c6e   :  { %v3282_v4 = vpop.f32.mrf.mxu0 }
0x1c6f   :  { %v3283_v5 = vadd.f32 %v3282_v4, %v3193_v3 }
0x1c70   :  { %v12469_v9 = vpop.f32.mrf.mxu0 }
0x1c71   :  { %v3287_v11 = vmul.f32 0.044715, %v3283_v5  ;;  %v3286_v16 = vmul.f32 0.5, %v3283_v5 }
0x1c73   :  { %v3288_v10 = vmul.f32 %v3287_v11, %v3283_v5 }
0x1c75   :  { %v3289_v13 = vmul.f32 %v3288_v10, %v3283_v5 }
0x1c77   :  { %v3290_v21 = vadd.f32 %v3289_v13, %v3283_v5 }
0x1c79   :  { %v3291_v14 = vmul.f32 0.7978846, %v3290_v21 }
0x1c7b   :  { %13228 = vtanh.f32 %v3291_v14 }
0x1c88   :  { %v13229_v20 = vpop.eup %13228 }
0x1c89   :  { %v3293_v17 = vadd.f32 1.0, %v13229_v20 }
0x1c8b   :  { %v3294_v18 = vmul.f32 %v3293_v17, %v3286_v16 }
0x1c8d   :  { %12475 = vmatmul.mubr.msk.f32.vlgmr.msra.gmra.mxu0 %vm838_vm12, %v3294_v18 }
0x1c8e   :  { %12486 = vmatprep.mubr.msk.f32.mxu0 %vm754_vm11, %v14340_v37 }
0x1d4d   :  { %v3364_v45 = vpop.f32.mrf.mxu0 }
0x1d4e   :  { %v3365_v29 = vadd.f32 %v3364_v45, %v3196_v23 }
0x1d4f   :  { %v12476_v26 = vpop.f32.mrf.mxu0 }
0x1d50   :  { %v3368_v27 = vadd.f32 %v3365_v29, %v2279_v25 }
0x1d52   :  { %12482 = vmatmul.mubr.msk.f32.vlgmr.msra.gmra.mxu1 %vm838_vm12, %v3368_v27 }
0x1e12   :  { %v14397_v28 = vpop.f32.mrf.mxu1 }
0x1e13   :  { %4026 = vrot.lane.b32.xlu0 %v14397_v28, %s13492_s4  ;;  %3644 = vrot.lane.b32.xlu1 %v14397_v28, %s13486_s23 }
0x1e14   :  { %12484 = vmatprep.subr.msk.mxu0 %vm754_vm11, %v14397_v28  ;;  %12489 = vmatprep.subr.mxu1 %v14397_v28  ;;  %v12483_v30 = vpop.f32.mrf.mxu1 }
0x1e15   :  { %12485 = vmatpush3.xpose.msk.msra.mxu0 %vm754_vm11, %v14397_v28  ;;  %12490 = vmatpush3.msra.mxu1 %v14397_v28 }
0x1e17   :  { %4024 = vrot.lane.b32.xlu0 %v14355_v53, %s13492_s4  ;;  %3835 = vrot.lane.b32.xlu1 %v14397_v28, %s13489_s27 }
0x1e18   :  { %12487 = vmatmul.mubr.msk.f32.vlgmr.msra.gmra.mxu0 %vm754_vm11, %v14355_v53 }
0x1e19   :  { %12496 = vmatprep.mubr.msk.f32.mxu0 %vm754_vm11, %v3641_v62 }
0x1e1b   :  { %3833 = vrot.lane.b32.xlu1 %v14355_v53, %s13489_s27 }
0x1e1f   :  { %4022 = vrot.lane.b32.xlu1 %v14340_v37, %s13492_s4 }
0x1e85   :  { %v14420_v32 = vpop.permute.xlu1 %3644  ;;  %v14432_v35 = vpop.permute.xlu0 %4026 }
0x1e86   :  { %12494 = vmatprep.subr.msk.mxu0 %vm754_vm11, %v14420_v32  ;;  %12499 = vmatprep.subr.mxu1 %v14420_v32 }
0x1e87   :  { %12495 = vmatpush3.xpose.msk.msra.mxu0 %vm754_vm11, %v14420_v32 }
0x1e89   :  { %v14427_v34 = vpop.permute.xlu1 %3835  ;;  %v4025_v54 = vpop.permute.xlu0 %4024 }
0x1e8a   :  { %12497 = vmatmul.mubr.msk.f32.vlgmr.msra.gmra.mxu0 %vm754_vm11, %v3643_v31  ;;  %12504 = vmatprep.subr.msk.mxu0 %vm754_vm11, %v14427_v34 }
0x1e8b   :  { %12505 = vmatpush3.xpose.msk.msra.mxu0 %vm754_vm11, %v14427_v34  ;;  %12506 = vmatprep.mubr.msk.f32.mxu0 %vm754_vm11, %v3832_v33 }
0x1e8c   :  { %12514 = vmatprep.subr.msk.mxu0 %vm754_vm11, %v14432_v35 }
0x1e8d   :  { %v3834_v52 = vpop.permute.xlu1 %3833 }
0x1e8e   :  { %12507 = vmatmul.mubr.msk.f32.vlgmr.msra.gmra.mxu0 %vm754_vm11, %v3834_v52 }
0x1e8f   :  { %12515 = vmatpush3.xpose.msk.msra.mxu0 %vm754_vm11, %v14432_v35 }
0x1e91   :  { %v4023_v36 = vpop.permute.xlu1 %4022 }
0x1e92   :  { %12516 = vmatprep.mubr.msk.f32.mxu0 %vm754_vm11, %v4023_v36 }
0x1e93   :  { %12517 = vmatmul.mubr.msk.f32.vlgmr.msra.gmra.mxu0 %vm754_vm11, %v4025_v54 }
0x1ed8   :  { %v12488_v39 = vpop.f32.mrf.mxu0 }
0x1ed9   :  { %v3534_v37 = vadd.f32 %v12488_v39, %v3445_v38 }
0x1eda   :  { %v3528_v8 = vpop.f32.mrf.mxu0 }
0x1edb   :  { %v3529_v41 = vadd.f32 %v3528_v8, %v3444_v40  ;;  %v3540_v42 = vsel %vm754_vm11, %v3534_v37, -inf }
0x1edc   :  { %3541 = vmax.xlane.f32.xlu0 %v3540_v42 }
0x1edd   :  { %v3537_v48 = vsel %vm754_vm11, %v3529_v41, -inf }
0x1ede   :  { %3538 = vmax.xlane.f32.xlu1 %v3537_v48 }
0x1f4a   :  { %v12498_v47 = vpop.f32.mrf.mxu0 }
0x1f4b   :  { %v3724_v50 = vadd.f32 %v12498_v47, %v3445_v38 }
0x1f4c   :  { %v3718_v6 = vpop.f32.mrf.mxu0 }
0x1f4d   :  { %v3719_v51 = vadd.f32 %v3718_v6, %v3444_v40  ;;  %v3730_v53 = vsel %vm754_vm11, %v3724_v50, -inf }
0x1f4e   :  { %v12508_v55 = vpop.f32.mrf.mxu0  ;;  %3731 = vmax.xlane.f32.xlu1 %v3730_v53 }
0x1f4f   :  { %v3915_v56 = vadd.f32 %v12508_v55, %v3445_v38  ;;  %v3727_v57 = vsel %vm754_vm11, %v3719_v51, -inf }
0x1f50   :  { %v3909_v58 = vpop.f32.mrf.mxu0  ;;  %3728 = vmax.xlane.f32.xlu0 %v3727_v57 }
0x1f51   :  { %v3910_v49 = vadd.f32 %v3909_v58, %v3444_v40  ;;  %v3921_v59 = vsel %vm754_vm11, %v3915_v56, -inf }
0x1f52   :  { %3922 = vmax.xlane.f32.xlu1 %v3921_v59 }
0x1f53   :  { %v12518_v60 = vpop.f32.mrf.mxu0  ;;  %v3918_v61 = vsel %vm754_vm11, %v3910_v49, -inf }
0x1f54   :  { %v4106_v63 = vadd.f32 %v12518_v60, %v3445_v38  ;;  %3919 = vmax.xlane.f32.xlu0 %v3918_v61 }
0x1f55   :  { %v4100_v0 = vpop.f32.mrf.mxu0 }
0x1f56   :  { %v4101_v2 = vadd.f32 %v4100_v0, %v3444_v40  ;;  %v4112_v3 = vsel %vm754_vm11, %v4106_v63, -inf }
0x1f57   :  { %4113 = vmax.xlane.f32.xlu1 %v4112_v3 }
0x1f58   :  { %v4109_v4 = vsel %vm754_vm11, %v4101_v2, -inf }
0x1f59   :  { %4110 = vmax.xlane.f32.xlu0 %v4109_v4 }
0x1f65   :  { %v3542_v5 = vpop.xlane.xlu0 %3541 }
0x1f66   :  { %v3544_v9 = vsub.f32 %v3534_v37, %v3542_v5 }
0x1f67   :  { %v3539_v11 = vpop.xlane.xlu1 %3538 }
0x1f68   :  { %v3547_v10 = vmul.f32 1.442695, %v3544_v9  ;;  %v3543_v13 = vsub.f32 %v3529_v41, %v3539_v11 }
0x1f6a   :  { %13230 = vpow2.f32 %v3547_v10  ;;  %v3545_v21 = vmul.f32 1.442695, %v3543_v13 }
0x1f6c   :  { %13232 = vpow2.f32 %v3545_v21 }
0x1f77   :  { %v13231_v14 = vpop.eup %13230 }
0x1f78   :  { %v3552_v20 = vsel %vm754_vm11, %v13231_v14, 0.0 }
0x1f79   :  { %v13233_v16 = vpop.eup %13232  ;;  %3553 = vadd.xlane.f32.xlu1 %v3552_v20 }
0x1f7a   :  { %v3549_v17 = vsel %vm754_vm11, %v13233_v16, 0.0 }
0x1f7b   :  { %3550 = vadd.xlane.f32.xlu0 %v3549_v17 }
0x1fd7   :  { %v3732_v18 = vpop.xlane.xlu1 %3731 }
0x1fd8   :  { %v3734_v19 = vsub.f32 %v3724_v50, %v3732_v18 }
0x1fd9   :  { %v3729_v22 = vpop.xlane.xlu0 %3728 }
0x1fda   :  { %v3737_v23 = vmul.f32 1.442695, %v3734_v19  ;;  %v3733_v24 = vsub.f32 %v3719_v51, %v3729_v22  ;;  %v3448_v19 = vld [vmem:[%s15992_s2 + $0x4a0] sm:$0xff] }
0x1fdb   :  { %v3923_v45 = vpop.xlane.xlu1 %3922 }
0x1fdc   :  { %13234 = vpow2.f32 %v3737_v23  ;;  %v3735_v29 = vmul.f32 1.442695, %v3733_v24  ;;  %v3925_v25 = vsub.f32 %v3915_v56, %v3923_v45  ;;  %v3446_v23 = vld [vmem:[%s15992_s2 + $0x480] sm:$0xff] }
0x1fdd   :  { %v3920_v26 = vpop.xlane.xlu0 %3919 }
0x1fde   :  { %13236 = vpow2.f32 %v3735_v29  ;;  %v3928_v27 = vmul.f32 1.442695, %v3925_v25  ;;  %v3924_v30 = vsub.f32 %v3910_v49, %v3920_v26 }
0x1fe0   :  { %13238 = vpow2.f32 %v3928_v27  ;;  %v3926_v62 = vmul.f32 1.442695, %v3924_v30  ;;  %v4114_v31 = vpop.xlane.xlu1 %4113 }
0x1fe1   :  { %v4116_v33 = vsub.f32 %v4106_v63, %v4114_v31 }
0x1fe2   :  { %13240 = vpow2.f32 %v3926_v62  ;;  %v4111_v52 = vpop.xlane.xlu0 %4110 }
0x1fe3   :  { %v4119_v36 = vmul.f32 1.442695, %v4116_v33  ;;  %v4115_v54 = vsub.f32 %v4101_v2, %v4111_v52 }
0x1fe5   :  { %13242 = vpow2.f32 %v4119_v36  ;;  %v4117_v38 = vmul.f32 1.442695, %v4115_v54 }
0x1fe7   :  { %13244 = vpow2.f32 %v4117_v38 }
0x1fe9   :  { %v13235_v39 = vpop.eup %13234 }
0x1fea   :  { %v3742_v40 = vsel %vm754_vm11, %v13235_v39, 0.0 }
0x1feb   :  { %v13237_v37 = vpop.eup %13236  ;;  %3743 = vadd.xlane.f32.xlu1 %v3742_v40 }
0x1fec   :  { %v3739_v8 = vsel %vm754_vm11, %v13237_v37, 0.0 }
0x1fed   :  { %v13239_v41 = vpop.eup %13238  ;;  %3740 = vadd.xlane.f32.xlu0 %v3739_v8 }
0x1fee   :  { %v3933_v42 = vsel %vm754_vm11, %v13239_v41, 0.0 }
0x1fef   :  { %v13241_v48 = vpop.eup %13240  ;;  %3934 = vadd.xlane.f32.xlu1 %v3933_v42 }
0x1ff0   :  { %v3930_v47 = vsel %vm754_vm11, %v13241_v48, 0.0 }
0x1ff1   :  { %3931 = vadd.xlane.f32.xlu0 %v3930_v47 }
0x1ff2   :  { %v13243_v50 = vpop.eup %13242 }
0x1ff3   :  { %v4124_v6 = vsel %vm754_vm11, %v13243_v50, 0.0 }
0x1ff4   :  { %v13245_v51 = vpop.eup %13244  ;;  %4125 = vadd.xlane.f32.xlu1 %v4124_v6 }
0x1ff5   :  { %v4121_v53 = vsel %vm754_vm11, %v13245_v51, 0.0 }
0x1ff6   :  { %4122 = vadd.xlane.f32.xlu0 %v4121_v53 }
0x2002   :  { %v3554_v55 = vpop.xlane.xlu1 %3553 }
0x2003   :  { %13246 = vrcp.f32 %v3554_v55 }
0x2004   :  { %v3551_v56 = vpop.xlane.xlu0 %3550 }
0x2005   :  { %13248 = vrcp.f32 %v3551_v56 }
0x2010   :  { %v13247_v57 = vpop.eup %13246 }
0x2011   :  { %v3558_v59 = vmul.f32 %v13247_v57, %v13231_v14 }
0x2012   :  { %v13249_v58 = vpop.eup %13248 }
0x2013   :  { %v3557_v49 = vmul.f32 %v13249_v58, %v13233_v16 }
0x2015   :  { %12491 = vmatprep.mubr.msk.f32.mxu1 %vm754_vm11, %v3557_v49 }
0x2016   :  { %12492 = vmatmul.mubr.msk.f32.vlgmr.msra.gmra.mxu1 %vm754_vm11, %v3558_v59 }
0x2017   :  { %12500 = vmatpush3.msra.mxu1 %v14420_v32 }
0x2018   :  { %12509 = vmatprep.subr.mxu1 %v14427_v34 }
0x2074   :  { %v3744_v60 = vpop.xlane.xlu1 %3743 }
0x2075   :  { %13250 = vrcp.f32 %v3744_v60 }
0x2076   :  { %v3741_v61 = vpop.xlane.xlu0 %3740 }
0x2077   :  { %13252 = vrcp.f32 %v3741_v61 }
0x2078   :  { %v3935_v63 = vpop.xlane.xlu1 %3934 }
0x2079   :  { %13254 = vrcp.f32 %v3935_v63 }
0x207a   :  { %v3932_v0 = vpop.xlane.xlu0 %3931 }
0x207b   :  { %13256 = vrcp.f32 %v3932_v0 }
0x207d   :  { %v4126_v2 = vpop.xlane.xlu1 %4125 }
0x207e   :  { %13258 = vrcp.f32 %v4126_v2 }
0x207f   :  { %v4123_v3 = vpop.xlane.xlu0 %4122 }
0x2080   :  { %13260 = vrcp.f32 %v4123_v3  ;;  %v4331_v3 = vld [vmem:[%s15992_s2 + $0x520] sm:$0xff] }
0x2082   :  { %v13251_v4 = vpop.eup %13250 }
0x2083   :  { %v3748_v11 = vmul.f32 %v13251_v4, %v13235_v39  ;;  %v4330_v4 = vld [vmem:[%s15992_s2 + $0x510] sm:$0xff] }
0x2084   :  { %v13253_v5 = vpop.eup %13252 }
0x2085   :  { %v3747_v9 = vmul.f32 %v13253_v5, %v13237_v37  ;;  %v14523_v5 = vmul.f32 0.35355338, %v14397_v28 }
0x2086   :  { %v13255_v10 = vpop.eup %13254 }
0x2087   :  { %12501 = vmatprep.mubr.msk.f32.mxu1 %vm754_vm11, %v3747_v9  ;;  %v3939_v21 = vmul.f32 %v13255_v10, %v13239_v41  ;;  %v3450_v41 = vld [vmem:[%s15992_s2 + $0x4c0] ss:$0 sm:$0xff] }
0x2088   :  { %v13257_v32 = vpop.eup %13256  ;;  %12502 = vmatmul.mubr.msk.f32.vlgmr.msra.gmra.mxu1 %vm754_vm11, %v3748_v11  ;;  %v4329_v9 = vld [vmem:[%s15992_s2 + $0x500] sm:$0xff]  ;;  %v4328_v11 = vld [vmem:[%s15992_s2 + $0x4f0] sm:$0xff] }
0x2089   :  { %12510 = vmatpush3.msra.mxu1 %v14427_v34  ;;  %v3938_v13 = vmul.f32 %v13257_v32, %v13241_v48  ;;  %v3449_v34 = vld [vmem:[%s15992_s2 + $0x4b0] sm:$0xff] }
0x208a   :  { %12519 = vmatprep.subr.mxu1 %v14432_v35  ;;  %12524 = vmatprep.subr.mxu0 %v3449_v34 }
0x208b   :  { %12511 = vmatprep.mubr.msk.f32.mxu1 %vm754_vm11, %v3938_v13  ;;  %v13259_v14 = vpop.eup %13258  ;;  %12525 = vmatpush3.msra.mxu0 %v3449_v34 }
0x208c   :  { %12512 = vmatmul.mubr.msk.f32.vlgmr.msra.gmra.mxu1 %vm754_vm11, %v3939_v21  ;;  %v4130_v17 = vmul.f32 %v13259_v14, %v13243_v50  ;;  %12526 = vmatprep.subr.mxu0 %v3448_v19 }
0x208d   :  { %v13261_v20 = vpop.eup %13260  ;;  %12520 = vmatpush3.msra.mxu1 %v14432_v35  ;;  %v3447_v35 = vld [vmem:[%s15992_s2 + $0x490] sm:$0xff]  ;;  %12527 = vmatpush3.msra.mxu0 %v3448_v19 }
0x208e   :  { %v4129_v16 = vmul.f32 %v13261_v20, %v13245_v51  ;;  %12528 = vmatprep.subr.mxu0 %v3447_v35  ;;  %12535 = vmatprep.subr.mxu1 %v4331_v3 }
0x208f   :  { %12529 = vmatpush3.msra.mxu0 %v3447_v35 }
0x2090   :  { %12521 = vmatprep.mubr.msk.f32.mxu1 %vm754_vm11, %v4129_v16  ;;  %12530 = vmatprep.subr.mxu0 %v3446_v23 }
0x2091   :  { %12522 = vmatmul.mubr.msk.f32.vlgmr.msra.gmra.mxu1 %vm754_vm11, %v4130_v17  ;;  %12531 = vmatpush3.msra.mxu0 %v3446_v23  ;;  %v4326_v17 = vld [vmem:[%s15992_s2 + $0x4d0] ss:$0 sm:$0xff] }
0x2092   :  { %12536 = vmatpush3.msra.mxu1 %v4331_v3 }
0x2093   :  { %12537 = vmatprep.subr.mxu1 %v4330_v4 }
0x2094   :  { %12538 = vmatpush3.msra.mxu1 %v4330_v4 }
0x2095   :  { %12539 = vmatprep.subr.mxu1 %v4329_v9 }
0x2096   :  { %12540 = vmatpush3.msra.mxu1 %v4329_v9 }
0x2097   :  { %12541 = vmatprep.subr.mxu1 %v4328_v11 }
0x2098   :  { %12542 = vmatpush3.msra.mxu1 %v4328_v11 }
0x2099   :  { %12557 = vmatprep.subr.mxu1 %v13472_v1 }
0x20d6   :  { %v12493_v18 = vpop.f32.mrf.mxu1 }
0x20d8   :  { %v3631_v22 = vpop.f32.mrf.mxu1 }
0x2148   :  { %v12503_v24 = vpop.f32.mrf.mxu1 }
0x2149   :  { %4217 = vrot.lane.b32.xlu1 %v12503_v24, %s13494_s5 }
0x214a   :  { %v3822_v45 = vpop.f32.mrf.mxu1 }
0x214b   :  { %4215 = vrot.lane.b32.xlu0 %v3822_v45, %s13494_s5 }
0x214c   :  { %v12513_v29 = vpop.f32.mrf.mxu1 }
0x214e   :  { %v4013_v25 = vpop.f32.mrf.mxu1 }
0x214f   :  { %4225 = vrot.lane.b32.xlu0 %v12513_v29, %s13495_s6  ;;  %4223 = vrot.lane.b32.xlu1 %v4013_v25, %s13495_s6 }
0x2151   :  { %v12523_v26 = vpop.f32.mrf.mxu1 }
0x2153   :  { %4233 = vrot.lane.b32.xlu0 %v12523_v26, %s13496_s13  ;;  %v4204_v27 = vpop.f32.mrf.mxu1 }
0x2154   :  { %4231 = vrot.lane.b32.xlu1 %v4204_v27, %s13496_s13  ;;  %v4336_v27 = vld [vmem:[%s15992_s2 + $0x570] sm:$0xff] }
0x2155   :  { %12546 = vmatprep.subr.mxu0 %v4336_v27 }
0x21bb   :  { %v4218_v30 = vpop.permute.xlu1 %4217 }
0x21bc   :  { %v4238_v54 = vsel %vm754_vm11, %v12493_v18, %v4218_v30  ;;  %v4335_v30 = vld [vmem:[%s15992_s2 + $0x560] sm:$0xff] }
0x21bd   :  { %v4216_v62 = vpop.permute.xlu0 %4215 }
0x21be   :  { %v4237_v52 = vsel %vm754_vm11, %v3631_v22, %v4216_v62  ;;  %v4327_v22 = vld [vmem:[%s15992_s2 + $0x4e0] ss:$0 sm:$0xff]  ;;  %v4334_v62 = vld [vmem:[%s15992_s2 + $0x550] sm:$0xff] }
0x21c1   :  { %v4226_v31 = vpop.permute.xlu0 %4225  ;;  %v4224_v33 = vpop.permute.xlu1 %4223 }
0x21c2   :  { %v4239_v38 = vsel %vm838_vm12, %v4237_v52, %v4224_v33  ;;  %v4240_v40 = vsel %vm838_vm12, %v4238_v54, %v4226_v31  ;;  %v4333_v31 = vld [vmem:[%s15992_s2 + $0x540] sm:$0xff]  ;;  %v4332_v33 = vld [vmem:[%s15992_s2 + $0x530] ss:$0 sm:$0xff] }
0x21c5   :  { %v4234_v36 = vpop.permute.xlu0 %4233 }
0x21c6   :  { %v4232_v39 = vpop.permute.xlu1 %4231  ;;  %v4242_v8 = vsel %vm1576_vm13, %v4240_v40, %v4234_v36 }
0x21c7   :  { %v4241_v37 = vsel %vm1576_vm13, %v4239_v38, %v4232_v39 }
0x21c8   :  { %12532 = vmatprep.mubr.msk.f32.mxu0 %vm197_vm10, %v4241_v37 }
0x21c9   :  { %12533 = vmatmul.mubr.msk.f32.vlgmr.msra.gmra.mxu0 %vm197_vm10, %v4242_v8  ;;  %v14588_v8 = vld [vmem:[%s15992_s2 + $0x210] sm:$0xff] }
0x21ca   :  { %12547 = vmatpush3.msra.mxu0 %v4336_v27 }
0x21cb   :  { %12548 = vmatprep.subr.mxu0 %v4335_v30 }
0x21cc   :  { %12549 = vmatpush3.msra.mxu0 %v4335_v30 }
0x21cd   :  { %12550 = vmatprep.subr.mxu0 %v4334_v62 }
0x21ce   :  { %12551 = vmatpush3.msra.mxu0 %v4334_v62 }
0x21cf   :  { %12552 = vmatprep.subr.mxu0 %v4333_v31 }
0x21d0   :  { %12553 = vmatpush3.msra.mxu0 %v4333_v31 }
0x21d1   :  { %12564 = vmatprep.subr.mxu0 %v13472_v1 }
0x2289   :  { %v12534_v42 = vpop.f32.mrf.mxu0 }
0x228a   :  { %v4321_v48 = vadd.f32 %v12534_v42, %v3450_v41 }
0x228b   :  { %v4315_v47 = vpop.f32.mrf.mxu0 }
0x228c   :  { %v4325_v50 = vadd.f32 %v14199_v43, %v4321_v48  ;;  %v4316_v6 = vadd.f32 %v4315_v47, %v3450_v41 }
0x228e   :  { %v4324_v51 = vadd.f32 %v4316_v6, %v14201_v44  ;;  %v4341_v53 = vsel %vm197_vm10, %v4325_v50, 0.0 }
0x228f   :  { %4342 = vadd.xlane.f32.xlu0 %v4341_v53 }
0x2290   :  { %v4338_v55 = vsel %vm197_vm10, %v4324_v51, 0.0 }
0x2291   :  { %4339 = vadd.xlane.f32.xlu1 %v4338_v55 }
0x2318   :  { %v4343_v56 = vpop.xlane.xlu0 %4342 }
0x2319   :  { %v4345_v57 = vmul.f32 0.03125, %v4343_v56 }
0x231a   :  { %v4340_v58 = vpop.xlane.xlu1 %4339 }
0x231b   :  { %v4347_v49 = vsub.f32 %v4325_v50, %v4345_v57  ;;  %v4344_v59 = vmul.f32 0.03125, %v4340_v58 }
0x231d   :  { %v4346_v60 = vsub.f32 %v4324_v51, %v4344_v59  ;;  %v4349_v61 = vmul.f32 %v4347_v49, %v4347_v49 }
0x231f   :  { %v4353_v63 = vsel %vm197_vm10, %v4349_v61, 0.0  ;;  %v4348_v0 = vmul.f32 %v4346_v60, %v4346_v60 }
0x2320   :  { %4354 = vadd.xlane.f32.xlu1 %v4353_v63 }
0x2321   :  { %v4350_v2 = vsel %vm197_vm10, %v4348_v0, 0.0 }
0x2322   :  { %4351 = vadd.xlane.f32.xlu0 %v4350_v2 }
0x2331   :  { %4720 = vrot.lane.b32.xlu1 %v14201_v44, %s13486_s23 }
0x2335   :  { %4718 = vrot.lane.b32.xlu1 %v14523_v5, %s13486_s23 }
0x2338   :  { %4722 = vrot.lane.b32.xlu0 %v14199_v43, %s13486_s23 }
0x23a9   :  { %v4355_v10 = vpop.xlane.xlu1 %4354 }
0x23aa   :  { %v4357_v32 = vmul.f32 0.03125, %v4355_v10 }
0x23ab   :  { %v4352_v13 = vpop.xlane.xlu0 %4351 }
0x23ac   :  { %v4359_v21 = vadd.f32 1e-05, %v4357_v32  ;;  %v4356_v14 = vmul.f32 0.03125, %v4352_v13 }
0x23ad   :  { %v14556_v25 = vpop.permute.xlu1 %4720 }
0x23ae   :  { %13262 = vrsqrt.f32 %v4359_v21  ;;  %v4358_v20 = vadd.f32 1e-05, %v4356_v14 }
0x23af   :  { %v14552_v29 = vpop.permute.xlu0 %4722 }
0x23b0   :  { %13264 = vrsqrt.f32 %v4358_v20 }
0x23b1   :  { %v4719_v26 = vpop.permute.xlu1 %4718 }
0x23bb   :  { %v13263_v16 = vpop.eup %13262 }
0x23bc   :  { %v4363_v34 = vmul.f32 %v13263_v16, %v4347_v49 }
0x23bd   :  { %v13265_v18 = vpop.eup %13264 }
0x23be   :  { %v4362_v19 = vmul.f32 %v13265_v18, %v4346_v60  ;;  %v4365_v35 = vmul.f32 %v4363_v34, %v4326_v17 }
0x23c0   :  { %v4364_v23 = vmul.f32 %v4362_v19, %v4326_v17  ;;  %v4367_v45 = vadd.f32 %v4365_v35, %v4327_v22 }
0x23c2   :  { %v4366_v24 = vadd.f32 %v4364_v23, %v4327_v22 }
0x23c4   :  { %12543 = vmatprep.mubr.msk.f32.mxu1 %vm197_vm10, %v4366_v24 }
0x23c5   :  { %12544 = vmatmul.mubr.msk.f32.vlgmr.msra.gmra.mxu1 %vm197_vm10, %v4367_v45 }
0x23c6   :  { %12558 = vmatpush3.xpose.msk.msra.mxu1 %vm754_vm11, %v14199_v43  ;;  %12561 = vmatprep.mubr.msk.f32.mxu1 %vm13477_vm2, %v13472_v1 }
0x23c7   :  { %12559 = vmatprep.subr.mxu1 %v13472_v1 }
0x23ca   :  { %12560 = vmatpush3.xpose.msk.msra.mxu1 %vm754_vm11, %v14201_v44 }
0x23cb   :  { %12571 = vmatprep.subr.mxu1 %v13472_v1 }
0x23cd   :  { %12562 = vmatmul.mubr.msk.f32.vlgmr.msra.gmra.mxu1 %vm754_vm11, %v14523_v5 }
0x23ce   :  { %12572 = vmatpush3.xpose.msk.msra.mxu1 %vm754_vm11, %v14552_v29  ;;  %12575 = vmatprep.mubr.msk.f32.mxu1 %vm13477_vm2, %v13472_v1 }
0x23cf   :  { %12573 = vmatprep.subr.mxu1 %v13472_v1 }
0x23d2   :  { %12574 = vmatpush3.xpose.msk.msra.mxu1 %vm754_vm11, %v14556_v25 }
0x23d3   :  { %12592 = vmatprep.subr.mxu1 %v13472_v1 }
0x23d5   :  { %12576 = vmatmul.mubr.msk.f32.vlgmr.msra.gmra.mxu1 %vm754_vm11, %v4719_v26 }
0x23d6   :  { %12596 = vmatprep.mubr.msk.f32.mxu1 %vm13477_vm2, %v13472_v1 }
0x2485   :  { %v12545_v52 = vpop.f32.mrf.mxu1 }
0x2486   :  { %v4446_v36 = vadd.f32 %v12545_v52, %v4332_v33 }
0x2487   :  { %v4440_v54 = vpop.f32.mrf.mxu1 }
0x2488   :  { %v4452_v38 = vmul.f32 0.044715, %v4446_v36  ;;  %v4441_v39 = vadd.f32 %v4440_v54, %v4332_v33  ;;  %v4450_v4 = vmul.f32 0.5, %v4446_v36 }
0x248a   :  { %v4454_v40 = vmul.f32 %v4452_v38, %v4446_v36  ;;  %v4451_v37 = vmul.f32 0.044715, %v4441_v39  ;;  %v4449_v2 = vmul.f32 0.5, %v4441_v39 }
0x248c   :  { %v4456_v41 = vmul.f32 %v4454_v40, %v4446_v36  ;;  %v4453_v42 = vmul.f32 %v4451_v37, %v4441_v39 }
0x248d   :  { %v4630_v48 = vpop.f32.mrf.mxu1 }
0x248e   :  { %v4458_v47 = vadd.f32 %v4456_v41, %v4446_v36  ;;  %v4455_v50 = vmul.f32 %v4453_v42, %v4441_v39  ;;  %v4631_v6 = vadd.f32 %v4630_v48, %v14588_v8 }
0x248f   :  { %v12563_v51 = vpop.f32.mrf.mxu1 }
0x2490   :  { %v4460_v53 = vmul.f32 0.7978846, %v4458_v47  ;;  %v4457_v55 = vadd.f32 %v4455_v50, %v4441_v39  ;;  %v4634_v56 = vsel %vm838_vm12, %v4631_v6, -inf }
0x2491   :  { %4635 = vmax.xlane.f32.xlu0 %v4634_v56 }
0x2492   :  { %13266 = vtanh.f32 %v4460_v53  ;;  %v4459_v57 = vmul.f32 0.7978846, %v4457_v55 }
0x2494   :  { %13268 = vtanh.f32 %v4459_v57 }
0x2495   :  { %v4796_v58 = vpop.f32.mrf.mxu1 }
0x2496   :  { %v4797_v49 = vadd.f32 %v4796_v58, %v14588_v8 }
0x2497   :  { %v12577_v59 = vpop.f32.mrf.mxu1 }
0x2498   :  { %v4800_v60 = vsel %vm838_vm12, %v4797_v49, -inf }
0x2499   :  { %4801 = vmax.xlane.f32.xlu1 %v4800_v60 }
0x249f   :  { %v13267_v61 = vpop.eup %13266 }
0x24a0   :  { %v4464_v0 = vadd.f32 1.0, %v13267_v61 }
0x24a1   :  { %v13269_v63 = vpop.eup %13268 }
0x24a2   :  { %v4463_v3 = vadd.f32 1.0, %v13269_v63  ;;  %v4466_v11 = vmul.f32 %v4464_v0, %v4450_v4  ;;  %v4551_v4 = vld [vmem:[%s15992_s2 + $0x6f0] sm:$0xff] }
0x24a4   :  { %v4465_v9 = vmul.f32 %v4463_v3, %v4449_v2  ;;  %v4552_v3 = vld [vmem:[%s15992_s2 + $0x700] sm:$0xff] }
0x24a6   :  { %12554 = vmatprep.mubr.msk.f32.mxu0 %vm197_vm10, %v4465_v9  ;;  %v4550_v9 = vld [vmem:[%s15992_s2 + $0x6e0] sm:$0xff] }
0x24a7   :  { %12555 = vmatmul.mubr.msk.f32.vlgmr.msra.gmra.mxu0 %vm197_vm10, %v4466_v11  ;;  %v4549_v11 = vld [vmem:[%s15992_s2 + $0x6d0] sm:$0xff] }
0x24a8   :  { %12565 = vmatpush3.msra.mxu0 %v14199_v43  ;;  %12568 = vmatprep.mubr.msk.f32.mxu0 %vm13477_vm2, %v13472_v1 }
0x24a9   :  { %12566 = vmatprep.subr.mxu0 %v13472_v1 }
0x24aa   :  { %12567 = vmatpush3.msra.mxu0 %v14201_v44  ;;  %4890 = vrot.lane.b32.xlu1 %v14199_v43, %s13489_s27 }
0x24ab   :  { %12578 = vmatprep.subr.mxu0 %v13472_v1 }
0x24ae   :  { %4886 = vrot.lane.b32.xlu1 %v14523_v5, %s13489_s27 }
0x251a   :  { %v4636_v10 = vpop.xlane.xlu0 %4635 }
0x251b   :  { %v4637_v32 = vsub.f32 %v4631_v6, %v4636_v10 }
0x251d   :  { %v4638_v13 = vmul.f32 1.442695, %v4637_v32 }
0x251f   :  { %13270 = vpow2.f32 %v4638_v13 }
0x2522   :  { %v4802_v21 = vpop.xlane.xlu1 %4801 }
0x2523   :  { %v4803_v14 = vsub.f32 %v4797_v49, %v4802_v21 }
0x2525   :  { %v4804_v20 = vmul.f32 1.442695, %v4803_v14 }
0x2526   :  { %v4891_v16 = vpop.permute.xlu1 %4890 }
0x2527   :  { %13272 = vpow2.f32 %v4804_v20  ;;  %12593 = vmatpush3.msra.mxu1 %v4891_v16 }
0x2528   :  { %12594 = vmatprep.subr.mxu1 %v13472_v1 }
0x252c   :  { %v13271_v17 = vpop.eup %13270 }
0x252d   :  { %v4640_v34 = vsel %vm838_vm12, %v13271_v17, 0.0 }
0x252e   :  { %4641 = vadd.xlane.f32.xlu0 %v4640_v34  ;;  %v4553_v34 = vld [vmem:[%s15992_s2 + $0x710] ss:$0 sm:$0xff] }
0x2534   :  { %v13273_v18 = vpop.eup %13272 }
0x2535   :  { %v4806_v19 = vsel %vm838_vm12, %v13273_v18, 0.0 }
0x2536   :  { %4807 = vadd.xlane.f32.xlu0 %v4806_v19 }
0x254c   :  { %4888 = vrot.lane.b32.xlu0 %v14201_v44, %s13489_s27 }
0x25b7   :  { %v4642_v35 = vpop.xlane.xlu0 %4641 }
0x25b8   :  { %13274 = vrcp.f32 %v4642_v35 }
0x25bf   :  { %v4808_v22 = vpop.xlane.xlu0 %4807 }
0x25c0   :  { %13276 = vrcp.f32 %v4808_v22 }
0x25c3   :  { %v4889_v23 = vpop.permute.xlu0 %4888 }
0x25c4   :  { %12595 = vmatpush3.msra.mxu1 %v4889_v23 }
0x25c5   :  { %v13275_v24 = vpop.eup %13274  ;;  %12599 = vmatprep.subr.mxu1 %v13472_v1 }
0x25c6   :  { %v4644_v45 = vmul.f32 %v13275_v24, %v13271_v17 }
0x25c8   :  { %12569 = vmatmul.mubr.msk.f32.vlgmr.msra.gmra.mxu0 %vm838_vm12, %v4644_v45 }
0x25c9   :  { %12579 = vmatpush3.msra.mxu0 %v14552_v29  ;;  %12582 = vmatprep.mubr.msk.f32.mxu0 %vm13477_vm2, %v13472_v1  ;;  %v4887_v29 = vpop.permute.xlu1 %4886 }
0x25ca   :  { %12580 = vmatprep.subr.mxu0 %v13472_v1 }
0x25cb   :  { %12581 = vmatpush3.msra.mxu0 %v14556_v25  ;;  %v14629_v25 = vpop.f32.mrf.mxu0 }
0x25cc   :  { %12585 = vmatprep.subr.mxu0 %v13472_v1 }
0x25cd   :  { %v13277_v26 = vpop.eup %13276  ;;  %v14631_v30 = vpop.f32.mrf.mxu0 }
0x25ce   :  { %v4810_v27 = vmul.f32 %v13277_v26, %v13273_v18 }
0x25d0   :  { %12583 = vmatmul.mubr.msk.f32.vlgmr.msra.gmra.mxu0 %vm838_vm12, %v4810_v27 }
0x25d1   :  { %12586 = vmatpush3.xpose.msk.msra.mxu0 %vm754_vm11, %v4891_v16  ;;  %12589 = vmatprep.mubr.msk.f32.mxu0 %vm13477_vm2, %v13472_v1 }
0x25d2   :  { %12587 = vmatprep.subr.mxu0 %v13472_v1 }
0x25d5   :  { %12588 = vmatpush3.xpose.msk.msra.mxu0 %vm754_vm11, %v4889_v23 }
0x25d6   :  { %12606 = vmatprep.subr.mxu0 %v13472_v1 }
0x25d8   :  { %12590 = vmatmul.mubr.msk.f32.vlgmr.msra.gmra.mxu0 %vm754_vm11, %v4887_v29 }
0x25d9   :  { %12610 = vmatprep.mubr.msk.f32.mxu0 %vm13477_vm2, %v13472_v1 }
0x2688   :  { %v14633_v62 = vpop.f32.mrf.mxu0 }
0x268a   :  { %v12570_v31 = vpop.f32.mrf.mxu0 }
0x268b   :  { %v5316_v31 = vld [vmem:[%s15992_s2 + $0x770] sm:$0xff] }
0x2690   :  { %v4882_v33 = vpop.f32.mrf.mxu0 }
0x2692   :  { %v12584_v52 = vpop.f32.mrf.mxu0 }
0x2693   :  { %v5314_v52 = vld [vmem:[%s15992_s2 + $0x750] sm:$0xff] }
0x2698   :  { %v4964_v36 = vpop.f32.mrf.mxu0 }
0x2699   :  { %v4965_v54 = vadd.f32 %v4964_v36, %v14588_v8  ;;  %v5313_v36 = vld [vmem:[%s15992_s2 + $0x740] sm:$0xff] }
0x269a   :  { %v12591_v38 = vpop.f32.mrf.mxu0 }
0x269b   :  { %v4968_v39 = vsel %vm838_vm12, %v4965_v54, -inf }
0x269c   :  { %4969 = vmax.xlane.f32.xlu1 %v4968_v39 }
0x26ad   :  { %5056 = vrot.lane.b32.xlu1 %v14201_v44, %s13492_s4 }
0x26b1   :  { %5054 = vrot.lane.b32.xlu1 %v14523_v5, %s13492_s4 }
0x2725   :  { %v4970_v40 = vpop.xlane.xlu1 %4969 }
0x2726   :  { %v4971_v37 = vsub.f32 %v4965_v54, %v4970_v40 }
0x2728   :  { %v4972_v41 = vmul.f32 1.442695, %v4971_v37 }
0x2729   :  { %v5057_v6 = vpop.permute.xlu1 %5056 }
0x272a   :  { %13278 = vpow2.f32 %v4972_v41 }
0x2737   :  { %v13279_v42 = vpop.eup %13278 }
0x2738   :  { %v4974_v48 = vsel %vm838_vm12, %v13279_v42, 0.0 }
0x2739   :  { %4975 = vadd.xlane.f32.xlu0 %v4974_v48 }
0x274f   :  { %5058 = vrot.lane.b32.xlu0 %v14199_v43, %s13492_s4  ;;  %v5055_v43 = vpop.permute.xlu1 %5054 }
0x27c2   :  { %v4976_v47 = vpop.xlane.xlu0 %4975 }
0x27c3   :  { %13280 = vrcp.f32 %v4976_v47 }
0x27c6   :  { %v5059_v50 = vpop.permute.xlu0 %5058 }
0x27c7   :  { %12607 = vmatpush3.msra.mxu0 %v5059_v50 }
0x27c8   :  { %12608 = vmatprep.subr.mxu0 %v13472_v1 }
0x27c9   :  { %12609 = vmatpush3.msra.mxu0 %v5057_v6 }
0x27ca   :  { %12613 = vmatprep.subr.mxu0 %v13472_v1 }
0x27d0   :  { %v13281_v44 = vpop.eup %13280 }
0x27d1   :  { %v4978_v5 = vmul.f32 %v13281_v44, %v13279_v42  ;;  %v5311_v42 = vld [vmem:[%s15992_s2 + $0x720] ss:$0 sm:$0xff] }
0x27d2   :  { %v14741_v44 = vld [vmem:[%s15992_s2 + $0xa0] sm:$0xff] }
0x27d3   :  { %12597 = vmatmul.mubr.msk.f32.vlgmr.msra.gmra.mxu1 %vm838_vm12, %v4978_v5  ;;  %v14748_v5 = vld [vmem:[%s15992_s2 + $0x90] sm:$0xff] }
0x27d4   :  { %12600 = vmatpush3.xpose.msk.msra.mxu1 %vm754_vm11, %v5059_v50  ;;  %12603 = vmatprep.mubr.msk.f32.mxu1 %vm13477_vm2, %v13472_v1 }
0x27d5   :  { %12601 = vmatprep.subr.mxu1 %v13472_v1 }
0x27d8   :  { %12602 = vmatpush3.xpose.msk.msra.mxu1 %vm754_vm11, %v5057_v6  ;;  %v14732_v6 = vld [vmem:[%s15992_s2 + $0xb0] sm:$0xff] }
0x27d9   :  { %12624 = vmatprep.subr.mxu1 %v13472_v1 }
0x27db   :  { %12604 = vmatmul.mubr.msk.f32.vlgmr.msra.gmra.mxu1 %vm754_vm11, %v5055_v43  ;;  %v14755_v43 = vld [vmem:[%s15992_s2 + $0x80] sm:$0xff] }
0x27dc   :  { %12632 = vmatprep.mubr.msk.f32.mxu1 %vm13477_vm2, %v13472_v1  ;;  %12625 = vmatpush3.msra.mxu1 %v5316_v31 }
0x27dd   :  { %12626 = vmatprep.subr.mxu1 %v13472_v1 }
0x2893   :  { %v5050_v51 = vpop.f32.mrf.mxu1 }
0x2895   :  { %v12598_v53 = vpop.f32.mrf.mxu1 }
0x2896   :  { %v14769_v53 = vld [vmem:[%s15992_s2 + $0x60] sm:$0xff] }
0x289b   :  { %v5132_v55 = vpop.f32.mrf.mxu1 }
0x289c   :  { %v5133_v56 = vadd.f32 %v5132_v55, %v14588_v8  ;;  %v14776_v55 = vld [vmem:[%s15992_s2 + $0x50] sm:$0xff] }
0x289d   :  { %v12605_v57 = vpop.f32.mrf.mxu1 }
0x289e   :  { %v5136_v58 = vsel %vm838_vm12, %v5133_v56, -inf  ;;  %v5321_v57 = vld [vmem:[%s15992_s2 + $0x7c0] sm:$0xff] }
0x289f   :  { %5137 = vmax.xlane.f32.xlu0 %v5136_v58  ;;  %v5320_v58 = vld [vmem:[%s15992_s2 + $0x7b0] sm:$0xff] }
0x28b5   :  { %5223 = vrot.lane.b32.xlu0 %v4882_v33, %s13494_s5 }
0x2928   :  { %v5138_v49 = vpop.xlane.xlu0 %5137 }
0x2929   :  { %v5139_v59 = vsub.f32 %v5133_v56, %v5138_v49  ;;  %v14783_v56 = vld [vmem:[%s15992_s2 + $0x40] sm:$0xff] }
0x292a   :  { %v5319_v49 = vld [vmem:[%s15992_s2 + $0x7a0] sm:$0xff] }
0x292b   :  { %v5140_v60 = vmul.f32 1.442695, %v5139_v59  ;;  %v5318_v59 = vld [vmem:[%s15992_s2 + $0x790] sm:$0xff] }
0x292c   :  { %v5224_v13 = vpop.permute.xlu0 %5223 }
0x292d   :  { %13282 = vpow2.f32 %v5140_v60  ;;  %v5234_v14 = vsel %vm754_vm11, %v14633_v62, %v5224_v13  ;;  %v4337_v62 = vld [vmem:[%s15992_s2 + $0x580] ss:$0 sm:$0xff] }
0x292e   :  { %v4545_v33 = vadd.f32 %v14629_v25, %v4337_v62  ;;  %v4540_v38 = vadd.f32 %v14631_v30, %v4337_v62  ;;  %v5312_v30 = vld [vmem:[%s15992_s2 + $0x730] ss:$0 sm:$0xff] }
0x293a   :  { %v13283_v61 = vpop.eup %13282 }
0x293b   :  { %v5142_v63 = vsel %vm838_vm12, %v13283_v61, 0.0 }
0x293c   :  { %5143 = vadd.xlane.f32.xlu1 %v5142_v63 }
0x294d   :  { %5227 = vrot.lane.b32.xlu1 %v5050_v51, %s13495_s6  ;;  %v14762_v51 = vld [vmem:[%s15992_s2 + $0x70] sm:$0xff] }
0x29c5   :  { %v5144_v0 = vpop.xlane.xlu1 %5143 }
0x29c6   :  { %13284 = vrcp.f32 %v5144_v0 }
0x29c9   :  { %v5228_v21 = vpop.permute.xlu1 %5227 }
0x29ca   :  { %v5235_v20 = vsel %vm838_vm12, %v5234_v14, %v5228_v21 }
0x29d3   :  { %v13285_v2 = vpop.eup %13284 }
0x29d4   :  { %v5146_v8 = vmul.f32 %v13285_v2, %v13283_v61 }
0x29d6   :  { %12611 = vmatmul.mubr.msk.f32.vlgmr.msra.gmra.mxu0 %vm838_vm12, %v5146_v8 }
0x29d7   :  { %12621 = vmatprep.mubr.msk.f32.mxu0 %vm13477_vm2, %v13472_v1  ;;  %12614 = vmatpush3.msra.mxu0 %v4552_v3  ;;  %v5589_v3 = vld [vmem:[%s15992_s2 + $0x8f0] sm:$0xff] }
0x29d8   :  { %12615 = vmatprep.subr.mxu0 %v13472_v1 }
0x29d9   :  { %12616 = vmatpush3.msra.mxu0 %v4551_v4  ;;  %v5588_v4 = vld [vmem:[%s15992_s2 + $0x8e0] sm:$0xff] }
0x29da   :  { %12617 = vmatprep.subr.mxu0 %v13472_v1 }
0x29db   :  { %12618 = vmatpush3.msra.mxu0 %v4550_v9  ;;  %v5317_v9 = vld [vmem:[%s15992_s2 + $0x780] ss:$0 sm:$0xff] }
0x29dc   :  { %12619 = vmatprep.subr.mxu0 %v13472_v1 }
0x29dd   :  { %12620 = vmatpush3.msra.mxu0 %v4549_v11 }
0x29de   :  { %12635 = vmatprep.subr.mxu0 %v13472_v1 }
0x2a96   :  { %v5218_v10 = vpop.f32.mrf.mxu0 }
0x2a97   :  { %5231 = vrot.lane.b32.xlu0 %v5218_v10, %s13496_s13 }
0x2a98   :  { %v12612_v32 = vpop.f32.mrf.mxu0 }
0x2b09   :  { %v5232_v16 = vpop.permute.xlu0 %5231 }
0x2b0a   :  { %v5236_v17 = vsel %vm1576_vm13, %v5235_v20, %v5232_v16 }
0x2b0b   :  { %12622 = vmatmul.mubr.msk.f32.vlgmr.msra.gmra.mxu0 %vm197_vm10, %v5236_v17 }
0x2b0c   :  { %12643 = vmatprep.mubr.msk.f32.mxu0 %vm13477_vm2, %v13472_v1  ;;  %12636 = vmatpush3.msra.mxu0 %v5321_v57 }
0x2b0d   :  { %12637 = vmatprep.subr.mxu0 %v13472_v1 }
0x2b0e   :  { %12638 = vmatpush3.msra.mxu0 %v5320_v58 }
0x2b0f   :  { %12639 = vmatprep.subr.mxu0 %v13472_v1 }
0x2b10   :  { %12640 = vmatpush3.msra.mxu0 %v5319_v49 }
0x2b11   :  { %12641 = vmatprep.subr.mxu0 %v13472_v1 }
0x2b12   :  { %12642 = vmatpush3.msra.mxu0 %v5318_v59  ;;  %v5889_v59 = vld [vmem:[%s15992_s2 + $0x7f0] sm:$0xff] }
0x2b13   :  { %12665 = vmatprep.subr.mxu0 %v13472_v1 }
0x2bcb   :  { %v5306_v18 = vpop.f32.mrf.mxu0 }
0x2bcc   :  { %v5307_v19 = vadd.f32 %v5306_v18, %v4553_v34 }
0x2bcd   :  { %v12623_v35 = vpop.f32.mrf.mxu0 }
0x2bce   :  { %v5310_v22 = vadd.f32 %v5307_v19, %v14397_v28  ;;  %v5315_v28 = vld [vmem:[%s15992_s2 + $0x760] sm:$0xff] }
0x2bcf   :  { %12627 = vmatpush3.msra.mxu1 %v5315_v28 }
0x2bd0   :  { %v5323_v23 = vsel %vm197_vm10, %v5310_v22, 0.0  ;;  %12628 = vmatprep.subr.mxu1 %v13472_v1 }
0x2bd1   :  { %5324 = vadd.xlane.f32.xlu1 %v5323_v23  ;;  %12629 = vmatpush3.msra.mxu1 %v5314_v52 }
0x2bd2   :  { %12630 = vmatprep.subr.mxu1 %v13472_v1 }
0x2bd3   :  { %12631 = vmatpush3.msra.mxu1 %v5313_v36  ;;  %v5587_v36 = vld [vmem:[%s15992_s2 + $0x8d0] sm:$0xff] }
0x2bd4   :  { %12646 = vmatprep.subr.mxu1 %v13472_v1 }
0x2c5a   :  { %v5325_v24 = vpop.xlane.xlu1 %5324 }
0x2c5b   :  { %v5326_v45 = vmul.f32 0.03125, %v5325_v24 }
0x2c5d   :  { %v5327_v26 = vsub.f32 %v5310_v22, %v5326_v45 }
0x2c5f   :  { %v5328_v27 = vmul.f32 %v5327_v26, %v5327_v26 }
0x2c61   :  { %v5329_v29 = vsel %vm197_vm10, %v5328_v27, 0.0 }
0x2c62   :  { %5330 = vadd.xlane.f32.xlu0 %v5329_v29 }
0x2c78   :  { %5494 = vrot.lane.b32.xlu0 %v4545_v33, %s13501_s11 }
0x2ceb   :  { %v5331_v25 = vpop.xlane.xlu0 %5330 }
0x2cec   :  { %v5332_v54 = vmul.f32 0.03125, %v5331_v25 }
0x2cee   :  { %v5333_v39 = vadd.f32 1e-05, %v5332_v54 }
0x2cef   :  { %v5495_v40 = vpop.permute.xlu0 %5494 }
0x2cf0   :  { %13286 = vrsqrt.f32 %v5333_v39  ;;  %v14717_v37 = vsel %vm197_vm10, %v4540_v38, %v5495_v40 }
0x2cf1   :  { %5590 = vrot.lane.b32.xlu1 %v14717_v37, %s13470_s14 }
0x2cf5   :  { %5596 = vrot.lane.b32.xlu1 %v14717_v37, %s13504_s1 }
0x2cfd   :  { %v13287_v41 = vpop.eup %13286 }
0x2cfe   :  { %v5335_v48 = vmul.f32 %v13287_v41, %v5327_v26 }
0x2d00   :  { %v5336_v47 = vmul.f32 %v5335_v48, %v5311_v42 }
0x2d02   :  { %v5337_v50 = vadd.f32 %v5336_v47, %v5312_v30 }
0x2d04   :  { %12633 = vmatmul.mubr.msk.f32.vlgmr.msra.gmra.mxu1 %vm197_vm10, %v5337_v50 }
0x2d05   :  { %12647 = vmatpush3.msra.mxu1 %v14732_v6  ;;  %12662 = vmatprep.mubr.msk.f32.mxu1 %vm13477_vm2, %v13472_v1 }
0x2d06   :  { %12648 = vmatprep.subr.mxu1 %v13472_v1 }
0x2d07   :  { %12649 = vmatpush3.msra.mxu1 %v14741_v44 }
0x2d08   :  { %12650 = vmatprep.subr.mxu1 %v13472_v1 }
0x2d09   :  { %12651 = vmatpush3.msra.mxu1 %v14748_v5 }
0x2d0a   :  { %12652 = vmatprep.subr.mxu1 %v13472_v1 }
0x2d0b   :  { %12653 = vmatpush3.msra.mxu1 %v14755_v43 }
0x2d0c   :  { %12654 = vmatprep.subr.mxu1 %v13472_v1 }
0x2d0d   :  { %12655 = vmatpush3.msra.mxu1 %v14762_v51 }
0x2d0e   :  { %12656 = vmatprep.subr.mxu1 %v13472_v1 }
0x2d0f   :  { %12657 = vmatpush3.msra.mxu1 %v14769_v53 }
0x2d10   :  { %12658 = vmatprep.subr.mxu1 %v13472_v1 }
0x2d11   :  { %12659 = vmatpush3.msra.mxu1 %v14776_v55 }
0x2d12   :  { %12660 = vmatprep.subr.mxu1 %v13472_v1 }
0x2d13   :  { %12661 = vmatpush3.msra.mxu1 %v14783_v56 }
0x2d14   :  { %12678 = vmatprep.subr.mxu1 %v13472_v1 }
0x2d63   :  { %v5591_v60 = vpop.permute.xlu1 %5590 }
0x2d64   :  { %v5593_v61 = vsel %vm23_vm0, 0.0, %v5591_v60 }
0x2d65   :  { %v5595_v63 = vsel %vm5594_vm9, %v5593_v61, 0.0  ;;  %v5808_v61 = vld [vmem:[%s15992_s2 + $0x240] sm:$0x3] }
0x2d66   :  { %5628 = vrot.lane.b32.xlu0 %v5595_v63, %s15996_s16 }
0x2d67   :  { %v5597_v0 = vpop.permute.xlu1 %5596 }
0x2d68   :  { %v5599_v2 = vsel %vm23_vm0, 0.0, %v5597_v0 }
0x2d69   :  { %v5600_v8 = vsel %vm5594_vm9, %v5599_v2, 0.0  ;;  %vm10783_vm9 = vcmask 1040384  }
0x2d6a   :  { %5621 = vrot.lane.b32.xlu0 %v5595_v63, %s15997_s9  ;;  %5631 = vrot.lane.b32.xlu1 %v5600_v8, %s13505_s0  ;;  %s13507_s9 = smov 113  }
0x2d6e   :  { %5614 = vrot.lane.b32.xlu0 %v5595_v63, %s13478_s19  ;;  %5624 = vrot.lane.b32.xlu1 %v5600_v8, %s13506_s10 }
0x2d72   :  { %5607 = vrot.lane.b32.xlu0 %v5595_v63, %s13475_s17  ;;  %5617 = vrot.lane.b32.xlu1 %v5600_v8, %s13502_s12  ;;  %s13511_s12 = smov [#allocation2]  }
0x2d76   :  { %5602 = vrot.lane.b32.xlu0 %v5600_v8, %s13501_s11  ;;  %5610 = vrot.lane.b32.xlu1 %v5600_v8, %s13503_s18  ;;  %s11443_s18 = sshll.u32 %s13511_s12, 4  ;;  %s11444_s18 = int_to_ptr.vmem [resolvable:$true] %s11443_s18 }
0x2d77   :  { %p13453_p1 = scmp.lt.s32.totalorder %s11444_s18, %s11444_s18 }
0x2d7a   :  { %5716 = vperm.xlu0 %13158, %v5589_v3   ;;  %5710 = vperm.xlu1 %13161, %v5588_v4  }
0x2d7e   :  { %5505 = vrot.lane.b32.xlu1 %v14717_v37, %s13475_s17 }
0x2dc4   :  { %v5407_v11 = vpop.f32.mrf.mxu1 }
0x2dc5   :  { %v5408_v10 = vadd.f32 %v5407_v11, %v5317_v9 }
0x2dc6   :  { %v12634_v32 = vpop.f32.mrf.mxu1 }
0x2dc7   :  { %v5412_v13 = vmul.f32 0.044715, %v5408_v10  ;;  %v5411_v35 = vmul.f32 0.5, %v5408_v10 }
0x2dc9   :  { %v5413_v21 = vmul.f32 %v5412_v13, %v5408_v10 }
0x2dcb   :  { %v5414_v14 = vmul.f32 %v5413_v21, %v5408_v10 }
0x2dcd   :  { %v5415_v20 = vadd.f32 %v5414_v14, %v5408_v10 }
0x2dcf   :  { %v5416_v16 = vmul.f32 0.7978846, %v5415_v20  ;;  %v14928_v20 = vld [vmem:[%s15992_s2 + $0x1d0] sm:$0xff] }
0x2dd1   :  { %13288 = vtanh.f32 %v5416_v16 }
0x2dd8   :  { %v5629_v17 = vpop.permute.xlu0 %5628 }
0x2ddc   :  { %v5622_v34 = vpop.permute.xlu0 %5621  ;;  %v5632_v18 = vpop.permute.xlu1 %5631 }
0x2ddd   :  { %v5634_v26 = vsel %vm197_vm10, %v5629_v17, %v5632_v18 }
0x2dde   :  { %v13289_v19 = vpop.eup %13288 }
0x2ddf   :  { %v5418_v22 = vadd.f32 1.0, %v13289_v19 }
0x2de0   :  { %v5615_v23 = vpop.permute.xlu0 %5614  ;;  %v5625_v24 = vpop.permute.xlu1 %5624 }
0x2de1   :  { %v5419_v45 = vmul.f32 %v5418_v22, %v5411_v35  ;;  %v5627_v62 = vsel %vm197_vm10, %v5622_v34, %v5625_v24  ;;  %v14934_v34 = vld [vmem:[%s15992_s2 + $0x1c0] sm:$0xff] }
0x2de3   :  { %12644 = vmatmul.mubr.msk.f32.vlgmr.msra.gmra.mxu0 %vm197_vm10, %v5419_v45 }
0x2de4   :  { %12666 = vmatpush3.msra.mxu0 %v5634_v26  ;;  %v5608_v27 = vpop.permute.xlu0 %5607  ;;  %v5618_v29 = vpop.permute.xlu1 %5617  ;;  %12675 = vmatprep.mubr.msk.f32.mxu0 %vm13477_vm2, %v13472_v1 }
0x2de5   :  { %v5620_v31 = vsel %vm197_vm10, %v5615_v23, %v5618_v29  ;;  %12667 = vmatprep.subr.mxu0 %v13472_v1 }
0x2de6   :  { %12668 = vmatpush3.msra.mxu0 %v5627_v62 }
0x2de7   :  { %12669 = vmatprep.subr.mxu0 %v13472_v1 }
0x2de8   :  { %12670 = vmatpush3.msra.mxu0 %v5620_v31  ;;  %v5603_v28 = vpop.permute.xlu0 %5602  ;;  %v5611_v33 = vpop.permute.xlu1 %5610 }
0x2de9   :  { %v5613_v52 = vsel %vm197_vm10, %v5608_v27, %v5611_v33  ;;  %12671 = vmatprep.subr.mxu0 %v13472_v1  ;;  %v5605_v25 = vsel %vm197_vm10, %v5595_v63, %v5603_v28  ;;  %v5888_v63 = vld [vmem:[%s15992_s2 + $0x7e0] sm:$0xff] }
0x2dea   :  { %12672 = vmatpush3.msra.mxu0 %v5613_v52 }
0x2deb   :  { %12673 = vmatprep.subr.mxu0 %v13472_v1 }
0x2dec   :  { %12674 = vmatpush3.msra.mxu0 %v5605_v25 }
0x2ded   :  { %12676 = vmatmul.mubr.msk.f32.vlgmr.msra.gmra.mxu0 %vm407_vm7, %v5587_v36  ;;  %12697 = vmatprep.subr.mxu0 %v13472_v1 }
0x2dee   :  { %12699 = vmatprep.mubr.msk.f32.mxu0 %vm13477_vm2, %v13472_v1 }
0x2df5   :  { %v5711_v54 = vpop.permute.xlu1 %5710  ;;  %v5717_v30 = vpop.permute.xlu0 %5716 }
0x2df9   :  { %v5506_v38 = vpop.permute.xlu1 %5505 }
0x2dfa   :  { %v5508_v39 = vsel %vm1982_vm5, %v5506_v38, %v14717_v37 }
0x2dfb   :  { %v5509_v40 = vmax.f32 %v14717_v37, %v5508_v39 }
0x2dfd   :  { %12663 = vmatmul.mubr.msk.f32.vlgmr.msra.gmra.mxu1 %vm36_vm4, %v5509_v40 }
0x2dfe   :  { %12679 = vmatpush3.msra.mxu1 %v14732_v6  ;;  %12694 = vmatprep.mubr.msk.f32.mxu1 %vm13477_vm2, %v13472_v1 }
0x2dff   :  { %12680 = vmatprep.subr.mxu1 %v13472_v1 }
0x2e00   :  { %12681 = vmatpush3.msra.mxu1 %v14741_v44 }
0x2e01   :  { %12682 = vmatprep.subr.mxu1 %v13472_v1 }
0x2e02   :  { %12683 = vmatpush3.msra.mxu1 %v14748_v5 }
0x2e03   :  { %12684 = vmatprep.subr.mxu1 %v13472_v1 }
0x2e04   :  { %12685 = vmatpush3.msra.mxu1 %v14755_v43 }
0x2e05   :  { %12686 = vmatprep.subr.mxu1 %v13472_v1 }
0x2e06   :  { %12687 = vmatpush3.msra.mxu1 %v14762_v51 }
0x2e07   :  { %12688 = vmatprep.subr.mxu1 %v13472_v1 }
0x2e08   :  { %12689 = vmatpush3.msra.mxu1 %v14769_v53 }
0x2e09   :  { %12690 = vmatprep.subr.mxu1 %v13472_v1 }
0x2e0a   :  { %12691 = vmatpush3.msra.mxu1 %v14776_v55 }
0x2e0b   :  { %12692 = vmatprep.subr.mxu1 %v13472_v1 }
0x2e0c   :  { %12693 = vmatpush3.msra.mxu1 %v14783_v56 }
0x2ea3   :  { %v14863_v37 = vpop.f32.mrf.mxu0 }
0x2ea5   :  { %v12645_v41 = vpop.f32.mrf.mxu0 }
0x2ead   :  { %v5704_v42 = vpop.f32.mrf.mxu0 }
0x2eae   :  { %v5713_v48 = vmul.f32 %v5711_v54, %v5704_v42 }
0x2eaf   :  { %v12677_v47 = vpop.f32.mrf.mxu0 }
0x2eb0   :  { %v5719_v50 = vadd.f32 %v5717_v30, %v5713_v48 }
0x2eb2   :  { %v5721_v6 = vmul.f32 1.442695, %v5719_v50  ;;  %vm5720_vm0 = vcmp.gt.f32.partialorder %v5719_v50, 0.0 }
0x2eb4   :  { %13290 = vpow2.f32 %v5721_v6 }
0x2ebd   :  { %v14865_v44 = vpop.f32.mrf.mxu1 }
0x2ebe   :  { %5584 = vrot.lane.b32.xlu1 %v14865_v44, %s13489_s27 }
0x2ebf   :  { %v12664_v5 = vpop.f32.mrf.mxu1 }
0x2ec1   :  { %v13291_v43 = vpop.eup %13290 }
0x2ec2   :  { %v11565_v51 = vadd.f32 -1.0, %v13291_v43 }
0x2ec4   :  { %v5724_v53 = vsel %vm5720_vm0, %v5719_v50, %v11565_v51  ;;  %vm10816_vm0 = vcmask 1041408  }
0x2ec5   :  { %5726 = vrot.lane.b32.xlu0 %v5724_v53, %s13475_s17 }
0x2f30   :  { %v14889_v0 = vpop.permute.xlu1 %5584 }
0x2f37   :  { %v5727_v55 = vpop.permute.xlu0 %5726 }
0x2f38   :  { %v5729_v56 = vsel %vm1982_vm5, %v5727_v55, %v5724_v53  ;;  %vm10745_vm5 = vcmask 654336  }
0x2f39   :  { %v5730_v57 = vmax.f32 %v5724_v53, %v5729_v56 }
0x2f3b   :  { %12695 = vmatmul.mubr.msk.f32.vlgmr.msra.gmra.mxu1 %vm36_vm4, %v5730_v57 }
0x2ffb   :  { %v14872_v58 = vpop.f32.mrf.mxu1 }
0x2ffc   :  { %v5809_v49 = vmul.f32 %v14872_v58, %v14872_v58 }
0x2ffd   :  { %v12696_v60 = vpop.f32.mrf.mxu1 }
0x2ffe   :  { %12698 = vmatpush3.xpose.msk.msra.mxu0 %vm197_vm10, %v5809_v49 }
0x2fff   :  { %12702 = vmatprep.subr.mxu0 %v5889_v59 }
0x3001   :  { %12700 = vmatmul.mubr.msk.f32.vlgmr.msra.gmra.mxu0 %vm197_vm10, %v5808_v61 }
0x3002   :  { %12703 = vmatpush3.msra.mxu0 %v5889_v59  ;;  %12706 = vmatprep.mubr.msk.f32.mxu0 %vm838_vm12, %v14865_v44 }
0x3003   :  { %12704 = vmatprep.subr.mxu0 %v5888_v63 }
0x3004   :  { %12705 = vmatpush3.msra.mxu0 %v5888_v63 }
0x3005   :  { %12707 = vmatmul.mubr.msk.f32.vlgmr.msra.gmra.mxu0 %vm838_vm12, %v14889_v0 }
0x30c1   :  { %v14893_v2 = vpop.f32.mrf.mxu0 }
0x30c3   :  { %v12701_v8 = vpop.f32.mrf.mxu0 }
0x30c5   :  { %v14895_v3 = vpop.f32.mrf.mxu0 }
0x30c6   :  { %5978 = vrot.lane.b32.xlu0 %v14895_v3, %s13484_s30 }
0x30c7   :  { %v14899_v4 = vpop.f32.mrf.mxu0 }
0x30c8   :  { %5976 = vrot.lane.b32.xlu1 %v14899_v4, %s13484_s30  ;;  %12713 = vmatprep.mubr.msk.f32.mxu0 %vm754_vm11, %v14899_v4 }
0x30ca   :  { %6178 = vrot.lane.b32.xlu0 %v14895_v3, %s13485_s15 }
0x30cc   :  { %6176 = vrot.lane.b32.xlu1 %v14899_v4, %s13485_s15 }
0x30ce   :  { %6172 = vrot.lane.b32.xlu0 %v14899_v4, %s13486_s23 }
0x30d0   :  { %6174 = vrot.lane.b32.xlu1 %v14895_v3, %s13486_s23 }
0x3138   :  { %v5979_v9 = vpop.permute.xlu0 %5978 }
0x3139   :  { %12709 = vmatprep.subr.msk.mxu0 %vm754_vm11, %v5979_v9 }
0x313a   :  { %12710 = vmatpush3.xpose.msk.msra.mxu0 %vm754_vm11, %v5979_v9  ;;  %v5977_v11 = vpop.permute.xlu1 %5976 }
0x313b   :  { %12711 = vmatprep.subr.msk.mxu0 %vm754_vm11, %v5977_v11 }
0x313c   :  { %v6179_v10 = vpop.permute.xlu0 %6178 }
0x313e   :  { %12712 = vmatpush3.xpose.msk.msra.mxu0 %vm754_vm11, %v5977_v11  ;;  %v6177_v13 = vpop.permute.xlu1 %6176 }
0x313f   :  { %12723 = vmatprep.subr.msk.mxu0 %vm754_vm11, %v6179_v10 }
0x3140   :  { %v6173_v32 = vpop.permute.xlu0 %6172 }
0x3141   :  { %12714 = vmatmul.mubr.msk.f32.vlgmr.msra.gmra.mxu0 %vm754_vm11, %v14895_v3 }
0x3142   :  { %12724 = vmatpush3.xpose.msk.msra.mxu0 %vm754_vm11, %v6179_v10  ;;  %12727 = vmatprep.mubr.msk.f32.mxu0 %vm754_vm11, %v6173_v32  ;;  %v6175_v21 = vpop.permute.xlu1 %6174 }
0x3143   :  { %12725 = vmatprep.subr.msk.mxu0 %vm754_vm11, %v6177_v13 }
0x3146   :  { %12726 = vmatpush3.xpose.msk.msra.mxu0 %vm754_vm11, %v6177_v13 }
0x3149   :  { %12728 = vmatmul.mubr.msk.f32.vlgmr.msra.gmra.mxu0 %vm754_vm11, %v6175_v21 }
0x3201   :  { %v12715_v14 = vpop.f32.mrf.mxu0 }
0x3202   :  { %v6060_v16 = vadd.f32 %v14928_v20, %v12715_v14 }
0x3203   :  { %v6054_v17 = vpop.f32.mrf.mxu0 }
0x3204   :  { %v6055_v18 = vadd.f32 %v14934_v34, %v6054_v17  ;;  %v6066_v19 = vsel %vm838_vm12, %v6060_v16, -inf }
0x3205   :  { %6067 = vmax.xlane.f32.xlu1 %v6066_v19 }
0x3206   :  { %v6063_v35 = vsel %vm838_vm12, %v6055_v18, -inf }
0x3207   :  { %6064 = vmax.xlane.f32.xlu0 %v6063_v35 }
0x3209   :  { %v12729_v22 = vpop.f32.mrf.mxu0 }
0x320a   :  { %v6260_v45 = vadd.f32 %v14928_v20, %v12729_v22 }
0x320b   :  { %v6254_v23 = vpop.f32.mrf.mxu0 }
0x320c   :  { %v6255_v24 = vadd.f32 %v14934_v34, %v6254_v23  ;;  %v6266_v27 = vsel %vm838_vm12, %v6260_v45, -inf }
0x320e   :  { %v6263_v26 = vsel %vm838_vm12, %v6255_v24, -inf }
0x320f   :  { %6264 = vmax.xlane.f32.xlu0 %v6263_v26 }
0x3213   :  { %6267 = vmax.xlane.f32.xlu0 %v6266_v27 }
0x3216   :  { %6087 = vrot.lane.b32.xlu1 %v14895_v3, %s13481_s21 }
0x321a   :  { %6287 = vrot.lane.b32.xlu1 %v14895_v3, %s13487_s24 }
0x321e   :  { %6285 = vrot.lane.b32.xlu1 %v14899_v4, %s13487_s24 }
0x3229   :  { %6085 = vrot.lane.b32.xlu0 %v14899_v4, %s13481_s21 }
0x328e   :  { %v6068_v29 = vpop.xlane.xlu1 %6067 }
0x328f   :  { %v6070_v62 = vsub.f32 %v6060_v16, %v6068_v29 }
0x3290   :  { %v6065_v31 = vpop.xlane.xlu0 %6064 }
0x3291   :  { %v6073_v28 = vmul.f32 1.442695, %v6070_v62  ;;  %v6069_v33 = vsub.f32 %v6055_v18, %v6065_v31 }
0x3292   :  { %v6088_v52 = vpop.permute.xlu1 %6087 }
0x3293   :  { %13292 = vpow2.f32 %v6073_v28  ;;  %v6071_v36 = vmul.f32 1.442695, %v6069_v33  ;;  %12716 = vmatprep.subr.mxu1 %v6088_v52 }
0x3294   :  { %12717 = vmatpush3.msra.mxu1 %v6088_v52 }
0x3295   :  { %13294 = vpow2.f32 %v6071_v36 }
0x3296   :  { %v6288_v30 = vpop.permute.xlu1 %6287 }
0x3298   :  { %v6265_v25 = vpop.xlane.xlu0 %6264 }
0x3299   :  { %v6269_v5 = vsub.f32 %v6255_v24, %v6265_v25 }
0x329a   :  { %v6286_v55 = vpop.permute.xlu1 %6285 }
0x329b   :  { %v6271_v43 = vmul.f32 1.442695, %v6269_v5 }
0x329c   :  { %v6268_v54 = vpop.xlane.xlu0 %6267 }
0x329d   :  { %v6270_v38 = vsub.f32 %v6260_v45, %v6268_v54 }
0x329f   :  { %v6273_v39 = vmul.f32 1.442695, %v6270_v38 }
0x32a0   :  { %v13293_v40 = vpop.eup %13292  ;;  %v6086_v41 = vpop.permute.xlu0 %6085 }
0x32a1   :  { %13296 = vpow2.f32 %v6273_v39  ;;  %12718 = vmatprep.subr.mxu1 %v6086_v41  ;;  %v6078_v42 = vsel %vm838_vm12, %v13293_v40, 0.0 }
0x32a2   :  { %v13295_v48 = vpop.eup %13294  ;;  %6079 = vadd.xlane.f32.xlu0 %v6078_v42  ;;  %12719 = vmatpush3.msra.mxu1 %v6086_v41  ;;  %13298 = vpow2.f32 %v6271_v43 }
0x32a3   :  { %12730 = vmatprep.subr.mxu1 %v6288_v30  ;;  %v6075_v47 = vsel %vm838_vm12, %v13295_v48, 0.0 }
0x32a4   :  { %6076 = vadd.xlane.f32.xlu1 %v6075_v47 }
0x32ae   :  { %v13297_v50 = vpop.eup %13296 }
0x32af   :  { %v6278_v6 = vsel %vm838_vm12, %v13297_v50, 0.0  ;;  %v13299_v51 = vpop.eup %13298 }
0x32b0   :  { %6279 = vadd.xlane.f32.xlu0 %v6278_v6  ;;  %v6275_v53 = vsel %vm838_vm12, %v13299_v51, 0.0 }
0x32b5   :  { %6376 = vrot.lane.b32.xlu1 %v14899_v4, %s13488_s26 }
0x32c6   :  { %6378 = vrot.lane.b32.xlu0 %v14895_v3, %s13488_s26 }
0x32ca   :  { %6372 = vrot.lane.b32.xlu0 %v14899_v4, %s13489_s27 }
0x32d9   :  { %6276 = vadd.xlane.f32.xlu1 %v6275_v53 }
0x32ea   :  { %6374 = vrot.lane.b32.xlu1 %v14895_v3, %s13489_s27 }
0x332b   :  { %v6080_v56 = vpop.xlane.xlu0 %6079 }
0x332c   :  { %13300 = vrcp.f32 %v6080_v56 }
0x332d   :  { %v6077_v57 = vpop.xlane.xlu1 %6076 }
0x332e   :  { %13302 = vrcp.f32 %v6077_v57 }
0x3331   :  { %v6377_v9 = vpop.permute.xlu1 %6376 }
0x3339   :  { %v13301_v49 = vpop.eup %13300  ;;  %v6280_v60 = vpop.xlane.xlu0 %6279 }
0x333a   :  { %v6084_v63 = vmul.f32 %v13301_v49, %v13293_v40  ;;  %13304 = vrcp.f32 %v6280_v60 }
0x333b   :  { %v13303_v59 = vpop.eup %13302 }
0x333c   :  { %v6083_v61 = vmul.f32 %v13303_v59, %v13295_v48 }
0x333d   :  { %v6379_v8 = vpop.permute.xlu0 %6378 }
0x333e   :  { %12720 = vmatprep.mubr.msk.f32.mxu1 %vm838_vm12, %v6083_v61 }
0x333f   :  { %12721 = vmatmul.mubr.msk.f32.vlgmr.msra.gmra.mxu1 %vm838_vm12, %v6084_v63 }
0x3340   :  { %12731 = vmatpush3.msra.mxu1 %v6288_v30 }
0x3341   :  { %12732 = vmatprep.subr.mxu1 %v6286_v55  ;;  %v6373_v14 = vpop.permute.xlu0 %6372 }
0x3342   :  { %12733 = vmatpush3.msra.mxu1 %v6286_v55 }
0x3343   :  { %12737 = vmatprep.subr.msk.mxu1 %vm754_vm11, %v6379_v8 }
0x3347   :  { %v13305_v10 = vpop.eup %13304 }
0x3348   :  { %v6284_v21 = vmul.f32 %v13305_v10, %v13297_v50 }
0x3362   :  { %v6277_v11 = vpop.xlane.xlu1 %6276 }
0x3363   :  { %13306 = vrcp.f32 %v6277_v11 }
0x3366   :  { %v6375_v16 = vpop.permute.xlu1 %6374 }
0x3370   :  { %v13307_v32 = vpop.eup %13306 }
0x3371   :  { %v6283_v13 = vmul.f32 %v13307_v32, %v13299_v51 }
0x3373   :  { %12734 = vmatprep.mubr.msk.f32.mxu1 %vm838_vm12, %v6283_v13 }
0x3374   :  { %12735 = vmatmul.mubr.msk.f32.vlgmr.msra.gmra.mxu1 %vm838_vm12, %v6284_v21 }
0x3375   :  { %12738 = vmatpush3.xpose.msk.msra.mxu1 %vm754_vm11, %v6379_v8  ;;  %12741 = vmatprep.mubr.msk.f32.mxu1 %vm754_vm11, %v6373_v14 }
0x3376   :  { %12739 = vmatprep.subr.msk.mxu1 %vm754_vm11, %v6377_v9 }
0x3379   :  { %12740 = vmatpush3.xpose.msk.msra.mxu1 %vm754_vm11, %v6377_v9 }
0x337c   :  { %12742 = vmatmul.mubr.msk.f32.vlgmr.msra.gmra.mxu1 %vm754_vm11, %v6375_v16 }
0x33ff   :  { %v14973_v17 = vpop.f32.mrf.mxu1 }
0x3401   :  { %v14975_v18 = vpop.f32.mrf.mxu1 }
0x3434   :  { %v14977_v19 = vpop.f32.mrf.mxu1 }
0x3436   :  { %v14979_v35 = vpop.f32.mrf.mxu1 }
0x343c   :  { %v12743_v22 = vpop.f32.mrf.mxu1 }
0x343d   :  { %v6460_v23 = vadd.f32 %v14928_v20, %v12743_v22 }
0x343e   :  { %v6454_v24 = vpop.f32.mrf.mxu1 }
0x343f   :  { %v6455_v45 = vadd.f32 %v14934_v34, %v6454_v24  ;;  %v6466_v26 = vsel %vm838_vm12, %v6460_v23, -inf }
0x3440   :  { %6467 = vmax.xlane.f32.xlu1 %v6466_v26  ;;  %v5970_v26 = vld [vmem:[%s15992_s2 + $0x810] sm:$0xff] }
0x3441   :  { %v6463_v27 = vsel %vm838_vm12, %v6455_v45, -inf }
0x3442   :  { %6464 = vmax.xlane.f32.xlu0 %v6463_v27  ;;  %v5969_v27 = vld [vmem:[%s15992_s2 + $0x800] sm:$0xff] }
0x3451   :  { %6487 = vrot.lane.b32.xlu1 %v14895_v3, %s13490_s28 }
0x3455   :  { %6578 = vrot.lane.b32.xlu1 %v14895_v3, %s13491_s29 }
0x3459   :  { %6576 = vrot.lane.b32.xlu1 %v14899_v4, %s13491_s29 }
0x345d   :  { %6574 = vrot.lane.b32.xlu1 %v14895_v3, %s13492_s4 }
0x34c9   :  { %v6468_v29 = vpop.xlane.xlu1 %6467 }
0x34ca   :  { %v6470_v62 = vsub.f32 %v6460_v23, %v6468_v29 }
0x34cb   :  { %v6465_v31 = vpop.xlane.xlu0 %6464 }
0x34cc   :  { %v6473_v28 = vmul.f32 1.442695, %v6470_v62  ;;  %v6469_v33 = vsub.f32 %v6455_v45, %v6465_v31  ;;  %v5971_v45 = vld [vmem:[%s15992_s2 + $0x820] sm:$0xff] }
0x34cd   :  { %v6488_v52 = vpop.permute.xlu1 %6487 }
0x34ce   :  { %13308 = vpow2.f32 %v6473_v28  ;;  %v6471_v36 = vmul.f32 1.442695, %v6469_v33  ;;  %12744 = vmatprep.subr.mxu0 %v6488_v52 }
0x34cf   :  { %12745 = vmatpush3.msra.mxu0 %v6488_v52 }
0x34d0   :  { %13310 = vpow2.f32 %v6471_v36 }
0x34d1   :  { %v6579_v48 = vpop.permute.xlu1 %6578 }
0x34d5   :  { %v6577_v43 = vpop.permute.xlu1 %6576 }
0x34d9   :  { %v6575_v51 = vpop.permute.xlu1 %6574 }
0x34db   :  { %v13309_v25 = vpop.eup %13308 }
0x34dc   :  { %v6478_v54 = vsel %vm838_vm12, %v13309_v25, 0.0 }
0x34dd   :  { %v13311_v38 = vpop.eup %13310  ;;  %6479 = vadd.xlane.f32.xlu0 %v6478_v54 }
0x34de   :  { %v6475_v39 = vsel %vm838_vm12, %v13311_v38, 0.0 }
0x34e1   :  { %6476 = vadd.xlane.f32.xlu0 %v6475_v39 }
0x34f7   :  { %6485 = vrot.lane.b32.xlu0 %v14899_v4, %s13490_s28 }
0x34fb   :  { %6572 = vrot.lane.b32.xlu0 %v14899_v4, %s13492_s4 }
0x3566   :  { %v6480_v40 = vpop.xlane.xlu0 %6479 }
0x3567   :  { %13312 = vrcp.f32 %v6480_v40 }
0x356a   :  { %v6477_v41 = vpop.xlane.xlu0 %6476 }
0x356b   :  { %13314 = vrcp.f32 %v6477_v41 }
0x356e   :  { %v6486_v42 = vpop.permute.xlu0 %6485 }
0x356f   :  { %12746 = vmatprep.subr.mxu0 %v6486_v42 }
0x3570   :  { %12747 = vmatpush3.msra.mxu0 %v6486_v42 }
0x3571   :  { %12751 = vmatprep.subr.msk.mxu0 %vm754_vm11, %v6579_v48 }
0x3572   :  { %v6573_v5 = vpop.permute.xlu0 %6572 }
0x3574   :  { %v13313_v30 = vpop.eup %13312 }
0x3575   :  { %v6484_v6 = vmul.f32 %v13313_v30, %v13309_v25 }
0x3578   :  { %v13315_v47 = vpop.eup %13314 }
0x3579   :  { %v6483_v50 = vmul.f32 %v13315_v47, %v13311_v38 }
0x357b   :  { %12748 = vmatprep.mubr.msk.f32.mxu0 %vm838_vm12, %v6483_v50 }
0x357c   :  { %12749 = vmatmul.mubr.msk.f32.vlgmr.msra.gmra.mxu0 %vm838_vm12, %v6484_v6 }
0x357d   :  { %12752 = vmatpush3.xpose.msk.msra.mxu0 %vm754_vm11, %v6579_v48  ;;  %12755 = vmatprep.mubr.msk.f32.mxu0 %vm754_vm11, %v6573_v5 }
0x357e   :  { %12753 = vmatprep.subr.msk.mxu0 %vm754_vm11, %v6577_v43 }
0x3581   :  { %12754 = vmatpush3.xpose.msk.msra.mxu0 %vm754_vm11, %v6577_v43 }
0x3584   :  { %12756 = vmatmul.mubr.msk.f32.vlgmr.msra.gmra.mxu0 %vm754_vm11, %v6575_v51  ;;  %v5322_v51 = vld [vmem:[%s15992_s2 + $0x7d0] ss:$0 sm:$0xff] }
0x363c   :  { %v12750_v53 = vpop.f32.mrf.mxu0 }
0x363e   :  { %v6563_v55 = vpop.f32.mrf.mxu0 }
0x3644   :  { %v12757_v56 = vpop.f32.mrf.mxu0 }
0x3645   :  { %v6660_v57 = vadd.f32 %v14928_v20, %v12757_v56 }
0x3646   :  { %v6654_v49 = vpop.f32.mrf.mxu0 }
0x3647   :  { %v6655_v59 = vadd.f32 %v14934_v34, %v6654_v49  ;;  %v6666_v60 = vsel %vm838_vm12, %v6660_v57, -inf }
0x3648   :  { %6667 = vmax.xlane.f32.xlu1 %v6666_v60 }
0x3649   :  { %v6663_v61 = vsel %vm838_vm12, %v6655_v59, -inf }
0x364a   :  { %6664 = vmax.xlane.f32.xlu0 %v6663_v61 }
0x3659   :  { %6687 = vrot.lane.b32.xlu1 %v14895_v3, %s13493_s20 }
0x365d   :  { %6774 = vrot.lane.b32.xlu1 %v14979_v35, %s13494_s5 }
0x3661   :  { %6776 = vrot.lane.b32.xlu1 %v14977_v19, %s13494_s5 }
0x3665   :  { %6784 = vrot.lane.b32.xlu1 %v12750_v53, %s13495_s6  ;;  %v5490_v53 = vadd.f32 %v14863_v37, %v5322_v51 }
0x36d1   :  { %v6668_v20 = vpop.xlane.xlu1 %6667 }
0x36d2   :  { %v6670_v63 = vsub.f32 %v6660_v57, %v6668_v20 }
0x36d3   :  { %v6665_v34 = vpop.xlane.xlu0 %6664 }
0x36d4   :  { %v6673_v8 = vmul.f32 1.442695, %v6670_v63  ;;  %v6669_v9 = vsub.f32 %v6655_v59, %v6665_v34 }
0x36d5   :  { %v6688_v11 = vpop.permute.xlu1 %6687 }
0x36d6   :  { %13316 = vpow2.f32 %v6673_v8  ;;  %v6671_v10 = vmul.f32 1.442695, %v6669_v9  ;;  %12758 = vmatprep.subr.mxu1 %v6688_v11  ;;  %v6888_v8 = vld [vmem:[%s15992_s2 + $0x880] sm:$0xff]  ;;  %v6887_v9 = vld [vmem:[%s15992_s2 + $0x870] sm:$0xff] }
0x36d7   :  { %12759 = vmatpush3.msra.mxu1 %v6688_v11  ;;  %12776 = vmatprep.subr.mxu0 %v6888_v8 }
0x36d8   :  { %13318 = vpow2.f32 %v6671_v10  ;;  %12777 = vmatpush3.msra.mxu0 %v6888_v8 }
0x36d9   :  { %v6775_v31 = vpop.permute.xlu1 %6774  ;;  %12778 = vmatprep.subr.mxu0 %v6887_v9 }
0x36da   :  { %v6796_v36 = vsel %vm754_vm11, %v14975_v18, %v6775_v31  ;;  %v5973_v18 = vld [vmem:[%s15992_s2 + $0x840] ss:$0 sm:$0xff]  ;;  %12779 = vmatpush3.msra.mxu0 %v6887_v9 }
0x36db   :  { %v7190_v9 = vld [vmem:[%s15992_s2 + $0x20] sm:$0xff] }
0x36dd   :  { %v6777_v28 = vpop.permute.xlu1 %6776 }
0x36de   :  { %v6797_v54 = vsel %vm754_vm11, %v14973_v17, %v6777_v28 }
0x36e1   :  { %v6785_v33 = vpop.permute.xlu1 %6784 }
0x36e2   :  { %v6799_v40 = vsel %vm838_vm12, %v6797_v54, %v6785_v33  ;;  %v6890_v54 = vld [vmem:[%s15992_s2 + $0x8a0] sm:$0xff] }
0x36e3   :  { %v13317_v3 = vpop.eup %13316 }
0x36e4   :  { %v6678_v32 = vsel %vm838_vm12, %v13317_v3, 0.0 }
0x36e5   :  { %v13319_v13 = vpop.eup %13318  ;;  %6679 = vadd.xlane.f32.xlu0 %v6678_v32  ;;  %v7279_v32 = vld [vmem:[%s15992_s2 + $0xb10] sm:$0xf] }
0x36e6   :  { %v6675_v21 = vsel %vm838_vm12, %v13319_v13, 0.0 }
0x36e9   :  { %6676 = vadd.xlane.f32.xlu0 %v6675_v21 }
0x36ff   :  { %6685 = vrot.lane.b32.xlu0 %v14899_v4, %s13493_s20  ;;  %v5972_v4 = vld [vmem:[%s15992_s2 + $0x830] sm:$0xff] }
0x3703   :  { %6782 = vrot.lane.b32.xlu0 %v6563_v55, %s13495_s6  ;;  %v5499_v55 = vrot.slane %v5490_v53, 4 }
0x376e   :  { %v6680_v14 = vpop.xlane.xlu0 %6679 }
0x376f   :  { %13320 = vrcp.f32 %v6680_v14 }
0x3772   :  { %v6677_v16 = vpop.xlane.xlu0 %6676 }
0x3773   :  { %13322 = vrcp.f32 %v6677_v16 }
0x3776   :  { %v6686_v19 = vpop.permute.xlu0 %6685 }
0x3777   :  { %12760 = vmatprep.subr.mxu1 %v6686_v19 }
0x3778   :  { %12761 = vmatpush3.msra.mxu1 %v6686_v19 }
0x3779   :  { %12765 = vmatprep.subr.mxu1 %v5972_v4 }
0x377a   :  { %v6783_v52 = vpop.permute.xlu0 %6782 }
0x377b   :  { %v6798_v38 = vsel %vm838_vm12, %v6796_v36, %v6783_v52 }
0x377c   :  { %v13321_v35 = vpop.eup %13320 }
0x377d   :  { %v6684_v24 = vmul.f32 %v13321_v35, %v13317_v3 }
0x3780   :  { %v13323_v22 = vpop.eup %13322 }
0x3781   :  { %v6683_v23 = vmul.f32 %v13323_v22, %v13319_v13 }
0x3783   :  { %12762 = vmatprep.mubr.msk.f32.mxu1 %vm838_vm12, %v6683_v23 }
0x3784   :  { %12763 = vmatmul.mubr.msk.f32.vlgmr.msra.gmra.mxu1 %vm838_vm12, %v6684_v24 }
0x3785   :  { %12766 = vmatpush3.msra.mxu1 %v5972_v4 }
0x3786   :  { %12767 = vmatprep.subr.mxu1 %v5971_v45 }
0x3787   :  { %12768 = vmatpush3.msra.mxu1 %v5971_v45  ;;  %v6885_v45 = vld [vmem:[%s15992_s2 + $0x850] ss:$0 sm:$0xff] }
0x3788   :  { %12769 = vmatprep.subr.mxu1 %v5970_v26 }
0x3789   :  { %12770 = vmatpush3.msra.mxu1 %v5970_v26 }
0x378a   :  { %12771 = vmatprep.subr.mxu1 %v5969_v27 }
0x378b   :  { %12772 = vmatpush3.msra.mxu1 %v5969_v27  ;;  %v7280_v27 = vld [vmem:[%s15992_s2 + $0xb20] sm:$0xf] }
0x3844   :  { %v12764_v29 = vpop.f32.mrf.mxu1 }
0x3845   :  { %6792 = vrot.lane.b32.xlu1 %v12764_v29, %s13496_s13  ;;  %v6886_v29 = vld [vmem:[%s15992_s2 + $0x860] ss:$0 sm:$0xff] }
0x3846   :  { %v6763_v62 = vpop.f32.mrf.mxu1 }
0x3847   :  { %6790 = vrot.lane.b32.xlu0 %v6763_v62, %s13496_s13 }
0x38b7   :  { %v6793_v25 = vpop.permute.xlu1 %6792 }
0x38b8   :  { %v6801_v42 = vsel %vm1576_vm13, %v6799_v40, %v6793_v25  ;;  %v6891_v25 = vld [vmem:[%s15992_s2 + $0x8b0] sm:$0xff] }
0x38b9   :  { %v6791_v39 = vpop.permute.xlu0 %6790  ;;  %12783 = vmatprep.subr.mxu0 %v6891_v25 }
0x38ba   :  { %v6800_v41 = vsel %vm1576_vm13, %v6798_v38, %v6791_v39  ;;  %v6889_v38 = vld [vmem:[%s15992_s2 + $0x890] ss:$0 sm:$0xff] }
0x38bb   :  { %12773 = vmatprep.mubr.msk.f32.mxu1 %vm197_vm10, %v6800_v41 }
0x38bc   :  { %12774 = vmatmul.mubr.msk.f32.vlgmr.msra.gmra.mxu1 %vm197_vm10, %v6801_v42 }
0x397c   :  { %v12775_v48 = vpop.f32.mrf.mxu1 }
0x397d   :  { %v6880_v30 = vadd.f32 %v12775_v48, %v5973_v18 }
0x397e   :  { %v6874_v17 = vpop.f32.mrf.mxu1 }
0x397f   :  { %v6884_v47 = vadd.f32 %v6880_v30, %v14889_v0  ;;  %v6875_v50 = vadd.f32 %v6874_v17, %v5973_v18 }
0x3981   :  { %v6883_v6 = vadd.f32 %v6875_v50, %v14865_v44  ;;  %v6896_v5 = vsel %vm838_vm12, %v6884_v47, 0.0 }
0x3982   :  { %6897 = vadd.xlane.f32.xlu1 %v6896_v5 }
0x3983   :  { %v6893_v43 = vsel %vm838_vm12, %v6883_v6, 0.0 }
0x3984   :  { %6894 = vadd.xlane.f32.xlu0 %v6893_v43 }
0x3993   :  { %5500 = vrot.lane.b32.xlu1 %v5499_v55, %s13495_s6 }
0x3a0b   :  { %v6898_v56 = vpop.xlane.xlu1 %6897 }
0x3a0c   :  { %v6900_v0 = vmul.f32 0.0625, %v6898_v56 }
0x3a0d   :  { %v6895_v57 = vpop.xlane.xlu0 %6894 }
0x3a0e   :  { %v6899_v49 = vmul.f32 0.0625, %v6895_v57  ;;  %v6902_v59 = vsub.f32 %v6884_v47, %v6900_v0 }
0x3a0f   :  { %v5501_v44 = vpop.permute.xlu1 %5500 }
0x3a10   :  { %v6901_v60 = vsub.f32 %v6883_v6, %v6899_v49  ;;  %v15062_v61 = vsel %vm838_vm12, %v5490_v53, %v5501_v44  ;;  %v6904_v37 = vmul.f32 %v6902_v59, %v6902_v59 }
0x3a11   :  { %7287 = vrot.lane.b32.xlu1 %v15062_v61, %s13507_s9  ;;  %s13510_s9 = smov 4  }
0x3a12   :  { %v6903_v20 = vmul.f32 %v6901_v60, %v6901_v60  ;;  %v6908_v34 = vsel %vm838_vm12, %v6904_v37, 0.0 }
0x3a14   :  { %v6905_v63 = vsel %vm838_vm12, %v6903_v20, 0.0 }
0x3a15   :  { %5805 = vrot.lane.b32.xlu1 %v14872_v58, %s13489_s27  ;;  %6906 = vadd.xlane.f32.xlu0 %v6905_v63 }
0x3a19   :  { %6909 = vadd.xlane.f32.xlu0 %v6908_v34  ;;  %v7191_v34 = vld [vmem:[%s15992_s2 + $0x30] sm:$0xff] }
0x3a2f   :  { %7281 = vrot.lane.b32.xlu0 %v15062_v61, %s13497_s25  ;;  %s13509_s25 = smov 14  }
0x3a83   :  { %v7288_v11 = vpop.permute.xlu1 %7287 }
0x3a84   :  { %v7290_v10 = vsel %vm184_vm14, 0.0, %v7288_v11  ;;  %v7189_v11 = vld [vmem:[%s15992_s2 + $0x10] sm:$0xff] }
0x3a85   :  { %v7291_v3 = vsel %vm7285_vm15, %v7290_v10, 0.0 }
0x3a86   :  { %7301 = vrot.lane.b32.xlu1 %v7291_v3, %s13508_s7 }
0x3a87   :  { %v5806_v53 = vpop.permute.xlu1 %5805 }
0x3a8a   :  { %7308 = vrot.lane.b32.xlu1 %v7291_v3, %s13509_s25 }
0x3a8e   :  { %7394 = vperm.xlu1 %13161, %v7279_v32  }
0x3a92   :  { %7193 = vrot.lane.b32.xlu1 %v15062_v61, %s13475_s17 }
0x3a9e   :  { %v6907_v13 = vpop.xlane.xlu0 %6906 }
0x3a9f   :  { %v6911_v21 = vmul.f32 0.0625, %v6907_v13  ;;  %v7106_v13 = vld [vmem:[%s15992_s2 + $0x910] sm:$0xff] }
0x3aa0   :  { %12790 = vmatprep.subr.mxu1 %v7106_v13 }
0x3aa1   :  { %v6913_v14 = vadd.f32 1e-05, %v6911_v21  ;;  %12791 = vmatpush3.msra.mxu1 %v7106_v13 }
0x3aa2   :  { %v6910_v16 = vpop.xlane.xlu0 %6909 }
0x3aa3   :  { %13324 = vrsqrt.f32 %v6913_v14  ;;  %v6912_v19 = vmul.f32 0.0625, %v6910_v16  ;;  %v6892_v16 = vld [vmem:[%s15992_s2 + $0x8c0] ss:$0 sm:$0xff] }
0x3aa5   :  { %v6914_v35 = vadd.f32 1e-05, %v6912_v19 }
0x3aa6   :  { %v7282_v22 = vpop.permute.xlu0 %7281 }
0x3aa7   :  { %13326 = vrsqrt.f32 %v6914_v35  ;;  %v7284_v23 = vsel %vm184_vm14, 0.0, %v7282_v22  ;;  %vm7196_vm14 = vcmask 252928  }
0x3aa8   :  { %v15086_v24 = vsel %vm7285_vm15, %v7284_v23, 0.0  ;;  %vm10818_vm15 = vcmask 123904  }
0x3aa9   :  { %7298 = vrot.lane.b32.xlu0 %v15086_v24, %s13475_s17 }
0x3aad   :  { %7305 = vrot.lane.b32.xlu0 %v15086_v24, %s13478_s19 }
0x3ab0   :  { %v13325_v4 = vpop.eup %13324 }
0x3ab1   :  { %7293 = vrot.lane.b32.xlu0 %v7291_v3, %s13495_s6  ;;  %v6917_v26 = vmul.f32 %v13325_v4, %v6901_v60  ;;  %v7188_v3 = vld [vmem:[%s15992_s2] sm:$0xff] }
0x3ab3   :  { %v6919_v62 = vmul.f32 %v6917_v26, %v6885_v45 }
0x3ab4   :  { %v13327_v31 = vpop.eup %13326 }
0x3ab5   :  { %7400 = vperm.xlu0 %13158, %v7280_v27   ;;  %v6918_v28 = vmul.f32 %v13327_v31, %v6902_v59  ;;  %v6921_v33 = vadd.f32 %v6919_v62, %v6886_v29 }
0x3ab7   :  { %v6920_v52 = vmul.f32 %v6918_v28, %v6885_v45  ;;  %12780 = vmatprep.mubr.msk.f32.mxu0 %vm838_vm12, %v6921_v33 }
0x3ab9   :  { %v6922_v36 = vadd.f32 %v6920_v52, %v6886_v29 }
0x3abb   :  { %12781 = vmatmul.mubr.msk.f32.vlgmr.msra.gmra.mxu0 %vm838_vm12, %v6922_v36 }
0x3abc   :  { %12784 = vmatpush3.msra.mxu0 %v6891_v25 }
0x3abd   :  { %12785 = vmatprep.subr.mxu0 %v6890_v54 }
0x3abe   :  { %12786 = vmatpush3.msra.mxu0 %v6890_v54 }
0x3abf   :  { %12797 = vmatprep.subr.mxu0 %v13472_v1 }
0x3af8   :  { %v7302_v55 = vpop.permute.xlu1 %7301 }
0x3afc   :  { %v7309_v56 = vpop.permute.xlu1 %7308 }
0x3b09   :  { %v15114_v49 = vpop.permute.xlu1 %7394 }
0x3b0d   :  { %v7194_v8 = vpop.permute.xlu1 %7193 }
0x3b0e   :  { %v7197_v10 = vsel %vm7196_vm14, %v7194_v8, %v15062_v61 }
0x3b0f   :  { %v7198_v32 = vmax.f32 %v15062_v61, %v7197_v10  ;;  %v7105_v61 = vld [vmem:[%s15992_s2 + $0x900] sm:$0xff] }
0x3b10   :  { %12792 = vmatprep.subr.mxu1 %v7105_v61 }
0x3b11   :  { %12793 = vmatpush3.msra.mxu1 %v7105_v61 }
0x3b12   :  { %12808 = vmatprep.subr.mxu1 %v13472_v1 }
0x3b1b   :  { %v7299_v21 = vpop.permute.xlu0 %7298 }
0x3b1c   :  { %v7304_v45 = vsel %vm838_vm12, %v7299_v21, %v7302_v55 }
0x3b1d   :  { %v7313_v62 = vrot.slane %v7304_v45, 4 }
0x3b1f   :  { %v7306_v14 = vpop.permute.xlu0 %7305 }
0x3b20   :  { %v7311_v31 = vsel %vm838_vm12, %v7306_v14, %v7309_v56 }
0x3b23   :  { %v7294_v4 = vpop.permute.xlu0 %7293 }
0x3b24   :  { %v7296_v29 = vsel %vm838_vm12, %v15086_v24, %v7294_v4 }
0x3b25   :  { %v7315_v24 = vsel %vm73_vm3, %v7296_v29, %v7313_v62 }
0x3b7b   :  { %v12782_v39 = vpop.f32.mrf.mxu0 }
0x3b7c   :  { %v7001_v40 = vadd.f32 %v12782_v39, %v6889_v38  ;;  %v7401_v39 = vpop.permute.xlu0 %7400 }
0x3b7d   :  { %v6995_v41 = vpop.f32.mrf.mxu0 }
0x3b7e   :  { %v7007_v42 = vmul.f32 0.044715, %v7001_v40  ;;  %v6996_v18 = vadd.f32 %v6995_v41, %v6889_v38  ;;  %v7005_v20 = vmul.f32 0.5, %v7001_v40 }
0x3b80   :  { %v7009_v48 = vmul.f32 %v7007_v42, %v7001_v40  ;;  %v7006_v30 = vmul.f32 0.044715, %v6996_v18  ;;  %v7004_v59 = vmul.f32 0.5, %v6996_v18 }
0x3b82   :  { %v7011_v17 = vmul.f32 %v7009_v48, %v7001_v40  ;;  %v7008_v47 = vmul.f32 %v7006_v30, %v6996_v18 }
0x3b84   :  { %v7013_v50 = vadd.f32 %v7011_v17, %v7001_v40  ;;  %v7010_v6 = vmul.f32 %v7008_v47, %v6996_v18 }
0x3b86   :  { %v7015_v5 = vmul.f32 0.7978846, %v7013_v50  ;;  %v7012_v43 = vadd.f32 %v7010_v6, %v6996_v18 }
0x3b88   :  { %13328 = vtanh.f32 %v7015_v5  ;;  %v7014_v51 = vmul.f32 0.7978846, %v7012_v43 }
0x3b8a   :  { %13330 = vtanh.f32 %v7014_v51  ;;  %v7494_v51 = vld [vmem:[%s15992_s2 + $0x250] sm:$0x3] }
0x3b95   :  { %v13329_v0 = vpop.eup %13328 }
0x3b96   :  { %v7019_v44 = vadd.f32 1.0, %v13329_v0 }
0x3b97   :  { %v13331_v57 = vpop.eup %13330 }
0x3b98   :  { %v7018_v60 = vadd.f32 1.0, %v13331_v57  ;;  %v7021_v37 = vmul.f32 %v7019_v44, %v7005_v20 }
0x3b9a   :  { %v7020_v63 = vmul.f32 %v7018_v60, %v7004_v59 }
0x3b9c   :  { %12787 = vmatprep.mubr.msk.f32.mxu0 %vm838_vm12, %v7020_v63 }
0x3b9d   :  { %12788 = vmatmul.mubr.msk.f32.vlgmr.msra.gmra.mxu0 %vm838_vm12, %v7021_v37 }
0x3b9e   :  { %12798 = vmatpush3.msra.mxu0 %v7191_v34  ;;  %12805 = vmatprep.mubr.msk.f32.mxu0 %vm13477_vm2, %v13472_v1 }
0x3b9f   :  { %12799 = vmatprep.subr.mxu0 %v13472_v1 }
0x3ba0   :  { %12800 = vmatpush3.msra.mxu0 %v7190_v9 }
0x3ba1   :  { %12801 = vmatprep.subr.mxu0 %v13472_v1 }
0x3ba2   :  { %12802 = vmatpush3.msra.mxu0 %v7189_v11 }
0x3ba3   :  { %12803 = vmatprep.subr.mxu0 %v13472_v1 }
0x3ba4   :  { %12804 = vmatpush3.msra.mxu0 %v7188_v3 }
0x3ba5   :  { %12806 = vmatmul.mubr.msk.f32.vlgmr.msra.gmra.mxu0 %vm197_vm10, %v7198_v32  ;;  %12826 = vmatprep.subr.mxu0 %v13472_v1 }
0x3ba6   :  { %12828 = vmatprep.mubr.msk.f32.mxu0 %vm13477_vm2, %v13472_v1 }
0x3c5d   :  { %v12789_v19 = vpop.f32.mrf.mxu0 }
0x3c5e   :  { %v7100_v35 = vadd.f32 %v12789_v19, %v6892_v16 }
0x3c5f   :  { %v7094_v22 = vpop.f32.mrf.mxu0 }
0x3c60   :  { %v7095_v23 = vadd.f32 %v7094_v22, %v6892_v16  ;;  %v7104_v27 = vadd.f32 %v7100_v35, %v5806_v53  ;;  %v7574_v53 = vld [vmem:[%s15992_s2 + $0xa30] sm:$0xff] }
0x3c62   :  { %v7103_v26 = vadd.f32 %v7095_v23, %v14872_v58  ;;  %v7278_v58 = vld [vmem:[%s15992_s2 + $0xb00] sm:$0xf] }
0x3c64   :  { %12794 = vmatprep.mubr.msk.f32.mxu1 %vm838_vm12, %v7103_v26 }
0x3c65   :  { %v7268_v28 = vpop.f32.mrf.mxu0  ;;  %12795 = vmatmul.mubr.msk.f32.vlgmr.msra.gmra.mxu1 %vm838_vm12, %v7104_v27 }
0x3c66   :  { %v7273_v33 = vrot.slane %v7268_v28, 4  ;;  %12809 = vmatpush3.msk.msra.mxu1 %vm73_vm3, %v7311_v31  ;;  %12812 = vmatprep.mubr.msk.f32.mxu1 %vm13477_vm2, %v13472_v1 }
0x3c67   :  { %v12807_v52 = vpop.f32.mrf.mxu0  ;;  %12810 = vmatprep.subr.mxu1 %v13472_v1 }
0x3c68   :  { %7274 = vrot.lane.b32.xlu1 %v7273_v33, %s13486_s23  ;;  %12811 = vmatpush3.msra.mxu1 %v7315_v24 }
0x3c69   :  { %12813 = vmatmul.mubr.msk.f32.vlgmr.msra.gmra.mxu1 %vm2101_vm6, %v7278_v58  ;;  %12815 = vmatprep.subr.mxu1 %v13472_v1  ;;  %vm10747_vm6 = vcmask 785408  }
0x3c6a   :  { %12816 = vmatpush3.msra.mxu1 %v7191_v34  ;;  %12823 = vmatprep.mubr.msk.f32.mxu1 %vm13477_vm2, %v13472_v1 }
0x3c6b   :  { %12817 = vmatprep.subr.mxu1 %v13472_v1 }
0x3c6c   :  { %12818 = vmatpush3.msra.mxu1 %v7190_v9 }
0x3c6d   :  { %12819 = vmatprep.subr.mxu1 %v13472_v1 }
0x3c6e   :  { %12820 = vmatpush3.msra.mxu1 %v7189_v11  ;;  %v13444_v11 = vld [vmem:[%s15992_s2 + $0x200] sm:$0xff] }
0x3c6f   :  { %12821 = vmatprep.subr.mxu1 %v13472_v1 }
0x3c70   :  { %12822 = vmatpush3.msra.mxu1 %v7188_v3 }
0x3c71   :  { %12836 = vmatprep.subr.mxu1 %v13472_v1 }
0x3cda   :  { %v7275_v55 = vpop.permute.xlu1 %7274 }
0x3cdb   :  { %v15203_v56 = vsel %vm73_vm3, %v7268_v28, %v7275_v55 }
0x3d25   :  { %v15176_v36 = vpop.f32.mrf.mxu1 }
0x3d27   :  { %v15178_v25 = vpop.f32.mrf.mxu1 }
0x3d29   :  { %v7388_v54 = vpop.f32.mrf.mxu1 }
0x3d2a   :  { %v7397_v38 = vmul.f32 %v15114_v49, %v7388_v54 }
0x3d2b   :  { %v12814_v40 = vpop.f32.mrf.mxu1 }
0x3d2c   :  { %v7403_v41 = vadd.f32 %v7401_v39, %v7397_v38 }
0x3d2e   :  { %v7405_v42 = vmul.f32 1.442695, %v7403_v41  ;;  %vm7404_vm1 = vcmp.gt.f32.partialorder %v7403_v41, 0.0 }
0x3d30   :  { %13332 = vpow2.f32 %v7405_v42 }
0x3d3d   :  { %v13333_v18 = vpop.eup %13332 }
0x3d3e   :  { %v11606_v48 = vadd.f32 -1.0, %v13333_v18 }
0x3d40   :  { %v7408_v30 = vsel %vm7404_vm1, %v7403_v41, %v11606_v48 }
0x3d41   :  { %7410 = vrot.lane.b32.xlu0 %v7408_v30, %s13475_s17 }
0x3db3   :  { %v7411_v17 = vpop.permute.xlu0 %7410 }
0x3db4   :  { %v7413_v47 = vsel %vm7196_vm14, %v7411_v17, %v7408_v30  ;;  %vm11075_vm14 = vcmask 320512  }
0x3db5   :  { %v7414_v50 = vmax.f32 %v7408_v30, %v7413_v47 }
0x3db7   :  { %12824 = vmatmul.mubr.msk.f32.vlgmr.msra.gmra.mxu1 %vm197_vm10, %v7414_v50 }
0x3db8   :  { %12838 = vmatprep.mubr.msk.f32.mxu1 %vm13477_vm2, %v13472_v1 }
0x3e77   :  { %v15186_v6 = vpop.f32.mrf.mxu1 }
0x3e78   :  { %v7495_v5 = vmul.f32 %v15186_v6, %v15186_v6 }
0x3e79   :  { %v12825_v43 = vpop.f32.mrf.mxu1 }
0x3e7a   :  { %12827 = vmatpush3.xpose.msk.msra.mxu0 %vm838_vm12, %v7495_v5 }
0x3e7b   :  { %12831 = vmatprep.subr.mxu0 %v13472_v1 }
0x3e7d   :  { %12829 = vmatmul.mubr.msk.f32.vlgmr.msra.gmra.mxu0 %vm838_vm12, %v7494_v51 }
0x3e7e   :  { %12832 = vmatpush3.msra.mxu0 %v7574_v53  ;;  %12833 = vmatprep.mubr.msk.f32.mxu0 %vm13477_vm2, %v13472_v1 }
0x3e7f   :  { %12841 = vmatprep.subr.mxu0 %v13472_v1 }
0x3e81   :  { %12834 = vmatmul.mubr.msk.f32.vlgmr.msra.gmra.mxu0 %vm754_vm11, %v15203_v56 }
0x3e82   :  { %12843 = vmatprep.mubr.msk.f32.mxu0 %vm13477_vm2, %v13472_v1 }
0x3f3d   :  { %v15209_v0 = vpop.f32.mrf.mxu0 }
0x3f3f   :  { %v12830_v57 = vpop.f32.mrf.mxu0 }
0x3f41   :  { %v15211_v49 = vpop.f32.mrf.mxu0 }
0x3f42   :  { %7819 = vrot.lane.b32.xlu1 %v15211_v49, %s13485_s15  ;;  %7654 = vrot.lane.b32.xlu0 %v15211_v49, %s13484_s30 }
0x3f43   :  { %v12835_v44 = vpop.f32.mrf.mxu0 }
0x3f46   :  { %7984 = vrot.lane.b32.xlu1 %v15211_v49, %s13488_s26  ;;  %7817 = vrot.lane.b32.xlu0 %v15211_v49, %s13486_s23 }
0x3f4a   :  { %8149 = vrot.lane.b32.xlu1 %v15211_v49, %s13491_s29  ;;  %7982 = vrot.lane.b32.xlu0 %v15211_v49, %s13489_s27 }
0x3f4e   :  { %8147 = vrot.lane.b32.xlu0 %v15211_v49, %s13492_s4 }
0x3fb4   :  { %v7820_v59 = vpop.permute.xlu1 %7819  ;;  %v7655_v60 = vpop.permute.xlu0 %7654 }
0x3fb5   :  { %12837 = vmatpush3.xpose.msk.msra.mxu1 %vm754_vm11, %v7655_v60 }
0x3fb6   :  { %12846 = vmatprep.subr.mxu1 %v13472_v1 }
0x3fb8   :  { %12839 = vmatmul.mubr.msk.f32.vlgmr.msra.gmra.mxu1 %vm754_vm11, %v15211_v49  ;;  %v7818_v20 = vpop.permute.xlu0 %7817  ;;  %v7985_v63 = vpop.permute.xlu1 %7984 }
0x3fb9   :  { %12847 = vmatpush3.xpose.msk.msra.mxu1 %vm754_vm11, %v7820_v59  ;;  %12848 = vmatprep.mubr.msk.f32.mxu1 %vm13477_vm2, %v13472_v1 }
0x3fba   :  { %12856 = vmatprep.subr.mxu1 %v13472_v1 }
0x3fbc   :  { %12849 = vmatmul.mubr.msk.f32.vlgmr.msra.gmra.mxu1 %vm754_vm11, %v7818_v20  ;;  %v7983_v37 = vpop.permute.xlu0 %7982  ;;  %v8150_v34 = vpop.permute.xlu1 %8149 }
0x3fbd   :  { %12857 = vmatpush3.xpose.msk.msra.mxu1 %vm754_vm11, %v7985_v63  ;;  %12858 = vmatprep.mubr.msk.f32.mxu1 %vm13477_vm2, %v13472_v1 }
0x3fbe   :  { %12866 = vmatprep.subr.mxu1 %v13472_v1 }
0x3fc0   :  { %12859 = vmatmul.mubr.msk.f32.vlgmr.msra.gmra.mxu1 %vm754_vm11, %v7983_v37  ;;  %v8148_v8 = vpop.permute.xlu0 %8147 }
0x3fc1   :  { %12867 = vmatpush3.xpose.msk.msra.mxu1 %vm754_vm11, %v8150_v34  ;;  %12868 = vmatprep.mubr.msk.f32.mxu1 %vm13477_vm2, %v13472_v1 }
0x3fc2   :  { %12876 = vmatprep.subr.mxu1 %v13472_v1 }
0x3fc4   :  { %12869 = vmatmul.mubr.msk.f32.vlgmr.msra.gmra.mxu1 %vm754_vm11, %v8148_v8 }
0x3fc5   :  { %12884 = vmatprep.mubr.msk.f32.mxu1 %vm13477_vm2, %v13472_v1 }
0x4078   :  { %v7726_v9 = vpop.f32.mrf.mxu1 }
0x4079   :  { %v7727_v10 = vadd.f32 %v13444_v11, %v7726_v9  ;;  %v7651_v9 = vld [vmem:[%s15992_s2 + $0xa70] sm:$0xff] }
0x407a   :  { %v12840_v3 = vpop.f32.mrf.mxu1  ;;  %12877 = vmatpush3.msra.mxu1 %v7651_v9 }
0x407b   :  { %v7730_v32 = vsel %vm754_vm11, %v7727_v10, -inf  ;;  %12878 = vmatprep.subr.mxu1 %v13472_v1 }
0x407c   :  { %7731 = vmax.xlane.f32.xlu1 %v7730_v32  ;;  %v7891_v13 = vpop.f32.mrf.mxu1 }
0x407d   :  { %v7892_v61 = vadd.f32 %v13444_v11, %v7891_v13  ;;  %v7650_v13 = vld [vmem:[%s15992_s2 + $0xa60] sm:$0xff] }
0x407e   :  { %v12850_v21 = vpop.f32.mrf.mxu1  ;;  %12879 = vmatpush3.msra.mxu1 %v7650_v13 }
0x407f   :  { %v7895_v14 = vsel %vm754_vm11, %v7892_v61, -inf  ;;  %12880 = vmatprep.subr.mxu1 %v13472_v1  ;;  %v7648_v21 = vld [vmem:[%s15992_s2 + $0xa40] sm:$0xff] }
0x4080   :  { %7896 = vmax.xlane.f32.xlu0 %v7895_v14  ;;  %v8056_v16 = vpop.f32.mrf.mxu1 }
0x4081   :  { %v8057_v19 = vadd.f32 %v13444_v11, %v8056_v16 }
0x4082   :  { %v12860_v35 = vpop.f32.mrf.mxu1 }
0x4083   :  { %v8060_v22 = vsel %vm754_vm11, %v8057_v19, -inf }
0x4084   :  { %8061 = vmax.xlane.f32.xlu0 %v8060_v22  ;;  %v8221_v23 = vpop.f32.mrf.mxu1 }
0x4085   :  { %v8222_v4 = vadd.f32 %v13444_v11, %v8221_v23 }
0x4086   :  { %v12870_v45 = vpop.f32.mrf.mxu1 }
0x4087   :  { %v8225_v26 = vsel %vm754_vm11, %v8222_v4, -inf }
0x4088   :  { %8226 = vmax.xlane.f32.xlu1 %v8225_v26 }
0x4099   :  { %7906 = vrot.lane.b32.xlu1 %v15211_v49, %s13487_s24 }
0x4105   :  { %v7732_v27 = vpop.xlane.xlu1 %7731 }
0x4106   :  { %v7733_v29 = vsub.f32 %v7727_v10, %v7732_v27 }
0x4108   :  { %v7734_v62 = vmul.f32 1.442695, %v7733_v29  ;;  %v7652_v29 = vld [vmem:[%s15992_s2 + $0xa80] ss:$0 sm:$0xff] }
0x4109   :  { %v7897_v31 = vpop.xlane.xlu0 %7896 }
0x410a   :  { %13334 = vpow2.f32 %v7734_v62  ;;  %v7898_v28 = vsub.f32 %v7892_v61, %v7897_v31  ;;  %v7649_v61 = vld [vmem:[%s15992_s2 + $0xa50] sm:$0xff] }
0x410b   :  { %12881 = vmatpush3.msra.mxu1 %v7649_v61 }
0x410c   :  { %v7899_v33 = vmul.f32 1.442695, %v7898_v28  ;;  %12882 = vmatprep.subr.mxu1 %v13472_v1 }
0x410d   :  { %v8062_v18 = vpop.xlane.xlu0 %8061  ;;  %12883 = vmatpush3.msra.mxu1 %v7648_v21 }
0x410e   :  { %13336 = vpow2.f32 %v7899_v33  ;;  %v8063_v48 = vsub.f32 %v8057_v19, %v8062_v18  ;;  %12899 = vmatprep.subr.mxu1 %v13472_v1 }
0x4110   :  { %v8064_v30 = vmul.f32 1.442695, %v8063_v48 }
0x4111   :  { %v8227_v58 = vpop.xlane.xlu1 %8226 }
0x4112   :  { %v8228_v52 = vsub.f32 %v8222_v4, %v8227_v58 }
0x4114   :  { %v8229_v24 = vmul.f32 1.442695, %v8228_v52  ;;  %v7489_v52 = vrot.slane %v15186_v6, 4 }
0x4115   :  { %v7907_v50 = vpop.permute.xlu1 %7906 }
0x4116   :  { %13338 = vpow2.f32 %v8229_v24  ;;  %v15316_v24 = vmul.f32 0.35355338, %v15178_v25 }
0x4117   :  { %v13335_v54 = vpop.eup %13334  ;;  %13340 = vpow2.f32 %v8064_v30 }
0x4118   :  { %v7736_v38 = vsel %vm754_vm11, %v13335_v54, 0.0 }
0x4119   :  { %7737 = vadd.xlane.f32.xlu0 %v7736_v38 }
0x411b   :  { %v13337_v39 = vpop.eup %13336 }
0x411c   :  { %v7901_v40 = vsel %vm754_vm11, %v13337_v39, 0.0 }
0x411d   :  { %7902 = vadd.xlane.f32.xlu1 %v7901_v40 }
0x4123   :  { %v13339_v41 = vpop.eup %13338 }
0x4124   :  { %v8231_v42 = vsel %vm754_vm11, %v13339_v41, 0.0  ;;  %v13341_v17 = vpop.eup %13340 }
0x4125   :  { %8232 = vadd.xlane.f32.xlu1 %v8231_v42  ;;  %v8066_v47 = vsel %vm754_vm11, %v13341_v17, 0.0  ;;  %v8403_v42 = vld [vmem:[%s15992_s2 + $0xab0] sm:$0xff] }
0x412f   :  { %7741 = vrot.lane.b32.xlu0 %v15211_v49, %s13481_s21 }
0x4136   :  { %8071 = vrot.lane.b32.xlu1 %v15211_v49, %s13490_s28 }
0x414e   :  { %8067 = vadd.xlane.f32.xlu0 %v8066_v47  ;;  %v8401_v47 = vld [vmem:[%s15992_s2 + $0xa90] ss:$0 sm:$0xff] }
0x4164   :  { %8236 = vrot.lane.b32.xlu0 %v15211_v49, %s13493_s20 }
0x41a2   :  { %v7738_v5 = vpop.xlane.xlu0 %7737 }
0x41a3   :  { %13342 = vrcp.f32 %v7738_v5  ;;  %v8402_v5 = vld [vmem:[%s15992_s2 + $0xaa0] ss:$0 sm:$0xff] }
0x41a6   :  { %v7742_v43 = vpop.permute.xlu0 %7741  ;;  %v7903_v51 = vpop.xlane.xlu1 %7902 }
0x41a7   :  { %13344 = vrcp.f32 %v7903_v51  ;;  %12842 = vmatpush3.msra.mxu0 %v7742_v43 }
0x41a8   :  { %12851 = vmatprep.subr.mxu0 %v13472_v1 }
0x41ae   :  { %v8233_v55 = vpop.xlane.xlu1 %8232 }
0x41b0   :  { %v13343_v53 = vpop.eup %13342 }
0x41b1   :  { %v7740_v57 = vmul.f32 %v13343_v53, %v13335_v54  ;;  %v8406_v53 = vld [vmem:[%s15992_s2 + $0xae0] sm:$0xff] }
0x41b2   :  { %v8072_v59 = vpop.permute.xlu1 %8071 }
0x41b3   :  { %12844 = vmatmul.mubr.msk.f32.vlgmr.msra.gmra.mxu0 %vm754_vm11, %v7740_v57  ;;  %v8404_v57 = vld [vmem:[%s15992_s2 + $0xac0] ss:$0 sm:$0xff] }
0x41b4   :  { %v13345_v44 = vpop.eup %13344  ;;  %12852 = vmatpush3.msra.mxu0 %v7907_v50  ;;  %12853 = vmatprep.mubr.msk.f32.mxu0 %vm13477_vm2, %v13472_v1 }
0x41b5   :  { %12861 = vmatprep.subr.mxu0 %v13472_v1  ;;  %v7905_v49 = vmul.f32 %v13345_v44, %v13337_v39 }
0x41b7   :  { %12854 = vmatmul.mubr.msk.f32.vlgmr.msra.gmra.mxu0 %vm754_vm11, %v7905_v49 }
0x41b8   :  { %12862 = vmatpush3.msra.mxu0 %v8072_v59  ;;  %12863 = vmatprep.mubr.msk.f32.mxu0 %vm13477_vm2, %v13472_v1 }
0x41b9   :  { %12871 = vmatprep.subr.mxu0 %v13472_v1 }
0x41d7   :  { %v8068_v60 = vpop.xlane.xlu0 %8067 }
0x41d8   :  { %13346 = vrcp.f32 %v8068_v60 }
0x41d9   :  { %13348 = vrcp.f32 %v8233_v55  ;;  %v8405_v55 = vld [vmem:[%s15992_s2 + $0xad0] sm:$0xff] }
0x41db   :  { %v8237_v34 = vpop.permute.xlu0 %8236 }
0x41e5   :  { %v13347_v20 = vpop.eup %13346 }
0x41e6   :  { %v8070_v63 = vmul.f32 %v13347_v20, %v13341_v17  ;;  %v13349_v37 = vpop.eup %13348 }
0x41e7   :  { %v8235_v8 = vmul.f32 %v13349_v37, %v13339_v41 }
0x41e8   :  { %12864 = vmatmul.mubr.msk.f32.vlgmr.msra.gmra.mxu0 %vm754_vm11, %v8070_v63 }
0x41e9   :  { %12872 = vmatpush3.msra.mxu0 %v8237_v34  ;;  %12873 = vmatprep.mubr.msk.f32.mxu0 %vm13477_vm2, %v13472_v1 }
0x41ea   :  { %12887 = vmatprep.subr.mxu0 %v13472_v1 }
0x41ec   :  { %12874 = vmatmul.mubr.msk.f32.vlgmr.msra.gmra.mxu0 %vm754_vm11, %v8235_v8 }
0x41ed   :  { %12889 = vmatprep.mubr.msk.f32.mxu0 %vm13477_vm2, %v13472_v1  ;;  %12888 = vmatpush3.msra.mxu0 %v8403_v42 }
0x41ee   :  { %12892 = vmatprep.subr.mxu0 %v13472_v1 }
0x4273   :  { %v7813_v11 = vpop.f32.mrf.mxu0 }
0x4275   :  { %v12845_v10 = vpop.f32.mrf.mxu0 }
0x4277   :  { %v7978_v3 = vpop.f32.mrf.mxu0 }
0x4278   :  { %8313 = vrot.lane.b32.xlu1 %v7978_v3, %s13494_s5  ;;  %v8580_v3 = vld [vmem:[%s15992_s2 + $0xb30] sm:$0xff] }
0x4279   :  { %v12855_v32 = vpop.f32.mrf.mxu0 }
0x427a   :  { %v8407_v32 = vld [vmem:[%s15992_s2 + $0xaf0] ss:$0 sm:$0xff] }
0x42a8   :  { %v8143_v14 = vpop.f32.mrf.mxu0 }
0x42a9   :  { %8317 = vrot.lane.b32.xlu0 %v8143_v14, %s13495_s6 }
0x42aa   :  { %v12865_v16 = vpop.f32.mrf.mxu0 }
0x42ac   :  { %v8308_v19 = vpop.f32.mrf.mxu0 }
0x42ad   :  { %8321 = vrot.lane.b32.xlu1 %v8308_v19, %s13496_s13 }
0x42ae   :  { %v12875_v35 = vpop.f32.mrf.mxu0 }
0x42ea   :  { %v8314_v22 = vpop.permute.xlu1 %8313 }
0x42eb   :  { %v8324_v4 = vsel %vm754_vm11, %v7813_v11, %v8314_v22 }
0x431b   :  { %v8318_v23 = vpop.permute.xlu0 %8317 }
0x431c   :  { %v8325_v45 = vsel %vm838_vm12, %v8324_v4, %v8318_v23 }
0x431f   :  { %v8322_v26 = vpop.permute.xlu1 %8321 }
0x4320   :  { %v8326_v27 = vsel %vm1576_vm13, %v8325_v45, %v8322_v26 }
0x4321   :  { %12885 = vmatmul.mubr.msk.f32.vlgmr.msra.gmra.mxu1 %vm197_vm10, %v8326_v27 }
0x4322   :  { %12901 = vmatprep.mubr.msk.f32.mxu1 %vm13477_vm2, %v13472_v1  ;;  %12900 = vmatpush3.msra.mxu1 %v8580_v3 }
0x43e1   :  { %v8396_v62 = vpop.f32.mrf.mxu1 }
0x43e2   :  { %v8397_v31 = vadd.f32 %v8396_v62, %v7652_v29 }
0x43e3   :  { %v12886_v28 = vpop.f32.mrf.mxu1 }
0x43e4   :  { %v8400_v33 = vadd.f32 %v8397_v31, %v15203_v56  ;;  %v8660_v56 = vmul.f32 0.35355338, %v15176_v36 }
0x43e6   :  { %v8408_v58 = vsel %vm754_vm11, %v8400_v33, 0.0 }
0x43e7   :  { %8409 = vadd.xlane.f32.xlu0 %v8408_v58 }
0x43fd   :  { %7490 = vrot.lane.b32.xlu0 %v7489_v52, %s13486_s23 }
0x4401   :  { %8848 = vrot.lane.b32.xlu0 %v15316_v24, %s13486_s23 }
0x4470   :  { %v8410_v54 = vpop.xlane.xlu0 %8409 }
0x4471   :  { %v8412_v38 = vmul.f32 0.125, %v8410_v54 }
0x4473   :  { %v8413_v39 = vsub.f32 %v8400_v33, %v8412_v38  ;;  %v13445_v33 = vld [vmem:[%s15992_s2 + $0x1f0] sm:$0xff] }
0x4474   :  { %v7491_v13 = vpop.permute.xlu0 %7490 }
0x4475   :  { %v8414_v40 = vmul.f32 %v8413_v39, %v8413_v39  ;;  %v7493_v14 = vsel %vm73_vm3, %v15186_v6, %v7491_v13  ;;  %vm10742_vm3 = vcmask 392192  }
0x4477   :  { %v8415_v41 = vsel %vm754_vm11, %v8414_v40, 0.0 }
0x4478   :  { %8416 = vadd.xlane.f32.xlu1 %v8415_v41  ;;  %v8849_v6 = vpop.permute.xlu0 %8848 }
0x4489   :  { %8850 = vrot.lane.b32.xlu1 %v8660_v56, %s13486_s23 }
0x4501   :  { %v8417_v18 = vpop.xlane.xlu1 %8416 }
0x4502   :  { %v8418_v48 = vmul.f32 0.125, %v8417_v18 }
0x4504   :  { %v8419_v30 = vadd.f32 1e-05, %v8418_v48 }
0x4505   :  { %v8851_v23 = vpop.permute.xlu1 %8850 }
0x4506   :  { %13350 = vrsqrt.f32 %v8419_v30 }
0x4513   :  { %v13351_v17 = vpop.eup %13350 }
0x4514   :  { %v8421_v50 = vmul.f32 %v13351_v17, %v8413_v39 }
0x4516   :  { %v8422_v43 = vmul.f32 %v8421_v50, %v8401_v47 }
0x4518   :  { %v8423_v51 = vadd.f32 %v8422_v43, %v8402_v5 }
0x451a   :  { %12890 = vmatmul.mubr.msk.f32.vlgmr.msra.gmra.mxu0 %vm754_vm11, %v8423_v51 }
0x451b   :  { %12896 = vmatprep.mubr.msk.f32.mxu0 %vm13477_vm2, %v13472_v1  ;;  %12893 = vmatpush3.msra.mxu0 %v8406_v53 }
0x451c   :  { %12894 = vmatprep.subr.mxu0 %v13472_v1 }
0x451d   :  { %12895 = vmatpush3.msra.mxu0 %v8405_v55 }
0x45da   :  { %v8493_v44 = vpop.f32.mrf.mxu0 }
0x45db   :  { %v8494_v49 = vadd.f32 %v8493_v44, %v8404_v57 }
0x45dc   :  { %v12891_v59 = vpop.f32.mrf.mxu0 }
0x45dd   :  { %v8498_v60 = vmul.f32 0.044715, %v8494_v49  ;;  %v8497_v9 = vmul.f32 0.5, %v8494_v49 }
0x45df   :  { %v8499_v20 = vmul.f32 %v8498_v60, %v8494_v49 }
0x45e1   :  { %v8500_v63 = vmul.f32 %v8499_v20, %v8494_v49 }
0x45e3   :  { %v8501_v37 = vadd.f32 %v8500_v63, %v8494_v49 }
0x45e5   :  { %v8502_v34 = vmul.f32 0.7978846, %v8501_v37 }
0x45e7   :  { %13352 = vtanh.f32 %v8502_v34 }
0x45f4   :  { %v13353_v8 = vpop.eup %13352 }
0x45f5   :  { %v8504_v11 = vadd.f32 1.0, %v13353_v8 }
0x45f7   :  { %v8505_v10 = vmul.f32 %v8504_v11, %v8497_v9 }
0x45f9   :  { %12897 = vmatmul.mubr.msk.f32.vlgmr.msra.gmra.mxu0 %vm838_vm12, %v8505_v10 }
0x45fa   :  { %12906 = vmatprep.mubr.msk.f32.mxu0 %vm754_vm11, %v15316_v24 }
0x46b9   :  { %v8575_v61 = vpop.f32.mrf.mxu0 }
0x46ba   :  { %v8576_v21 = vadd.f32 %v8575_v61, %v8407_v32 }
0x46bb   :  { %v12898_v16 = vpop.f32.mrf.mxu0 }
0x46bc   :  { %v8579_v19 = vadd.f32 %v8576_v21, %v7493_v14 }
0x46be   :  { %12902 = vmatmul.mubr.msk.f32.vlgmr.msra.gmra.mxu1 %vm754_vm11, %v8579_v19 }
0x477e   :  { %v15358_v35 = vpop.f32.mrf.mxu1 }
0x477f   :  { %9043 = vrot.lane.b32.xlu0 %v15358_v35, %s13489_s27  ;;  %8852 = vrot.lane.b32.xlu1 %v15358_v35, %s13486_s23 }
0x4780   :  { %12904 = vmatprep.subr.msk.mxu0 %vm754_vm11, %v15358_v35  ;;  %12909 = vmatprep.subr.mxu1 %v15358_v35  ;;  %v12903_v22 = vpop.f32.mrf.mxu1 }
0x4781   :  { %12905 = vmatpush3.xpose.msk.msra.mxu0 %vm754_vm11, %v15358_v35  ;;  %12910 = vmatpush3.msra.mxu1 %v15358_v35 }
0x4783   :  { %9041 = vrot.lane.b32.xlu0 %v8660_v56, %s13489_s27  ;;  %9039 = vrot.lane.b32.xlu1 %v15316_v24, %s13489_s27 }
0x4784   :  { %12907 = vmatmul.mubr.msk.f32.vlgmr.msra.gmra.mxu0 %vm754_vm11, %v8660_v56 }
0x4785   :  { %12916 = vmatprep.mubr.msk.f32.mxu0 %vm754_vm11, %v8849_v6 }
0x4787   :  { %9230 = vrot.lane.b32.xlu0 %v15316_v24, %s13492_s4  ;;  %9234 = vrot.lane.b32.xlu1 %v15358_v35, %s13492_s4  ;;  %v13446_v24 = vld [vmem:[%s15992_s2 + $0x1e0] sm:$0xff] }
0x478b   :  { %9232 = vrot.lane.b32.xlu1 %v8660_v56, %s13492_s4 }
0x47f1   :  { %v15380_v4 = vpop.permute.xlu0 %9043  ;;  %v15382_v45 = vpop.permute.xlu1 %8852 }
0x47f2   :  { %12914 = vmatprep.subr.msk.mxu0 %vm754_vm11, %v15382_v45  ;;  %12919 = vmatprep.subr.mxu1 %v15382_v45 }
0x47f3   :  { %12915 = vmatpush3.xpose.msk.msra.mxu0 %vm754_vm11, %v15382_v45 }
0x47f4   :  { %12924 = vmatprep.subr.msk.mxu0 %vm754_vm11, %v15380_v4 }
0x47f5   :  { %v9042_v26 = vpop.permute.xlu0 %9041  ;;  %v9040_v27 = vpop.permute.xlu1 %9039 }
0x47f6   :  { %12917 = vmatmul.mubr.msk.f32.vlgmr.msra.gmra.mxu0 %vm754_vm11, %v8851_v23 }
0x47f7   :  { %12925 = vmatpush3.xpose.msk.msra.mxu0 %vm754_vm11, %v15380_v4  ;;  %12926 = vmatprep.mubr.msk.f32.mxu0 %vm754_vm11, %v9040_v27 }
0x47f9   :  { %v9231_v29 = vpop.permute.xlu0 %9230  ;;  %v15395_v62 = vpop.permute.xlu1 %9234 }
0x47fa   :  { %12927 = vmatmul.mubr.msk.f32.vlgmr.msra.gmra.mxu0 %vm754_vm11, %v9042_v26  ;;  %12934 = vmatprep.subr.msk.mxu0 %vm754_vm11, %v15395_v62 }
0x47fb   :  { %12935 = vmatpush3.xpose.msk.msra.mxu0 %vm754_vm11, %v15395_v62  ;;  %12936 = vmatprep.mubr.msk.f32.mxu0 %vm754_vm11, %v9231_v29 }
0x47fd   :  { %v9233_v31 = vpop.permute.xlu1 %9232 }
0x47fe   :  { %12937 = vmatmul.mubr.msk.f32.vlgmr.msra.gmra.mxu0 %vm754_vm11, %v9233_v31 }
0x4844   :  { %v12908_v28 = vpop.f32.mrf.mxu0 }
0x4845   :  { %v8742_v58 = vadd.f32 %v13445_v33, %v12908_v28 }
0x4846   :  { %v8736_v52 = vpop.f32.mrf.mxu0 }
0x4847   :  { %v8737_v54 = vadd.f32 %v13446_v24, %v8736_v52  ;;  %v8748_v38 = vsel %vm754_vm11, %v8742_v58, -inf }
0x4848   :  { %8749 = vmax.xlane.f32.xlu1 %v8748_v38 }
0x4849   :  { %v8745_v39 = vsel %vm754_vm11, %v8737_v54, -inf }
0x484a   :  { %8746 = vmax.xlane.f32.xlu0 %v8745_v39 }
0x48b6   :  { %v12918_v40 = vpop.f32.mrf.mxu0 }
0x48b7   :  { %v8932_v18 = vadd.f32 %v13445_v33, %v12918_v40 }
0x48b8   :  { %v8926_v41 = vpop.f32.mrf.mxu0 }
0x48b9   :  { %v8927_v56 = vadd.f32 %v13446_v24, %v8926_v41  ;;  %v8938_v43 = vsel %vm754_vm11, %v8932_v18, -inf }
0x48ba   :  { %v12928_v42 = vpop.f32.mrf.mxu0 }
0x48bb   :  { %v8935_v48 = vsel %vm754_vm11, %v8927_v56, -inf  ;;  %v9123_v50 = vadd.f32 %v13445_v33, %v12928_v42 }
0x48bc   :  { %v9117_v30 = vpop.f32.mrf.mxu0  ;;  %8936 = vmax.xlane.f32.xlu0 %v8935_v48 }
0x48bd   :  { %v9118_v17 = vadd.f32 %v13446_v24, %v9117_v30  ;;  %v9129_v44 = vsel %vm754_vm11, %v9123_v50, -inf }
0x48be   :  { %v12938_v47 = vpop.f32.mrf.mxu0 }
0x48bf   :  { %v9126_v5 = vsel %vm754_vm11, %v9118_v17, -inf  ;;  %v9314_v55 = vadd.f32 %v13445_v33, %v12938_v47 }
0x48c0   :  { %v9308_v51 = vpop.f32.mrf.mxu0  ;;  %9127 = vmax.xlane.f32.xlu1 %v9126_v5  ;;  %8939 = vmax.xlane.f32.xlu0 %v8938_v43 }
0x48c1   :  { %v9309_v53 = vadd.f32 %v13446_v24, %v9308_v51  ;;  %v9320_v49 = vsel %vm754_vm11, %v9314_v55, -inf }
0x48c3   :  { %v9317_v57 = vsel %vm754_vm11, %v9309_v53, -inf }
0x48c4   :  { %9318 = vmax.xlane.f32.xlu1 %v9317_v57  ;;  %9130 = vmax.xlane.f32.xlu0 %v9129_v44 }
0x48c8   :  { %9321 = vmax.xlane.f32.xlu0 %v9320_v49 }
0x48d1   :  { %v8750_v59 = vpop.xlane.xlu1 %8749 }
0x48d2   :  { %v8752_v60 = vsub.f32 %v8742_v58, %v8750_v59 }
0x48d3   :  { %v8747_v20 = vpop.xlane.xlu0 %8746 }
0x48d4   :  { %v8755_v63 = vmul.f32 1.442695, %v8752_v60  ;;  %v8751_v37 = vsub.f32 %v8737_v54, %v8747_v20 }
0x48d6   :  { %13354 = vpow2.f32 %v8755_v63  ;;  %v8753_v34 = vmul.f32 1.442695, %v8751_v37 }
0x48d8   :  { %13356 = vpow2.f32 %v8753_v34 }
0x48e3   :  { %v13355_v8 = vpop.eup %13354 }
0x48e4   :  { %v8760_v9 = vsel %vm754_vm11, %v13355_v8, 0.0 }
0x48e5   :  { %v13357_v11 = vpop.eup %13356  ;;  %8761 = vadd.xlane.f32.xlu0 %v8760_v9 }
0x48e6   :  { %v8757_v10 = vsel %vm754_vm11, %v13357_v11, 0.0 }
0x48e7   :  { %8758 = vadd.xlane.f32.xlu1 %v8757_v10 }
0x4945   :  { %v8937_v3 = vpop.xlane.xlu0 %8936 }
0x4946   :  { %v8941_v32 = vsub.f32 %v8927_v56, %v8937_v3 }
0x4948   :  { %v8943_v13 = vmul.f32 1.442695, %v8941_v32 }
0x4949   :  { %v9128_v61 = vpop.xlane.xlu1 %9127  ;;  %v8940_v21 = vpop.xlane.xlu0 %8939 }
0x494a   :  { %13358 = vpow2.f32 %v8943_v13  ;;  %v9132_v14 = vsub.f32 %v9118_v17, %v9128_v61  ;;  %v8942_v16 = vsub.f32 %v8932_v18, %v8940_v21  ;;  %v8656_v61 = vld [vmem:[%s15992_s2 + $0x940] sm:$0xff] }
0x494c   :  { %v9134_v19 = vmul.f32 1.442695, %v9132_v14  ;;  %v8945_v22 = vmul.f32 1.442695, %v8942_v16  ;;  %v8654_v16 = vld [vmem:[%s15992_s2 + $0x920] sm:$0xff] }
0x494d   :  { %v9319_v6 = vpop.xlane.xlu1 %9318  ;;  %v9131_v23 = vpop.xlane.xlu0 %9130 }
0x494e   :  { %13360 = vpow2.f32 %v9134_v19  ;;  %v9323_v26 = vsub.f32 %v9309_v53, %v9319_v6  ;;  %v9133_v27 = vsub.f32 %v9123_v50, %v9131_v23 }
0x494f   :  { %13362 = vpow2.f32 %v8945_v22 }
0x4950   :  { %v9325_v29 = vmul.f32 1.442695, %v9323_v26  ;;  %v9136_v31 = vmul.f32 1.442695, %v9133_v27 }
0x4951   :  { %v9322_v28 = vpop.xlane.xlu0 %9321 }
0x4952   :  { %13364 = vpow2.f32 %v9325_v29  ;;  %v9324_v33 = vsub.f32 %v9314_v55, %v9322_v28 }
0x4953   :  { %13366 = vpow2.f32 %v9136_v31 }
0x4954   :  { %v9327_v58 = vmul.f32 1.442695, %v9324_v33 }
0x4956   :  { %13368 = vpow2.f32 %v9327_v58 }
0x4957   :  { %v13359_v52 = vpop.eup %13358 }
0x4958   :  { %v8947_v24 = vsel %vm754_vm11, %v13359_v52, 0.0 }
0x4959   :  { %8948 = vadd.xlane.f32.xlu1 %v8947_v24 }
0x495b   :  { %v13361_v54 = vpop.eup %13360 }
0x495c   :  { %v13363_v38 = vpop.eup %13362  ;;  %v9138_v39 = vsel %vm754_vm11, %v13361_v54, 0.0 }
0x495d   :  { %9139 = vadd.xlane.f32.xlu1 %v9138_v39  ;;  %v8950_v40 = vsel %vm754_vm11, %v13363_v38, 0.0 }
0x495e   :  { %8951 = vadd.xlane.f32.xlu0 %v8950_v40 }
0x495f   :  { %v13365_v41 = vpop.eup %13364 }
0x4960   :  { %v13367_v56 = vpop.eup %13366  ;;  %v9329_v42 = vsel %vm754_vm11, %v13365_v41, 0.0 }
0x4961   :  { %9330 = vadd.xlane.f32.xlu1 %v9329_v42  ;;  %v9141_v18 = vsel %vm754_vm11, %v13367_v56, 0.0 }
0x4962   :  { %9142 = vadd.xlane.f32.xlu0 %v9141_v18 }
0x4963   :  { %v13369_v48 = vpop.eup %13368 }
0x4964   :  { %v9332_v30 = vsel %vm754_vm11, %v13369_v48, 0.0 }
0x4966   :  { %9333 = vadd.xlane.f32.xlu0 %v9332_v30 }
0x496e   :  { %v8762_v17 = vpop.xlane.xlu0 %8761 }
0x496f   :  { %13370 = vrcp.f32 %v8762_v17 }
0x4970   :  { %v8759_v47 = vpop.xlane.xlu1 %8758 }
0x4971   :  { %13372 = vrcp.f32 %v8759_v47 }
0x497c   :  { %v13371_v50 = vpop.eup %13370 }
0x497d   :  { %v8766_v51 = vmul.f32 %v13371_v50, %v13355_v8 }
0x497e   :  { %v13373_v5 = vpop.eup %13372 }
0x497f   :  { %v8765_v43 = vmul.f32 %v13373_v5, %v13357_v11  ;;  %v15475_v5 = vmul.f32 0.35355338, %v15358_v35 }
0x4981   :  { %12911 = vmatprep.mubr.msk.f32.mxu1 %vm754_vm11, %v8765_v43 }
0x4982   :  { %12912 = vmatmul.mubr.msk.f32.vlgmr.msra.gmra.mxu1 %vm754_vm11, %v8766_v51 }
0x4983   :  { %12920 = vmatpush3.msra.mxu1 %v15382_v45 }
0x4984   :  { %12929 = vmatprep.subr.mxu1 %v15380_v4 }
0x49e2   :  { %v8949_v53 = vpop.xlane.xlu1 %8948 }
0x49e3   :  { %13374 = vrcp.f32 %v8949_v53 }
0x49e6   :  { %v9140_v55 = vpop.xlane.xlu1 %9139 }
0x49e7   :  { %13376 = vrcp.f32 %v9140_v55  ;;  %v8952_v57 = vpop.xlane.xlu0 %8951 }
0x49e8   :  { %13378 = vrcp.f32 %v8952_v57 }
0x49ea   :  { %v9331_v44 = vpop.xlane.xlu1 %9330 }
0x49eb   :  { %13380 = vrcp.f32 %v9331_v44  ;;  %v9143_v49 = vpop.xlane.xlu0 %9142 }
0x49ec   :  { %13382 = vrcp.f32 %v9143_v49 }
0x49ef   :  { %v9334_v59 = vpop.xlane.xlu0 %9333 }
0x49f0   :  { %v13375_v60 = vpop.eup %13374  ;;  %13384 = vrcp.f32 %v9334_v59 }
0x49f1   :  { %v8955_v20 = vmul.f32 %v13375_v60, %v13359_v52 }
0x49f3   :  { %12921 = vmatprep.mubr.msk.f32.mxu1 %vm754_vm11, %v8955_v20 }
0x49f4   :  { %v13377_v63 = vpop.eup %13376 }
0x49f5   :  { %v13379_v45 = vpop.eup %13378  ;;  %v9146_v37 = vmul.f32 %v13377_v63, %v13361_v54  ;;  %v9539_v63 = vld [vmem:[%s15992_s2 + $0x9c0] sm:$0xff] }
0x49f6   :  { %v8956_v34 = vmul.f32 %v13379_v45, %v13363_v38  ;;  %v9538_v45 = vld [vmem:[%s15992_s2 + $0x9b0] sm:$0xff] }
0x49f8   :  { %v13381_v8 = vpop.eup %13380  ;;  %12922 = vmatmul.mubr.msk.f32.vlgmr.msra.gmra.mxu1 %vm754_vm11, %v8956_v34  ;;  %v9536_v34 = vld [vmem:[%s15992_s2 + $0x990] sm:$0xff] }
0x49f9   :  { %v13383_v9 = vpop.eup %13382  ;;  %12930 = vmatpush3.msra.mxu1 %v15380_v4  ;;  %12931 = vmatprep.mubr.msk.f32.mxu1 %vm754_vm11, %v9146_v37  ;;  %v9337_v11 = vmul.f32 %v13381_v8, %v13365_v41  ;;  %v8657_v4 = vld [vmem:[%s15992_s2 + $0x950] sm:$0xff]  ;;  %v8658_v41 = vld [vmem:[%s15992_s2 + $0x960] ss:$0 sm:$0xff] }
0x49fa   :  { %12939 = vmatprep.subr.mxu1 %v15395_v62  ;;  %v9147_v10 = vmul.f32 %v13383_v9, %v13367_v56  ;;  %12944 = vmatprep.subr.mxu0 %v8657_v4  ;;  %v9537_v37 = vld [vmem:[%s15992_s2 + $0x9a0] sm:$0xff] }
0x49fb   :  { %12945 = vmatpush3.msra.mxu0 %v8657_v4  ;;  %v9534_v4 = vld [vmem:[%s15992_s2 + $0x970] ss:$0 sm:$0xff] }
0x49fc   :  { %12932 = vmatmul.mubr.msk.f32.vlgmr.msra.gmra.mxu1 %vm754_vm11, %v9147_v10  ;;  %12946 = vmatprep.subr.mxu0 %v8656_v61 }
0x49fd   :  { %v13385_v3 = vpop.eup %13384  ;;  %12940 = vmatpush3.msra.mxu1 %v15395_v62  ;;  %12941 = vmatprep.mubr.msk.f32.mxu1 %vm754_vm11, %v9337_v11  ;;  %v8655_v62 = vld [vmem:[%s15992_s2 + $0x930] sm:$0xff] }
0x49fe   :  { %v9338_v32 = vmul.f32 %v13385_v3, %v13369_v48  ;;  %12947 = vmatpush3.msra.mxu0 %v8656_v61  ;;  %12955 = vmatprep.subr.mxu1 %v9539_v63 }
0x49ff   :  { %12948 = vmatprep.subr.mxu0 %v8655_v62 }
0x4a00   :  { %12942 = vmatmul.mubr.msk.f32.vlgmr.msra.gmra.mxu1 %vm754_vm11, %v9338_v32  ;;  %12949 = vmatpush3.msra.mxu0 %v8655_v62 }
0x4a01   :  { %12950 = vmatprep.subr.mxu0 %v8654_v16  ;;  %12956 = vmatpush3.msra.mxu1 %v9539_v63 }
0x4a02   :  { %12951 = vmatpush3.msra.mxu0 %v8654_v16  ;;  %12957 = vmatprep.subr.mxu1 %v9538_v45 }
0x4a03   :  { %12958 = vmatpush3.msra.mxu1 %v9538_v45 }
0x4a04   :  { %12959 = vmatprep.subr.mxu1 %v9537_v37 }
0x4a05   :  { %12960 = vmatpush3.msra.mxu1 %v9537_v37 }
0x4a06   :  { %12961 = vmatprep.subr.mxu1 %v9536_v34 }
0x4a07   :  { %12962 = vmatpush3.msra.mxu1 %v9536_v34 }
0x4a08   :  { %12977 = vmatprep.subr.mxu1 %v13472_v1 }
0x4a42   :  { %v12913_v13 = vpop.f32.mrf.mxu1 }
0x4a44   :  { %v8839_v21 = vpop.f32.mrf.mxu1 }
0x4ab8   :  { %v12923_v14 = vpop.f32.mrf.mxu1 }
0x4ab9   :  { %9425 = vrot.lane.b32.xlu0 %v12923_v14, %s13494_s5 }
0x4aba   :  { %v9030_v19 = vpop.f32.mrf.mxu1 }
0x4abb   :  { %9423 = vrot.lane.b32.xlu1 %v9030_v19, %s13494_s5 }
0x4abc   :  { %v12933_v22 = vpop.f32.mrf.mxu1 }
0x4abe   :  { %v9221_v6 = vpop.f32.mrf.mxu1 }
0x4abf   :  { %9433 = vrot.lane.b32.xlu1 %v12933_v22, %s13495_s6 }
0x4ac0   :  { %v12943_v23 = vpop.f32.mrf.mxu1 }
0x4ac2   :  { %v9412_v26 = vpop.f32.mrf.mxu1 }
0x4ac3   :  { %9431 = vrot.lane.b32.xlu1 %v9221_v6, %s13495_s6  ;;  %9439 = vrot.lane.b32.xlu0 %v9412_v26, %s13496_s13 }
0x4ac7   :  { %9441 = vrot.lane.b32.xlu1 %v12943_v23, %s13496_s13 }
0x4b2b   :  { %v9426_v29 = vpop.permute.xlu0 %9425 }
0x4b2c   :  { %v9446_v54 = vsel %vm754_vm11, %v12913_v13, %v9426_v29  ;;  %v9544_v29 = vld [vmem:[%s15992_s2 + $0xa10] sm:$0xff] }
0x4b2d   :  { %v9424_v27 = vpop.permute.xlu1 %9423  ;;  %12966 = vmatprep.subr.mxu0 %v9544_v29 }
0x4b2e   :  { %v9445_v28 = vsel %vm754_vm11, %v8839_v21, %v9424_v27  ;;  %v9535_v21 = vld [vmem:[%s15992_s2 + $0x980] ss:$0 sm:$0xff] }
0x4b31   :  { %v9434_v31 = vpop.permute.xlu1 %9433 }
0x4b32   :  { %v9448_v38 = vsel %vm838_vm12, %v9446_v54, %v9434_v31  ;;  %v9543_v31 = vld [vmem:[%s15992_s2 + $0xa00] sm:$0xff] }
0x4b35   :  { %v9432_v33 = vpop.permute.xlu1 %9431  ;;  %v9440_v58 = vpop.permute.xlu0 %9439 }
0x4b36   :  { %v9447_v52 = vsel %vm838_vm12, %v9445_v28, %v9432_v33  ;;  %v9542_v28 = vld [vmem:[%s15992_s2 + $0x9f0] sm:$0xff]  ;;  %v9541_v33 = vld [vmem:[%s15992_s2 + $0x9e0] sm:$0xff] }
0x4b37   :  { %v9449_v24 = vsel %vm1576_vm13, %v9447_v52, %v9440_v58  ;;  %v9540_v58 = vld [vmem:[%s15992_s2 + $0x9d0] ss:$0 sm:$0xff] }
0x4b38   :  { %12952 = vmatprep.mubr.msk.f32.mxu0 %vm197_vm10, %v9449_v24 }
0x4b39   :  { %v9442_v39 = vpop.permute.xlu1 %9441 }
0x4b3a   :  { %v9450_v40 = vsel %vm1576_vm13, %v9448_v38, %v9442_v39 }
0x4b3b   :  { %12953 = vmatmul.mubr.msk.f32.vlgmr.msra.gmra.mxu0 %vm197_vm10, %v9450_v40 }
0x4b3c   :  { %12967 = vmatpush3.msra.mxu0 %v9544_v29 }
0x4b3d   :  { %12968 = vmatprep.subr.mxu0 %v9543_v31 }
0x4b3e   :  { %12969 = vmatpush3.msra.mxu0 %v9543_v31 }
0x4b3f   :  { %12970 = vmatprep.subr.mxu0 %v9542_v28 }
0x4b40   :  { %12971 = vmatpush3.msra.mxu0 %v9542_v28 }
0x4b41   :  { %12972 = vmatprep.subr.mxu0 %v9541_v33 }
0x4b42   :  { %12973 = vmatpush3.msra.mxu0 %v9541_v33 }
0x4b43   :  { %12984 = vmatprep.subr.mxu0 %v13472_v1 }
0x4bfb   :  { %v12954_v56 = vpop.f32.mrf.mxu0 }
0x4bfc   :  { %v9529_v42 = vadd.f32 %v12954_v56, %v8658_v41 }
0x4bfd   :  { %v9523_v18 = vpop.f32.mrf.mxu0 }
0x4bfe   :  { %v9533_v48 = vadd.f32 %v15176_v36, %v9529_v42  ;;  %v9524_v30 = vadd.f32 %v9523_v18, %v8658_v41 }
0x4c00   :  { %v9532_v17 = vadd.f32 %v9524_v30, %v15178_v25  ;;  %v9549_v47 = vsel %vm197_vm10, %v9533_v48, 0.0 }
0x4c01   :  { %9550 = vadd.xlane.f32.xlu1 %v9549_v47 }
0x4c02   :  { %v9546_v50 = vsel %vm197_vm10, %v9532_v17, 0.0 }
0x4c03   :  { %9547 = vadd.xlane.f32.xlu0 %v9546_v50 }
0x4c12   :  { %9929 = vrot.lane.b32.xlu1 %v15176_v36, %s13486_s23 }
0x4c16   :  { %9925 = vrot.lane.b32.xlu1 %v15475_v5, %s13486_s23 }
0x4c8a   :  { %v9551_v43 = vpop.xlane.xlu1 %9550 }
0x4c8b   :  { %v9553_v51 = vmul.f32 0.03125, %v9551_v43 }
0x4c8c   :  { %v9548_v53 = vpop.xlane.xlu0 %9547 }
0x4c8d   :  { %v9552_v55 = vmul.f32 0.03125, %v9548_v53  ;;  %v9555_v57 = vsub.f32 %v9533_v48, %v9553_v51 }
0x4c8e   :  { %v15512_v23 = vpop.permute.xlu1 %9929 }
0x4c8f   :  { %v9554_v44 = vsub.f32 %v9532_v17, %v9552_v55  ;;  %v9557_v60 = vmul.f32 %v9555_v57, %v9555_v57  ;;  %v15548_v17 = vld [vmem:[%s15992_s2 + $0x210] sm:$0xff] }
0x4c91   :  { %v9556_v49 = vmul.f32 %v9554_v44, %v9554_v44  ;;  %v9561_v20 = vsel %vm197_vm10, %v9557_v60, 0.0 }
0x4c92   :  { %v9926_v27 = vpop.permute.xlu1 %9925 }
0x4c93   :  { %v9558_v59 = vsel %vm197_vm10, %v9556_v49, 0.0 }
0x4c94   :  { %9559 = vadd.xlane.f32.xlu0 %v9558_v59 }
0x4c98   :  { %9562 = vadd.xlane.f32.xlu0 %v9561_v20 }
0x4cae   :  { %9927 = vrot.lane.b32.xlu0 %v15178_v25, %s13486_s23 }
0x4d1d   :  { %v9560_v8 = vpop.xlane.xlu0 %9559 }
0x4d1e   :  { %v9564_v9 = vmul.f32 0.03125, %v9560_v8 }
0x4d20   :  { %v9566_v11 = vadd.f32 1e-05, %v9564_v9 }
0x4d21   :  { %v9563_v10 = vpop.xlane.xlu0 %9562 }
0x4d22   :  { %13386 = vrsqrt.f32 %v9566_v11  ;;  %v9565_v3 = vmul.f32 0.03125, %v9563_v10 }
0x4d24   :  { %v9567_v32 = vadd.f32 1e-05, %v9565_v3 }
0x4d25   :  { %v15521_v26 = vpop.permute.xlu0 %9927 }
0x4d26   :  { %13388 = vrsqrt.f32 %v9567_v32 }
0x4d2f   :  { %v13387_v13 = vpop.eup %13386 }
0x4d30   :  { %v9570_v61 = vmul.f32 %v13387_v13, %v9554_v44 }
0x4d32   :  { %v9572_v62 = vmul.f32 %v9570_v61, %v9534_v4 }
0x4d33   :  { %v13389_v14 = vpop.eup %13388 }
0x4d34   :  { %v9571_v16 = vmul.f32 %v13389_v14, %v9555_v57  ;;  %v9574_v19 = vadd.f32 %v9572_v62, %v9535_v21 }
0x4d36   :  { %v9573_v22 = vmul.f32 %v9571_v16, %v9534_v4  ;;  %12963 = vmatprep.mubr.msk.f32.mxu1 %vm197_vm10, %v9574_v19 }
0x4d38   :  { %v9575_v6 = vadd.f32 %v9573_v22, %v9535_v21 }
0x4d3a   :  { %12964 = vmatmul.mubr.msk.f32.vlgmr.msra.gmra.mxu1 %vm197_vm10, %v9575_v6 }
0x4d3b   :  { %12978 = vmatpush3.xpose.msk.msra.mxu1 %vm754_vm11, %v15176_v36  ;;  %12981 = vmatprep.mubr.msk.f32.mxu1 %vm13477_vm2, %v13472_v1 }
0x4d3c   :  { %12979 = vmatprep.subr.mxu1 %v13472_v1 }
0x4d3f   :  { %12980 = vmatpush3.xpose.msk.msra.mxu1 %vm754_vm11, %v15178_v25 }
0x4d40   :  { %12991 = vmatprep.subr.mxu1 %v13472_v1 }
0x4d42   :  { %12982 = vmatmul.mubr.msk.f32.vlgmr.msra.gmra.mxu1 %vm754_vm11, %v15475_v5 }
0x4d43   :  { %12992 = vmatpush3.xpose.msk.msra.mxu1 %vm754_vm11, %v15512_v23  ;;  %12995 = vmatprep.mubr.msk.f32.mxu1 %vm13477_vm2, %v13472_v1 }
0x4d44   :  { %12993 = vmatprep.subr.mxu1 %v13472_v1 }
0x4d47   :  { %12994 = vmatpush3.xpose.msk.msra.mxu1 %vm754_vm11, %v15521_v26 }
0x4d48   :  { %13012 = vmatprep.subr.mxu1 %v13472_v1 }
0x4d4a   :  { %12996 = vmatmul.mubr.msk.f32.vlgmr.msra.gmra.mxu1 %vm754_vm11, %v9926_v27 }
0x4d4b   :  { %13016 = vmatprep.mubr.msk.f32.mxu1 %vm13477_vm2, %v13472_v1 }
0x4dfa   :  { %v12965_v52 = vpop.f32.mrf.mxu1 }
0x4dfb   :  { %v9654_v24 = vadd.f32 %v12965_v52, %v9540_v58 }
0x4dfc   :  { %v9648_v54 = vpop.f32.mrf.mxu1 }
0x4dfd   :  { %v9660_v38 = vmul.f32 0.044715, %v9654_v24  ;;  %v9649_v39 = vadd.f32 %v9648_v54, %v9540_v58  ;;  %v9658_v34 = vmul.f32 0.5, %v9654_v24 }
0x4dff   :  { %v9662_v40 = vmul.f32 %v9660_v38, %v9654_v24  ;;  %v9659_v41 = vmul.f32 0.044715, %v9649_v39  ;;  %v9657_v45 = vmul.f32 0.5, %v9649_v39 }
0x4e01   :  { %v9664_v56 = vmul.f32 %v9662_v40, %v9654_v24  ;;  %v9661_v42 = vmul.f32 %v9659_v41, %v9649_v39 }
0x4e02   :  { %v9837_v18 = vpop.f32.mrf.mxu1 }
0x4e03   :  { %v9666_v48 = vadd.f32 %v9664_v56, %v9654_v24  ;;  %v9663_v30 = vmul.f32 %v9661_v42, %v9649_v39  ;;  %v9838_v47 = vadd.f32 %v15548_v17, %v9837_v18 }
0x4e04   :  { %v12983_v50 = vpop.f32.mrf.mxu1 }
0x4e05   :  { %v9668_v43 = vmul.f32 0.7978846, %v9666_v48  ;;  %v9665_v51 = vadd.f32 %v9663_v30, %v9649_v39  ;;  %v9841_v53 = vsel %vm838_vm12, %v9838_v47, -inf }
0x4e06   :  { %9842 = vmax.xlane.f32.xlu1 %v9841_v53 }
0x4e07   :  { %13390 = vtanh.f32 %v9668_v43  ;;  %v9667_v55 = vmul.f32 0.7978846, %v9665_v51 }
0x4e09   :  { %13392 = vtanh.f32 %v9667_v55 }
0x4e0a   :  { %v10003_v57 = vpop.f32.mrf.mxu1 }
0x4e0b   :  { %v10004_v44 = vadd.f32 %v15548_v17, %v10003_v57 }
0x4e0c   :  { %v12997_v49 = vpop.f32.mrf.mxu1 }
0x4e0d   :  { %v10007_v59 = vsel %vm838_vm12, %v10004_v44, -inf }
0x4e0e   :  { %10008 = vmax.xlane.f32.xlu0 %v10007_v59 }
0x4e14   :  { %v13391_v60 = vpop.eup %13390 }
0x4e15   :  { %v9672_v63 = vadd.f32 1.0, %v13391_v60 }
0x4e16   :  { %v13393_v20 = vpop.eup %13392 }
0x4e17   :  { %10095 = vrot.lane.b32.xlu1 %v15178_v25, %s13489_s27  ;;  %v9671_v37 = vadd.f32 1.0, %v13393_v20  ;;  %v9674_v9 = vmul.f32 %v9672_v63, %v9658_v34 }
0x4e19   :  { %v9673_v8 = vmul.f32 %v9671_v37, %v9657_v45 }
0x4e1b   :  { %12974 = vmatprep.mubr.msk.f32.mxu0 %vm197_vm10, %v9673_v8  ;;  %v9759_v8 = vld [vmem:[%s15992_s2 + $0xb70] sm:$0xff] }
0x4e1c   :  { %12975 = vmatmul.mubr.msk.f32.vlgmr.msra.gmra.mxu0 %vm197_vm10, %v9674_v9  ;;  %v9758_v9 = vld [vmem:[%s15992_s2 + $0xb60] sm:$0xff] }
0x4e1d   :  { %12985 = vmatpush3.msra.mxu0 %v15176_v36  ;;  %12988 = vmatprep.mubr.msk.f32.mxu0 %vm13477_vm2, %v13472_v1 }
0x4e1e   :  { %12986 = vmatprep.subr.mxu0 %v13472_v1 }
0x4e1f   :  { %12987 = vmatpush3.msra.mxu0 %v15178_v25 }
0x4e20   :  { %12998 = vmatprep.subr.mxu0 %v13472_v1 }
0x4e8f   :  { %v9843_v11 = vpop.xlane.xlu1 %9842 }
0x4e90   :  { %v9844_v10 = vsub.f32 %v9838_v47, %v9843_v11  ;;  %v9757_v11 = vld [vmem:[%s15992_s2 + $0xb50] sm:$0xff] }
0x4e92   :  { %v9845_v3 = vmul.f32 1.442695, %v9844_v10  ;;  %v9756_v10 = vld [vmem:[%s15992_s2 + $0xb40] sm:$0xff] }
0x4e93   :  { %v10096_v19 = vpop.permute.xlu1 %10095 }
0x4e94   :  { %13394 = vpow2.f32 %v9845_v3 }
0x4e97   :  { %v10009_v32 = vpop.xlane.xlu0 %10008 }
0x4e98   :  { %v10010_v13 = vsub.f32 %v10004_v44, %v10009_v32 }
0x4e9a   :  { %v10011_v4 = vmul.f32 1.442695, %v10010_v13 }
0x4e9c   :  { %13396 = vpow2.f32 %v10011_v4 }
0x4ea1   :  { %v13395_v61 = vpop.eup %13394 }
0x4ea2   :  { %v9847_v21 = vsel %vm838_vm12, %v13395_v61, 0.0 }
0x4ea3   :  { %9848 = vadd.xlane.f32.xlu0 %v9847_v21 }
0x4ea9   :  { %v13397_v62 = vpop.eup %13396 }
0x4eaa   :  { %v10013_v14 = vsel %vm838_vm12, %v13397_v62, 0.0 }
0x4eab   :  { %10014 = vadd.xlane.f32.xlu1 %v10013_v14 }
0x4eb9   :  { %10097 = vrot.lane.b32.xlu0 %v15176_v36, %s13489_s27 }
0x4ebc   :  { %10093 = vrot.lane.b32.xlu1 %v15475_v5, %s13489_s27 }
0x4f2c   :  { %v9849_v16 = vpop.xlane.xlu0 %9848 }
0x4f2d   :  { %13398 = vrcp.f32 %v9849_v16  ;;  %v9760_v16 = vld [vmem:[%s15992_s2 + $0xb80] ss:$0 sm:$0xff] }
0x4f30   :  { %v10098_v22 = vpop.permute.xlu0 %10097 }
0x4f31   :  { %13013 = vmatpush3.msra.mxu1 %v10098_v22 }
0x4f32   :  { %13014 = vmatprep.subr.mxu1 %v13472_v1 }
0x4f33   :  { %13015 = vmatpush3.msra.mxu1 %v10096_v19 }
0x4f34   :  { %v10015_v6 = vpop.xlane.xlu1 %10014  ;;  %13019 = vmatprep.subr.mxu1 %v13472_v1 }
0x4f35   :  { %13400 = vrcp.f32 %v10015_v6 }
0x4f3a   :  { %v13399_v27 = vpop.eup %13398 }
0x4f3b   :  { %v9851_v29 = vmul.f32 %v13399_v27, %v13395_v61 }
0x4f3d   :  { %12989 = vmatmul.mubr.msk.f32.vlgmr.msra.gmra.mxu0 %vm838_vm12, %v9851_v29 }
0x4f3e   :  { %12999 = vmatpush3.msra.mxu0 %v15512_v23  ;;  %13002 = vmatprep.mubr.msk.f32.mxu0 %vm13477_vm2, %v13472_v1  ;;  %v10094_v23 = vpop.permute.xlu1 %10093 }
0x4f3f   :  { %13000 = vmatprep.subr.mxu0 %v13472_v1 }
0x4f40   :  { %13001 = vmatpush3.msra.mxu0 %v15521_v26  ;;  %v15589_v26 = vpop.f32.mrf.mxu0 }
0x4f41   :  { %13005 = vmatprep.subr.mxu0 %v13472_v1 }
0x4f42   :  { %v13401_v31 = vpop.eup %13400  ;;  %v15591_v33 = vpop.f32.mrf.mxu0 }
0x4f43   :  { %v10017_v28 = vmul.f32 %v13401_v31, %v13397_v62  ;;  %v9545_v31 = vld [vmem:[%s15992_s2 + $0xa20] ss:$0 sm:$0xff] }
0x4f45   :  { %13003 = vmatmul.mubr.msk.f32.vlgmr.msra.gmra.mxu0 %vm838_vm12, %v10017_v28  ;;  %v9753_v28 = vadd.f32 %v15589_v26, %v9545_v31 }
0x4f46   :  { %13006 = vmatpush3.xpose.msk.msra.mxu0 %vm754_vm11, %v10098_v22  ;;  %13009 = vmatprep.mubr.msk.f32.mxu0 %vm13477_vm2, %v13472_v1 }
0x4f47   :  { %13007 = vmatprep.subr.mxu0 %v13472_v1 }
0x4f4a   :  { %13008 = vmatpush3.xpose.msk.msra.mxu0 %vm754_vm11, %v10096_v19 }
0x4f4b   :  { %13026 = vmatprep.subr.mxu0 %v13472_v1 }
0x4f4d   :  { %13010 = vmatmul.mubr.msk.f32.vlgmr.msra.gmra.mxu0 %vm754_vm11, %v10094_v23 }
0x4f4e   :  { %13030 = vmatprep.mubr.msk.f32.mxu0 %vm13477_vm2, %v13472_v1 }
0x4ffd   :  { %v15593_v58 = vpop.f32.mrf.mxu0 }
0x4fff   :  { %v12990_v52 = vpop.f32.mrf.mxu0 }
0x5000   :  { %v9748_v52 = vadd.f32 %v15591_v33, %v9545_v31 }
0x5005   :  { %v10089_v24 = vpop.f32.mrf.mxu0 }
0x5007   :  { %v13004_v54 = vpop.f32.mrf.mxu0 }
0x500d   :  { %v10171_v38 = vpop.f32.mrf.mxu0 }
0x500e   :  { %v10172_v39 = vadd.f32 %v15548_v17, %v10171_v38 }
0x500f   :  { %v13011_v40 = vpop.f32.mrf.mxu0 }
0x5010   :  { %v10175_v41 = vsel %vm838_vm12, %v10172_v39, -inf }
0x5011   :  { %10176 = vmax.xlane.f32.xlu0 %v10175_v41 }
0x5027   :  { %10265 = vrot.lane.b32.xlu0 %v15176_v36, %s13492_s4 }
0x502b   :  { %10261 = vrot.lane.b32.xlu0 %v15475_v5, %s13492_s4 }
0x509a   :  { %v10177_v56 = vpop.xlane.xlu0 %10176 }
0x509b   :  { %v10178_v42 = vsub.f32 %v10172_v39, %v10177_v56 }
0x509d   :  { %v10179_v18 = vmul.f32 1.442695, %v10178_v42 }
0x509e   :  { %v10266_v48 = vpop.permute.xlu0 %10265 }
0x509f   :  { %13402 = vpow2.f32 %v10179_v18  ;;  %13027 = vmatpush3.msra.mxu0 %v10266_v48 }
0x50a0   :  { %13028 = vmatprep.subr.mxu0 %v13472_v1 }
0x50ac   :  { %v13403_v30 = vpop.eup %13402 }
0x50ad   :  { %v10181_v47 = vsel %vm838_vm12, %v13403_v30, 0.0 }
0x50ae   :  { %10182 = vadd.xlane.f32.xlu1 %v10181_v47  ;;  %v10521_v47 = vld [vmem:[%s15992_s2 + $0xbc0] sm:$0xff] }
0x50bf   :  { %10263 = vrot.lane.b32.xlu1 %v15178_v25, %s13492_s4  ;;  %v10262_v25 = vpop.permute.xlu0 %10261 }
0x5137   :  { %v10183_v50 = vpop.xlane.xlu1 %10182 }
0x5138   :  { %13404 = vrcp.f32 %v10183_v50 }
0x513b   :  { %v10264_v36 = vpop.permute.xlu1 %10263 }
0x513c   :  { %13029 = vmatpush3.msra.mxu0 %v10264_v36 }
0x513d   :  { %13033 = vmatprep.subr.mxu0 %v13472_v1 }
0x5145   :  { %v13405_v5 = vpop.eup %13404 }
0x5146   :  { %v10185_v43 = vmul.f32 %v13405_v5, %v13403_v30  ;;  %v10522_v30 = vld [vmem:[%s15992_s2 + $0xbd0] sm:$0xff] }
0x5148   :  { %13017 = vmatmul.mubr.msk.f32.vlgmr.msra.gmra.mxu1 %vm838_vm12, %v10185_v43 }
0x5149   :  { %13020 = vmatpush3.xpose.msk.msra.mxu1 %vm754_vm11, %v10266_v48  ;;  %13023 = vmatprep.mubr.msk.f32.mxu1 %vm13477_vm2, %v13472_v1  ;;  %v10523_v48 = vld [vmem:[%s15992_s2 + $0xbe0] sm:$0xff] }
0x514a   :  { %13021 = vmatprep.subr.mxu1 %v13472_v1 }
0x514d   :  { %13022 = vmatpush3.xpose.msk.msra.mxu1 %vm754_vm11, %v10264_v36 }
0x514e   :  { %13044 = vmatprep.subr.mxu1 %v13472_v1 }
0x5150   :  { %13024 = vmatmul.mubr.msk.f32.vlgmr.msra.gmra.mxu1 %vm754_vm11, %v10262_v25 }
0x5151   :  { %13052 = vmatprep.mubr.msk.f32.mxu1 %vm13477_vm2, %v13472_v1  ;;  %13045 = vmatpush3.msra.mxu1 %v10523_v48  ;;  %v10806_v48 = vld [vmem:[%s15992_s2 + $0xd30] sm:$0xff] }
0x5152   :  { %13046 = vmatprep.subr.mxu1 %v13472_v1 }
0x5153   :  { %13047 = vmatpush3.msra.mxu1 %v10522_v30  ;;  %v10805_v30 = vld [vmem:[%s15992_s2 + $0xd20] sm:$0xff] }
0x5154   :  { %13048 = vmatprep.subr.mxu1 %v13472_v1 }
0x5155   :  { %13049 = vmatpush3.msra.mxu1 %v10521_v47 }
0x5156   :  { %13050 = vmatprep.subr.mxu1 %v13472_v1 }
0x5208   :  { %v10257_v51 = vpop.f32.mrf.mxu1 }
0x520a   :  { %v13018_v53 = vpop.f32.mrf.mxu1 }
0x5210   :  { %v10339_v55 = vpop.f32.mrf.mxu1 }
0x5211   :  { %v10340_v57 = vadd.f32 %v15548_v17, %v10339_v55 }
0x5212   :  { %v13025_v44 = vpop.f32.mrf.mxu1 }
0x5213   :  { %v10343_v49 = vsel %vm838_vm12, %v10340_v57, -inf }
0x5214   :  { %10344 = vmax.xlane.f32.xlu1 %v10343_v49 }
0x5225   :  { %10434 = vrot.lane.b32.xlu1 %v10257_v51, %s13495_s6 }
0x529d   :  { %v10345_v59 = vpop.xlane.xlu1 %10344 }
0x529e   :  { %v10346_v60 = vsub.f32 %v10340_v57, %v10345_v59 }
0x52a0   :  { %v10347_v20 = vmul.f32 1.442695, %v10346_v60 }
0x52a1   :  { %v10435_v4 = vpop.permute.xlu1 %10434 }
0x52a2   :  { %13406 = vpow2.f32 %v10347_v20 }
0x52af   :  { %v13407_v63 = vpop.eup %13406 }
0x52b0   :  { %v10349_v45 = vsel %vm838_vm12, %v13407_v63, 0.0 }
0x52b1   :  { %10350 = vadd.xlane.f32.xlu0 %v10349_v45 }
0x52c7   :  { %10430 = vrot.lane.b32.xlu0 %v10089_v24, %s13494_s5 }
0x533a   :  { %v10351_v37 = vpop.xlane.xlu0 %10350 }
0x533b   :  { %13408 = vrcp.f32 %v10351_v37 }
0x533c   :  { %13410 = vlog2.f32 %v14893_v2  ;;  %v10520_v2 = vld [vmem:[%s15992_s2 + $0xbb0] sm:$0xff] }
0x533d   :  { %13051 = vmatpush3.msra.mxu1 %v10520_v2 }
0x533e   :  { %v10431_v13 = vpop.permute.xlu0 %10430  ;;  %10868 = vmatprep.subr.mxu1 %v13472_v1 }
0x533f   :  { %v10441_v61 = vsel %vm754_vm11, %v15593_v58, %v10431_v13 }
0x5340   :  { %v10442_v21 = vsel %vm838_vm12, %v10441_v61, %v10435_v4 }
0x5348   :  { %v13409_v34 = vpop.eup %13408 }
0x5349   :  { %v10353_v17 = vmul.f32 %v13409_v34, %v13407_v63  ;;  %v13411_v50 = vpop.eup %13410 }
0x534a   :  { %v5887_v36 = vmul.f32 0.6931472, %v13411_v50 }
0x534b   :  { %13031 = vmatmul.mubr.msk.f32.vlgmr.msra.gmra.mxu0 %vm838_vm12, %v10353_v17 }
0x534c   :  { %13041 = vmatprep.mubr.msk.f32.mxu0 %vm13477_vm2, %v13472_v1  ;;  %13034 = vmatpush3.msra.mxu0 %v9759_v8  ;;  %v10518_v8 = vld [vmem:[%s15992_s2 + $0xb90] ss:$0 sm:$0xff] }
0x534d   :  { %13035 = vmatprep.subr.mxu0 %v13472_v1 }
0x534e   :  { %13036 = vmatpush3.msra.mxu0 %v9758_v9 }
0x534f   :  { %13037 = vmatprep.subr.mxu0 %v13472_v1 }
0x5350   :  { %13038 = vmatpush3.msra.mxu0 %v9757_v11 }
0x5351   :  { %13039 = vmatprep.subr.mxu0 %v13472_v1 }
0x5352   :  { %13040 = vmatpush3.msra.mxu0 %v9756_v10 }
0x5353   :  { %13055 = vmatprep.subr.mxu0 %v13472_v1 }
0x540b   :  { %v10425_v3 = vpop.f32.mrf.mxu0 }
0x540c   :  { %10438 = vrot.lane.b32.xlu1 %v10425_v3, %s13496_s13  ;;  %v10519_v3 = vld [vmem:[%s15992_s2 + $0xba0] ss:$0 sm:$0xff] }
0x540d   :  { %v13032_v32 = vpop.f32.mrf.mxu0 }
0x547e   :  { %v10439_v62 = vpop.permute.xlu1 %10438 }
0x547f   :  { %v10443_v14 = vsel %vm1576_vm13, %v10442_v21, %v10439_v62 }
0x5480   :  { %13042 = vmatmul.mubr.msk.f32.vlgmr.msra.gmra.mxu0 %vm197_vm10, %v10443_v14 }
0x5481   :  { %13063 = vmatprep.mubr.msk.f32.mxu0 %vm13477_vm2, %v13472_v1 }
0x5540   :  { %v10513_v19 = vpop.f32.mrf.mxu0 }
0x5541   :  { %v10514_v22 = vadd.f32 %v10513_v19, %v9760_v16 }
0x5542   :  { %v13043_v6 = vpop.f32.mrf.mxu0 }
0x5543   :  { %v10517_v27 = vadd.f32 %v10514_v22, %v15358_v35 }
0x5545   :  { %v10530_v29 = vsel %vm197_vm10, %v10517_v27, 0.0 }
0x5546   :  { %10531 = vadd.xlane.f32.xlu0 %v10530_v29 }
0x555c   :  { %10701 = vrot.lane.b32.xlu0 %v9753_v28, %s13495_s6 }
0x55cf   :  { %v10532_v23 = vpop.xlane.xlu0 %10531 }
0x55d0   :  { %v10533_v58 = vmul.f32 0.03125, %v10532_v23 }
0x55d2   :  { %v15659_v24 = vsub.f32 %v10517_v27, %v10533_v58 }
0x55d3   :  { %v10702_v54 = vpop.permute.xlu0 %10701 }
0x55d4   :  { %v15662_v35 = vsel %vm838_vm12, %v9748_v52, %v10702_v54  ;;  %v10535_v38 = vmul.f32 %v15659_v24, %v15659_v24 }
0x55d5   :  { %v10716_v39 = vrot.slane %v15662_v35, 2  ;;  %v10720_v26 = vrot.slane %v15662_v35, 3  ;;  %v10724_v33 = vrot.slane %v15662_v35, 4  ;;  %v10728_v41 = vrot.slane %v15662_v35, 5 }
0x55d6   :  { %v10536_v40 = vsel %vm197_vm10, %v10535_v38, 0.0  ;;  %v10732_v56 = vrot.slane %v15662_v35, 6  ;;  %v10736_v42 = vrot.slane %v15662_v35, 7  ;;  %v10712_v18 = vrot.slane %v15662_v35, 1 }
0x55d7   :  { %10537 = vadd.xlane.f32.xlu1 %v10536_v40  ;;  %10755 = vrot.lane.b32.xlu0 %v10716_v39, %s13495_s6  ;;  %v10528_v40 = vld [vmem:[%s15992_s2 + $0xc30] sm:$0xff] }
0x55d8   :  { %13056 = vmatpush3.msra.mxu0 %v10528_v40 }
0x55d9   :  { %13057 = vmatprep.subr.mxu0 %v13472_v1 }
0x55db   :  { %10758 = vrot.lane.b32.xlu0 %v10720_v26, %s13501_s11 }
0x55df   :  { %10761 = vrot.lane.b32.xlu0 %v10724_v33, %s13490_s28 }
0x55e3   :  { %10764 = vrot.lane.b32.xlu0 %v10728_v41, %s13481_s21 }
0x55e7   :  { %10767 = vrot.lane.b32.xlu0 %v10732_v56, %s13488_s26 }
0x55e8   :  { %10751 = vrot.lane.b32.xlu1 %v15662_v35, %s13489_s27 }
0x55eb   :  { %10770 = vrot.lane.b32.xlu0 %v10736_v42, %s13484_s30 }
0x55ec   :  { %10713 = vrot.lane.b32.xlu1 %v10712_v18, %s13495_s6 }
0x55ef   :  { %10737 = vrot.lane.b32.xlu0 %v10736_v42, %s13489_s27  ;;  %v10808_v42 = vld [vmem:[%s15992_s2 + $0xd50] sm:$0xff] }
0x55f0   :  { %10717 = vrot.lane.b32.xlu1 %v10716_v39, %s13501_s11 }
0x55f4   :  { %10721 = vrot.lane.b32.xlu1 %v10720_v26, %s13490_s28  ;;  %v10527_v26 = vld [vmem:[%s15992_s2 + $0xc20] sm:$0xff] }
0x55f5   :  { %13058 = vmatpush3.msra.mxu0 %v10527_v26 }
0x55f6   :  { %13059 = vmatprep.subr.mxu0 %v13472_v1 }
0x55f8   :  { %10725 = vrot.lane.b32.xlu1 %v10724_v33, %s13481_s21  ;;  %v10526_v33 = vld [vmem:[%s15992_s2 + $0xc10] sm:$0xff] }
0x55f9   :  { %13060 = vmatpush3.msra.mxu0 %v10526_v33  ;;  %v10529_v33 = vld [vmem:[%s15992_s2 + $0xc40] ss:$0 sm:$0xff] }
0x55fa   :  { %13061 = vmatprep.subr.mxu0 %v13472_v1 }
0x55fc   :  { %10729 = vrot.lane.b32.xlu1 %v10728_v41, %s13488_s26  ;;  %v10525_v41 = vld [vmem:[%s15992_s2 + $0xc00] sm:$0xff] }
0x55fd   :  { %13062 = vmatpush3.msra.mxu0 %v10525_v41  ;;  %v10814_v41 = vld [vmem:[%s15992_s2 + $0xdb0] sm:$0xff] }
0x55fe   :  { %13066 = vmatprep.subr.mxu0 %v13472_v1 }
0x5600   :  { %10733 = vrot.lane.b32.xlu1 %v10732_v56, %s13484_s30  ;;  %v10809_v56 = vld [vmem:[%s15992_s2 + $0xd60] sm:$0xff] }
0x5604   :  { %10786 = vrot.lane.b32.xlu1 %v5887_v36, %s13494_s5 }
0x5649   :  { %v10756_v5 = vpop.permute.xlu0 %10755 }
0x564d   :  { %v10759_v43 = vpop.permute.xlu0 %10758 }
0x5651   :  { %v10762_v57 = vpop.permute.xlu0 %10761 }
0x5655   :  { %v10765_v59 = vpop.permute.xlu0 %10764 }
0x5659   :  { %v10768_v37 = vpop.permute.xlu0 %10767 }
0x565d   :  { %v10771_v32 = vpop.permute.xlu0 %10770 }
0x5660   :  { %v10538_v25 = vpop.xlane.xlu1 %10537 }
0x5661   :  { %v10539_v51 = vmul.f32 0.03125, %v10538_v25  ;;  %v10738_v29 = vpop.permute.xlu0 %10737 }
0x5663   :  { %v10540_v53 = vadd.f32 1e-05, %v10539_v51 }
0x5664   :  { %v10752_v55 = vpop.permute.xlu1 %10751 }
0x5665   :  { %13412 = vrsqrt.f32 %v10540_v53  ;;  %v10773_v44 = vsel %vm838_vm12, %v10752_v55, %v10712_v18  ;;  %v10807_v18 = vld [vmem:[%s15992_s2 + $0xd40] sm:$0xff]  ;;  %v10804_v55 = vld [vmem:[%s15992_s2 + $0xd10] sm:$0xff] }
0x5666   :  { %v10774_v60 = vsel %vm197_vm10, %v10773_v44, %v10756_v5  ;;  %13414 = vlog2.f32 %v13814_v46  ;;  %v10803_v44 = vld [vmem:[%s15992_s2 + $0xd00] sm:$0xff] }
0x5667   :  { %v10775_v63 = vsel %vm10742_vm3, %v10774_v60, %v10759_v43  ;;  %13416 = vlog2.f32 %v15209_v0  ;;  %v10802_v0 = vld [vmem:[%s15992_s2 + $0xcf0] sm:$0xff] }
0x5668   :  { %v10714_v49 = vpop.permute.xlu1 %10713  ;;  %v10776_v34 = vsel %vm36_vm4, %v10775_v63, %v10762_v57  ;;  %v10800_v60 = vld [vmem:[%s15992_s2 + $0xcd0] sm:$0xff] }
0x5669   :  { %v10777_v10 = vsel %vm10745_vm5, %v10776_v34, %v10765_v59  ;;  %v10740_v61 = vsel %vm838_vm12, %v15662_v35, %v10714_v49  ;;  %v10801_v49 = vld [vmem:[%s15992_s2 + $0xce0] sm:$0xff]  ;;  %v10798_v63 = vld [vmem:[%s15992_s2 + $0xcb0] sm:$0xff] }
0x566a   :  { %v10778_v4 = vsel %vm10747_vm6, %v10777_v10, %v10768_v37  ;;  %v10796_v37 = vld [vmem:[%s15992_s2 + $0xc90] sm:$0xff]  ;;  %v10795_v34 = vld [vmem:[%s15992_s2 + $0xc80] sm:$0xff] }
0x566b   :  { %v10779_v16 = vsel %vm10749_vm8, %v10778_v4, %v10771_v32 }
0x566c   :  { %v10718_v20 = vpop.permute.xlu1 %10717  ;;  %v10781_v28 = vrot.slane %v10779_v16, 7 }
0x566d   :  { %v10741_v62 = vsel %vm197_vm10, %v10740_v61, %v10718_v20  ;;  %v10799_v20 = vld [vmem:[%s15992_s2 + $0xcc0] sm:$0xff] }
0x5670   :  { %v10722_v45 = vpop.permute.xlu1 %10721 }
0x5671   :  { %v10743_v14 = vsel %vm10742_vm3, %v10741_v62, %v10722_v45  ;;  %v10797_v45 = vld [vmem:[%s15992_s2 + $0xca0] sm:$0xff] }
0x5672   :  { %v13413_v17 = vpop.eup %13412 }
0x5673   :  { %v10542_v9 = vmul.f32 %v13413_v17, %v15659_v24  ;;  %v13415_v22 = vpop.eup %13414  ;;  %v10794_v17 = vld [vmem:[%s15992_s2 + $0xc70] sm:$0xff] }
0x5674   :  { %v10726_v11 = vpop.permute.xlu1 %10725  ;;  %v657_v58 = vmul.f32 0.6931472, %v13415_v22  ;;  %v13417_v57 = vpop.eup %13416 }
0x5675   :  { %v10543_v46 = vmul.f32 %v10542_v9, %v10518_v8  ;;  %v10744_v19 = vsel %vm36_vm4, %v10743_v14, %v10726_v11  ;;  %v7573_v59 = vmul.f32 0.6931472, %v13417_v57  ;;  %v10811_v8 = vld [vmem:[%s15992_s2 + $0xd80] sm:$0xff]  ;;  %v10524_v9 = vld [vmem:[%s15992_s2 + $0xbf0] ss:$0 sm:$0xff]  ;;  %vm11057_vm4 = vcmask 31744  }
0x5676   :  { %v10810_v11 = vld [vmem:[%s15992_s2 + $0xd70] sm:$0xff] }
0x5677   :  { %v10544_v13 = vadd.f32 %v10543_v46, %v10519_v3 }
0x5678   :  { %v10730_v21 = vpop.permute.xlu1 %10729 }
0x5679   :  { %13053 = vmatmul.mubr.msk.f32.vlgmr.msra.gmra.mxu1 %vm197_vm10, %v10544_v13  ;;  %v10746_v6 = vsel %vm10745_vm5, %v10744_v19, %v10730_v21 }
0x567a   :  { %10869 = vmatpush1.msra.mxu1 %v10809_v56 }
0x567b   :  { %10870 = vmatprep.subr.mxu1 %v13472_v1 }
0x567c   :  { %v10734_v27 = vpop.permute.xlu1 %10733  ;;  %10871 = vmatpush1.msra.mxu1 %v10808_v42 }
0x567d   :  { %v10748_v31 = vsel %vm10747_vm6, %v10746_v6, %v10734_v27  ;;  %10872 = vmatprep.subr.mxu1 %v13472_v1 }
0x567e   :  { %v10750_v23 = vsel %vm10749_vm8, %v10748_v31, %v10738_v29  ;;  %10873 = vmatpush1.msra.mxu1 %v10807_v18  ;;  %v10846_v29 = vsub.s32 1, %v14034_v12  ;;  %v11672_v31 = vld [vmem:[%s15992_s2 + $0xc50] ss:$8 sm:$0x3] }
0x567f   :  { %v10784_v52 = vsel %vm10783_vm9, %v10750_v23, %v10781_v28  ;;  %10874 = vmatprep.subr.mxu1 %v13472_v1  ;;  %v11673_v28 = vld [vmem:[%s15992_s2 + $0xc60] ss:$8 sm:$0x3] }
0x5680   :  { %v10787_v24 = vpop.permute.xlu1 %10786  ;;  %v10817_v35 = vsel %vm10816_vm0, %v10784_v52, 0.0  ;;  %10875 = vmatpush1.msra.mxu1 %v10806_v48  ;;  %v10847_v23 = vrot.slane %v11672_v31, %v10846_v29 }
0x5681   :  { %v10789_v54 = vsel %vm754_vm11, %v657_v58, %v10787_v24  ;;  %10876 = vmatprep.subr.mxu1 %v13472_v1  ;;  %v10843_v58 = vrot.slane %v11672_v31, %v14038_v15 }
0x5682   :  { %v10819_v38 = vsel %vm10818_vm15, %v10789_v54, 0.0  ;;  %10877 = vmatpush1.msra.mxu1 %v10805_v30  ;;  %v10812_v30 = vld [vmem:[%s15992_s2 + $0xd90] ss:$0 sm:$0xff] }
0x5683   :  { %v10820_v39 = vadd.f32 %v10819_v38, %v10817_v35  ;;  %10878 = vmatprep.subr.mxu1 %v13472_v1  ;;  %v10856_v38 = vrot.slane %v11673_v28, %v14038_v15  ;;  %v10813_v15 = vld [vmem:[%s15992_s2 + $0xda0] sm:$0xff] }
0x5684   :  { %10879 = vmatpush1.msra.mxu1 %v10804_v55 }
0x5685   :  { %10821 = vadd.xlane.f32.xlu0 %v10820_v39  ;;  %10880 = vmatprep.subr.mxu1 %v13472_v1 }
0x5686   :  { %10881 = vmatpush1.msra.mxu1 %v10803_v44 }
0x5687   :  { %10882 = vmatprep.subr.mxu1 %v13472_v1 }
0x5688   :  { %10883 = vmatpush1.msra.mxu1 %v10802_v0 }
0x5689   :  { %10884 = vmatprep.subr.mxu1 %v13472_v1 }
0x568a   :  { %10885 = vmatpush1.msra.mxu1 %v10801_v49 }
0x568b   :  { %10886 = vmatprep.subr.mxu1 %v13472_v1 }
0x568c   :  { %10887 = vmatpush1.msra.mxu1 %v10800_v60 }
0x568d   :  { %10888 = vmatprep.subr.mxu1 %v13472_v1 }
0x568e   :  { %10889 = vmatpush1.msra.mxu1 %v10799_v20 }
0x568f   :  { %10890 = vmatprep.subr.mxu1 %v13472_v1 }
0x5690   :  { %10891 = vmatpush1.msra.mxu1 %v10798_v63 }
0x5691   :  { %10892 = vmatprep.subr.mxu1 %v13472_v1 }
0x5692   :  { %10893 = vmatpush1.msra.mxu1 %v10797_v45 }
0x5693   :  { %10894 = vmatprep.subr.mxu1 %v13472_v1 }
0x5694   :  { %10895 = vmatpush1.msra.mxu1 %v10796_v37 }
0x5695   :  { %10896 = vmatprep.subr.mxu1 %v13472_v1 }
0x5696   :  { %10897 = vmatpush1.msra.mxu1 %v10795_v34 }
0x5697   :  { %10898 = vmatprep.subr.mxu1 %v13472_v1 }
0x5698   :  { %10899 = vmatpush1.msra.mxu1 %v10794_v17 }
0x5699   :  { %10928 = vmatprep.subr.mxu1 %v13472_v1 }
0x569a   :  { %10929 = vmatpush2.msra.mxu1 %v10811_v8 }
0x569b   :  { %10930 = vmatprep.subr.mxu1 %v13472_v1 }
0x569c   :  { %10931 = vmatpush2.msra.mxu1 %v10810_v11 }
0x570e   :  { %v10822_v47 = vpop.xlane.xlu0 %10821 }
0x570f   :  { %v10824_v2 = vmul.f32 0.0069444445, %v10822_v47 }
0x5711   :  { %v15771_v50 = vsub.f32 %v10784_v52, %v10824_v2  ;;  %v15773_v36 = vsub.f32 %v10789_v54, %v10824_v2  ;;  %v10860_v54 = vrot.slane %v11673_v28, %v10846_v29 }
0x5713   :  { %v10827_v5 = vmul.f32 %v15771_v50, %v15771_v50  ;;  %v10828_v43 = vmul.f32 %v15773_v36, %v15773_v36 }
0x5715   :  { %v10829_v25 = vsel %vm10816_vm0, %v10827_v5, 0.0  ;;  %v10830_v51 = vsel %vm10818_vm15, %v10828_v43, 0.0 }
0x5716   :  { %v10831_v53 = vadd.f32 %v10830_v51, %v10829_v25 }
0x5718   :  { %10832 = vadd.xlane.f32.xlu1 %v10831_v53 }
0x5729   :  { %11054 = vrot.lane.b32.xlu1 %v7573_v59, %s13510_s9  ;;  %s13448_s9 = scalar_lea.vmem %s11444_s18, 32 }
0x572a   :  { %p13449_p0 = scmp.ne.s32.totalorder %s11444_s18, %s13448_s9  ;;  %p13454_p2 = scmp.lt.s32.totalorder %s13448_s9, %s13448_s9 }
0x572c   :  { %p13455_p3 = por %p13454_p2, %p13453_p1 }
0x572e   :  { %p13456_p4 = pnand %p13455_p3, %p13449_p0 }
0x5739   :  { %v10614_v10 = vpop.f32.mrf.mxu1 }
0x573a   :  { %v10615_v3 = vadd.f32 %v10614_v10, %v10524_v9 }
0x573b   :  { %v13054_v46 = vpop.f32.mrf.mxu1 }
0x573c   :  { %v10619_v32 = vmul.f32 0.044715, %v10615_v3  ;;  %v10618_v14 = vmul.f32 0.5, %v10615_v3 }
0x573e   :  { %v10620_v13 = vmul.f32 %v10619_v32, %v10615_v3 }
0x5740   :  { %v10621_v4 = vmul.f32 %v10620_v13, %v10615_v3 }
0x5742   :  { %v10622_v61 = vadd.f32 %v10621_v4, %v10615_v3 }
0x5744   :  { %v10623_v21 = vmul.f32 0.7978846, %v10622_v61 }
0x5746   :  { %13418 = vtanh.f32 %v10623_v21 }
0x5753   :  { %v13419_v62 = vpop.eup %13418 }
0x5754   :  { %v10625_v16 = vadd.f32 1.0, %v13419_v62 }
0x5756   :  { %v10626_v19 = vmul.f32 %v10625_v16, %v10618_v14 }
0x5758   :  { %13064 = vmatmul.mubr.msk.f32.vlgmr.msra.gmra.mxu0 %vm197_vm10, %v10626_v19 }
0x5759   :  { %13070 = vmatprep.mubr.msk.f32.mxu0 %vm13477_vm2, %v13472_v1  ;;  %13067 = vmatpush3.msra.mxu0 %v10814_v41  ;;  %v11065_v41 = vld [vmem:[%s15992_s2 + $0xde0] ss:$0 sm:$0xff] }
0x575a   :  { %13068 = vmatprep.subr.mxu0 %v13472_v1 }
0x575b   :  { %13069 = vmatpush3.msra.mxu0 %v10813_v15 }
0x575c   :  { %13073 = vmatprep.subr.mxu0 %v13472_v1 }
0x57a1   :  { %v10833_v22 = vpop.xlane.xlu1 %10832 }
0x57a2   :  { %v10834_v6 = vmul.f32 0.0069444445, %v10833_v22 }
0x57a4   :  { %v10835_v27 = vadd.f32 1e-05, %v10834_v6 }
0x57a6   :  { %13420 = vrsqrt.f32 %v10835_v27 }
0x57b3   :  { %v13421_v52 = vpop.eup %13420 }
0x57b4   :  { %v10838_v24 = vmul.f32 %v13421_v52, %v15773_v36  ;;  %v10837_v35 = vmul.f32 %v13421_v52, %v15771_v50  ;;  %v11069_v52 = vld [vmem:[%s15992_s2 + $0xe20] sm:$0xff] }
0x57b6   :  { %v10851_v12 = vmul.f32 %v10847_v23, %v10838_v24  ;;  %v10850_v39 = vmul.f32 %v10843_v58, %v10837_v35  ;;  %v11070_v58 = vld [vmem:[%s15992_s2 + $0xe30] sm:$0xff] }
0x57b7   :  { %v11068_v24 = vld [vmem:[%s15992_s2 + $0xe10] sm:$0xff] }
0x57b8   :  { %v10864_v40 = vadd.f32 %v10860_v54, %v10851_v12  ;;  %v10863_v26 = vadd.f32 %v10856_v38, %v10850_v39  ;;  %v11067_v54 = vld [vmem:[%s15992_s2 + $0xe00] sm:$0xff]  ;;  %v11066_v35 = vld [vmem:[%s15992_s2 + $0xdf0] sm:$0xff] }
0x57ba   :  { %11674 = vmatprep.mubr.msk.f32.mxu1 %vm838_vm12, %v10864_v40 }
0x57bb   :  { %10933 = vmatmul.mubr.f32.vlgmr.msra.gmra.mxu1 %v10863_v26  ;;  %v11064_v26 = vld [vmem:[%s15992_s2 + $0xdd0] ss:$0 sm:$0xff] }
0x5818   :  { %v10696_v56 = vpop.f32.mrf.mxu0 }
0x5819   :  { %v10697_v42 = vadd.f32 %v10696_v56, %v10529_v33 }
0x581a   :  { %v13065_v18 = vpop.f32.mrf.mxu0 }
0x581b   :  { %v10706_v48 = vrot.slane %v10697_v42, 4  ;;  %v11072_v18 = vld [vmem:[%s15992_s2 + $0xe50] sm:$0xff] }
0x581d   :  { %10707 = vrot.lane.b32.xlu0 %v10706_v48, %s13494_s5  ;;  %v11071_v48 = vld [vmem:[%s15992_s2 + $0xe40] ss:$0 sm:$0xff] }
0x587b   :  { %v10934_v47 = vpop.f32.mrf.mxu1 }
0x587c   :  { %v10935_v2 = vadd.f32 %v10934_v47, %v10812_v30 }
0x587d   :  { %v10936_v50 = vpop.f32.mrf.mxu1 }
0x587e   :  { %v10939_v36 = vmul.f32 0.044715, %v10935_v2  ;;  %v10938_v59 = vmul.f32 0.5, %v10935_v2 }
0x5880   :  { %v10940_v5 = vmul.f32 %v10939_v36, %v10935_v2 }
0x5882   :  { %v10941_v43 = vmul.f32 %v10940_v5, %v10935_v2 }
0x5884   :  { %v10942_v25 = vadd.f32 %v10941_v43, %v10935_v2 }
0x5886   :  { %v10943_v51 = vmul.f32 0.7978846, %v10942_v25 }
0x5888   :  { %13422 = vtanh.f32 %v10943_v51 }
0x5889   :  { %13424 = vlog2.f32 %v14235_v7  ;;  %v11055_v7 = vpop.permute.xlu1 %11054 }
0x588f   :  { %v10708_v53 = vpop.permute.xlu0 %10707 }
0x5890   :  { %v10710_v55 = vsel %vm754_vm11, %v10697_v42, %v10708_v53  ;;  %v11073_v42 = vld [vmem:[%s15992_s2 + $0xe60] sm:$0xff] }
0x5891   :  { %11036 = vrot.lane.b32.xlu0 %v10710_v55, %s13486_s23  ;;  %v11025_v57 = vrot.slane %v10710_v55, 2  ;;  %v11021_v44 = vrot.slane %v10710_v55, 1  ;;  %v11029_v49 = vrot.slane %v10710_v55, 3 }
0x5893   :  { %11040 = vrot.lane.b32.xlu1 %v11025_v57, %s13494_s5 }
0x5895   :  { %v13423_v0 = vpop.eup %13422  ;;  %11022 = vrot.lane.b32.xlu0 %v11021_v44, %s13494_s5 }
0x5896   :  { %v10945_v60 = vadd.f32 1.0, %v13423_v0  ;;  %v13425_v20 = vpop.eup %13424 }
0x5897   :  { %11043 = vrot.lane.b32.xlu1 %v11029_v49, %s13495_s6  ;;  %v2359_v45 = vmul.f32 0.6931472, %v13425_v20 }
0x5898   :  { %v10946_v63 = vmul.f32 %v10945_v60, %v10938_v59  ;;  %v10815_v60 = vld [vmem:[%s15992_s2 + $0xdc0] ss:$0 sm:$0xff] }
0x5899   :  { %11026 = vrot.lane.b32.xlu0 %v11025_v57, %s13495_s6  ;;  %v11058_v37 = vsel %vm11057_vm4, %v2359_v45, %v11055_v7 }
0x589a   :  { %13071 = vmatmul.mubr.msk.f32.vlgmr.msra.gmra.mxu0 %vm838_vm12, %v10946_v63 }
0x589b   :  { %11030 = vrot.lane.b32.xlu1 %v11029_v49, %s13496_s13  ;;  %13083 = vmatprep.mubr.msk.f32.mxu0 %vm13477_vm2, %v13472_v1 }
0x589c   :  { %13074 = vmatpush3.msra.mxu0 %v11070_v58 }
0x589d   :  { %11060 = vrot.lane.b32.xlu0 %v11058_v37, %s13501_s11  ;;  %13075 = vmatprep.subr.mxu0 %v13472_v1 }
0x589e   :  { %13076 = vmatpush3.msra.mxu0 %v11069_v52 }
0x589f   :  { %13077 = vmatprep.subr.mxu0 %v13472_v1 }
0x58a0   :  { %13078 = vmatpush3.msra.mxu0 %v11068_v24 }
0x58a1   :  { %13079 = vmatprep.subr.mxu0 %v13472_v1 }
0x58a2   :  { %13080 = vmatpush3.msra.mxu0 %v11067_v54 }
0x58a3   :  { %13081 = vmatprep.subr.mxu0 %v13472_v1 }
0x58a4   :  { %13082 = vmatpush3.msra.mxu0 %v11066_v35 }
0x58a5   :  { %13086 = vmatprep.subr.mxu0 %v13472_v1 }
0x5903   :  { %v11037_v34 = vpop.permute.xlu0 %11036 }
0x5904   :  { %v11046_v8 = vsel %vm754_vm11, %v11037_v34, %v11021_v44  ;;  %v11074_v44 = vld [vmem:[%s15992_s2 + $0xe70] ss:$0 sm:$0xff] }
0x5905   :  { %v11041_v17 = vpop.permute.xlu1 %11040 }
0x5906   :  { %v11047_v11 = vsel %vm838_vm12, %v11046_v8, %v11041_v17 }
0x5907   :  { %v11023_v9 = vpop.permute.xlu0 %11022 }
0x5908   :  { %v11033_v46 = vsel %vm754_vm11, %v10710_v55, %v11023_v9 }
0x5909   :  { %v11044_v10 = vpop.permute.xlu1 %11043 }
0x590a   :  { %v11048_v3 = vsel %vm1576_vm13, %v11047_v11, %v11044_v10  ;;  %v11257_v11 = vld [vmem:[%s15992_s2 + $0xed0] sm:$0xff]  ;;  %v11256_v10 = vld [vmem:[%s15992_s2 + $0xec0] sm:$0xff] }
0x590b   :  { %v11027_v32 = vpop.permute.xlu0 %11026  ;;  %v11050_v4 = vrot.slane %v11048_v3, 7  ;;  %v11255_v3 = vld [vmem:[%s15992_s2 + $0xeb0] sm:$0xff] }
0x590c   :  { %v11034_v13 = vsel %vm838_vm12, %v11033_v46, %v11027_v32  ;;  %v11254_v46 = vld [vmem:[%s15992_s2 + $0xea0] sm:$0xff] }
0x590d   :  { %v11031_v61 = vpop.permute.xlu1 %11030 }
0x590e   :  { %v11035_v21 = vsel %vm1576_vm13, %v11034_v13, %v11031_v61 }
0x590f   :  { %v11061_v62 = vpop.permute.xlu0 %11060  ;;  %v11052_v14 = vsel %vm10783_vm9, %v11035_v21, %v11050_v4  ;;  %v11252_v21 = vld [vmem:[%s15992_s2 + $0xe80] ss:$0 sm:$0xff] }
0x5910   :  { %v11063_v16 = vsel %vm197_vm10, %v11052_v14, %v11061_v62  ;;  %v11253_v14 = vld [vmem:[%s15992_s2 + $0xe90] ss:$0 sm:$0xff] }
0x5911   :  { %v11076_v19 = vsel %vm11075_vm14, %v11063_v16, 0.0 }
0x5912   :  { %11077 = vadd.xlane.f32.xlu1 %v11076_v19 }
0x595a   :  { %v15886_v22 = vpop.f32.mrf.mxu0 }
0x595b   :  { %v11017_v20 = vadd.f32 %v15886_v22, %v10815_v60  ;;  %v11262_v22 = vld [vmem:[%s15992_s2 + $0xf20] sm:$0xff] }
0x595c   :  { %v13072_v6 = vpop.f32.mrf.mxu0 }
0x595d   :  { %v11261_v6 = vld [vmem:[%s15992_s2 + $0xf10] sm:$0xff] }
0x599b   :  { %v11078_v27 = vpop.xlane.xlu1 %11077 }
0x599c   :  { %v11080_v29 = vmul.f32 0.025, %v11078_v27  ;;  %v11260_v27 = vld [vmem:[%s15992_s2 + $0xf00] sm:$0xff] }
0x599e   :  { %v11081_v31 = vsub.f32 %v11063_v16, %v11080_v29  ;;  %v11259_v29 = vld [vmem:[%s15992_s2 + $0xef0] sm:$0xff] }
0x59a0   :  { %v11082_v28 = vmul.f32 %v11081_v31, %v11081_v31 }
0x59a2   :  { %v11083_v23 = vsel %vm11075_vm14, %v11082_v28, 0.0 }
0x59a3   :  { %11084 = vadd.xlane.f32.xlu0 %v11083_v23 }
0x5a2c   :  { %v11085_v38 = vpop.xlane.xlu0 %11084 }
0x5a2d   :  { %v11086_v12 = vmul.f32 0.025, %v11085_v38 }
0x5a2f   :  { %v11087_v39 = vadd.f32 1e-05, %v11086_v12 }
0x5a31   :  { %13426 = vrsqrt.f32 %v11087_v39 }
0x5a3e   :  { %v13427_v40 = vpop.eup %13426 }
0x5a3f   :  { %v11089_v33 = vmul.f32 %v13427_v40, %v11081_v31  ;;  %v11258_v31 = vld [vmem:[%s15992_s2 + $0xee0] ss:$0 sm:$0xff] }
0x5a41   :  { %v11090_v56 = vmul.f32 %v11089_v33, %v11064_v26 }
0x5a43   :  { %v11091_v15 = vadd.f32 %v11090_v56, %v11065_v41 }
0x5a45   :  { %13084 = vmatmul.mubr.msk.f32.vlgmr.msra.gmra.mxu0 %vm407_vm7, %v11091_v15  ;;  %vm11264_vm7 = vcmask 254976  }
0x5a46   :  { %13090 = vmatprep.mubr.msk.f32.mxu0 %vm13477_vm2, %v13472_v1  ;;  %13087 = vmatpush3.msra.mxu0 %v11073_v42 }
0x5a47   :  { %13088 = vmatprep.subr.mxu0 %v13472_v1 }
0x5a48   :  { %13089 = vmatpush3.msra.mxu0 %v11072_v18 }
0x5a49   :  { %13093 = vmatprep.subr.mxu0 %v13472_v1 }
0x5b05   :  { %v11161_v30 = vpop.f32.mrf.mxu0 }
0x5b06   :  { %v11162_v47 = vadd.f32 %v11161_v30, %v11071_v48 }
0x5b07   :  { %v13085_v2 = vpop.f32.mrf.mxu0 }
0x5b08   :  { %v11166_v50 = vmul.f32 0.044715, %v11162_v47  ;;  %v11165_v53 = vmul.f32 0.5, %v11162_v47 }
0x5b0a   :  { %v11167_v36 = vmul.f32 %v11166_v50, %v11162_v47 }
0x5b0c   :  { %v11168_v5 = vmul.f32 %v11167_v36, %v11162_v47 }
0x5b0e   :  { %v11169_v43 = vadd.f32 %v11168_v5, %v11162_v47 }
0x5b10   :  { %v11170_v25 = vmul.f32 0.7978846, %v11169_v43 }
0x5b12   :  { %13428 = vtanh.f32 %v11170_v25 }
0x5b1f   :  { %v13429_v51 = vpop.eup %13428 }
0x5b20   :  { %v11172_v55 = vadd.f32 1.0, %v13429_v51 }
0x5b22   :  { %v11173_v57 = vmul.f32 %v11172_v55, %v11165_v53 }
0x5b24   :  { %13091 = vmatmul.mubr.msk.f32.vlgmr.msra.gmra.mxu0 %vm838_vm12, %v11173_v57 }
0x5b25   :  { %13101 = vmatprep.mubr.msk.f32.mxu0 %vm13477_vm2, %v13472_v1  ;;  %13094 = vmatpush3.msra.mxu0 %v11257_v11 }
0x5b26   :  { %13095 = vmatprep.subr.mxu0 %v13472_v1 }
0x5b27   :  { %13096 = vmatpush3.msra.mxu0 %v11256_v10 }
0x5b28   :  { %13097 = vmatprep.subr.mxu0 %v13472_v1 }
0x5b29   :  { %13098 = vmatpush3.msra.mxu0 %v11255_v3 }
0x5b2a   :  { %13099 = vmatprep.subr.mxu0 %v13472_v1 }
0x5b2b   :  { %13100 = vmatpush3.msra.mxu0 %v11254_v46 }
0x5b2c   :  { %13104 = vmatprep.subr.mxu0 %v13472_v1 }
0x5be4   :  { %v11243_v0 = vpop.f32.mrf.mxu0 }
0x5be5   :  { %v11244_v49 = vadd.f32 %v11243_v0, %v11074_v44 }
0x5be6   :  { %v13092_v59 = vpop.f32.mrf.mxu0 }
0x5be7   :  { %11248 = vrot.lane.b32.xlu0 %v11244_v49, %s13495_s6 }
0x5c59   :  { %v11249_v63 = vpop.permute.xlu0 %11248 }
0x5c5a   :  { %v11251_v7 = vsel %vm838_vm12, %v11017_v20, %v11249_v63 }
0x5c5b   :  { %v11265_v45 = vsel %vm11264_vm7, %v11251_v7, 0.0 }
0x5c5c   :  { %11266 = vadd.xlane.f32.xlu1 %v11265_v45 }
0x5ce5   :  { %v11267_v37 = vpop.xlane.xlu1 %11266 }
0x5ce6   :  { %v11268_v34 = vmul.f32 0.03125, %v11267_v37 }
0x5ce8   :  { %v11269_v17 = vsub.f32 %v11251_v7, %v11268_v34 }
0x5cea   :  { %v11270_v8 = vmul.f32 %v11269_v17, %v11269_v17 }
0x5cec   :  { %v11271_v9 = vsel %vm11264_vm7, %v11270_v8, 0.0 }
0x5ced   :  { %11272 = vadd.xlane.f32.xlu1 %v11271_v9 }
0x5d76   :  { %v11273_v32 = vpop.xlane.xlu1 %11272 }
0x5d77   :  { %v11274_v13 = vmul.f32 0.03125, %v11273_v32 }
0x5d79   :  { %v11275_v4 = vadd.f32 1e-05, %v11274_v13 }
0x5d7b   :  { %13430 = vrsqrt.f32 %v11275_v4 }
0x5d88   :  { %v13431_v61 = vpop.eup %13430 }
0x5d89   :  { %v11277_v62 = vmul.f32 %v13431_v61, %v11269_v17 }
0x5d8b   :  { %v11278_v16 = vmul.f32 %v11277_v62, %v11252_v21 }
0x5d8d   :  { %v11279_v19 = vadd.f32 %v11278_v16, %v11253_v14 }
0x5d8f   :  { %13102 = vmatmul.mubr.msk.f32.vlgmr.msra.gmra.mxu0 %vm197_vm10, %v11279_v19 }
0x5d90   :  { %13112 = vmatprep.mubr.msk.f32.mxu0 %vm13477_vm2, %v13472_v1  ;;  %13105 = vmatpush3.msra.mxu0 %v11262_v22  ;;  %vm11435_vm2 = vcmask 58368  }
0x5d91   :  { %13106 = vmatprep.subr.mxu0 %v13472_v1 }
0x5d92   :  { %13107 = vmatpush3.msra.mxu0 %v11261_v6 }
0x5d93   :  { %13108 = vmatprep.subr.mxu0 %v13472_v1 }
0x5d94   :  { %13109 = vmatpush3.msra.mxu0 %v11260_v27 }
0x5d95   :  { %13110 = vmatprep.subr.mxu0 %v13472_v1  ;;  %v11263_v1 = vld [vmem:[%s15992_s2 + $0xf30] ss:$0 sm:$0xff] }
0x5d96   :  { %13111 = vmatpush3.msra.mxu0 %v11259_v29 }
0x5e4f   :  { %v11349_v28 = vpop.f32.mrf.mxu0 }
0x5e50   :  { %v11350_v23 = vadd.f32 %v11349_v28, %v11258_v31 }
0x5e51   :  { %v13103_v58 = vpop.f32.mrf.mxu0 }
0x5e52   :  { %v11354_v52 = vmul.f32 0.044715, %v11350_v23  ;;  %v11353_v39 = vmul.f32 0.5, %v11350_v23 }
0x5e54   :  { %v11355_v24 = vmul.f32 %v11354_v52, %v11350_v23 }
0x5e56   :  { %v11356_v54 = vmul.f32 %v11355_v24, %v11350_v23 }
0x5e58   :  { %v11357_v35 = vadd.f32 %v11356_v54, %v11350_v23 }
0x5e5a   :  { %v11358_v38 = vmul.f32 0.7978846, %v11357_v35 }
0x5e5c   :  { %13432 = vtanh.f32 %v11358_v38 }
0x5e69   :  { %v13433_v12 = vpop.eup %13432 }
0x5e6a   :  { %v11360_v40 = vadd.f32 1.0, %v13433_v12 }
0x5e6c   :  { %v11361_v26 = vmul.f32 %v11360_v40, %v11353_v39 }
0x5e6e   :  { %13113 = vmatmul.mubr.msk.f32.vlgmr.msra.gmra.mxu0 %vm197_vm10, %v11361_v26 }
0x5f2e   :  { %v11431_v33 = vpop.f32.mrf.mxu0 }
0x5f2f   :  { %v11432_v41 = vadd.f32 %v11431_v33, %v11263_v1 }
0x5f30   :  { %v13114_v56 = vpop.f32.mrf.mxu0 }
0x5f31   :  { %11436 = vst.msk [vmem:[#allocation2] sm:$0x3] %vm11435_vm2, %v11432_v41 }
0x5f32   :  { %13459 = shalt.err (!%p13456_p4)
}
0x5f33   :  { %11446 = dma.vmem_to_hbm [thread:$0]  %s11444_s18, 32, %s15993_s3, [#allocation3]  }
0x5f34   :  { %13468 = dma.done.wait [#allocation3], 32  }
0x5f35   :  { %13469 = vsyncadd [#allocation3], 4294967264 }
0x5f36   :  { %11450 = vsyncpa [#allocation3], 1 }

</bundles_post_ra>
